<compile_context>
chip_gen: v7x
topology: tpu7x:2x2x1
jax: 0.10.0
libtpu: 0.0.40
codegen_flags: <defaults>
</compile_context>

<pallas_src>
import functools

import jax
import jax.numpy as jnp
from jax.experimental import pallas as pl
from jax.experimental.pallas import tpu as pltpu

LANE = 128  # pad channel/feature dims to full 128-lane vregs for dense stores


# ----------------------------------------------------------------------------
# Pallas kernels
# ----------------------------------------------------------------------------
def conv3x3_kernel(x_ref, w_ref, b_ref, o_ref, *scratch, H, W, Cin, Cout, pool):
    """3x3/pad-1 conv + folded-BN bias + ReLU (+ fused 2x2 max-pool).

    x_ref: (1, H+2, W+2, Cin)  padded NHWC tile for one batch element (bf16)
    w_ref: (9, Cin, Cout)      per-tap weights with BN scale folded in (bf16)
    b_ref: (1, Cout)           folded BN bias (f32)
    o_ref: (1, H, W, Cout) or (1, H/2, W/2, Cout) when pool=True
    scratch (pool only): VMEM((H/2 * W, Cout), f32)
    """
    xp = x_ref[0]                                    # (H+2, W+2, Cin) in VMEM
    acc = jnp.zeros((H * W, Cout), jnp.float32)
    for dy in range(3):                              # static unroll: 9 MXU matmuls
        for dx in range(3):
            tap = xp[dy:dy + H, dx:dx + W, :].reshape(H * W, Cin)
            acc = acc + jnp.dot(tap, w_ref[dy * 3 + dx],
                                preferred_element_type=jnp.float32)
    y = jnp.maximum(acc + b_ref[...], 0.0)           # (H*W, Cout) f32

    if not pool:
        o_ref[...] = y.reshape(1, H, W, Cout).astype(o_ref.dtype)
    else:
        pool_ref, = scratch
        Ho, Wo = H // 2, W // 2
        # H-direction pair max: rows 2i and 2i+1 sit exactly W sublanes apart,
        # so an aligned (layout-preserving) reshape + aligned static slices.
        y3 = y.reshape(Ho, 2 * W, Cout)
        yh = jnp.maximum(y3[:, :W, :], y3[:, W:, :])          # (Ho, W, Cout)
        # W-direction pair max: even/odd columns via stride-2 reads of VMEM.
        pool_ref[...] = yh.reshape(Ho * W, Cout)
        even = pool_ref[pl.ds(0, Ho * Wo, stride=2), :]
        odd = pool_ref[pl.ds(1, Ho * Wo, stride=2), :]
        out = jnp.maximum(even, odd)                          # (Ho*Wo, Cout)
        o_ref[...] = out.reshape(1, Ho, Wo, Cout).astype(o_ref.dtype)


def linear_kernel(x_ref, w_ref, b_ref, o_ref, *, relu):
    """o = maybe_relu(x @ w + b); K-tiled, accumulating into the resident o block."""
    k = pl.program_id(0)

    @pl.when(k == 0)
    def _():
        o_ref[...] = jnp.zeros_like(o_ref)

    o_ref[...] += jnp.dot(x_ref[...], w_ref[...],
                          preferred_element_type=jnp.float32)

    @pl.when(k == pl.num_programs(0) - 1)
    def _():
        y = o_ref[...] + b_ref[...]
        if relu:
            y = jnp.maximum(y, 0.0)
        o_ref[...] = y


# ----------------------------------------------------------------------------
# Pallas wrappers
# ----------------------------------------------------------------------------
def conv_bn_relu(x, w, bias, *, pool=False):
    """Conv2d(3x3, pad=1) + BN(eval) + ReLU [+ MaxPool2d(2,2)].  x: (B,H,W,Cin) bf16."""
    B, H, W, Cin = x.shape
    Cout = w.shape[-1]
    Ho, Wo = (H // 2, W // 2) if pool else (H, W)
    xp = jnp.pad(x, ((0, 0), (1, 1), (1, 1), (0, 0)))  # halo pad (layout glue only)
    kernel = functools.partial(conv3x3_kernel, H=H, W=W, Cin=Cin, Cout=Cout, pool=pool)
    scratch = [pltpu.VMEM((Ho * W, Cout), jnp.float32)] if pool else []
    return pl.pallas_call(
        kernel,
        out_shape=jax.ShapeDtypeStruct((B, Ho, Wo, Cout), jnp.bfloat16),
        grid_spec=pltpu.PrefetchScalarGridSpec(
            num_scalar_prefetch=0,
            grid=(B,),                                  # VMEM bounded per step, pipelined
            in_specs=[
                pl.BlockSpec((1, H + 2, W + 2, Cin), lambda b: (b, 0, 0, 0)),
                pl.BlockSpec((9, Cin, Cout), lambda b: (0, 0, 0)),
                pl.BlockSpec((1, Cout), lambda b: (0, 0)),
            ],
            out_specs=pl.BlockSpec((1, Ho, Wo, Cout), lambda b: (b, 0, 0, 0)),
            scratch_shapes=scratch,
        ),
        compiler_params=pltpu.CompilerParams(
            dimension_semantics=("parallel",)),         # megacore across batch
    )(xp, w, bias.reshape(1, Cout))


def linear(x, w, bias, *, relu, tk=2048):
    """(M,K)bf16 @ (K,N)bf16 + bias [+ReLU] -> (M,N) f32, weight-streaming over K."""
    M, K = x.shape
    Kw, N = w.shape
    assert K == Kw
    tk = min(tk, K)
    assert K % tk == 0
    kernel = functools.partial(linear_kernel, relu=relu)
    return pl.pallas_call(
        kernel,
        out_shape=jax.ShapeDtypeStruct((M, N), jnp.float32),
        grid_spec=pltpu.PrefetchScalarGridSpec(
            num_scalar_prefetch=0,
            grid=(K // tk,),
            in_specs=[
                pl.BlockSpec((M, tk), lambda k: (0, k)),
                pl.BlockSpec((tk, N), lambda k: (k, 0)),
                pl.BlockSpec((1, N), lambda k: (0, 0)),
            ],
            out_specs=pl.BlockSpec((M, N), lambda k: (0, 0)),
        ),
        compiler_params=pltpu.CompilerParams(
            dimension_semantics=("arbitrary",)),
    )(x, w, bias.reshape(1, N))


# ----------------------------------------------------------------------------
# Parameters (deterministic, in-script)
# ----------------------------------------------------------------------------
def init_params(key, num_classes=10):
    eps = 1e-5
    ks = jax.random.split(key, 16)

    def conv_layer(kw, kb, cin, cout, cin_pad, cout_pad):
        # PyTorch weight layout is (cout, cin, 3, 3); generated here directly
        # as per-tap (3, 3, cin, cout).  BN eval defaults: gamma=1, beta=0,
        # running_mean=0, running_var=1.
        fan_in = 9 * cin
        w = jax.random.normal(kw, (3, 3, cin, cout), jnp.float32) * jnp.sqrt(2.0 / fan_in)
        b_conv = jax.random.normal(kb, (cout,), jnp.float32) * 0.01
        gamma = jnp.ones((cout,), jnp.float32)
        beta = jnp.zeros((cout,), jnp.float32)
        mean = jnp.zeros((cout,), jnp.float32)
        var = jnp.ones((cout,), jnp.float32)
        s = gamma / jnp.sqrt(var + eps)
        w = w * s                                   # fold BN scale into weight columns
        bias = (b_conv - mean) * s + beta
        # Zero-pad channels to 128 lanes: identical math, lane-dense stores,
        # 128-aligned per-tap contraction dims.
        w = jnp.pad(w, ((0, 0), (0, 0), (0, cin_pad - cin), (0, cout_pad - cout)))
        bias = jnp.pad(bias, (0, cout_pad - cout))
        return {"w": w.reshape(9, cin_pad, cout_pad).astype(jnp.bfloat16),
                "bias": bias}

    def linear_layer(kw, kb, din, dout, dout_pad):
        # fc1 rows are generated directly in NHWC-flatten (H, W, C) order; a
        # real PyTorch checkpoint (rows in (C, H, W) order) would get a
        # one-time host-side row permutation at load time.
        w = jax.random.normal(kw, (din, dout), jnp.float32) * jnp.sqrt(1.0 / din)
        b = jax.random.normal(kb, (dout,), jnp.float32) * 0.01
        w = jnp.pad(w, ((0, 0), (0, dout_pad - dout)))
        b = jnp.pad(b, (0, dout_pad - dout))
        return {"w": w.astype(jnp.bfloat16), "bias": b}

    return {
        "conv1": conv_layer(ks[0], ks[1], 3, 64, 3, LANE),
        "conv2": conv_layer(ks[2], ks[3], 64, 64, LANE, LANE),
        "conv3": conv_layer(ks[4], ks[5], 64, 128, LANE, LANE),
        "conv4": conv_layer(ks[6], ks[7], 128, 128, LANE, LANE),
        "fc1": linear_layer(ks[8], ks[9], 128 * 8 * 8, 512, 512),
        "fc2": linear_layer(ks[10], ks[11], 512, 512, 512),
        "fc3": linear_layer(ks[12], ks[13], 512, num_classes, LANE),
    }


# ----------------------------------------------------------------------------
# Forward pass (ModifiedVGG, mode='mlp', eval)
# ----------------------------------------------------------------------------
def modified_vgg_forward(x_nchw, params, num_classes=10):
    x = jnp.transpose(x_nchw, (0, 2, 3, 1)).astype(jnp.bfloat16)   # NCHW -> NHWC
    B = x.shape[0]

    # features (BN folded, ReLU fused, MaxPool fused into conv2/conv4 epilogues)
    x = conv_bn_relu(x, params["conv1"]["w"], params["conv1"]["bias"])              # (B,32,32,128)
    x = conv_bn_relu(x, params["conv2"]["w"], params["conv2"]["bias"], pool=True)   # (B,16,16,128)
    x = conv_bn_relu(x, params["conv3"]["w"], params["conv3"]["bias"])              # (B,16,16,128)
    x = conv_bn_relu(x, params["conv4"]["w"], params["conv4"]["bias"], pool=True)   # (B, 8, 8,128)

    # Flatten in NHWC order (fc1 weight rows match, so no NHWC->NCHW transpose).
    x = x.reshape(B, 8 * 8 * 128)

    # classifier (Dropout == identity in eval); Linears stream bf16 weights.
    x = linear(x, params["fc1"]["w"], params["fc1"]["bias"], relu=True)
    x = linear(x.astype(jnp.bfloat16), params["fc2"]["w"], params["fc2"]["bias"], relu=True)
    x = linear(x.astype(jnp.bfloat16), params["fc3"]["w"], params["fc3"]["bias"], relu=False)
    return x[:, :num_classes]


if __name__ == "__main__":
    key = jax.random.PRNGKey(0)
    pkey, xkey = jax.random.split(key)
    params = init_params(pkey, num_classes=10)
    # Classifier dimensions imply 32x32 spatial input (CIFAR-like); batch=2.
    x = jax.random.normal(xkey, (2, 3, 32, 32), jnp.float32)
    out = modified_vgg_forward(x, params)
    out = jax.block_until_ready(out)
    assert out.shape == (2, 10), out.shape
    assert bool(jnp.all(jnp.isfinite(out)))
    print("KERNEL_OK")
</pallas_src>

<mosaic_0001>
module attributes {stable_mosaic.version = 11 : i64} {
  func.func @conv3x3_kernel(%arg0: i32, %arg1: memref<1x34x34x3xbf16, #tpu.memory_space<vmem>>, %arg2: memref<9x3x128xbf16, #tpu.memory_space<vmem>>, %arg3: memref<1x128xf32, #tpu.memory_space<vmem>>, %arg4: memref<1x32x32x128xbf16, #tpu.memory_space<vmem>>) attributes {dimension_semantics = [#tpu.dimension_semantics<parallel>], iteration_bounds = array<i64: 2>, scalar_prefetch = 0 : i64, scratch_operands = 0 : i64, tpu.core_type = #tpu.core_type<tc>, window_params = [{transform_indices = @transform_0, window_bounds = array<i64: 1, 34, 34, 3>}, {pipeline_mode = #tpu.pipeline_mode<synchronous>, transform_indices = @transform_1, window_bounds = array<i64: 9, 3, 128>}, {pipeline_mode = #tpu.pipeline_mode<synchronous>, transform_indices = @transform_2, window_bounds = array<i64: 1, 128>}, {transform_indices = @transform_3, window_bounds = array<i64: 1, 32, 32, 128>}]} {
    %c0 = arith.constant 0 : index
    %c0_0 = arith.constant 0 : index
    %c0_1 = arith.constant 0 : index
    %c0_2 = arith.constant 0 : index
    %0 = vector.load %arg1[%c0, %c0_0, %c0_1, %c0_2] : memref<1x34x34x3xbf16, #tpu.memory_space<vmem>>, vector<1x34x34x3xbf16>
    %1 = vector.shape_cast %0 : vector<1x34x34x3xbf16> to vector<34x34x3xbf16>
    %cst = arith.constant 0.000000e+00 : f32
    %2 = vector.broadcast %cst : f32 to vector<1024x128xf32>
    %3 = vector.extract_strided_slice %1 {offsets = [0, 0, 0], sizes = [32, 32, 3], strides = [1, 1, 1]} : vector<34x34x3xbf16> to vector<32x32x3xbf16>
    %4 = vector.shape_cast %3 : vector<32x32x3xbf16> to vector<1024x3xbf16>
    %c0_3 = arith.constant 0 : index
    %c0_4 = arith.constant 0 : index
    %c0_5 = arith.constant 0 : index
    %5 = vector.load %arg2[%c0_3, %c0_4, %c0_5] : memref<9x3x128xbf16, #tpu.memory_space<vmem>>, vector<1x3x128xbf16>
    %6 = vector.shape_cast %5 : vector<1x3x128xbf16> to vector<3x128xbf16>
    %cst_6 = arith.constant dense<0.000000e+00> : vector<1024x128xf32>
    %7 = tpu.matmul %4, %6, %cst_6 {dimension_numbers = #tpu.dot_dimension_numbers<[1], [0], [0], [1], [0, 0, 1, 1], [], []>} : vector<1024x3xbf16>, vector<3x128xbf16>, vector<1024x128xf32> -> vector<1024x128xf32>
    %8 = arith.addf %2, %7 : vector<1024x128xf32>
    %9 = vector.extract_strided_slice %1 {offsets = [0, 1, 0], sizes = [32, 32, 3], strides = [1, 1, 1]} : vector<34x34x3xbf16> to vector<32x32x3xbf16>
    %10 = vector.shape_cast %9 : vector<32x32x3xbf16> to vector<1024x3xbf16>
    %c1 = arith.constant 1 : index
    %c0_7 = arith.constant 0 : index
    %c0_8 = arith.constant 0 : index
    %11 = vector.load %arg2[%c1, %c0_7, %c0_8] : memref<9x3x128xbf16, #tpu.memory_space<vmem>>, vector<1x3x128xbf16>
    %12 = vector.shape_cast %11 : vector<1x3x128xbf16> to vector<3x128xbf16>
    %cst_9 = arith.constant dense<0.000000e+00> : vector<1024x128xf32>
    %13 = tpu.matmul %10, %12, %cst_9 {dimension_numbers = #tpu.dot_dimension_numbers<[1], [0], [0], [1], [0, 0, 1, 1], [], []>} : vector<1024x3xbf16>, vector<3x128xbf16>, vector<1024x128xf32> -> vector<1024x128xf32>
    %14 = arith.addf %8, %13 : vector<1024x128xf32>
    %15 = vector.extract_strided_slice %1 {offsets = [0, 2, 0], sizes = [32, 32, 3], strides = [1, 1, 1]} : vector<34x34x3xbf16> to vector<32x32x3xbf16>
    %16 = vector.shape_cast %15 : vector<32x32x3xbf16> to vector<1024x3xbf16>
    %c2 = arith.constant 2 : index
    %c0_10 = arith.constant 0 : index
    %c0_11 = arith.constant 0 : index
    %17 = vector.load %arg2[%c2, %c0_10, %c0_11] : memref<9x3x128xbf16, #tpu.memory_space<vmem>>, vector<1x3x128xbf16>
    %18 = vector.shape_cast %17 : vector<1x3x128xbf16> to vector<3x128xbf16>
    %cst_12 = arith.constant dense<0.000000e+00> : vector<1024x128xf32>
    %19 = tpu.matmul %16, %18, %cst_12 {dimension_numbers = #tpu.dot_dimension_numbers<[1], [0], [0], [1], [0, 0, 1, 1], [], []>} : vector<1024x3xbf16>, vector<3x128xbf16>, vector<1024x128xf32> -> vector<1024x128xf32>
    %20 = arith.addf %14, %19 : vector<1024x128xf32>
    %21 = vector.extract_strided_slice %1 {offsets = [1, 0, 0], sizes = [32, 32, 3], strides = [1, 1, 1]} : vector<34x34x3xbf16> to vector<32x32x3xbf16>
    %22 = vector.shape_cast %21 : vector<32x32x3xbf16> to vector<1024x3xbf16>
    %c3 = arith.constant 3 : index
    %c0_13 = arith.constant 0 : index
    %c0_14 = arith.constant 0 : index
    %23 = vector.load %arg2[%c3, %c0_13, %c0_14] : memref<9x3x128xbf16, #tpu.memory_space<vmem>>, vector<1x3x128xbf16>
    %24 = vector.shape_cast %23 : vector<1x3x128xbf16> to vector<3x128xbf16>
    %cst_15 = arith.constant dense<0.000000e+00> : vector<1024x128xf32>
    %25 = tpu.matmul %22, %24, %cst_15 {dimension_numbers = #tpu.dot_dimension_numbers<[1], [0], [0], [1], [0, 0, 1, 1], [], []>} : vector<1024x3xbf16>, vector<3x128xbf16>, vector<1024x128xf32> -> vector<1024x128xf32>
    %26 = arith.addf %20, %25 : vector<1024x128xf32>
    %27 = vector.extract_strided_slice %1 {offsets = [1, 1, 0], sizes = [32, 32, 3], strides = [1, 1, 1]} : vector<34x34x3xbf16> to vector<32x32x3xbf16>
    %28 = vector.shape_cast %27 : vector<32x32x3xbf16> to vector<1024x3xbf16>
    %c4 = arith.constant 4 : index
    %c0_16 = arith.constant 0 : index
    %c0_17 = arith.constant 0 : index
    %29 = vector.load %arg2[%c4, %c0_16, %c0_17] : memref<9x3x128xbf16, #tpu.memory_space<vmem>>, vector<1x3x128xbf16>
    %30 = vector.shape_cast %29 : vector<1x3x128xbf16> to vector<3x128xbf16>
    %cst_18 = arith.constant dense<0.000000e+00> : vector<1024x128xf32>
    %31 = tpu.matmul %28, %30, %cst_18 {dimension_numbers = #tpu.dot_dimension_numbers<[1], [0], [0], [1], [0, 0, 1, 1], [], []>} : vector<1024x3xbf16>, vector<3x128xbf16>, vector<1024x128xf32> -> vector<1024x128xf32>
    %32 = arith.addf %26, %31 : vector<1024x128xf32>
    %33 = vector.extract_strided_slice %1 {offsets = [1, 2, 0], sizes = [32, 32, 3], strides = [1, 1, 1]} : vector<34x34x3xbf16> to vector<32x32x3xbf16>
    %34 = vector.shape_cast %33 : vector<32x32x3xbf16> to vector<1024x3xbf16>
    %c5 = arith.constant 5 : index
    %c0_19 = arith.constant 0 : index
    %c0_20 = arith.constant 0 : index
    %35 = vector.load %arg2[%c5, %c0_19, %c0_20] : memref<9x3x128xbf16, #tpu.memory_space<vmem>>, vector<1x3x128xbf16>
    %36 = vector.shape_cast %35 : vector<1x3x128xbf16> to vector<3x128xbf16>
    %cst_21 = arith.constant dense<0.000000e+00> : vector<1024x128xf32>
    %37 = tpu.matmul %34, %36, %cst_21 {dimension_numbers = #tpu.dot_dimension_numbers<[1], [0], [0], [1], [0, 0, 1, 1], [], []>} : vector<1024x3xbf16>, vector<3x128xbf16>, vector<1024x128xf32> -> vector<1024x128xf32>
    %38 = arith.addf %32, %37 : vector<1024x128xf32>
    %39 = vector.extract_strided_slice %1 {offsets = [2, 0, 0], sizes = [32, 32, 3], strides = [1, 1, 1]} : vector<34x34x3xbf16> to vector<32x32x3xbf16>
    %40 = vector.shape_cast %39 : vector<32x32x3xbf16> to vector<1024x3xbf16>
    %c6 = arith.constant 6 : index
    %c0_22 = arith.constant 0 : index
    %c0_23 = arith.constant 0 : index
    %41 = vector.load %arg2[%c6, %c0_22, %c0_23] : memref<9x3x128xbf16, #tpu.memory_space<vmem>>, vector<1x3x128xbf16>
    %42 = vector.shape_cast %41 : vector<1x3x128xbf16> to vector<3x128xbf16>
    %cst_24 = arith.constant dense<0.000000e+00> : vector<1024x128xf32>
    %43 = tpu.matmul %40, %42, %cst_24 {dimension_numbers = #tpu.dot_dimension_numbers<[1], [0], [0], [1], [0, 0, 1, 1], [], []>} : vector<1024x3xbf16>, vector<3x128xbf16>, vector<1024x128xf32> -> vector<1024x128xf32>
    %44 = arith.addf %38, %43 : vector<1024x128xf32>
    %45 = vector.extract_strided_slice %1 {offsets = [2, 1, 0], sizes = [32, 32, 3], strides = [1, 1, 1]} : vector<34x34x3xbf16> to vector<32x32x3xbf16>
    %46 = vector.shape_cast %45 : vector<32x32x3xbf16> to vector<1024x3xbf16>
    %c7 = arith.constant 7 : index
    %c0_25 = arith.constant 0 : index
    %c0_26 = arith.constant 0 : index
    %47 = vector.load %arg2[%c7, %c0_25, %c0_26] : memref<9x3x128xbf16, #tpu.memory_space<vmem>>, vector<1x3x128xbf16>
    %48 = vector.shape_cast %47 : vector<1x3x128xbf16> to vector<3x128xbf16>
    %cst_27 = arith.constant dense<0.000000e+00> : vector<1024x128xf32>
    %49 = tpu.matmul %46, %48, %cst_27 {dimension_numbers = #tpu.dot_dimension_numbers<[1], [0], [0], [1], [0, 0, 1, 1], [], []>} : vector<1024x3xbf16>, vector<3x128xbf16>, vector<1024x128xf32> -> vector<1024x128xf32>
    %50 = arith.addf %44, %49 : vector<1024x128xf32>
    %51 = vector.extract_strided_slice %1 {offsets = [2, 2, 0], sizes = [32, 32, 3], strides = [1, 1, 1]} : vector<34x34x3xbf16> to vector<32x32x3xbf16>
    %52 = vector.shape_cast %51 : vector<32x32x3xbf16> to vector<1024x3xbf16>
    %c8 = arith.constant 8 : index
    %c0_28 = arith.constant 0 : index
    %c0_29 = arith.constant 0 : index
    %53 = vector.load %arg2[%c8, %c0_28, %c0_29] : memref<9x3x128xbf16, #tpu.memory_space<vmem>>, vector<1x3x128xbf16>
    %54 = vector.shape_cast %53 : vector<1x3x128xbf16> to vector<3x128xbf16>
    %cst_30 = arith.constant dense<0.000000e+00> : vector<1024x128xf32>
    %55 = tpu.matmul %52, %54, %cst_30 {dimension_numbers = #tpu.dot_dimension_numbers<[1], [0], [0], [1], [0, 0, 1, 1], [], []>} : vector<1024x3xbf16>, vector<3x128xbf16>, vector<1024x128xf32> -> vector<1024x128xf32>
    %56 = arith.addf %50, %55 : vector<1024x128xf32>
    %c0_31 = arith.constant 0 : index
    %c0_32 = arith.constant 0 : index
    %57 = vector.load %arg3[%c0_31, %c0_32] : memref<1x128xf32, #tpu.memory_space<vmem>>, vector<1x128xf32>
    %58 = vector.broadcast %57 : vector<1x128xf32> to vector<1024x128xf32>
    %59 = arith.addf %56, %58 : vector<1024x128xf32>
    %cst_33 = arith.constant 0.000000e+00 : f32
    %60 = vector.broadcast %cst_33 : f32 to vector<1024x128xf32>
    %61 = arith.maximumf %59, %60 : vector<1024x128xf32>
    %62 = vector.shape_cast %61 : vector<1024x128xf32> to vector<1x32x32x128xf32>
    %63 = arith.truncf %62 : vector<1x32x32x128xf32> to vector<1x32x32x128xbf16>
    %c0_34 = arith.constant 0 : index
    %c0_35 = arith.constant 0 : index
    %c0_36 = arith.constant 0 : index
    %c0_37 = arith.constant 0 : index
    %64 = vector.load %arg4[%c0_34, %c0_35, %c0_36, %c0_37] : memref<1x32x32x128xbf16, #tpu.memory_space<vmem>>, vector<1x32x32x128xbf16>
    tpu.vector_store %arg4[%c0_34, %c0_35, %c0_36, %c0_37], %63 {strides = array<i32>} : memref<1x32x32x128xbf16, #tpu.memory_space<vmem>>, vector<1x32x32x128xbf16>,
    return
  }
  func.func @transform_0(%arg0: i32) -> (i32, i32, i32, i32) {
    %c0_i32 = arith.constant 0 : i32
    %c0_i32_0 = arith.constant 0 : i32
    %c0_i32_1 = arith.constant 0 : i32
    %c0_i32_2 = arith.constant 0 : i32
    return %arg0, %c0_i32, %c0_i32_0, %c0_i32_1 : i32, i32, i32, i32
  }
  func.func @transform_1(%arg0: i32) -> (i32, i32, i32) {
    %c0_i32 = arith.constant 0 : i32
    %c0_i32_0 = arith.constant 0 : i32
    %c0_i32_1 = arith.constant 0 : i32
    %c0_i32_2 = arith.constant 0 : i32
    return %c0_i32, %c0_i32_0, %c0_i32_1 : i32, i32, i32
  }
  func.func @transform_2(%arg0: i32) -> (i32, i32) {
    %c0_i32 = arith.constant 0 : i32
    %c0_i32_0 = arith.constant 0 : i32
    %c0_i32_1 = arith.constant 0 : i32
    return %c0_i32, %c0_i32_0 : i32, i32
  }
  func.func @transform_3(%arg0: i32) -> (i32, i32, i32, i32) {
    %c0_i32 = arith.constant 0 : i32
    %c0_i32_0 = arith.constant 0 : i32
    %c0_i32_1 = arith.constant 0 : i32
    %c0_i32_2 = arith.constant 0 : i32
    return %arg0, %c0_i32, %c0_i32_0, %c0_i32_1 : i32, i32, i32, i32
  }
}

</mosaic_0001>

<bundles_post_ra>
// kernel: tpu_custom_call.1
= control target key start
LH: loop header
LB: loop body
LE: loop exit
PB: predicated region body
PF: predicated region fallthrough
CT: control target
= control target key end

     0   :  { %8 = vsyncpa [#allocation3], 0  ;;  %s18614_s0 = inlined_call_operand.vmem [shape: bf16[2,34,34,3], index: 0, kind: input, shape index: {}]   ;;  %s18615_s1 = inlined_call_operand.vmem [shape: bf16[9,3,128], index: 1, kind: input, shape index: {}]   ;;  %s18616_s2 = inlined_call_operand.vmem [shape: f32[1,128], index: 2, kind: input, shape index: {}]   ;;  %s18617_s3 = inlined_call_operand.hbm [shape: bf16[2,32,32,128], index: 3, kind: output, shape index: {}]  }
   0x1   :  { %10 = vsyncpa [#allocation3 + $0x1], 0  ;;  %s15157_s12 = smov 0   ;;  %s15159_s13 = smov 0  }
   0x2   :  { %s15161_s14 = smov 0   ;;  %s15163_s15 = smov 0  }
   0x3 LB: > { %s15178_s16 = sadd.s32 4294967295, %s15131_s15   ;;  %s10507_s17 = sadd.s32 4294967294, %s15131_s15   ;;  %s15131_s15 = sphi %s15163_s15, %s19509_s15   ;;  %s15127_s14 = sphi %s15161_s14, %s19508_s14   ;;  %s15123_s13 = sphi %s15159_s13, %s19507_s13   ;;  %s15119_s12 = sphi %s15157_s12, %s19506_s12  }
   0x4   : > { %s15182_s18 = sadd.s32 1, %s15131_s15   ;;  %s91_s19 = sadd.s32 1, %s15127_s14 }
   0x5   : > { %s88_s20 = ssub.s32 %s15131_s15, %s15182_s18  ;;  %p101_p0 = scmp.ne.s32.totalorder %s15127_s14, %s15123_s13 }
   0x6   : > { %p89_p1 = scmp.eq.s32.totalorder %s88_s20, 0  ;;  %p102_p2 = scmp.eq.s32.totalorder %s15178_s16, 1 }
   0x7   : > { %p107_p3 = scmp.ne.s32.totalorder %s15123_s13, %s15119_s12  ;;  %p108_p4 = scmp.eq.s32.totalorder %s10507_s17, 1 }
   0x8   : > { %s15193_s21 = scalar_select %p89_p1, %s15127_s14, %s91_s19  }
   0x9   : > { %p15195_p5 = por %p102_p2, %p101_p0  ;;  %p15199_p6 = por %p108_p4, %p107_p3 }
   0xa   : > { %p10510_p7 = scmp.ge.s32.totalorder %s15131_s15, 1  ;;  %p140_p8 = scmp.lt.s32.totalorder %s15131_s15, 3 }
   0xc   : > { %p141_p9 = pnand %p10510_p7, %p140_p8 }
   0xe   : > { %144 = sbr.rel (%p141_p9) target bundleno = 1480 (0x5c8), region = 32 }
  0x15   : > { %v10513_v0 = vld [vmem:[%s18615_s1 + $0x2] sm:$0x3]  ;;  %vm2139_vm0 = vcmask 1040384   ;;  %vm2140_vm1 = vcmask 1041408   ;;  %p164_p10 = scmp.lt.s32.totalorder %s15178_s16, 1  ;;  %v15133_v1 = vmov 65535  }
  0x16   : > { %v2141_v2 = vsel %vm2139_vm0, 4294967295, %v15133_v1  ;;  %v10998_v3 = vld [vmem:[%s18615_s1 + $0x8] sm:$0x3]  ;;  %v340_v5 = vld [vmem:[%s18615_s1] sm:$0x3]  ;;  %vm1946_vm4 = vcmask 23552  }
  0x17   : > { %v15212_v4 = vsel %vm2140_vm1, %v2141_v2, 0  ;;  %s165_s28 = scalar_select %p164_p10, %s15178_s16, 1  ;;  %v11066_v9 = vld [vmem:[%s18615_s1 + $0xa] sm:$0x3]  ;;  %vm341_vm2 = vsmask.f32 3328 }
  0x18   : > { %v2144_v6 = vand.u32 %v10513_v0, %v15212_v4  ;;  %v15220_v7 = vand.u32 %v10998_v3, %v15212_v4  ;;  %v15223_v8 = vand.u32 %v15212_v4, %v340_v5  ;;  %v15229_v10 = vand.u32 %v11066_v9, %v15212_v4  ;;  %s161_s4 = sand.u32 1, %s15123_s13   ;;  %s15134_s24 = smov [#allocation2]  }
  0x19   : > { %s14762_s6 = smul.u32 680, %s165_s28  ;;  %vm342_vm3 = vsmask.f32 7440  ;;  %v18938_v36 = vmov 0  ;;  %vm3783_vm6 = vcmask 1042432   ;;  %vm3784_vm7 = vcmask 1046532  }
  0x1a   : > { %18937 = vst [vmem:[#allocation5_spill] sm:$0xff] %v15220_v7  ;;  %12566 = vmatprep.subr.bf16.mxu1 %v2144_v6  ;;  %13086 = vmatprep.subr.bf16.mxu0 %v15220_v7  ;;  %vm15249_vm5 = vmor %vm341_vm2, %vm342_vm3  ;;  %s10511_s5 = sshll.u32 %s161_s4, 9  ;;  %s15073_s25 = sshll.u32 %s15134_s24, 4  ;;  %s15074_s25 = int_to_ptr.vmem [resolvable:$false] %s15073_s25 }
  0x1b   : > { %12567 = vmatpush3.bf16.msra.mxu1 %v2144_v6  ;;  %13087 = vmatpush3.bf16.msra.mxu0 %v15220_v7  ;;  %s15236_s9 = scalar_lea.vmem %s18614_s0, %s14762_s6  ;;  %v18939_v36 = vsel %vm15249_vm5, 4294967295, %v18938_v36  ;;  %vm15646_vm8 = vmor %vm3783_vm6, %vm3784_vm7  ;;  %s18270_s6 = scalar_lea.vmem [#allocation2], %s10511_s5 }
  0x1c   : > { %v170_v11 = vld [vmem:[%s15236_s9] sm:$0xf]  ;;  %v171_v12 = vld [vmem:[%s15236_s9 + $0x4] sm:$0xf]  ;;  %v172_v13 = vld [vmem:[%s15236_s9 + $0x8] sm:$0xf]  ;;  %12696 = vmatprep.subr.bf16.mxu1 %v15223_v8  ;;  %13216 = vmatprep.subr.bf16.mxu0 %v15229_v10 }
  0x1d   : > { %v345_v14 = vshrl.u32 %v170_v11, 16  ;;  %v348_v15 = vshll.u32 %v170_v11, 16  ;;  %v354_v16 = vshll.u32 %v171_v12, 16  ;;  %v358_v17 = vshrl.u32 %v171_v12, 16  ;;  %v175_v20 = vld [vmem:[%s15236_s9 + $0x14] sm:$0xf] }
  0x1e   : > { %v364_v18 = vshll.u32 %v172_v13, 16  ;;  %v368_v19 = vshrl.u32 %v172_v13, 16  ;;  %v176_v21 = vld [vmem:[%s15236_s9 + $0x18] sm:$0xf]  ;;  %v177_v26 = vld [vmem:[%s15236_s9 + $0x1c] sm:$0xf] }
  0x1f   : > { %v347_v22 = vrot.slane %v345_v14, 4  ;;  %v350_v23 = vrot.slane %v348_v15, 5  ;;  %v356_v24 = vrot.slane %v354_v16, 5  ;;  %v360_v25 = vrot.slane %v358_v17, 4  ;;  %v173_v35 = vld [vmem:[%s15236_s9 + $0xc] sm:$0xf] }
  0x20   : > { %v366_v27 = vrot.slane %v364_v18, 5  ;;  %v370_v28 = vrot.slane %v368_v19, 4  ;;  %v389_v29 = vshrl.u32 %v175_v20, 16  ;;  %v392_v30 = vshll.u32 %v175_v20, 16  ;;  %18940 = vst [vmem:[#allocation6_spill] sm:$0xff] %v18939_v36  ;;  %s10445_s10 = sshll.u32 %s18270_s6, 4  ;;  %s18567_s10 = int_to_ptr.vmem [resolvable:$true] %s10445_s10 }
  0x21   : > { %v351_v31 = vor.u32 %v350_v23, %v347_v22  ;;  %v361_v32 = vor.u32 %v360_v25, %v356_v24  ;;  %v398_v33 = vshll.u32 %v176_v21, 16  ;;  %v402_v34 = vshrl.u32 %v176_v21, 16  ;;  %v174_v49 = vld [vmem:[%s15236_s9 + $0x10] sm:$0x1]  ;;  %v15259_v54 = vld [vmem:[%s15236_s9 + $0x20] sm:$0xf]  ;;  %p15076_p0 = scmp.lt.s32.totalorder %s18567_s10, %s15074_s25 }
  0x22   : > { %v371_v37 = vor.u32 %v370_v28, %v366_v27  ;;  %v391_v38 = vrot.slane %v389_v29, 4  ;;  %v394_v39 = vrot.slane %v392_v30, 5  ;;  %v408_v40 = vshll.u32 %v177_v26, 16  ;;  %v15265_v1 = vld [vmem:[%s15236_s9 + $0x24] sm:$0x1]  ;;  %s15069_s20 = scalar_lea.vmem %s18567_s10, 8192 }
  0x23   : > { %v352_v41 = vrot.slane %v351_v31, 4  ;;  %v362_v42 = vrot.slane %v361_v32, 4  ;;  %v400_v43 = vrot.slane %v398_v33, 5  ;;  %v404_v44 = vrot.slane %v402_v34, 4  ;;  %v180_v11 = vld [vmem:[%s15236_s9 + $0x28] sm:$0xf]  ;;  %p15070_p11 = scmp.ne.s32.totalorder %s18567_s10, %s15069_s20 }
  0x24   : > { %v372_v45 = vrot.slane %v371_v37, 4  ;;  %v395_v46 = vor.u32 %v394_v39, %v391_v38  ;;  %v410_v47 = vrot.slane %v408_v40, 5  ;;  %v412_v48 = vshrl.u32 %v177_v26, 16  ;;  %v181_v16 = vld [vmem:[%s15236_s9 + $0x2c] sm:$0xf]  ;;  %s15075_s26 = scalar_lea.vmem %s15074_s25, 16384 }
  0x25   : > { %v357_v50 = vsel %vm15249_vm5, %v352_v41, %v356_v24  ;;  %v367_v51 = vsel %vm15249_vm5, %v362_v42, %v366_v27  ;;  %v405_v52 = vor.u32 %v404_v44, %v400_v43  ;;  %v374_v53 = vshll.u32 %v173_v35, 16  ;;  %v182_v21 = vld [vmem:[%s15236_s9 + $0x30] sm:$0xf]  ;;  %v183_v30 = vld [vmem:[%s15236_s9 + $0x34] sm:$0xf]  ;;  %p15071_p12 = pnand %p15070_p11, %p15195_p5  ;;  %p15077_p1 = scmp.lt.s32.totalorder %s15075_s26, %s15069_s20 }
  0x26   : > { %v10514_v55 = vcombine.low %v357_v50, %v367_v51  ;;  %v396_v56 = vrot.slane %v395_v46, 4  ;;  %v414_v57 = vrot.slane %v412_v48, 4  ;;  %v378_v58 = vshrl.u32 %v173_v35, 16  ;;  %v184_v35 = vld [vmem:[%s15236_s9 + $0x38] sm:$0x1] }
  0x27   : > { %v406_v59 = vrot.slane %v405_v52, 4  ;;  %v376_v60 = vrot.slane %v374_v53, 5  ;;  %v384_v61 = vshll.u32 %v174_v49, 16  ;;  %v418_v2 = vshll.u32 %v15259_v54, 16  ;;  %v186_v50 = vld [vmem:[%s15236_s9 + $0x40] sm:$0xf]  ;;  %p15072_p13 = pneg %p15071_p12  ;;  %p15078_p2 = por %p15077_p1, %p15076_p0 }
  0x28   : > { %12568 = vmatprep.mubr.msk.bf16.mxu1 %vm1946_vm4, %v10514_v55  ;;  %v401_v62 = vsel %vm15249_vm5, %v396_v56, %v400_v43  ;;  %v415_v63 = vor.u32 %v414_v57, %v410_v47  ;;  %v380_v0 = vrot.slane %v378_v58, 4  ;;  %v422_v9 = vshrl.u32 %v15259_v54, 16  ;;  %v16515_v36 = vld [vmem:[%s15236_s9 + $0x168] sm:$0xf] }
  0x29   : > { %v411_v3 = vsel %vm15249_vm5, %v406_v59, %v410_v47  ;;  %v377_v5 = vsel %vm15249_vm5, %v372_v45, %v376_v60  ;;  %v386_v6 = vrot.slane %v384_v61, 5  ;;  %v420_v15 = vrot.slane %v418_v2, 5  ;;  %v185_v45 = vld [vmem:[%s15236_s9 + $0x3c] sm:$0xf]  ;;  %19047 = vst [vmem:[#allocation111_spill] sm:$0xff] %v16515_v36  ;;  %p15079_p3 = pnand %p15078_p2, %p15072_p13 }
  0x2a   : > { %v416_v12 = vrot.slane %v415_v63, 4  ;;  %v10516_v13 = vcombine.low %v401_v62, %v411_v3  ;;  %v381_v14 = vor.u32 %v380_v0, %v376_v60  ;;  %v424_v17 = vrot.slane %v422_v9, 4  ;;  %v187_v62 = vld [vmem:[%s15236_s9 + $0x44] sm:$0xf] }
  0x2b   : > { %v428_v18 = vshll.u32 %v15265_v1, 16  ;;  %v3807_v19 = vrot.slane %v15259_v54, 5  ;;  %v3810_v20 = vrot.slane %v15265_v1, 5  ;;  %v433_v24 = vshrl.u32 %v180_v11, 16  ;;  %v259_v54 = vld [vmem:[%s15236_s9 + $0x164] sm:$0x1] }
  0x2c   : > { %13088 = vmatprep.mubr.msk.bf16.mxu0 %vm1946_vm4, %v10516_v13  ;;  %v382_v22 = vrot.slane %v381_v14, 4  ;;  %v421_v23 = vsel %vm15249_vm5, %v416_v12, %v420_v15  ;;  %v436_v25 = vshll.u32 %v180_v11, 16  ;;  %v425_v26 = vor.u32 %v424_v17, %v420_v15 }
  0x2d   : > { %v430_v27 = vrot.slane %v428_v18, 5  ;;  %v442_v28 = vshll.u32 %v181_v16, 16  ;;  %v446_v29 = vshrl.u32 %v181_v16, 16  ;;  %v435_v32 = vrot.slane %v433_v24, 4  ;;  %v190_v24 = vld [vmem:[%s15236_s9 + $0x50] sm:$0xf] }
  0x2e   : > { %v387_v31 = vsel %vm15249_vm5, %v382_v22, %v386_v6  ;;  %v438_v33 = vrot.slane %v436_v25, 5  ;;  %v452_v34 = vshll.u32 %v182_v21, 16  ;;  %v426_v38 = vrot.slane %v425_v26, 4  ;;  %v188_v6 = vld [vmem:[%s15236_s9 + $0x48] sm:$0xf] }
  0x2f   : > { %v10515_v37 = vcombine.low %v377_v5, %v387_v31  ;;  %v444_v39 = vrot.slane %v442_v28, 5  ;;  %v448_v40 = vrot.slane %v446_v29, 4  ;;  %v456_v43 = vshrl.u32 %v182_v21, 16  ;;  %v189_v21 = vld [vmem:[%s15236_s9 + $0x4c] sm:$0x1] }
  0x30   : > { %v439_v41 = vor.u32 %v438_v33, %v435_v32  ;;  %v454_v42 = vrot.slane %v452_v34, 5  ;;  %v462_v44 = vshll.u32 %v183_v30, 16  ;;  %v431_v46 = vsel %vm15249_vm5, %v426_v38, %v430_v27  ;;  %v191_v29 = vld [vmem:[%s15236_s9 + $0x54] sm:$0xf] }
  0x31   : > { %12569 = vmatmul.mubr.msk.bf16.vlgmr.msra.gmra.mrb[0].mxu1 %vm1946_vm4, %v10515_v37  ;;  %v449_v47 = vor.u32 %v448_v40, %v444_v39  ;;  %v466_v48 = vshrl.u32 %v183_v30, 16  ;;  %v472_v49 = vshll.u32 %v184_v35, 16  ;;  %v10517_v51 = vcombine.low %v421_v23, %v431_v46 }
  0x32   : > { %12697 = vmatpush3.bf16.msra.mxu1 %v15223_v8  ;;  %12572 = vmatprep.mubr.msk.bf16.mxu1 %vm1946_vm4, %v10516_v13  ;;  %v440_v52 = vrot.slane %v439_v41, 4  ;;  %v458_v53 = vrot.slane %v456_v43, 4  ;;  %v464_v55 = vrot.slane %v462_v44, 5  ;;  %v477_v59 = vshrl.u32 %v185_v45, 16  ;;  %v192_v41 = vld [vmem:[%s15236_s9 + $0x58] sm:$0xf] }
  0x33   : > { %v450_v56 = vrot.slane %v449_v47, 4  ;;  %v468_v57 = vrot.slane %v466_v48, 4  ;;  %v474_v58 = vrot.slane %v472_v49, 5  ;;  %13089 = vmatmul.mubr.msk.bf16.vlgmr.msra.gmra.mrb[0].mxu0 %vm1946_vm4, %v10517_v51  ;;  %v480_v63 = vshll.u32 %v185_v45, 16  ;;  %v193_v48 = vld [vmem:[%s15236_s9 + $0x5c] sm:$0xf] }
  0x34   : > { %v445_v60 = vsel %vm15249_vm5, %v440_v52, %v444_v39  ;;  %v459_v61 = vor.u32 %v458_v53, %v454_v42  ;;  %v486_v8 = vshll.u32 %v186_v50, 16  ;;  %13217 = vmatpush3.bf16.msra.mxu0 %v15229_v10  ;;  %v479_v3 = vrot.slane %v477_v59, 4 }
  0x35   : > { %v455_v0 = vsel %vm15249_vm5, %v450_v56, %v454_v42  ;;  %v469_v2 = vor.u32 %v468_v57, %v464_v55  ;;  %v490_v5 = vshrl.u32 %v186_v50, 16  ;;  %v482_v12 = vrot.slane %v480_v63, 5  ;;  %v194_v57 = vld [vmem:[%s15236_s9 + $0x60] sm:$0x1]  ;;  %v195_v63 = vld [vmem:[%s15236_s9 + $0x64] sm:$0xf] }
  0x36   : > { %v15301_v9 = vcombine.low %v445_v60, %v455_v0  ;;  %v460_v11 = vrot.slane %v459_v61, 4  ;;  %v488_v13 = vrot.slane %v486_v8, 5  ;;  %v496_v16 = vshll.u32 %v187_v62, 16 }
  0x37   : > { %v470_v14 = vrot.slane %v469_v2, 4  ;;  %v492_v15 = vrot.slane %v490_v5, 4  ;;  %v500_v17 = vshrl.u32 %v187_v62, 16  ;;  %v483_v18 = vor.u32 %v482_v12, %v479_v3  ;;  %v196_v5 = vld [vmem:[%s15236_s9 + $0x68] sm:$0xf] }
  0x38   : > { %18941 = vst [vmem:[#allocation7_spill] sm:$0xff] %v15301_v9  ;;  %13092 = vmatprep.mubr.msk.bf16.mxu0 %vm1946_vm4, %v15301_v9  ;;  %v465_v10 = vsel %vm15249_vm5, %v460_v11, %v464_v55  ;;  %v506_v22 = vshll.u32 %v188_v6, 16  ;;  %v510_v23 = vshrl.u32 %v188_v6, 16  ;;  %v498_v27 = vrot.slane %v496_v16, 5  ;;  %v197_v16 = vld [vmem:[%s15236_s9 + $0x6c] sm:$0xf] }
  0x39   : > { %12573 = vmatmul.mubr.msk.bf16.gmra.mrb[4].mxu1 %vm1946_vm4, %v10517_v51  ;;  %v475_v25 = vsel %vm15249_vm5, %v470_v14, %v474_v58  ;;  %v493_v26 = vor.u32 %v492_v15, %v488_v13  ;;  %v502_v28 = vrot.slane %v500_v17, 4  ;;  %v484_v31 = vrot.slane %v483_v18, 4 }
  0x3a   : > { %v15313_v30 = vcombine.low %v465_v10, %v475_v25  ;;  %12576 = vmatprep.mubr.msk.bf16.mxu1 %vm1946_vm4, %v15301_v9  ;;  %v508_v32 = vrot.slane %v506_v22, 5  ;;  %v512_v33 = vrot.slane %v510_v23, 4  ;;  %v516_v37 = vshll.u32 %v189_v21, 16 }
  0x3b   : > { %v494_v34 = vrot.slane %v493_v26, 4  ;;  %v503_v35 = vor.u32 %v502_v28, %v498_v27  ;;  %v521_v38 = vshrl.u32 %v190_v24, 16  ;;  %v489_v39 = vsel %vm15249_vm5, %v484_v31, %v488_v13 }
  0x3c   : > { %18942 = vst [vmem:[#allocation8_spill] sm:$0xff] %v15313_v30  ;;  %13093 = vmatmul.mubr.msk.bf16.gmra.mrb[4].mxu0 %vm1946_vm4, %v15313_v30  ;;  %v513_v40 = vor.u32 %v512_v33, %v508_v32  ;;  %v524_v42 = vshll.u32 %v190_v24, 16  ;;  %v530_v43 = vshll.u32 %v191_v29, 16  ;;  %v518_v46 = vrot.slane %v516_v37, 5  ;;  %v198_v33 = vld [vmem:[%s15236_s9 + $0x70] sm:$0xf] }
  0x3d   : > { %v499_v44 = vsel %vm15249_vm5, %v494_v34, %v498_v27  ;;  %v504_v45 = vrot.slane %v503_v35, 4  ;;  %v523_v47 = vrot.slane %v521_v38, 4  ;;  %v534_v55 = vshrl.u32 %v191_v29, 16  ;;  %v199_v38 = vld [vmem:[%s15236_s9 + $0x74] sm:$0x1] }
  0x3e   : > { %v15325_v49 = vcombine.low %v489_v39, %v499_v44  ;;  %v514_v50 = vrot.slane %v513_v40, 4  ;;  %v526_v51 = vrot.slane %v524_v42, 5  ;;  %v532_v52 = vrot.slane %v530_v43, 5  ;;  %v200_v40 = vld [vmem:[%s15236_s9 + $0x78] sm:$0xf] }
  0x3f   : > { %v509_v53 = vsel %vm15249_vm5, %v504_v45, %v508_v32  ;;  %v540_v56 = vshll.u32 %v192_v41, 16  ;;  %v544_v58 = vshrl.u32 %v192_v41, 16  ;;  %v550_v61 = vshll.u32 %v193_v48, 16 }
  0x40   : > { %18943 = vst [vmem:[#allocation9_spill] sm:$0xff] %v15325_v49  ;;  %13096 = vmatprep.mubr.msk.bf16.mxu0 %vm1946_vm4, %v15325_v49  ;;  %v519_v59 = vsel %vm15249_vm5, %v514_v50, %v518_v46  ;;  %v527_v60 = vor.u32 %v526_v51, %v523_v47  ;;  %v554_v62 = vshrl.u32 %v193_v48, 16  ;;  %v536_v0 = vrot.slane %v534_v55, 4 }
  0x41   : > { %12577 = vmatmul.mubr.msk.bf16.gmra.mrb[8].mxu1 %vm1946_vm4, %v15313_v30  ;;  %v15337_v8 = vcombine.low %v509_v53, %v519_v59  ;;  %v542_v2 = vrot.slane %v540_v56, 5  ;;  %v546_v3 = vrot.slane %v544_v58, 4  ;;  %v552_v11 = vrot.slane %v550_v61, 5  ;;  %v201_v53 = vld [vmem:[%s15236_s9 + $0x7c] sm:$0xf] }
  0x42   : > { %12580 = vmatprep.mubr.msk.bf16.mxu1 %vm1946_vm4, %v15325_v49  ;;  %v528_v6 = vrot.slane %v527_v60, 4  ;;  %v556_v12 = vrot.slane %v554_v62, 4  ;;  %v560_v13 = vshll.u32 %v194_v57, 16  ;;  %v537_v14 = vor.u32 %v536_v0, %v532_v52  ;;  %v202_v59 = vld [vmem:[%s15236_s9 + $0x80] sm:$0xf] }
  0x43   : > { %18944 = vst [vmem:[#allocation10_spill] sm:$0xff] %v15337_v8  ;;  %v547_v15 = vor.u32 %v546_v3, %v542_v2  ;;  %v565_v17 = vshrl.u32 %v195_v63, 16  ;;  %v568_v10 = vshll.u32 %v195_v63, 16  ;;  %v574_v23 = vshll.u32 %v196_v5, 16  ;;  %v16233_v49 = vld [vmem:[%s15236_s9 + $0x244] sm:$0xf] }
  0x44   : > { %13097 = vmatmul.mubr.msk.bf16.gmra.mrb[8].mxu0 %vm1946_vm4, %v15337_v8  ;;  %v533_v18 = vsel %vm15249_vm5, %v528_v6, %v532_v52  ;;  %v557_v21 = vor.u32 %v556_v12, %v552_v11  ;;  %v562_v22 = vrot.slane %v560_v13, 5  ;;  %v538_v24 = vrot.slane %v537_v14, 4  ;;  %v203_v14 = vld [vmem:[%s15236_s9 + $0x84] sm:$0xf] }
  0x45   : > { %v548_v25 = vrot.slane %v547_v15, 4  ;;  %v567_v26 = vrot.slane %v565_v17, 4  ;;  %v570_v27 = vrot.slane %v568_v10, 5  ;;  %v576_v29 = vrot.slane %v574_v23, 5  ;;  %v204_v15 = vld [vmem:[%s15236_s9 + $0x88] sm:$0x1] }
  0x46   : > { %v558_v28 = vrot.slane %v557_v21, 4  ;;  %v578_v31 = vshrl.u32 %v196_v5, 16  ;;  %v584_v32 = vshll.u32 %v197_v16, 16  ;;  %v543_v34 = vsel %vm15249_vm5, %v538_v24, %v542_v2 }
  0x47   : > { %v553_v35 = vsel %vm15249_vm5, %v548_v25, %v552_v11  ;;  %v571_v37 = vor.u32 %v570_v27, %v567_v26  ;;  %v588_v39 = vshrl.u32 %v197_v16, 16  ;;  %v15354_v41 = vcombine.low %v533_v18, %v543_v34 }
  0x48   : > { %v563_v42 = vsel %vm15249_vm5, %v558_v28, %v562_v22  ;;  %v580_v43 = vrot.slane %v578_v31, 4  ;;  %v586_v44 = vrot.slane %v584_v32, 5  ;;  %v594_v48 = vshll.u32 %v198_v33, 16  ;;  %v205_v22 = vld [vmem:[%s15236_s9 + $0x8c] sm:$0xf] }
  0x49   : > { %18945 = vst [vmem:[#allocation11_spill] sm:$0xff] %v15354_v41  ;;  %12581 = vmatmul.mubr.msk.bf16.gmra.mrb[12].mxu1 %vm1946_vm4, %v15337_v8  ;;  %v15360_v45 = vcombine.low %v553_v35, %v563_v42  ;;  %v572_v46 = vrot.slane %v571_v37, 4  ;;  %v590_v47 = vrot.slane %v588_v39, 4  ;;  %13100 = vmatprep.mubr.msk.bf16.mxu0 %vm1946_vm4, %v15354_v41  ;;  %v598_v51 = vshrl.u32 %v198_v33, 16  ;;  %v206_v35 = vld [vmem:[%s15236_s9 + $0x90] sm:$0xf] }
  0x4a   : > { %12584 = vmatprep.mubr.msk.bf16.mxu1 %vm1946_vm4, %v15354_v41  ;;  %v581_v50 = vor.u32 %v580_v43, %v576_v29  ;;  %v604_v52 = vshll.u32 %v199_v38, 16  ;;  %v609_v55 = vshrl.u32 %v200_v40, 16  ;;  %v596_v58 = vrot.slane %v594_v48, 5  ;;  %v207_v43 = vld [vmem:[%s15236_s9 + $0x94] sm:$0xf] }
  0x4b   : > { %18946 = vst [vmem:[#allocation12_spill] sm:$0xff] %v15360_v45  ;;  %v577_v56 = vsel %vm15249_vm5, %v572_v46, %v576_v29  ;;  %v591_v57 = vor.u32 %v590_v47, %v586_v44  ;;  %v612_v60 = vshll.u32 %v200_v40, 16  ;;  %v600_v62 = vrot.slane %v598_v51, 4  ;;  %v16209_v41 = vld [vmem:[%s15236_s9 + $0x104] sm:$0xf] }
  0x4c   : > { %13101 = vmatmul.mubr.msk.bf16.gmra.mrb[12].mxu0 %vm1946_vm4, %v15360_v45  ;;  %v582_v61 = vrot.slane %v581_v50, 4  ;;  %v606_v63 = vrot.slane %v604_v52, 5  ;;  %v611_v0 = vrot.slane %v609_v55, 4  ;;  %v618_v5 = vshll.u32 %v201_v53, 16  ;;  %v208_v55 = vld [vmem:[%s15236_s9 + $0x98] sm:$0xf] }
  0x4d   : > { %v592_v2 = vrot.slane %v591_v57, 4  ;;  %v614_v3 = vrot.slane %v612_v60, 5  ;;  %v622_v6 = vshrl.u32 %v201_v53, 16  ;;  %v601_v12 = vor.u32 %v600_v62, %v596_v58 }
  0x4e   : > { %v587_v11 = vsel %vm15249_vm5, %v582_v61, %v586_v44  ;;  %v628_v13 = vshll.u32 %v202_v59, 16  ;;  %v632_v16 = vshrl.u32 %v202_v59, 16  ;;  %v620_v21 = vrot.slane %v618_v5, 5  ;;  %v209_v59 = vld [vmem:[%s15236_s9 + $0x9c] sm:$0x1] }
  0x4f   : > { %v15376_v17 = vcombine.low %v577_v56, %v587_v11  ;;  %v597_v10 = vsel %vm15249_vm5, %v592_v2, %v596_v58  ;;  %v615_v18 = vor.u32 %v614_v3, %v611_v0  ;;  %v602_v23 = vrot.slane %v601_v12, 4  ;;  %v210_v11 = vld [vmem:[%s15236_s9 + $0xa0] sm:$0xf] }
  0x50   : > { %v624_v24 = vrot.slane %v622_v6, 4  ;;  %v630_v25 = vrot.slane %v628_v13, 5  ;;  %v634_v26 = vrot.slane %v632_v16, 4  ;;  %v638_v28 = vshll.u32 %v203_v14, 16  ;;  %v211_v16 = vld [vmem:[%s15236_s9 + $0xa4] sm:$0xf] }
  0x51   : > { %18947 = vst [vmem:[#allocation13_spill] sm:$0xff] %v15376_v17  ;;  %13104 = vmatprep.mubr.msk.bf16.mxu0 %vm1946_vm4, %v15376_v17  ;;  %12585 = vmatmul.mubr.msk.bf16.gmra.mrb[16].mxu1 %vm1946_vm4, %v15360_v45  ;;  %v616_v27 = vrot.slane %v615_v18, 4  ;;  %v642_v29 = vshrl.u32 %v203_v14, 16  ;;  %v648_v31 = vshll.u32 %v204_v15, 16  ;;  %v607_v32 = vsel %vm15249_vm5, %v602_v23, %v606_v63 }
  0x52   : > { %12588 = vmatprep.mubr.msk.bf16.mxu1 %vm1946_vm4, %v15376_v17  ;;  %v625_v33 = vor.u32 %v624_v24, %v620_v21  ;;  %v635_v34 = vor.u32 %v634_v26, %v630_v25  ;;  %v653_v37 = vshrl.u32 %v205_v22, 16  ;;  %v15390_v38 = vcombine.low %v597_v10, %v607_v32 }
  0x53   : > { %v621_v39 = vsel %vm15249_vm5, %v616_v27, %v620_v21  ;;  %v640_v40 = vrot.slane %v638_v28, 5  ;;  %v644_v42 = vrot.slane %v642_v29, 4  ;;  %v650_v47 = vrot.slane %v648_v31, 5  ;;  %v212_v29 = vld [vmem:[%s15236_s9 + $0xa8] sm:$0xf] }
  0x54   : > { %18948 = vst [vmem:[#allocation14_spill] sm:$0xff] %v15390_v38  ;;  %v626_v44 = vrot.slane %v625_v33, 4  ;;  %v636_v46 = vrot.slane %v635_v34, 4  ;;  %v655_v48 = vrot.slane %v653_v37, 4  ;;  %13105 = vmatmul.mubr.msk.bf16.gmra.mrb[16].mxu0 %vm1946_vm4, %v15390_v38  ;;  %v656_v51 = vshll.u32 %v205_v22, 16 }
  0x55   : > { %v645_v50 = vor.u32 %v644_v42, %v640_v40  ;;  %v662_v52 = vshll.u32 %v206_v35, 16  ;;  %v666_v53 = vshrl.u32 %v206_v35, 16  ;;  %v672_v58 = vshll.u32 %v207_v43, 16 }
  0x56   : > { %v631_v56 = vsel %vm15249_vm5, %v626_v44, %v630_v25  ;;  %v641_v57 = vsel %vm15249_vm5, %v636_v46, %v640_v40  ;;  %v676_v60 = vshrl.u32 %v207_v43, 16  ;;  %v658_v63 = vrot.slane %v656_v51, 5  ;;  %v214_v46 = vld [vmem:[%s15236_s9 + $0xb0] sm:$0x1] }
  0x57   : > { %v15403_v61 = vcombine.low %v621_v39, %v631_v56  ;;  %v646_v62 = vrot.slane %v645_v50, 4  ;;  %v664_v0 = vrot.slane %v662_v52, 5  ;;  %v668_v2 = vrot.slane %v666_v53, 4  ;;  %v213_v39 = vld [vmem:[%s15236_s9 + $0xac] sm:$0xf] }
  0x58   : > { %v674_v3 = vrot.slane %v672_v58, 5  ;;  %v678_v5 = vrot.slane %v676_v60, 4  ;;  %v682_v6 = vshll.u32 %v208_v55, 16  ;;  %v659_v13 = vor.u32 %v658_v63, %v655_v48  ;;  %v216_v63 = vld [vmem:[%s15236_s9 + $0xb8] sm:$0xf] }
  0x59   : > { %18949 = vst [vmem:[#allocation15_spill] sm:$0xff] %v15403_v61  ;;  %13108 = vmatprep.mubr.msk.bf16.mxu0 %vm1946_vm4, %v15403_v61  ;;  %12589 = vmatmul.mubr.msk.bf16.gmra.mrb[20].mxu1 %vm1946_vm4, %v15390_v38  ;;  %v651_v12 = vsel %vm15249_vm5, %v646_v62, %v650_v47  ;;  %v686_v14 = vshrl.u32 %v208_v55, 16  ;;  %v692_v15 = vshll.u32 %v209_v59, 16  ;;  %v669_v18 = vor.u32 %v668_v2, %v664_v0 }
  0x5a   : > { %v15413_v10 = vcombine.low %v641_v57, %v651_v12  ;;  %12592 = vmatprep.mubr.msk.bf16.mxu1 %vm1946_vm4, %v15403_v61  ;;  %v679_v21 = vor.u32 %v678_v5, %v674_v3  ;;  %v684_v22 = vrot.slane %v682_v6, 5  ;;  %v660_v23 = vrot.slane %v659_v13, 4  ;;  %v215_v57 = vld [vmem:[%s15236_s9 + $0xb4] sm:$0xf]  ;;  %v14930_v61 = vld [vmem:[%s15236_s9 + $0x100] sm:$0x1] }
  0x5b   : > { %v688_v24 = vrot.slane %v686_v14, 4  ;;  %v694_v25 = vrot.slane %v692_v15, 5  ;;  %v697_v26 = vshrl.u32 %v210_v11, 16  ;;  %v670_v27 = vrot.slane %v669_v18, 4 }
  0x5c   : > { %18950 = vst [vmem:[#allocation16_spill] sm:$0xff] %v15413_v10  ;;  %v680_v28 = vrot.slane %v679_v21, 4  ;;  %v700_v31 = vshll.u32 %v210_v11, 16  ;;  %v706_v32 = vshll.u32 %v211_v16, 16  ;;  %13109 = vmatmul.mubr.msk.bf16.gmra.mrb[20].mxu0 %vm1946_vm4, %v15413_v10  ;;  %v665_v33 = vsel %vm15249_vm5, %v660_v23, %v664_v0 }
  0x5d   : > { %v689_v34 = vor.u32 %v688_v24, %v684_v22  ;;  %v699_v35 = vrot.slane %v697_v26, 4  ;;  %v710_v37 = vshrl.u32 %v211_v16, 16  ;;  %v675_v40 = vsel %vm15249_vm5, %v670_v27, %v674_v3  ;;  %v217_v16 = vld [vmem:[%s15236_s9 + $0xbc] sm:$0xf]  ;;  %v218_v26 = vld [vmem:[%s15236_s9 + $0xc0] sm:$0xf] }
  0x5e   : > { %v685_v42 = vsel %vm15249_vm5, %v680_v28, %v684_v22  ;;  %v702_v43 = vrot.slane %v700_v31, 5  ;;  %v708_v44 = vrot.slane %v706_v32, 5  ;;  %v15428_v47 = vcombine.low %v665_v33, %v675_v40  ;;  %v219_v40 = vld [vmem:[%s15236_s9 + $0xc4] sm:$0x1] }
  0x5f   : > { %v690_v48 = vrot.slane %v689_v34, 4  ;;  %v712_v50 = vrot.slane %v710_v37, 4  ;;  %v716_v51 = vshll.u32 %v212_v29, 16  ;;  %v720_v53 = vshrl.u32 %v212_v29, 16 }
  0x60   : > { %18951 = vst [vmem:[#allocation17_spill] sm:$0xff] %v15428_v47  ;;  %v703_v52 = vor.u32 %v702_v43, %v699_v35  ;;  %v726_v55 = vshll.u32 %v213_v39, 16  ;;  %v730_v56 = vshrl.u32 %v213_v39, 16  ;;  %13112 = vmatprep.mubr.msk.bf16.mxu0 %vm1946_vm4, %v15428_v47  ;;  %v736_v62 = vshll.u32 %v214_v46, 16 }
  0x61   : > { %12593 = vmatmul.mubr.msk.bf16.gmra.mrb[24].mxu1 %vm1946_vm4, %v15413_v10  ;;  %v695_v58 = vsel %vm15249_vm5, %v690_v48, %v694_v25  ;;  %v713_v59 = vor.u32 %v712_v50, %v708_v44  ;;  %v718_v60 = vrot.slane %v716_v51, 5  ;;  %v722_v3 = vrot.slane %v720_v53, 4 }
  0x62   : > { %v15438_v0 = vcombine.low %v685_v42, %v695_v58  ;;  %12596 = vmatprep.mubr.msk.bf16.mxu1 %vm1946_vm4, %v15428_v47  ;;  %v704_v2 = vrot.slane %v703_v52, 4  ;;  %v728_v5 = vrot.slane %v726_v55, 5  ;;  %v732_v11 = vrot.slane %v730_v56, 4  ;;  %v221_v52 = vld [vmem:[%s15236_s9 + $0xcc] sm:$0xf] }
  0x63   : > { %v714_v6 = vrot.slane %v713_v59, 4  ;;  %v738_v12 = vrot.slane %v736_v62, 5  ;;  %v741_v13 = vshrl.u32 %v215_v57, 16  ;;  %v723_v15 = vor.u32 %v722_v3, %v718_v60  ;;  %v222_v3 = vld [vmem:[%s15236_s9 + $0xd0] sm:$0xf] }
  0x64   : > { %18952 = vst [vmem:[#allocation18_spill] sm:$0xff] %v15438_v0  ;;  %v709_v14 = vsel %vm15249_vm5, %v704_v2, %v708_v44  ;;  %v744_v18 = vshll.u32 %v215_v57, 16  ;;  %v750_v21 = vshll.u32 %v216_v63, 16  ;;  %13113 = vmatmul.mubr.msk.bf16.gmra.mrb[24].mxu0 %vm1946_vm4, %v15438_v0  ;;  %v733_v23 = vor.u32 %v732_v11, %v728_v5  ;;  %v220_v44 = vld [vmem:[%s15236_s9 + $0xc8] sm:$0xf] }
  0x65   : > { %v719_v22 = vsel %vm15249_vm5, %v714_v6, %v718_v60  ;;  %v743_v24 = vrot.slane %v741_v13, 4  ;;  %v754_v25 = vshrl.u32 %v216_v63, 16  ;;  %v724_v28 = vrot.slane %v723_v15, 4  ;;  %v223_v15 = vld [vmem:[%s15236_s9 + $0xd4] sm:$0xf] }
  0x66   : > { %v15450_v27 = vcombine.low %v709_v14, %v719_v22  ;;  %v746_v29 = vrot.slane %v744_v18, 5  ;;  %v752_v31 = vrot.slane %v750_v21, 5  ;;  %v734_v32 = vrot.slane %v733_v23, 4 }
  0x67   : > { %v756_v33 = vrot.slane %v754_v25, 4  ;;  %v760_v34 = vshll.u32 %v217_v16, 16  ;;  %v764_v35 = vshrl.u32 %v217_v16, 16  ;;  %v729_v37 = vsel %vm15249_vm5, %v724_v28, %v728_v5 }
  0x68   : > { %18953 = vst [vmem:[#allocation19_spill] sm:$0xff] %v15450_v27  ;;  %13116 = vmatprep.mubr.msk.bf16.mxu0 %vm1946_vm4, %v15450_v27  ;;  %v747_v39 = vor.u32 %v746_v29, %v743_v24  ;;  %v770_v42 = vshll.u32 %v218_v26, 16  ;;  %v774_v43 = vshrl.u32 %v218_v26, 16  ;;  %v739_v46 = vsel %vm15249_vm5, %v734_v32, %v738_v12  ;;  %v224_v26 = vld [vmem:[%s15236_s9 + $0xd8] sm:$0x1] }
  0x69   : > { %12597 = vmatmul.mubr.msk.bf16.gmra.mrb[28].mxu1 %vm1946_vm4, %v15438_v0  ;;  %v757_v48 = vor.u32 %v756_v33, %v752_v31  ;;  %v762_v50 = vrot.slane %v760_v34, 5  ;;  %v766_v51 = vrot.slane %v764_v35, 4  ;;  %v15463_v53 = vcombine.low %v729_v37, %v739_v46  ;;  %v225_v34 = vld [vmem:[%s15236_s9 + $0xdc] sm:$0xf]  ;;  %v16160_v0 = vld [vmem:[%s15236_s9 + $0x230] sm:$0xf] }
  0x6a   : > { %12600 = vmatprep.mubr.msk.bf16.mxu1 %vm1946_vm4, %v15450_v27  ;;  %v748_v55 = vrot.slane %v747_v39, 4  ;;  %v772_v56 = vrot.slane %v770_v42, 5  ;;  %v776_v57 = vrot.slane %v774_v43, 4  ;;  %v780_v60 = vshll.u32 %v219_v40, 16  ;;  %v226_v42 = vld [vmem:[%s15236_s9 + $0xe0] sm:$0xf] }
  0x6b   : > { %18954 = vst [vmem:[#allocation20_spill] sm:$0xff] %v15463_v53  ;;  %v758_v58 = vrot.slane %v757_v48, 4  ;;  %v767_v59 = vor.u32 %v766_v51, %v762_v50  ;;  %v785_v62 = vshrl.u32 %v220_v44, 16  ;;  %v788_v5 = vshll.u32 %v220_v44, 16  ;;  %v16145_v27 = vld [vmem:[%s15236_s9 + $0xf4] sm:$0xf] }
  0x6c   : > { %v753_v63 = vsel %vm15249_vm5, %v748_v55, %v752_v31  ;;  %v777_v2 = vor.u32 %v776_v57, %v772_v56  ;;  %v794_v6 = vshll.u32 %v221_v52, 16  ;;  %13117 = vmatmul.mubr.msk.bf16.gmra.mrb[28].mxu0 %vm1946_vm4, %v15463_v53  ;;  %v782_v13 = vrot.slane %v780_v60, 5 }
  0x6d   : > { %v763_v11 = vsel %vm15249_vm5, %v758_v58, %v762_v50  ;;  %v768_v12 = vrot.slane %v767_v59, 4  ;;  %v787_v14 = vrot.slane %v785_v62, 4  ;;  %v790_v21 = vrot.slane %v788_v5, 5 }
  0x6e   : > { %v15475_v16 = vcombine.low %v753_v63, %v763_v11  ;;  %v778_v18 = vrot.slane %v777_v2, 4  ;;  %v796_v22 = vrot.slane %v794_v6, 5  ;;  %v798_v24 = vshrl.u32 %v221_v52, 16  ;;  %v227_v52 = vld [vmem:[%s15236_s9 + $0xe4] sm:$0xf] }
  0x6f   : > { %v773_v23 = vsel %vm15249_vm5, %v768_v12, %v772_v56  ;;  %v804_v25 = vshll.u32 %v222_v3, 16  ;;  %v808_v28 = vshrl.u32 %v222_v3, 16  ;;  %v791_v31 = vor.u32 %v790_v21, %v787_v14  ;;  %v229_v21 = vld [vmem:[%s15236_s9 + $0xec] sm:$0x1] }
  0x70   : > { %18955 = vst [vmem:[#allocation21_spill] sm:$0xff] %v15475_v16  ;;  %13120 = vmatprep.mubr.msk.bf16.mxu0 %vm1946_vm4, %v15475_v16  ;;  %v783_v29 = vsel %vm15249_vm5, %v778_v18, %v782_v13  ;;  %v814_v32 = vshll.u32 %v223_v15, 16  ;;  %v818_v33 = vshrl.u32 %v223_v15, 16  ;;  %v800_v37 = vrot.slane %v798_v24, 4  ;;  %v228_v13 = vld [vmem:[%s15236_s9 + $0xe8] sm:$0xf] }
  0x71   : > { %12601 = vmatmul.mubr.msk.bf16.gmra.mrb[32].mxu1 %vm1946_vm4, %v15463_v53  ;;  %v15487_v35 = vcombine.low %v773_v23, %v783_v29  ;;  %v806_v39 = vrot.slane %v804_v25, 5  ;;  %v810_v40 = vrot.slane %v808_v28, 4  ;;  %v792_v43 = vrot.slane %v791_v31, 4  ;;  %v230_v23 = vld [vmem:[%s15236_s9 + $0xf0] sm:$0xf] }
  0x72   : > { %12604 = vmatprep.mubr.msk.bf16.mxu1 %vm1946_vm4, %v15475_v16  ;;  %v816_v44 = vrot.slane %v814_v32, 5  ;;  %v820_v46 = vrot.slane %v818_v33, 4  ;;  %v824_v48 = vshll.u32 %v224_v26, 16  ;;  %v801_v50 = vor.u32 %v800_v37, %v796_v22  ;;  %v16112_v53 = vld [vmem:[%s15236_s9 + $0x224] sm:$0xf] }
  0x73   : > { %18956 = vst [vmem:[#allocation22_spill] sm:$0xff] %v15487_v35  ;;  %v811_v51 = vor.u32 %v810_v40, %v806_v39  ;;  %v829_v55 = vshrl.u32 %v225_v34, 16  ;;  %v832_v56 = vshll.u32 %v225_v34, 16  ;;  %v797_v57 = vsel %vm15249_vm5, %v792_v43, %v796_v22  ;;  %v231_v40 = vld [vmem:[%s15236_s9 + $0xf4] sm:$0xf] }
  0x74   : > { %v821_v58 = vor.u32 %v820_v46, %v816_v44  ;;  %v826_v59 = vrot.slane %v824_v48, 5  ;;  %v838_v60 = vshll.u32 %v226_v42, 16  ;;  %13121 = vmatmul.mubr.msk.bf16.gmra.mrb[32].mxu0 %vm1946_vm4, %v15487_v35  ;;  %v802_v62 = vrot.slane %v801_v50, 4  ;;  %v232_v48 = vld [vmem:[%s15236_s9 + $0xf8] sm:$0xf] }
  0x75   : > { %v812_v63 = vrot.slane %v811_v51, 4  ;;  %v831_v2 = vrot.slane %v829_v55, 4  ;;  %v834_v3 = vrot.slane %v832_v56, 5  ;;  %v842_v11 = vshrl.u32 %v226_v42, 16 }
  0x76   : > { %v822_v5 = vrot.slane %v821_v58, 4  ;;  %v840_v6 = vrot.slane %v838_v60, 5  ;;  %v848_v12 = vshll.u32 %v227_v52, 16  ;;  %v807_v14 = vsel %vm15249_vm5, %v802_v62, %v806_v39 }
  0x77   : > { %v817_v15 = vsel %vm15249_vm5, %v812_v63, %v816_v44  ;;  %v835_v18 = vor.u32 %v834_v3, %v831_v2  ;;  %v852_v22 = vshrl.u32 %v227_v52, 16  ;;  %v15504_v24 = vcombine.low %v797_v57, %v807_v14  ;;  %v233_v3 = vld [vmem:[%s15236_s9 + $0xfc] sm:$0xf] }
  0x78   : > { %v827_v25 = vsel %vm15249_vm5, %v822_v5, %v826_v59  ;;  %v844_v26 = vrot.slane %v842_v11, 4  ;;  %v850_v28 = vrot.slane %v848_v12, 5  ;;  %v858_v33 = vshll.u32 %v228_v13, 16  ;;  %v234_v5 = vld [vmem:[%s15236_s9 + $0x100] sm:$0x1] }
  0x79   : > { %18957 = vst [vmem:[#allocation23_spill] sm:$0xff] %v15504_v24  ;;  %12605 = vmatmul.mubr.msk.bf16.gmra.mrb[36].mxu1 %vm1946_vm4, %v15487_v35  ;;  %v15510_v29 = vcombine.low %v817_v15, %v827_v25  ;;  %v836_v31 = vrot.slane %v835_v18, 4  ;;  %v854_v32 = vrot.slane %v852_v22, 4  ;;  %13124 = vmatprep.mubr.msk.bf16.mxu0 %vm1946_vm4, %v15504_v24  ;;  %v862_v37 = vshrl.u32 %v228_v13, 16  ;;  %v235_v15 = vld [vmem:[%s15236_s9 + $0x104] sm:$0xf] }
  0x7a   : > { %12608 = vmatprep.mubr.msk.bf16.mxu1 %vm1946_vm4, %v15504_v24  ;;  %v845_v34 = vor.u32 %v844_v26, %v840_v6  ;;  %v868_v39 = vshll.u32 %v229_v21, 16  ;;  %v873_v42 = vshrl.u32 %v230_v23, 16  ;;  %v860_v46 = vrot.slane %v858_v33, 5 }
  0x7b   : > { %18958 = vst [vmem:[#allocation24_spill] sm:$0xff] %v15510_v29  ;;  %v841_v43 = vsel %vm15249_vm5, %v836_v31, %v840_v6  ;;  %v855_v44 = vor.u32 %v854_v32, %v850_v28  ;;  %v876_v50 = vshll.u32 %v230_v23, 16  ;;  %v864_v52 = vrot.slane %v862_v37, 4  ;;  %v236_v37 = vld [vmem:[%s15236_s9 + $0x108] sm:$0xf] }
  0x7c   : > { %v846_v51 = vrot.slane %v845_v34, 4  ;;  %v870_v55 = vrot.slane %v868_v39, 5  ;;  %v875_v56 = vrot.slane %v873_v42, 4  ;;  %13125 = vmatmul.mubr.msk.bf16.gmra.mrb[36].mxu0 %vm1946_vm4, %v15510_v29  ;;  %v882_v59 = vshll.u32 %v231_v40, 16 }
  0x7d   : > { %v856_v57 = vrot.slane %v855_v44, 4  ;;  %v878_v58 = vrot.slane %v876_v50, 5  ;;  %v886_v60 = vshrl.u32 %v231_v40, 16  ;;  %v865_v63 = vor.u32 %v864_v52, %v860_v46 }
  0x7e   : > { %v851_v62 = vsel %vm15249_vm5, %v846_v51, %v850_v28  ;;  %v892_v2 = vshll.u32 %v232_v48, 16  ;;  %v896_v6 = vshrl.u32 %v232_v48, 16  ;;  %v884_v14 = vrot.slane %v882_v59, 5  ;;  %v238_v59 = vld [vmem:[%s15236_s9 + $0x110] sm:$0xf] }
  0x7f   : > { %v15526_v11 = vcombine.low %v841_v43, %v851_v62  ;;  %v861_v12 = vsel %vm15249_vm5, %v856_v57, %v860_v46  ;;  %v879_v13 = vor.u32 %v878_v58, %v875_v56  ;;  %v866_v18 = vrot.slane %v865_v63, 4  ;;  %v237_v46 = vld [vmem:[%s15236_s9 + $0x10c] sm:$0xf] }
  0x80   : > { %v888_v21 = vrot.slane %v886_v60, 4  ;;  %v894_v22 = vrot.slane %v892_v2, 5  ;;  %v898_v23 = vrot.slane %v896_v6, 4  ;;  %v902_v26 = vshll.u32 %v233_v3, 16  ;;  %v239_v2 = vld [vmem:[%s15236_s9 + $0x114] sm:$0x1] }
  0x81   : > { %18959 = vst [vmem:[#allocation25_spill] sm:$0xff] %v15526_v11  ;;  %13128 = vmatprep.mubr.msk.bf16.mxu0 %vm1946_vm4, %v15526_v11  ;;  %12609 = vmatmul.mubr.msk.bf16.gmra.mrb[40].mxu1 %vm1946_vm4, %v15510_v29  ;;  %v880_v25 = vrot.slane %v879_v13, 4  ;;  %v906_v28 = vshrl.u32 %v233_v3, 16  ;;  %v912_v31 = vshll.u32 %v234_v5, 16  ;;  %v871_v32 = vsel %vm15249_vm5, %v866_v18, %v870_v55 }
  0x82   : > { %12612 = vmatprep.mubr.msk.bf16.mxu1 %vm1946_vm4, %v15526_v11  ;;  %v889_v33 = vor.u32 %v888_v21, %v884_v14  ;;  %v899_v34 = vor.u32 %v898_v23, %v894_v22  ;;  %v917_v39 = vshrl.u32 %v235_v15, 16  ;;  %v15540_v40 = vcombine.low %v861_v12, %v871_v32  ;;  %v240_v23 = vld [vmem:[%s15236_s9 + $0x118] sm:$0xf]  ;;  %v14913_v11 = vld [vmem:[%s15236_s9 + $0xbc] sm:$0xf] }
  0x83   : > { %v885_v42 = vsel %vm15249_vm5, %v880_v25, %v884_v14  ;;  %v904_v43 = vrot.slane %v902_v26, 5  ;;  %v908_v44 = vrot.slane %v906_v28, 4  ;;  %v914_v51 = vrot.slane %v912_v31, 5  ;;  %v241_v31 = vld [vmem:[%s15236_s9 + $0x11c] sm:$0xf] }
  0x84   : > { %18960 = vst [vmem:[#allocation26_spill] sm:$0xff] %v15540_v40  ;;  %v890_v48 = vrot.slane %v889_v33, 4  ;;  %v900_v50 = vrot.slane %v899_v34, 4  ;;  %v919_v52 = vrot.slane %v917_v39, 4  ;;  %13129 = vmatmul.mubr.msk.bf16.gmra.mrb[40].mxu0 %vm1946_vm4, %v15540_v40  ;;  %v920_v56 = vshll.u32 %v235_v15, 16 }
  0x85   : > { %v909_v55 = vor.u32 %v908_v44, %v904_v43  ;;  %v926_v57 = vshll.u32 %v236_v37, 16  ;;  %v930_v58 = vshrl.u32 %v236_v37, 16  ;;  %v936_v63 = vshll.u32 %v237_v46, 16 }
  0x86   : > { %v895_v60 = vsel %vm15249_vm5, %v890_v48, %v894_v22  ;;  %v905_v62 = vsel %vm15249_vm5, %v900_v50, %v904_v43  ;;  %v940_v3 = vshrl.u32 %v237_v46, 16  ;;  %v922_v12 = vrot.slane %v920_v56, 5  ;;  %v242_v50 = vld [vmem:[%s15236_s9 + $0x120] sm:$0xf] }
  0x87   : > { %v15553_v5 = vcombine.low %v885_v42, %v895_v60  ;;  %v910_v6 = vrot.slane %v909_v55, 4  ;;  %v928_v13 = vrot.slane %v926_v57, 5  ;;  %v932_v14 = vrot.slane %v930_v58, 4 }
  0x88   : > { %v938_v15 = vrot.slane %v936_v63, 5  ;;  %v942_v18 = vrot.slane %v940_v3, 4  ;;  %v946_v21 = vshll.u32 %v238_v59, 16  ;;  %v923_v25 = vor.u32 %v922_v12, %v919_v52  ;;  %v244_v3 = vld [vmem:[%s15236_s9 + $0x128] sm:$0x1] }
  0x89   : > { %18961 = vst [vmem:[#allocation27_spill] sm:$0xff] %v15553_v5  ;;  %13132 = vmatprep.mubr.msk.bf16.mxu0 %vm1946_vm4, %v15553_v5  ;;  %12613 = vmatmul.mubr.msk.bf16.gmra.mrb[44].mxu1 %vm1946_vm4, %v15540_v40  ;;  %v915_v22 = vsel %vm15249_vm5, %v910_v6, %v914_v51  ;;  %v950_v26 = vshrl.u32 %v238_v59, 16  ;;  %v956_v28 = vshll.u32 %v239_v2, 16  ;;  %v933_v33 = vor.u32 %v932_v14, %v928_v13  ;;  %v243_v59 = vld [vmem:[%s15236_s9 + $0x124] sm:$0xf] }
  0x8a   : > { %v15563_v32 = vcombine.low %v905_v62, %v915_v22  ;;  %12616 = vmatprep.mubr.msk.bf16.mxu1 %vm1946_vm4, %v15553_v5  ;;  %v943_v34 = vor.u32 %v942_v18, %v938_v15  ;;  %v948_v37 = vrot.slane %v946_v21, 5  ;;  %v924_v39 = vrot.slane %v923_v25, 4  ;;  %v245_v25 = vld [vmem:[%s15236_s9 + $0x12c] sm:$0xf] }
  0x8b   : > { %v952_v42 = vrot.slane %v950_v26, 4  ;;  %v958_v43 = vrot.slane %v956_v28, 5  ;;  %v961_v44 = vshrl.u32 %v240_v23, 16  ;;  %v934_v46 = vrot.slane %v933_v33, 4  ;;  %v246_v33 = vld [vmem:[%s15236_s9 + $0x130] sm:$0xf] }
  0x8c   : > { %18962 = vst [vmem:[#allocation28_spill] sm:$0xff] %v15563_v32  ;;  %v944_v48 = vrot.slane %v943_v34, 4  ;;  %v964_v51 = vshll.u32 %v240_v23, 16  ;;  %v970_v52 = vshll.u32 %v241_v31, 16  ;;  %13133 = vmatmul.mubr.msk.bf16.gmra.mrb[44].mxu0 %vm1946_vm4, %v15563_v32  ;;  %v929_v55 = vsel %vm15249_vm5, %v924_v39, %v928_v13 }
  0x8d   : > { %v953_v56 = vor.u32 %v952_v42, %v948_v37  ;;  %v963_v57 = vrot.slane %v961_v44, 4  ;;  %v974_v58 = vshrl.u32 %v241_v31, 16  ;;  %v939_v60 = vsel %vm15249_vm5, %v934_v46, %v938_v15 }
  0x8e   : > { %v949_v62 = vsel %vm15249_vm5, %v944_v48, %v948_v37  ;;  %v966_v63 = vrot.slane %v964_v51, 5  ;;  %v972_v2 = vrot.slane %v970_v52, 5  ;;  %v15578_v6 = vcombine.low %v929_v55, %v939_v60  ;;  %v247_v52 = vld [vmem:[%s15236_s9 + $0x134] sm:$0xf] }
  0x8f   : > { %v954_v12 = vrot.slane %v953_v56, 4  ;;  %v976_v14 = vrot.slane %v974_v58, 4  ;;  %v980_v13 = vshll.u32 %v242_v50, 16  ;;  %v984_v21 = vshrl.u32 %v242_v50, 16 }
  0x90   : > { %18963 = vst [vmem:[#allocation29_spill] sm:$0xff] %v15578_v6  ;;  %v967_v18 = vor.u32 %v966_v63, %v963_v57  ;;  %v990_v23 = vshll.u32 %v243_v59, 16  ;;  %v994_v22 = vshrl.u32 %v243_v59, 16  ;;  %13136 = vmatprep.mubr.msk.bf16.mxu0 %vm1946_vm4, %v15578_v6  ;;  %v1000_v31 = vshll.u32 %v244_v3, 16 }
  0x91   : > { %12617 = vmatmul.mubr.msk.bf16.gmra.mrb[48].mxu1 %vm1946_vm4, %v15563_v32  ;;  %v959_v15 = vsel %vm15249_vm5, %v954_v12, %v958_v43  ;;  %v977_v26 = vor.u32 %v976_v14, %v972_v2  ;;  %v982_v28 = vrot.slane %v980_v13, 5  ;;  %v986_v39 = vrot.slane %v984_v21, 4 }
  0x92   : > { %v15588_v34 = vcombine.low %v949_v62, %v959_v15  ;;  %12620 = vmatprep.mubr.msk.bf16.mxu1 %vm1946_vm4, %v15578_v6  ;;  %v968_v37 = vrot.slane %v967_v18, 4  ;;  %v992_v42 = vrot.slane %v990_v23, 5  ;;  %v996_v46 = vrot.slane %v994_v22, 4  ;;  %v248_v62 = vld [vmem:[%s15236_s9 + $0x138] sm:$0xf] }
  0x93   : > { %v978_v44 = vrot.slane %v977_v26, 4  ;;  %v1002_v48 = vrot.slane %v1000_v31, 5  ;;  %v1005_v50 = vshrl.u32 %v245_v25, 16  ;;  %v987_v51 = vor.u32 %v986_v39, %v982_v28  ;;  %v14903_v6 = vld [vmem:[%s15236_s9 + $0x94] sm:$0xf] }
  0x94   : > { %18964 = vst [vmem:[#allocation30_spill] sm:$0xff] %v15588_v34  ;;  %v973_v43 = vsel %vm15249_vm5, %v968_v37, %v972_v2  ;;  %v1008_v55 = vshll.u32 %v245_v25, 16  ;;  %v1014_v56 = vshll.u32 %v246_v33, 16  ;;  %13137 = vmatmul.mubr.msk.bf16.gmra.mrb[48].mxu0 %vm1946_vm4, %v15588_v34  ;;  %v997_v58 = vor.u32 %v996_v46, %v992_v42  ;;  %v249_v25 = vld [vmem:[%s15236_s9 + $0x13c] sm:$0x1] }
  0x95   : > { %v983_v57 = vsel %vm15249_vm5, %v978_v44, %v982_v28  ;;  %v1007_v59 = vrot.slane %v1005_v50, 4  ;;  %v1018_v60 = vshrl.u32 %v246_v33, 16  ;;  %v988_v3 = vrot.slane %v987_v51, 4  ;;  %v250_v28 = vld [vmem:[%s15236_s9 + $0x140] sm:$0xf] }
  0x96   : > { %v15600_v63 = vcombine.low %v973_v43, %v983_v57  ;;  %v1010_v2 = vrot.slane %v1008_v55, 5  ;;  %v1016_v12 = vrot.slane %v1014_v56, 5  ;;  %v998_v14 = vrot.slane %v997_v58, 4  ;;  %v251_v44 = vld [vmem:[%s15236_s9 + $0x144] sm:$0xf] }
  0x97   : > { %v1020_v13 = vrot.slane %v1018_v60, 4  ;;  %v1024_v18 = vshll.u32 %v247_v52, 16  ;;  %v1028_v21 = vshrl.u32 %v247_v52, 16  ;;  %v993_v23 = vsel %vm15249_vm5, %v988_v3, %v992_v42  ;;  %v252_v58 = vld [vmem:[%s15236_s9 + $0x148] sm:$0xf] }
  0x98   : > { %18965 = vst [vmem:[#allocation31_spill] sm:$0xff] %v15600_v63  ;;  %13140 = vmatprep.mubr.msk.bf16.mxu0 %vm1946_vm4, %v15600_v63  ;;  %v1011_v22 = vor.u32 %v1010_v2, %v1007_v59  ;;  %v1034_v15 = vshll.u32 %v248_v62, 16  ;;  %v1038_v26 = vshrl.u32 %v248_v62, 16  ;;  %v1003_v31 = vsel %vm15249_vm5, %v998_v14, %v1002_v48 }
  0x99   : > { %12621 = vmatmul.mubr.msk.bf16.gmra.mrb[52].mxu1 %vm1946_vm4, %v15588_v34  ;;  %v1021_v33 = vor.u32 %v1020_v13, %v1016_v12  ;;  %v1026_v37 = vrot.slane %v1024_v18, 5  ;;  %v1030_v39 = vrot.slane %v1028_v21, 4  ;;  %v15613_v46 = vcombine.low %v993_v23, %v1003_v31  ;;  %v253_v13 = vld [vmem:[%s15236_s9 + $0x14c] sm:$0xf] }
  0x9a   : > { %12624 = vmatprep.mubr.msk.bf16.mxu1 %vm1946_vm4, %v15600_v63  ;;  %v1012_v42 = vrot.slane %v1011_v22, 4  ;;  %v1036_v50 = vrot.slane %v1034_v15, 5  ;;  %v1040_v43 = vrot.slane %v1038_v26, 4  ;;  %v1044_v55 = vshll.u32 %v249_v25, 16  ;;  %v254_v26 = vld [vmem:[%s15236_s9 + $0x150] sm:$0x1] }
  0x9b   : > { %18966 = vst [vmem:[#allocation32_spill] sm:$0xff] %v15613_v46  ;;  %v1022_v51 = vrot.slane %v1021_v33, 4  ;;  %v1031_v52 = vor.u32 %v1030_v39, %v1026_v37  ;;  %v1049_v56 = vshrl.u32 %v250_v28, 16  ;;  %v1052_v59 = vshll.u32 %v250_v28, 16 }
  0x9c   : > { %v1017_v48 = vsel %vm15249_vm5, %v1012_v42, %v1016_v12  ;;  %v1041_v57 = vor.u32 %v1040_v43, %v1036_v50  ;;  %v1058_v60 = vshll.u32 %v251_v44, 16  ;;  %13141 = vmatmul.mubr.msk.bf16.gmra.mrb[52].mxu0 %vm1946_vm4, %v15613_v46  ;;  %v1046_v2 = vrot.slane %v1044_v55, 5 }
  0x9d   : > { %v1027_v62 = vsel %vm15249_vm5, %v1022_v51, %v1026_v37  ;;  %v1032_v3 = vrot.slane %v1031_v52, 4  ;;  %v1051_v14 = vrot.slane %v1049_v56, 4  ;;  %v1054_v23 = vrot.slane %v1052_v59, 5  ;;  %v255_v59 = vld [vmem:[%s15236_s9 + $0x154] sm:$0xf] }
  0x9e   : > { %v15625_v18 = vcombine.low %v1017_v48, %v1027_v62  ;;  %v1042_v21 = vrot.slane %v1041_v57, 4  ;;  %v1060_v12 = vrot.slane %v1058_v60, 5  ;;  %v1062_v25 = vshrl.u32 %v251_v44, 16 }
  0x9f   : > { %v1037_v22 = vsel %vm15249_vm5, %v1032_v3, %v1036_v50  ;;  %v1068_v15 = vshll.u32 %v252_v58, 16  ;;  %v1072_v28 = vshrl.u32 %v252_v58, 16  ;;  %v1055_v33 = vor.u32 %v1054_v23, %v1051_v14  ;;  %v11133_v58 = vld [vmem:[%s18615_s1 + $0xc] sm:$0x3]  ;;  %v14873_v14 = vld [vmem:[%s15236_s9 + $0x14] sm:$0xf] }
  0xa0   : > { %18967 = vst [vmem:[#allocation33_spill] sm:$0xff] %v15625_v18  ;;  %13144 = vmatprep.mubr.msk.bf16.mxu0 %vm1946_vm4, %v15625_v18  ;;  %v1047_v31 = vsel %vm15249_vm5, %v1042_v21, %v1046_v2  ;;  %v1078_v37 = vshll.u32 %v253_v13, 16  ;;  %v1082_v39 = vshrl.u32 %v253_v13, 16  ;;  %v1064_v50 = vrot.slane %v1062_v25, 4 }
  0xa1   : > { %12625 = vmatmul.mubr.msk.bf16.gmra.mrb[56].mxu1 %vm1946_vm4, %v15613_v46  ;;  %v15636_v42 = vcombine.low %v1037_v22, %v1047_v31  ;;  %v1070_v44 = vrot.slane %v1068_v15, 5  ;;  %v1074_v43 = vrot.slane %v1072_v28, 4  ;;  %v1056_v51 = vrot.slane %v1055_v33, 4  ;;  %v14874_v22 = vld [vmem:[%s15236_s9 + $0x18] sm:$0xf] }
  0xa2   : > { %12628 = vmatprep.mubr.msk.bf16.mxu1 %vm1946_vm4, %v15625_v18  ;;  %v1080_v52 = vrot.slane %v1078_v37, 5  ;;  %v1084_v55 = vrot.slane %v1082_v39, 4  ;;  %v1088_v56 = vshll.u32 %v254_v26, 16  ;;  %v1065_v48 = vor.u32 %v1064_v50, %v1060_v12  ;;  %v14875_v15 = vld [vmem:[%s15236_s9 + $0x1c] sm:$0xf] }
  0xa3   : > { %18968 = vst [vmem:[#allocation34_spill] sm:$0xff] %v15636_v42  ;;  %v1075_v57 = vor.u32 %v1074_v43, %v1070_v44  ;;  %v1061_v60 = vsel %vm15249_vm5, %v1056_v51, %v1060_v12  ;;  %v18969_v2 = vmov 0  ;;  %v10771_v13 = vrot.slane %v14873_v14, 9  ;;  %v256_v51 = vld [vmem:[%s15236_s9 + $0x158] sm:$0xf] }
  0xa4   : > { %v1085_v62 = vor.u32 %v1084_v55, %v1080_v52  ;;  %v1090_v3 = vrot.slane %v1088_v56, 5  ;;  %v18970_v2 = vsel %vm15646_vm8, 4294967295, %v18969_v2  ;;  %13145 = vmatmul.mubr.msk.bf16.gmra.mrb[56].mxu0 %vm1946_vm4, %v15636_v42  ;;  %v1066_v21 = vrot.slane %v1065_v48, 4  ;;  %v14893_v18 = vld [vmem:[%s15236_s9 + $0x6c] sm:$0xf] }
  0xa5   : > { %18971 = vst [vmem:[#allocation35_spill] sm:$0xff] %v18970_v2  ;;  %v1076_v23 = vrot.slane %v1075_v57, 4  ;;  %v3801_v25 = vrot.slane %v14874_v22, 5  ;;  %v3804_v26 = vrot.slane %v14875_v15, 5  ;;  %v15656_v28 = vand.u32 %v11133_v58, %v15212_v4  ;;  %v14876_v22 = vld [vmem:[%s15236_s9 + $0x28] sm:$0xf] }
  0xa6   : > { %v1086_v12 = vrot.slane %v1085_v62, 4  ;;  %v3809_v31 = vrot.slane %v3807_v19, 4  ;;  %v1093_v33 = vshrl.u32 %v255_v59, 16  ;;  %v1071_v37 = vsel %vm15249_vm5, %v1066_v21, %v1070_v44 }
  0xa7   : > { %v1081_v39 = vsel %vm15249_vm5, %v1076_v23, %v1080_v52  ;;  %v3802_v50 = vsel %vm15646_vm8, %v10771_v13, %v3801_v25  ;;  %v3803_v43 = vrot.slane %v3801_v25, 4  ;;  %v15667_v55 = vcombine.low %v1061_v60, %v1071_v37  ;;  %13346 = vmatprep.subr.bf16.mxu0 %v15656_v28  ;;  %v257_v52 = vld [vmem:[%s15236_s9 + $0x15c] sm:$0xf]  ;;  %v258_v13 = vld [vmem:[%s15236_s9 + $0x160] sm:$0xf] }
  0xa8   : > { %v1091_v56 = vsel %vm15249_vm5, %v1086_v12, %v1090_v3  ;;  %v3806_v48 = vrot.slane %v3804_v26, 4  ;;  %v3811_v44 = vsel %vm15646_vm8, %v3809_v31, %v3810_v20  ;;  %v1095_v60 = vrot.slane %v1093_v33, 4  ;;  %v14877_v12 = vld [vmem:[%s15236_s9 + $0x2c] sm:$0xf]  ;;  %v14878_v33 = vld [vmem:[%s15236_s9 + $0x30] sm:$0xf] }
  0xa9   : > { %18972 = vst [vmem:[#allocation36_spill] sm:$0xff] %v15667_v55  ;;  %12629 = vmatmul.mubr.msk.bf16.gmra.mrb[60].mxu1 %vm1946_vm4, %v15636_v42  ;;  %v15679_v57 = vcombine.low %v1081_v39, %v1091_v56  ;;  %v3805_v58 = vsel %vm15646_vm8, %v3803_v43, %v3804_v26  ;;  %v1096_v62 = vshll.u32 %v255_v59, 16  ;;  %13148 = vmatprep.mubr.msk.bf16.mxu0 %vm1946_vm4, %v15667_v55  ;;  %v1102_v3 = vshll.u32 %v256_v51, 16 }
  0xaa   : > { %12632 = vmatprep.mubr.msk.bf16.mxu1 %vm1946_vm4, %v15667_v55  ;;  %v15687_v1 = vcombine.low %v3802_v50, %v3805_v58  ;;  %v3808_v20 = vsel %vm15646_vm8, %v3806_v48, %v3807_v19  ;;  %v1106_v14 = vshrl.u32 %v256_v51, 16  ;;  %v1112_v23 = vshll.u32 %v257_v52, 16 }
  0xab   : > { %18973 = vst [vmem:[#allocation37_spill] sm:$0xff] %v15679_v57  ;;  %v15694_v21 = vcombine.low %v3808_v20, %v3811_v44  ;;  %v1098_v59 = vrot.slane %v1096_v62, 5  ;;  %v10772_v25 = vrot.slane %v14876_v22, 9  ;;  %v1104_v15 = vrot.slane %v1102_v3, 5 }
  0xac   : > { %18974 = vst [vmem:[#allocation38_spill] sm:$0xff] %v15687_v1  ;;  %v1108_v26 = vrot.slane %v1106_v14, 4  ;;  %v3814_v31 = vrot.slane %v14877_v12, 5  ;;  %v3817_v37 = vrot.slane %v14878_v33, 5  ;;  %13149 = vmatmul.mubr.msk.bf16.gmra.mrb[60].mxu0 %vm1946_vm4, %v15679_v57  ;;  %v1114_v39 = vrot.slane %v1112_v23, 5 }
  0xad   : > { %18975 = vst [vmem:[#allocation39_spill] sm:$0xff] %v15694_v21  ;;  %v1099_v19 = vor.u32 %v1098_v59, %v1095_v60  ;;  %v1116_v50 = vshrl.u32 %v257_v52, 16  ;;  %v1122_v43 = vshll.u32 %v258_v13, 16  ;;  %13218 = vmatprep.mubr.msk.bf16.mxu0 %vm1946_vm4, %v15687_v1  ;;  %v1126_v44 = vshrl.u32 %v258_v13, 16  ;;  %v260_v23 = vld [vmem:[%s15236_s9 + $0x168] sm:$0xf] }
  0xae   : > { %v1109_v51 = vor.u32 %v1108_v26, %v1104_v15  ;;  %v3815_v56 = vsel %vm15646_vm8, %v10772_v25, %v3814_v31  ;;  %v3816_v48 = vrot.slane %v3814_v31, 4  ;;  %v1132_v3 = vshll.u32 %v259_v54, 16  ;;  %v261_v12 = vld [vmem:[%s15236_s9 + $0x16c] sm:$0xf]  ;;  %v14879_v54 = vld [vmem:[%s15236_s9 + $0x34] sm:$0xf] }
  0xaf   : > { %v1100_v58 = vrot.slane %v1099_v19, 4  ;;  %v1118_v62 = vrot.slane %v1116_v50, 4  ;;  %v1124_v20 = vrot.slane %v1122_v43, 5  ;;  %v1128_v14 = vrot.slane %v1126_v44, 4 }
  0xb0   : > { %v1110_v60 = vrot.slane %v1109_v51, 4  ;;  %v3818_v52 = vsel %vm15646_vm8, %v3816_v48, %v3817_v37  ;;  %v3819_v59 = vrot.slane %v3817_v37, 4  ;;  %v1134_v26 = vrot.slane %v1132_v3, 5  ;;  %v14880_v37 = vld [vmem:[%s15236_s9 + $0x38] sm:$0x1] }
  0xb1   : > { %12633 = vmatmul.mubr.msk.bf16.gmra.mrb[64].mxu1 %vm1946_vm4, %v15679_v57  ;;  %v1105_v13 = vsel %vm15249_vm5, %v1100_v58, %v1104_v15  ;;  %v15713_v22 = vcombine.low %v3815_v56, %v3818_v52  ;;  %v1119_v25 = vor.u32 %v1118_v62, %v1114_v39  ;;  %v1129_v33 = vor.u32 %v1128_v14, %v1124_v20  ;;  %v262_v48 = vld [vmem:[%s15236_s9 + $0x170] sm:$0xf] }
  0xb2   : > { %v1115_v31 = vsel %vm15249_vm5, %v1110_v60, %v1114_v39  ;;  %v3820_v19 = vrot.slane %v14879_v54, 5  ;;  %v3823_v50 = vrot.slane %v14880_v37, 5  ;;  %v1137_v44 = vshrl.u32 %v260_v23, 16  ;;  %v14881_v54 = vld [vmem:[%s15236_s9 + $0x3c] sm:$0xf] }
  0xb3   : > { %18976 = vst [vmem:[#allocation40_spill] sm:$0xff] %v15713_v22  ;;  %v15720_v43 = vcombine.low %v1105_v13, %v1115_v31  ;;  %v1120_v51 = vrot.slane %v1119_v25, 4  ;;  %v1140_v57 = vshll.u32 %v260_v23, 16  ;;  %v1130_v15 = vrot.slane %v1129_v33, 4  ;;  %v14882_v37 = vld [vmem:[%s15236_s9 + $0x40] sm:$0xf] }
  0xb4   : > { %v3821_v56 = vsel %vm15646_vm8, %v3819_v59, %v3820_v19  ;;  %v3822_v58 = vrot.slane %v3820_v19, 4  ;;  %v1146_v62 = vshll.u32 %v261_v12, 16  ;;  %13219 = vmatmul.mubr.msk.bf16.vlgmr.msra.gmra.mrb[0].mxu0 %vm1946_vm4, %v15694_v21  ;;  %v1139_v3 = vrot.slane %v1137_v44, 4  ;;  %v16423_v21 = vld [vmem:[%s15236_s9 + $0x27c] sm:$0x1] }
  0xb5   : > { %18977 = vst [vmem:[#allocation41_spill] sm:$0xff] %v15720_v43  ;;  %12636 = vmatprep.mubr.msk.bf16.mxu1 %vm1946_vm4, %v15720_v43  ;;  %v1125_v39 = vsel %vm15249_vm5, %v1120_v51, %v1124_v20  ;;  %v1142_v60 = vrot.slane %v1140_v57, 5  ;;  %v1150_v52 = vshrl.u32 %v261_v12, 16  ;;  %13347 = vmatpush3.bf16.msra.mxu0 %v15656_v28  ;;  %v1135_v14 = vsel %vm15249_vm5, %v1130_v15, %v1134_v26  ;;  %v263_v20 = vld [vmem:[%s15236_s9 + $0x174] sm:$0xf] }
  0xb6   : > { %13222 = vmatprep.mubr.msk.bf16.mxu0 %vm1946_vm4, %v15713_v22  ;;  %v3824_v59 = vsel %vm15646_vm8, %v3822_v58, %v3823_v50  ;;  %v1148_v23 = vrot.slane %v1146_v62, 5  ;;  %v1156_v13 = vshll.u32 %v262_v48, 16  ;;  %v15739_v25 = vcombine.low %v1125_v39, %v1135_v14  ;;  %v264_v28 = vld [vmem:[%s15236_s9 + $0x178] sm:$0x1]  ;;  %v14883_v26 = vld [vmem:[%s15236_s9 + $0x44] sm:$0xf] }
  0xb7   : > { %v15741_v57 = vcombine.low %v3821_v56, %v3824_v59  ;;  %v1143_v12 = vor.u32 %v1142_v60, %v1139_v3  ;;  %v1152_v31 = vrot.slane %v1150_v52, 4  ;;  %v10773_v19 = vrot.slane %v14881_v54, 9  ;;  %v265_v54 = vld [vmem:[%s15236_s9 + $0x17c] sm:$0xf] }
  0xb8   : > { %18978 = vst [vmem:[#allocation42_spill] sm:$0xff] %v15739_v25  ;;  %v1158_v33 = vrot.slane %v1156_v13, 5  ;;  %v3827_v51 = vrot.slane %v14882_v37, 5  ;;  %v3830_v44 = vrot.slane %v14883_v26, 5  ;;  %v1160_v58 = vshrl.u32 %v262_v48, 16 }
  0xb9   : > { %18979 = vst [vmem:[#allocation43_spill] sm:$0xff] %v15741_v57  ;;  %12637 = vmatmul.mubr.msk.bf16.gmra.mrb[68].mxu1 %vm1946_vm4, %v15739_v25  ;;  %v1144_v50 = vrot.slane %v1143_v12, 4  ;;  %v1153_v15 = vor.u32 %v1152_v31, %v1148_v23  ;;  %v1166_v62 = vshll.u32 %v263_v20, 16  ;;  %v1170_v3 = vshrl.u32 %v263_v20, 16  ;;  %v14884_v37 = vld [vmem:[%s15236_s9 + $0x48] sm:$0xf] }
  0xba   : > { %v3828_v56 = vsel %vm15646_vm8, %v10773_v19, %v3827_v51  ;;  %v3829_v39 = vrot.slane %v3827_v51, 4  ;;  %v1176_v60 = vshll.u32 %v264_v28, 16  ;;  %v1162_v59 = vrot.slane %v1160_v58, 4  ;;  %v266_v26 = vld [vmem:[%s15236_s9 + $0x180] sm:$0xf] }
  0xbb   : > { %v1149_v52 = vsel %vm15249_vm5, %v1144_v50, %v1148_v23  ;;  %v1154_v14 = vrot.slane %v1153_v15, 4  ;;  %v1168_v13 = vrot.slane %v1166_v62, 5  ;;  %v1172_v12 = vrot.slane %v1170_v3, 4  ;;  %v14885_v58 = vld [vmem:[%s15236_s9 + $0x4c] sm:$0x1] }
  0xbc   : > { %v3831_v48 = vsel %vm15646_vm8, %v3829_v39, %v3830_v44  ;;  %v1178_v31 = vrot.slane %v1176_v60, 5  ;;  %v3832_v19 = vrot.slane %v3830_v44, 4  ;;  %13223 = vmatmul.mubr.msk.bf16.gmra.mrb[4].mxu0 %vm1946_vm4, %v15741_v57  ;;  %v1163_v23 = vor.u32 %v1162_v59, %v1158_v33  ;;  %v267_v39 = vld [vmem:[%s15236_s9 + $0x184] sm:$0xf]  ;;  %v14945_v22 = vld [vmem:[%s15236_s9 + $0x13c] sm:$0x1] }
  0xbd   : > { %v1159_v20 = vsel %vm15249_vm5, %v1154_v14, %v1158_v33  ;;  %v15760_v28 = vcombine.low %v3828_v56, %v3831_v48  ;;  %v3833_v51 = vrot.slane %v14884_v37, 5  ;;  %v1173_v15 = vor.u32 %v1172_v12, %v1168_v13 }
  0xbe   : > { %v15764_v50 = vcombine.low %v1149_v52, %v1159_v20  ;;  %v3836_v62 = vrot.slane %v14885_v58, 5  ;;  %v1181_v3 = vshrl.u32 %v265_v54, 16  ;;  %v1164_v44 = vrot.slane %v1163_v23, 4  ;;  %v268_v58 = vld [vmem:[%s15236_s9 + $0x188] sm:$0xf] }
  0xbf   : > { %18980 = vst [vmem:[#allocation44_spill] sm:$0xff] %v15760_v28  ;;  %13226 = vmatprep.mubr.msk.bf16.mxu0 %vm1946_vm4, %v15760_v28  ;;  %v3834_v60 = vsel %vm15646_vm8, %v3832_v19, %v3833_v51  ;;  %v3835_v56 = vrot.slane %v3833_v51, 4  ;;  %v1184_v33 = vshll.u32 %v265_v54, 16  ;;  %v1174_v52 = vrot.slane %v1173_v15, 4 }
  0xc0   : > { %18981 = vst [vmem:[#allocation45_spill] sm:$0xff] %v15764_v50  ;;  %12640 = vmatprep.mubr.msk.bf16.mxu1 %vm1946_vm4, %v15764_v50  ;;  %v1183_v14 = vrot.slane %v1181_v3, 4  ;;  %v1190_v59 = vshll.u32 %v266_v26, 16  ;;  %v1194_v48 = vshrl.u32 %v266_v26, 16  ;;  %v1169_v12 = vsel %vm15249_vm5, %v1164_v44, %v1168_v13  ;;  %v269_v3 = vld [vmem:[%s15236_s9 + $0x18c] sm:$0x1] }
  0xc1   : > { %v3837_v20 = vsel %vm15646_vm8, %v3835_v56, %v3836_v62  ;;  %v1186_v19 = vrot.slane %v1184_v33, 5  ;;  %v1200_v23 = vshll.u32 %v267_v39, 16  ;;  %v1179_v54 = vsel %vm15249_vm5, %v1174_v52, %v1178_v31  ;;  %v14886_v44 = vld [vmem:[%s15236_s9 + $0x50] sm:$0xf]  ;;  %v14887_v62 = vld [vmem:[%s15236_s9 + $0x54] sm:$0xf] }
  0xc2   : > { %v15780_v37 = vcombine.low %v3834_v60, %v3837_v20  ;;  %v1192_v51 = vrot.slane %v1190_v59, 5  ;;  %v1196_v15 = vrot.slane %v1194_v48, 4  ;;  %v15784_v26 = vcombine.low %v1169_v12, %v1179_v54  ;;  %v14888_v33 = vld [vmem:[%s15236_s9 + $0x58] sm:$0xf] }
  0xc3   : > { %v1187_v50 = vor.u32 %v1186_v19, %v1183_v14  ;;  %v1202_v13 = vrot.slane %v1200_v23, 5  ;;  %v10774_v25 = vrot.slane %v14886_v44, 9  ;;  %v3840_v56 = vrot.slane %v14887_v62, 5  ;;  %v14889_v62 = vld [vmem:[%s15236_s9 + $0x5c] sm:$0xf] }
  0xc4   : > { %18982 = vst [vmem:[#allocation46_spill] sm:$0xff] %v15780_v37  ;;  %18983 = vst [vmem:[#allocation47_spill] sm:$0xff] %v15784_v26  ;;  %v1197_v43 = vor.u32 %v1196_v15, %v1192_v51  ;;  %v3843_v55 = vrot.slane %v14888_v33, 5  ;;  %v1204_v42 = vshrl.u32 %v267_v39, 16  ;;  %12641 = vmatmul.mubr.msk.bf16.gmra.mrb[72].mxu1 %vm1946_vm4, %v15784_v26  ;;  %13227 = vmatmul.mubr.msk.bf16.gmra.mrb[8].mxu0 %vm1946_vm4, %v15780_v37  ;;  %v1210_v60 = vshll.u32 %v268_v58, 16 }
  0xc5   : > { %v1188_v31 = vrot.slane %v1187_v50, 4  ;;  %v1214_v52 = vshrl.u32 %v268_v58, 16  ;;  %v1220_v14 = vshll.u32 %v269_v3, 16  ;;  %v3841_v48 = vsel %vm15646_vm8, %v10774_v25, %v3840_v56  ;;  %v270_v50 = vld [vmem:[%s15236_s9 + $0x190] sm:$0xf] }
  0xc6   : > { %v1198_v59 = vrot.slane %v1197_v43, 4  ;;  %v3842_v12 = vrot.slane %v3840_v56, 4  ;;  %v1206_v20 = vrot.slane %v1204_v42, 4  ;;  %v1212_v19 = vrot.slane %v1210_v60, 5  ;;  %v271_v3 = vld [vmem:[%s15236_s9 + $0x194] sm:$0xf] }
  0xc7   : > { %v1193_v39 = vsel %vm15249_vm5, %v1188_v31, %v1192_v51  ;;  %v1216_v23 = vrot.slane %v1214_v52, 4  ;;  %v1222_v54 = vrot.slane %v1220_v14, 5  ;;  %v3845_v25 = vrot.slane %v3843_v55, 4  ;;  %v14890_v31 = vld [vmem:[%s15236_s9 + $0x60] sm:$0x1] }
  0xc8   : > { %v1203_v15 = vsel %vm15249_vm5, %v1198_v59, %v1202_v13  ;;  %v3844_v43 = vsel %vm15646_vm8, %v3842_v12, %v3843_v55  ;;  %v1207_v58 = vor.u32 %v1206_v20, %v1202_v13  ;;  %v3846_v56 = vrot.slane %v14889_v62, 5  ;;  %v272_v52 = vld [vmem:[%s15236_s9 + $0x198] sm:$0xf] }
  0xc9   : > { %v15803_v44 = vcombine.low %v1193_v39, %v1203_v15  ;;  %v15805_v42 = vcombine.low %v3841_v48, %v3844_v43  ;;  %v1217_v51 = vor.u32 %v1216_v23, %v1212_v19  ;;  %v3849_v60 = vrot.slane %v14890_v31, 5 }
  0xca   : > { %v1208_v33 = vrot.slane %v1207_v58, 4  ;;  %v1225_v14 = vshrl.u32 %v270_v50, 16  ;;  %v1228_v59 = vshll.u32 %v270_v50, 16  ;;  %v3847_v13 = vsel %vm15646_vm8, %v3845_v25, %v3846_v56 }
  0xcb   : > { %18984 = vst [vmem:[#allocation48_spill] sm:$0xff] %v15803_v44  ;;  %18985 = vst [vmem:[#allocation49_spill] sm:$0xff] %v15805_v42  ;;  %12644 = vmatprep.mubr.msk.bf16.mxu1 %vm1946_vm4, %v15803_v44  ;;  %13230 = vmatprep.mubr.msk.bf16.mxu0 %vm1946_vm4, %v15805_v42  ;;  %v1218_v55 = vrot.slane %v1217_v51, 4  ;;  %v3848_v48 = vrot.slane %v3846_v56, 4  ;;  %v1234_v12 = vshll.u32 %v271_v3, 16  ;;  %v1238_v50 = vshrl.u32 %v271_v3, 16 }
  0xcc   : > { %v1213_v20 = vsel %vm15249_vm5, %v1208_v33, %v1212_v19  ;;  %v1227_v39 = vrot.slane %v1225_v14, 4  ;;  %v1230_v23 = vrot.slane %v1228_v59, 5  ;;  %v1244_v25 = vshll.u32 %v272_v52, 16  ;;  %v273_v51 = vld [vmem:[%s15236_s9 + $0x19c] sm:$0xf] }
  0xcd   : > { %v1223_v15 = vsel %vm15249_vm5, %v1218_v55, %v1222_v54  ;;  %v3850_v43 = vsel %vm15646_vm8, %v3848_v48, %v3849_v60  ;;  %v1236_v58 = vrot.slane %v1234_v12, 5  ;;  %v1240_v19 = vrot.slane %v1238_v50, 4  ;;  %v274_v33 = vld [vmem:[%s15236_s9 + $0x1a0] sm:$0x1]  ;;  %v14891_v59 = vld [vmem:[%s15236_s9 + $0x64] sm:$0xf] }
  0xce   : > { %v15823_v62 = vcombine.low %v1213_v20, %v1223_v15  ;;  %v15825_v56 = vcombine.low %v3847_v13, %v3850_v43  ;;  %v1231_v31 = vor.u32 %v1230_v23, %v1227_v39  ;;  %v1246_v14 = vrot.slane %v1244_v25, 5  ;;  %v14892_v44 = vld [vmem:[%s15236_s9 + $0x68] sm:$0xf]  ;;  %v275_v43 = vld [vmem:[%s15236_s9 + $0x1a4] sm:$0xf] }
  0xcf   : > { %v10775_v3 = vrot.slane %v14891_v59, 9  ;;  %v3853_v26 = vrot.slane %v14892_v44, 5  ;;  %v3856_v54 = vrot.slane %v14893_v18, 5  ;;  %v1241_v55 = vor.u32 %v1240_v19, %v1236_v58  ;;  %v14894_v59 = vld [vmem:[%s15236_s9 + $0x70] sm:$0xf] }
  0xd0   : > { %18986 = vst [vmem:[#allocation50_spill] sm:$0xff] %v15823_v62  ;;  %18987 = vst [vmem:[#allocation51_spill] sm:$0xff] %v15825_v56  ;;  %12645 = vmatmul.mubr.msk.bf16.gmra.mrb[76].mxu1 %vm1946_vm4, %v15823_v62  ;;  %13231 = vmatmul.mubr.msk.bf16.gmra.mrb[12].mxu0 %vm1946_vm4, %v15825_v56  ;;  %v1232_v60 = vrot.slane %v1231_v31, 4  ;;  %v1248_v13 = vshrl.u32 %v272_v52, 16  ;;  %v1254_v48 = vshll.u32 %v273_v51, 16  ;;  %v1258_v39 = vshrl.u32 %v273_v51, 16 }
  0xd1   : > { %v3854_v12 = vsel %vm15646_vm8, %v10775_v3, %v3853_v26  ;;  %v3855_v20 = vrot.slane %v3853_v26, 4  ;;  %v1264_v44 = vshll.u32 %v274_v33, 16  ;;  %v1242_v23 = vrot.slane %v1241_v55, 4  ;;  %v276_v3 = vld [vmem:[%s15236_s9 + $0x1a8] sm:$0xf] }
  0xd2   : > { %v1237_v18 = vsel %vm15249_vm5, %v1232_v60, %v1236_v58  ;;  %v1250_v50 = vrot.slane %v1248_v13, 4  ;;  %v1256_v15 = vrot.slane %v1254_v48, 5  ;;  %v1260_v25 = vrot.slane %v1258_v39, 4  ;;  %v14895_v13 = vld [vmem:[%s15236_s9 + $0x74] sm:$0x1] }
  0xd3   : > { %v3857_v52 = vsel %vm15646_vm8, %v3855_v20, %v3856_v54  ;;  %v1266_v31 = vrot.slane %v1264_v44, 5  ;;  %v3858_v19 = vrot.slane %v3856_v54, 4  ;;  %v1247_v26 = vsel %vm15249_vm5, %v1242_v23, %v1246_v14  ;;  %v277_v62 = vld [vmem:[%s15236_s9 + $0x1ac] sm:$0xf] }
  0xd4   : > { %v15844_v51 = vcombine.low %v3854_v12, %v3857_v52  ;;  %v1251_v33 = vor.u32 %v1250_v50, %v1246_v14  ;;  %v3859_v58 = vrot.slane %v14894_v59, 5  ;;  %v15848_v60 = vcombine.low %v1237_v18, %v1247_v26  ;;  %v278_v59 = vld [vmem:[%s15236_s9 + $0x1b0] sm:$0xf] }
  0xd5   : > { %v1261_v55 = vor.u32 %v1260_v25, %v1256_v15  ;;  %v3862_v48 = vrot.slane %v14895_v13, 5  ;;  %v1269_v46 = vshrl.u32 %v275_v43, 16  ;;  %v1272_v14 = vshll.u32 %v275_v43, 16  ;;  %v14896_v13 = vld [vmem:[%s15236_s9 + $0x78] sm:$0xf] }
  0xd6   : > { %18988 = vst [vmem:[#allocation52_spill] sm:$0xff] %v15844_v51  ;;  %18989 = vst [vmem:[#allocation53_spill] sm:$0xff] %v15848_v60  ;;  %13234 = vmatprep.mubr.msk.bf16.mxu0 %vm1946_vm4, %v15844_v51  ;;  %v1252_v54 = vrot.slane %v1251_v33, 4  ;;  %v3860_v20 = vsel %vm15646_vm8, %v3858_v19, %v3859_v58  ;;  %v3861_v12 = vrot.slane %v3859_v58, 4  ;;  %12648 = vmatprep.mubr.msk.bf16.mxu1 %vm1946_vm4, %v15848_v60  ;;  %v1278_v18 = vshll.u32 %v276_v3, 16 }
  0xd7   : > { %v1262_v39 = vrot.slane %v1261_v55, 4  ;;  %v1271_v44 = vrot.slane %v1269_v46, 4  ;;  %v1282_v23 = vshrl.u32 %v276_v3, 16  ;;  %v1274_v25 = vrot.slane %v1272_v14, 5  ;;  %v279_v58 = vld [vmem:[%s15236_s9 + $0x1b4] sm:$0x1] }
  0xd8   : > { %v1257_v50 = vsel %vm15249_vm5, %v1252_v54, %v1256_v15  ;;  %v3863_v52 = vsel %vm15646_vm8, %v3861_v12, %v3862_v48  ;;  %v1288_v19 = vshll.u32 %v277_v62, 16  ;;  %v1280_v33 = vrot.slane %v1278_v18, 5  ;;  %v14897_v12 = vld [vmem:[%s15236_s9 + $0x7c] sm:$0xf]  ;;  %v14898_v60 = vld [vmem:[%s15236_s9 + $0x80] sm:$0xf] }
  0xd9   : > { %v1267_v43 = vsel %vm15249_vm5, %v1262_v39, %v1266_v31  ;;  %v15864_v26 = vcombine.low %v3860_v20, %v3863_v52  ;;  %v1284_v46 = vrot.slane %v1282_v23, 4  ;;  %v1275_v55 = vor.u32 %v1274_v25, %v1271_v44  ;;  %v16379_v51 = vld [vmem:[%s15236_s9 + $0x26c] sm:$0xf] }
  0xda   : > { %v15868_v3 = vcombine.low %v1257_v50, %v1267_v43  ;;  %v1290_v15 = vrot.slane %v1288_v19, 5  ;;  %v10776_v54 = vrot.slane %v14896_v13, 9  ;;  %v3866_v14 = vrot.slane %v14897_v12, 5 }
  0xdb   : > { %18990 = vst [vmem:[#allocation54_spill] sm:$0xff] %v15864_v26  ;;  %13235 = vmatmul.mubr.msk.bf16.gmra.mrb[16].mxu0 %vm1946_vm4, %v15864_v26  ;;  %v1285_v48 = vor.u32 %v1284_v46, %v1280_v33  ;;  %v3869_v31 = vrot.slane %v14898_v60, 5  ;;  %v1292_v20 = vshrl.u32 %v277_v62, 16  ;;  %v1276_v39 = vrot.slane %v1275_v55, 4  ;;  %v280_v55 = vld [vmem:[%s15236_s9 + $0x1b8] sm:$0xf] }
  0xdc   : > { %18991 = vst [vmem:[#allocation55_spill] sm:$0xff] %v15868_v3  ;;  %12649 = vmatmul.mubr.msk.bf16.gmra.mrb[80].mxu1 %vm1946_vm4, %v15868_v3  ;;  %v1298_v18 = vshll.u32 %v278_v59, 16  ;;  %v1302_v44 = vshrl.u32 %v278_v59, 16  ;;  %v1308_v23 = vshll.u32 %v279_v58, 16  ;;  %v3867_v52 = vsel %vm15646_vm8, %v10776_v54, %v3866_v14  ;;  %v282_v3 = vld [vmem:[%s15236_s9 + $0x1c0] sm:$0xf] }
  0xdd   : > { %v1286_v50 = vrot.slane %v1285_v48, 4  ;;  %v3868_v25 = vrot.slane %v3866_v14, 4  ;;  %v1294_v19 = vrot.slane %v1292_v20, 4  ;;  %v1281_v43 = vsel %vm15249_vm5, %v1276_v39, %v1280_v33  ;;  %v281_v48 = vld [vmem:[%s15236_s9 + $0x1bc] sm:$0xf] }
  0xde   : > { %v1300_v62 = vrot.slane %v1298_v18, 5  ;;  %v1304_v60 = vrot.slane %v1302_v44, 4  ;;  %v1310_v46 = vrot.slane %v1308_v23, 5  ;;  %v3871_v54 = vrot.slane %v3869_v31, 4  ;;  %v14899_v20 = vld [vmem:[%s15236_s9 + $0x84] sm:$0xf] }
  0xdf   : > { %v1291_v59 = vsel %vm15249_vm5, %v1286_v50, %v1290_v15  ;;  %v3870_v58 = vsel %vm15646_vm8, %v3868_v25, %v3869_v31  ;;  %v1295_v13 = vor.u32 %v1294_v19, %v1290_v15  ;;  %v3872_v39 = vrot.slane %v14899_v20, 5  ;;  %v14900_v44 = vld [vmem:[%s15236_s9 + $0x88] sm:$0x1]  ;;  %v16355_v26 = vld [vmem:[%s15236_s9 + $0x12c] sm:$0xf] }
  0xe0   : > { %v15887_v12 = vcombine.low %v1281_v43, %v1291_v59  ;;  %v15889_v14 = vcombine.low %v3867_v52, %v3870_v58  ;;  %v1305_v33 = vor.u32 %v1304_v60, %v1300_v62  ;;  %v3875_v23 = vrot.slane %v14900_v44, 5 }
  0xe1   : > { %v1296_v18 = vrot.slane %v1295_v13, 4  ;;  %v1313_v63 = vshrl.u32 %v280_v55, 16  ;;  %v1316_v50 = vshll.u32 %v280_v55, 16  ;;  %v3873_v31 = vsel %vm15646_vm8, %v3871_v54, %v3872_v39 }
  0xe2   : > { %18992 = vst [vmem:[#allocation56_spill] sm:$0xff] %v15887_v12  ;;  %18993 = vst [vmem:[#allocation57_spill] sm:$0xff] %v15889_v14  ;;  %12652 = vmatprep.mubr.msk.bf16.mxu1 %vm1946_vm4, %v15887_v12  ;;  %13238 = vmatprep.mubr.msk.bf16.mxu0 %vm1946_vm4, %v15889_v14  ;;  %v1306_v15 = vrot.slane %v1305_v33, 4  ;;  %v3874_v52 = vrot.slane %v3872_v39, 4  ;;  %v1322_v25 = vshll.u32 %v281_v48, 16  ;;  %v1326_v55 = vshrl.u32 %v281_v48, 16 }
  0xe3   : > { %v1301_v19 = vsel %vm15249_vm5, %v1296_v18, %v1300_v62  ;;  %v1315_v43 = vrot.slane %v1313_v63, 4  ;;  %v1318_v60 = vrot.slane %v1316_v50, 5  ;;  %v1332_v54 = vshll.u32 %v282_v3, 16  ;;  %v283_v33 = vld [vmem:[%s15236_s9 + $0x1c4] sm:$0xf] }
  0xe4   : > { %v1311_v59 = vsel %vm15249_vm5, %v1306_v15, %v1310_v46  ;;  %v3876_v58 = vsel %vm15646_vm8, %v3874_v52, %v3875_v23  ;;  %v1324_v13 = vrot.slane %v1322_v25, 5  ;;  %v1328_v62 = vrot.slane %v1326_v55, 4  ;;  %v284_v63 = vld [vmem:[%s15236_s9 + $0x1c8] sm:$0x1]  ;;  %v14901_v50 = vld [vmem:[%s15236_s9 + $0x8c] sm:$0xf] }
  0xe5   : > { %v15907_v20 = vcombine.low %v1301_v19, %v1311_v59  ;;  %v15909_v39 = vcombine.low %v3873_v31, %v3876_v58  ;;  %v1319_v44 = vor.u32 %v1318_v60, %v1315_v43  ;;  %v1334_v18 = vrot.slane %v1332_v54, 5  ;;  %v14902_v12 = vld [vmem:[%s15236_s9 + $0x90] sm:$0xf]  ;;  %v285_v58 = vld [vmem:[%s15236_s9 + $0x1cc] sm:$0xf] }
  0xe6   : > { %v10777_v48 = vrot.slane %v14901_v50, 9  ;;  %v3879_v34 = vrot.slane %v14902_v12, 5  ;;  %v3882_v46 = vrot.slane %v14903_v6, 5  ;;  %v1329_v15 = vor.u32 %v1328_v62, %v1324_v13  ;;  %v14904_v50 = vld [vmem:[%s15236_s9 + $0x98] sm:$0xf] }
  0xe7   : > { %18994 = vst [vmem:[#allocation58_spill] sm:$0xff] %v15907_v20  ;;  %18995 = vst [vmem:[#allocation59_spill] sm:$0xff] %v15909_v39  ;;  %12653 = vmatmul.mubr.msk.bf16.gmra.mrb[84].mxu1 %vm1946_vm4, %v15907_v20  ;;  %13239 = vmatmul.mubr.msk.bf16.gmra.mrb[20].mxu0 %vm1946_vm4, %v15909_v39  ;;  %v1320_v23 = vrot.slane %v1319_v44, 4  ;;  %v1336_v31 = vshrl.u32 %v282_v3, 16  ;;  %v1342_v52 = vshll.u32 %v283_v33, 16  ;;  %v1346_v43 = vshrl.u32 %v283_v33, 16 }
  0xe8   : > { %v3880_v25 = vsel %vm15646_vm8, %v10777_v48, %v3879_v34  ;;  %v3881_v19 = vrot.slane %v3879_v34, 4  ;;  %v1352_v12 = vshll.u32 %v284_v63, 16  ;;  %v1330_v60 = vrot.slane %v1329_v15, 4  ;;  %v286_v48 = vld [vmem:[%s15236_s9 + $0x1d0] sm:$0xf] }
  0xe9   : > { %v1325_v6 = vsel %vm15249_vm5, %v1320_v23, %v1324_v13  ;;  %v1338_v55 = vrot.slane %v1336_v31, 4  ;;  %v1344_v59 = vrot.slane %v1342_v52, 5  ;;  %v1348_v54 = vrot.slane %v1346_v43, 4  ;;  %v14905_v31 = vld [vmem:[%s15236_s9 + $0x9c] sm:$0x1] }
  0xea   : > { %v3883_v3 = vsel %vm15646_vm8, %v3881_v19, %v3882_v46  ;;  %v1354_v44 = vrot.slane %v1352_v12, 5  ;;  %v3884_v62 = vrot.slane %v3882_v46, 4  ;;  %v1335_v34 = vsel %vm15249_vm5, %v1330_v60, %v1334_v18  ;;  %v287_v20 = vld [vmem:[%s15236_s9 + $0x1d4] sm:$0xf] }
  0xeb   : > { %v15928_v33 = vcombine.low %v3880_v25, %v3883_v3  ;;  %v1339_v63 = vor.u32 %v1338_v55, %v1334_v18  ;;  %v3885_v13 = vrot.slane %v14904_v50, 5  ;;  %v15932_v23 = vcombine.low %v1325_v6, %v1335_v34  ;;  %v288_v50 = vld [vmem:[%s15236_s9 + $0x1d8] sm:$0xf] }
  0xec   : > { %v1349_v15 = vor.u32 %v1348_v54, %v1344_v59  ;;  %v3888_v52 = vrot.slane %v14905_v31, 5  ;;  %v1357_v32 = vshrl.u32 %v285_v58, 16  ;;  %v1360_v18 = vshll.u32 %v285_v58, 16  ;;  %v14906_v31 = vld [vmem:[%s15236_s9 + $0xa0] sm:$0xf] }
  0xed   : > { %18996 = vst [vmem:[#allocation60_spill] sm:$0xff] %v15928_v33  ;;  %18997 = vst [vmem:[#allocation61_spill] sm:$0xff] %v15932_v23  ;;  %13242 = vmatprep.mubr.msk.bf16.mxu0 %vm1946_vm4, %v15928_v33  ;;  %v1340_v46 = vrot.slane %v1339_v63, 4  ;;  %v3886_v19 = vsel %vm15646_vm8, %v3884_v62, %v3885_v13  ;;  %v3887_v25 = vrot.slane %v3885_v13, 4  ;;  %12656 = vmatprep.mubr.msk.bf16.mxu1 %vm1946_vm4, %v15932_v23  ;;  %v1366_v6 = vshll.u32 %v286_v48, 16 }
  0xee   : > { %v1350_v43 = vrot.slane %v1349_v15, 4  ;;  %v1359_v12 = vrot.slane %v1357_v32, 4  ;;  %v1370_v60 = vshrl.u32 %v286_v48, 16  ;;  %v1362_v54 = vrot.slane %v1360_v18, 5  ;;  %v289_v13 = vld [vmem:[%s15236_s9 + $0x1dc] sm:$0x1] }
  0xef   : > { %v1345_v55 = vsel %vm15249_vm5, %v1340_v46, %v1344_v59  ;;  %v3889_v3 = vsel %vm15646_vm8, %v3887_v25, %v3888_v52  ;;  %v1376_v62 = vshll.u32 %v287_v20, 16  ;;  %v1368_v63 = vrot.slane %v1366_v6, 5  ;;  %v14907_v25 = vld [vmem:[%s15236_s9 + $0xa4] sm:$0xf]  ;;  %v14908_v23 = vld [vmem:[%s15236_s9 + $0xa8] sm:$0xf] }
  0xf0   : > { %v1355_v58 = vsel %vm15249_vm5, %v1350_v43, %v1354_v44  ;;  %v15948_v34 = vcombine.low %v3886_v19, %v3889_v3  ;;  %v1372_v32 = vrot.slane %v1370_v60, 4  ;;  %v1363_v15 = vor.u32 %v1362_v54, %v1359_v12  ;;  %v14940_v33 = vld [vmem:[%s15236_s9 + $0x128] sm:$0x1] }
  0xf1   : > { %v15952_v48 = vcombine.low %v1345_v55, %v1355_v58  ;;  %v1378_v59 = vrot.slane %v1376_v62, 5  ;;  %v10778_v46 = vrot.slane %v14906_v31, 9  ;;  %v3892_v18 = vrot.slane %v14907_v25, 5 }
  0xf2   : > { %18998 = vst [vmem:[#allocation62_spill] sm:$0xff] %v15948_v34  ;;  %13243 = vmatmul.mubr.msk.bf16.gmra.mrb[24].mxu0 %vm1946_vm4, %v15948_v34  ;;  %v1373_v52 = vor.u32 %v1372_v32, %v1368_v63  ;;  %v3895_v44 = vrot.slane %v14908_v23, 5  ;;  %v1380_v19 = vshrl.u32 %v287_v20, 16  ;;  %v1364_v43 = vrot.slane %v1363_v15, 4  ;;  %v290_v15 = vld [vmem:[%s15236_s9 + $0x1e0] sm:$0xf] }
  0xf3   : > { %18999 = vst [vmem:[#allocation63_spill] sm:$0xff] %v15952_v48  ;;  %12657 = vmatmul.mubr.msk.bf16.gmra.mrb[88].mxu1 %vm1946_vm4, %v15952_v48  ;;  %v1386_v6 = vshll.u32 %v288_v50, 16  ;;  %v1390_v12 = vshrl.u32 %v288_v50, 16  ;;  %v1396_v60 = vshll.u32 %v289_v13, 16  ;;  %v3893_v3 = vsel %vm15646_vm8, %v10778_v46, %v3892_v18  ;;  %v292_v48 = vld [vmem:[%s15236_s9 + $0x1e8] sm:$0xf] }
  0xf4   : > { %v1374_v55 = vrot.slane %v1373_v52, 4  ;;  %v3894_v54 = vrot.slane %v3892_v18, 4  ;;  %v1382_v62 = vrot.slane %v1380_v19, 4  ;;  %v1369_v58 = vsel %vm15249_vm5, %v1364_v43, %v1368_v63  ;;  %v291_v52 = vld [vmem:[%s15236_s9 + $0x1e4] sm:$0xf] }
  0xf5   : > { %v1388_v20 = vrot.slane %v1386_v6, 5  ;;  %v1392_v23 = vrot.slane %v1390_v12, 4  ;;  %v1398_v32 = vrot.slane %v1396_v60, 5  ;;  %v3897_v46 = vrot.slane %v3895_v44, 4  ;;  %v14909_v19 = vld [vmem:[%s15236_s9 + $0xac] sm:$0xf] }
  0xf6   : > { %v1379_v50 = vsel %vm15249_vm5, %v1374_v55, %v1378_v59  ;;  %v3896_v13 = vsel %vm15646_vm8, %v3894_v54, %v3895_v44  ;;  %v1383_v31 = vor.u32 %v1382_v62, %v1378_v59  ;;  %v3898_v43 = vrot.slane %v14909_v19, 5  ;;  %v14910_v12 = vld [vmem:[%s15236_s9 + $0xb0] sm:$0x1] }
  0xf7   : > { %v15971_v25 = vcombine.low %v1369_v58, %v1379_v50  ;;  %v15973_v18 = vcombine.low %v3893_v3, %v3896_v13  ;;  %v1393_v63 = vor.u32 %v1392_v23, %v1388_v20  ;;  %v3901_v60 = vrot.slane %v14910_v12, 5 }
  0xf8   : > { %v1384_v6 = vrot.slane %v1383_v31, 4  ;;  %v1401_v5 = vshrl.u32 %v290_v15, 16  ;;  %v1404_v55 = vshll.u32 %v290_v15, 16  ;;  %v3899_v44 = vsel %vm15646_vm8, %v3897_v46, %v3898_v43 }
  0xf9   : > { %19000 = vst [vmem:[#allocation64_spill] sm:$0xff] %v15971_v25  ;;  %19001 = vst [vmem:[#allocation65_spill] sm:$0xff] %v15973_v18  ;;  %12660 = vmatprep.mubr.msk.bf16.mxu1 %vm1946_vm4, %v15971_v25  ;;  %13246 = vmatprep.mubr.msk.bf16.mxu0 %vm1946_vm4, %v15973_v18  ;;  %v1394_v59 = vrot.slane %v1393_v63, 4  ;;  %v3900_v3 = vrot.slane %v3898_v43, 4  ;;  %v1410_v54 = vshll.u32 %v291_v52, 16  ;;  %v1414_v15 = vshrl.u32 %v291_v52, 16 }
  0xfa   : > { %v1389_v62 = vsel %vm15249_vm5, %v1384_v6, %v1388_v20  ;;  %v1403_v58 = vrot.slane %v1401_v5, 4  ;;  %v1406_v23 = vrot.slane %v1404_v55, 5  ;;  %v1420_v46 = vshll.u32 %v292_v48, 16  ;;  %v293_v63 = vld [vmem:[%s15236_s9 + $0x1ec] sm:$0xf] }
  0xfb   : > { %v1399_v50 = vsel %vm15249_vm5, %v1394_v59, %v1398_v32  ;;  %v3902_v13 = vsel %vm15646_vm8, %v3900_v3, %v3901_v60  ;;  %v1412_v31 = vrot.slane %v1410_v54, 5  ;;  %v1416_v20 = vrot.slane %v1414_v15, 4  ;;  %v294_v5 = vld [vmem:[%s15236_s9 + $0x1f0] sm:$0x1]  ;;  %v14911_v55 = vld [vmem:[%s15236_s9 + $0xb4] sm:$0xf] }
  0xfc   : > { %v15991_v19 = vcombine.low %v1389_v62, %v1399_v50  ;;  %v15993_v43 = vcombine.low %v3899_v44, %v3902_v13  ;;  %v1407_v12 = vor.u32 %v1406_v23, %v1403_v58  ;;  %v1422_v6 = vrot.slane %v1420_v46, 5  ;;  %v14912_v25 = vld [vmem:[%s15236_s9 + $0xb8] sm:$0xf]  ;;  %v295_v13 = vld [vmem:[%s15236_s9 + $0x1f4] sm:$0xf] }
  0xfd   : > { %v10779_v52 = vrot.slane %v14911_v55, 9  ;;  %v3905_v40 = vrot.slane %v14912_v25, 5  ;;  %v3908_v32 = vrot.slane %v14913_v11, 5  ;;  %v1417_v59 = vor.u32 %v1416_v20, %v1412_v31  ;;  %v14914_v55 = vld [vmem:[%s15236_s9 + $0xc0] sm:$0xf] }
  0xfe   : > { %19002 = vst [vmem:[#allocation66_spill] sm:$0xff] %v15991_v19  ;;  %19003 = vst [vmem:[#allocation67_spill] sm:$0xff] %v15993_v43  ;;  %12661 = vmatmul.mubr.msk.bf16.gmra.mrb[92].mxu1 %vm1946_vm4, %v15991_v19  ;;  %13247 = vmatmul.mubr.msk.bf16.gmra.mrb[28].mxu0 %vm1946_vm4, %v15993_v43  ;;  %v1408_v60 = vrot.slane %v1407_v12, 4  ;;  %v1424_v44 = vshrl.u32 %v292_v48, 16  ;;  %v1430_v3 = vshll.u32 %v293_v63, 16  ;;  %v1434_v58 = vshrl.u32 %v293_v63, 16 }
  0xff   : > { %v3906_v54 = vsel %vm15646_vm8, %v10779_v52, %v3905_v40  ;;  %v3907_v62 = vrot.slane %v3905_v40, 4  ;;  %v1440_v25 = vshll.u32 %v294_v5, 16  ;;  %v1418_v23 = vrot.slane %v1417_v59, 4  ;;  %v296_v52 = vld [vmem:[%s15236_s9 + $0x1f8] sm:$0xf] }
 0x100   : > { %v1413_v11 = vsel %vm15249_vm5, %v1408_v60, %v1412_v31  ;;  %v1426_v15 = vrot.slane %v1424_v44, 4  ;;  %v1432_v50 = vrot.slane %v1430_v3, 5  ;;  %v1436_v46 = vrot.slane %v1434_v58, 4  ;;  %v14915_v44 = vld [vmem:[%s15236_s9 + $0xc4] sm:$0x1] }
 0x101   : > { %v3909_v48 = vsel %vm15646_vm8, %v3907_v62, %v3908_v32  ;;  %v1442_v12 = vrot.slane %v1440_v25, 5  ;;  %v3910_v20 = vrot.slane %v3908_v32, 4  ;;  %v1423_v40 = vsel %vm15249_vm5, %v1418_v23, %v1422_v6  ;;  %v297_v19 = vld [vmem:[%s15236_s9 + $0x1fc] sm:$0xf]  ;;  %v16306_v43 = vld [vmem:[%s15236_s9 + $0x258] sm:$0xf] }
 0x102   : > { %v16012_v63 = vcombine.low %v3906_v54, %v3909_v48  ;;  %v1427_v5 = vor.u32 %v1426_v15, %v1422_v6  ;;  %v3911_v31 = vrot.slane %v14914_v55, 5  ;;  %v16016_v60 = vcombine.low %v1413_v11, %v1423_v40  ;;  %v298_v55 = vld [vmem:[%s15236_s9 + $0x200] sm:$0xf] }
 0x103   : > { %v1437_v59 = vor.u32 %v1436_v46, %v1432_v50  ;;  %v3914_v3 = vrot.slane %v14915_v44, 5  ;;  %v1445_v29 = vshrl.u32 %v295_v13, 16  ;;  %v1448_v6 = vshll.u32 %v295_v13, 16  ;;  %v14916_v44 = vld [vmem:[%s15236_s9 + $0xc8] sm:$0xf] }
 0x104   : > { %19004 = vst [vmem:[#allocation68_spill] sm:$0xff] %v16012_v63  ;;  %19005 = vst [vmem:[#allocation69_spill] sm:$0xff] %v16016_v60  ;;  %13250 = vmatprep.mubr.msk.bf16.mxu0 %vm1946_vm4, %v16012_v63  ;;  %v1428_v32 = vrot.slane %v1427_v5, 4  ;;  %v3912_v62 = vsel %vm15646_vm8, %v3910_v20, %v3911_v31  ;;  %v3913_v54 = vrot.slane %v3911_v31, 4  ;;  %12664 = vmatprep.mubr.msk.bf16.mxu1 %vm1946_vm4, %v16016_v60  ;;  %v1454_v11 = vshll.u32 %v296_v52, 16 }
 0x105   : > { %v1438_v58 = vrot.slane %v1437_v59, 4  ;;  %v1447_v25 = vrot.slane %v1445_v29, 4  ;;  %v1458_v23 = vshrl.u32 %v296_v52, 16  ;;  %v1450_v46 = vrot.slane %v1448_v6, 5  ;;  %v299_v31 = vld [vmem:[%s15236_s9 + $0x204] sm:$0x1] }
 0x106   : > { %v1433_v15 = vsel %vm15249_vm5, %v1428_v32, %v1432_v50  ;;  %v3915_v48 = vsel %vm15646_vm8, %v3913_v54, %v3914_v3  ;;  %v1464_v20 = vshll.u32 %v297_v19, 16  ;;  %v1456_v5 = vrot.slane %v1454_v11, 5  ;;  %v14917_v54 = vld [vmem:[%s15236_s9 + $0xcc] sm:$0xf]  ;;  %v14918_v60 = vld [vmem:[%s15236_s9 + $0xd0] sm:$0xf] }
 0x107   : > { %v1443_v13 = vsel %vm15249_vm5, %v1438_v58, %v1442_v12  ;;  %v16032_v40 = vcombine.low %v3912_v62, %v3915_v48  ;;  %v1460_v29 = vrot.slane %v1458_v23, 4  ;;  %v1451_v59 = vor.u32 %v1450_v46, %v1447_v25 }
 0x108   : > { %v16036_v52 = vcombine.low %v1433_v15, %v1443_v13  ;;  %v1466_v50 = vrot.slane %v1464_v20, 5  ;;  %v10780_v32 = vrot.slane %v14916_v44, 9  ;;  %v3918_v6 = vrot.slane %v14917_v54, 5 }
 0x109   : > { %19006 = vst [vmem:[#allocation70_spill] sm:$0xff] %v16032_v40  ;;  %13251 = vmatmul.mubr.msk.bf16.gmra.mrb[32].mxu0 %vm1946_vm4, %v16032_v40  ;;  %v1461_v3 = vor.u32 %v1460_v29, %v1456_v5  ;;  %v3921_v12 = vrot.slane %v14918_v60, 5  ;;  %v1468_v62 = vshrl.u32 %v297_v19, 16  ;;  %v1452_v58 = vrot.slane %v1451_v59, 4  ;;  %v300_v59 = vld [vmem:[%s15236_s9 + $0x208] sm:$0xf] }
 0x10a   : > { %19007 = vst [vmem:[#allocation71_spill] sm:$0xff] %v16036_v52  ;;  %12665 = vmatmul.mubr.msk.bf16.gmra.mrb[96].mxu1 %vm1946_vm4, %v16036_v52  ;;  %v1474_v11 = vshll.u32 %v298_v55, 16  ;;  %v1478_v25 = vshrl.u32 %v298_v55, 16  ;;  %v1484_v23 = vshll.u32 %v299_v31, 16  ;;  %v3919_v48 = vsel %vm15646_vm8, %v10780_v32, %v3918_v6  ;;  %v302_v52 = vld [vmem:[%s15236_s9 + $0x210] sm:$0xf] }
 0x10b   : > { %v1462_v15 = vrot.slane %v1461_v3, 4  ;;  %v3920_v46 = vrot.slane %v3918_v6, 4  ;;  %v1470_v20 = vrot.slane %v1468_v62, 4  ;;  %v1457_v13 = vsel %vm15249_vm5, %v1452_v58, %v1456_v5  ;;  %v301_v3 = vld [vmem:[%s15236_s9 + $0x20c] sm:$0xf] }
 0x10c   : > { %v1476_v19 = vrot.slane %v1474_v11, 5  ;;  %v1480_v60 = vrot.slane %v1478_v25, 4  ;;  %v1486_v29 = vrot.slane %v1484_v23, 5  ;;  %v3923_v32 = vrot.slane %v3921_v12, 4  ;;  %v14919_v62 = vld [vmem:[%s15236_s9 + $0xd4] sm:$0xf] }
 0x10d   : > { %v1467_v55 = vsel %vm15249_vm5, %v1462_v15, %v1466_v50  ;;  %v3922_v31 = vsel %vm15646_vm8, %v3920_v46, %v3921_v12  ;;  %v1471_v44 = vor.u32 %v1470_v20, %v1466_v50  ;;  %v3924_v58 = vrot.slane %v14919_v62, 5  ;;  %v14920_v25 = vld [vmem:[%s15236_s9 + $0xd8] sm:$0x1] }
 0x10e   : > { %v16055_v54 = vcombine.low %v1457_v13, %v1467_v55  ;;  %v16057_v6 = vcombine.low %v3919_v48, %v3922_v31  ;;  %v1481_v5 = vor.u32 %v1480_v60, %v1476_v19  ;;  %v3927_v23 = vrot.slane %v14920_v25, 5 }
 0x10f   : > { %v1472_v11 = vrot.slane %v1471_v44, 4  ;;  %v1489_v24 = vshrl.u32 %v300_v59, 16  ;;  %v1492_v15 = vshll.u32 %v300_v59, 16  ;;  %v3925_v12 = vsel %vm15646_vm8, %v3923_v32, %v3924_v58 }
 0x110   : > { %19008 = vst [vmem:[#allocation72_spill] sm:$0xff] %v16055_v54  ;;  %19009 = vst [vmem:[#allocation73_spill] sm:$0xff] %v16057_v6  ;;  %12668 = vmatprep.mubr.msk.bf16.mxu1 %vm1946_vm4, %v16055_v54  ;;  %13254 = vmatprep.mubr.msk.bf16.mxu0 %vm1946_vm4, %v16057_v6  ;;  %v1482_v50 = vrot.slane %v1481_v5, 4  ;;  %v3926_v48 = vrot.slane %v3924_v58, 4  ;;  %v1498_v46 = vshll.u32 %v301_v3, 16  ;;  %v1502_v59 = vshrl.u32 %v301_v3, 16 }
 0x111   : > { %v1477_v20 = vsel %vm15249_vm5, %v1472_v11, %v1476_v19  ;;  %v1491_v13 = vrot.slane %v1489_v24, 4  ;;  %v1494_v60 = vrot.slane %v1492_v15, 5  ;;  %v1508_v32 = vshll.u32 %v302_v52, 16  ;;  %v16075_v5 = vld [vmem:[%s15236_s9 + $0x214] sm:$0xf]  ;;  %v19239_v2 = vld [vmem:[#allocation70_spill] sm:$0xff] }
 0x112   : > { %v1487_v55 = vsel %vm15249_vm5, %v1482_v50, %v1486_v29  ;;  %v3928_v31 = vsel %vm15646_vm8, %v3926_v48, %v3927_v23  ;;  %v1500_v44 = vrot.slane %v1498_v46, 5  ;;  %v1504_v24 = vrot.slane %v1502_v59, 4  ;;  %v304_v11 = vld [vmem:[%s15236_s9 + $0x218] sm:$0x1]  ;;  %v14921_v3 = vld [vmem:[%s15236_s9 + $0xdc] sm:$0xf] }
 0x113   : > { %v16077_v62 = vcombine.low %v1477_v20, %v1487_v55  ;;  %v16079_v58 = vcombine.low %v3925_v12, %v3928_v31  ;;  %v1495_v19 = vor.u32 %v1494_v60, %v1491_v13  ;;  %v1510_v25 = vrot.slane %v1508_v32, 5  ;;  %v14922_v54 = vld [vmem:[%s15236_s9 + $0xe0] sm:$0xf]  ;;  %v14923_v29 = vld [vmem:[%s15236_s9 + $0xe4] sm:$0xf] }
 0x114   : > { %v10781_v15 = vrot.slane %v14921_v3, 9  ;;  %v3931_v35 = vrot.slane %v14922_v54, 5  ;;  %v3934_v50 = vrot.slane %v14923_v29, 5  ;;  %v1505_v12 = vor.u32 %v1504_v24, %v1500_v44 }
 0x115   : > { %19010 = vst [vmem:[#allocation74_spill] sm:$0xff] %v16077_v62  ;;  %19011 = vst [vmem:[#allocation75_spill] sm:$0xff] %v16079_v58  ;;  %12669 = vmatmul.mubr.msk.bf16.gmra.mrb[100].mxu1 %vm1946_vm4, %v16077_v62  ;;  %13255 = vmatmul.mubr.msk.bf16.gmra.mrb[36].mxu0 %vm1946_vm4, %v16079_v58  ;;  %v1496_v23 = vrot.slane %v1495_v19, 4  ;;  %v1512_v48 = vshrl.u32 %v302_v52, 16  ;;  %v1518_v46 = vshll.u32 %v16075_v5, 16  ;;  %v1522_v54 = vshrl.u32 %v16075_v5, 16 }
 0x116   : > { %v3932_v20 = vsel %vm15646_vm8, %v10781_v15, %v3931_v35  ;;  %v3933_v13 = vrot.slane %v3931_v35, 4  ;;  %v1528_v60 = vshll.u32 %v304_v11, 16  ;;  %v1506_v55 = vrot.slane %v1505_v12, 4  ;;  %v16096_v52 = vld [vmem:[%s15236_s9 + $0x21c] sm:$0xf] }
 0x117   : > { %v1501_v59 = vsel %vm15249_vm5, %v1496_v23, %v1500_v44  ;;  %v1514_v31 = vrot.slane %v1512_v48, 4  ;;  %v1520_v32 = vrot.slane %v1518_v46, 5  ;;  %v1524_v24 = vrot.slane %v1522_v54, 4  ;;  %v14924_v44 = vld [vmem:[%s15236_s9 + $0xe8] sm:$0xf] }
 0x118   : > { %v3935_v19 = vsel %vm15646_vm8, %v3933_v13, %v3934_v50  ;;  %v1530_v3 = vrot.slane %v1528_v60, 5  ;;  %v3936_v35 = vrot.slane %v3934_v50, 4  ;;  %v1511_v15 = vsel %vm15249_vm5, %v1506_v55, %v1510_v25  ;;  %v16106_v12 = vld [vmem:[%s15236_s9 + $0x220] sm:$0xf]  ;;  %v14925_v62 = vld [vmem:[%s15236_s9 + $0xec] sm:$0x1] }
 0x119   : > { %v16102_v11 = vcombine.low %v3932_v20, %v3935_v19  ;;  %v1515_v29 = vor.u32 %v1514_v31, %v1510_v25  ;;  %v3937_v23 = vrot.slane %v14924_v44, 5  ;;  %v16108_v48 = vcombine.low %v1501_v59, %v1511_v15  ;;  %v16277_v58 = vld [vmem:[%s15236_s9 + $0x254] sm:$0x1] }
 0x11a   : > { %v1525_v46 = vor.u32 %v1524_v24, %v1520_v32  ;;  %v3940_v16 = vrot.slane %v14925_v62, 5  ;;  %v1533_v13 = vshrl.u32 %v16096_v52, 16  ;;  %v1536_v54 = vshll.u32 %v16096_v52, 16 }
 0x11b   : > { %19012 = vst [vmem:[#allocation76_spill] sm:$0xff] %v16102_v11  ;;  %19013 = vst [vmem:[#allocation77_spill] sm:$0xff] %v16108_v48  ;;  %13258 = vmatprep.mubr.msk.bf16.mxu0 %vm1946_vm4, %v16102_v11  ;;  %v1516_v50 = vrot.slane %v1515_v29, 4  ;;  %v3938_v25 = vsel %vm15646_vm8, %v3936_v35, %v3937_v23  ;;  %v3939_v20 = vrot.slane %v3937_v23, 4  ;;  %12672 = vmatprep.mubr.msk.bf16.mxu1 %vm1946_vm4, %v16108_v48  ;;  %v1542_v59 = vshll.u32 %v16106_v12, 16 }
 0x11c   : > { %v1526_v62 = vrot.slane %v1525_v46, 4  ;;  %v1535_v60 = vrot.slane %v1533_v13, 4  ;;  %v1546_v55 = vshrl.u32 %v16106_v12, 16  ;;  %v1538_v24 = vrot.slane %v1536_v54, 5  ;;  %v16134_v46 = vld [vmem:[%s15236_s9 + $0x228] sm:$0xf] }
 0x11d   : > { %v1521_v31 = vsel %vm15249_vm5, %v1516_v50, %v1520_v32  ;;  %v3941_v19 = vsel %vm15646_vm8, %v3939_v20, %v3940_v16  ;;  %v1552_v35 = vshll.u32 %v16112_v53, 16  ;;  %v1544_v44 = vrot.slane %v1542_v59, 5  ;;  %v16137_v13 = vld [vmem:[%s15236_s9 + $0x22c] sm:$0x1]  ;;  %v14926_v20 = vld [vmem:[%s15236_s9 + $0xf0] sm:$0xf] }
 0x11e   : > { %v1531_v15 = vsel %vm15249_vm5, %v1526_v62, %v1530_v3  ;;  %v16131_v29 = vcombine.low %v3938_v25, %v3941_v19  ;;  %v1548_v23 = vrot.slane %v1546_v55, 4  ;;  %v1539_v50 = vor.u32 %v1538_v24, %v1535_v60  ;;  %v14928_v25 = vld [vmem:[%s15236_s9 + $0xf8] sm:$0xf]  ;;  %v14935_v11 = vld [vmem:[%s15236_s9 + $0x114] sm:$0x1] }
 0x11f   : > { %v16139_v32 = vcombine.low %v1521_v31, %v1531_v15  ;;  %v1554_v16 = vrot.slane %v1552_v35, 5  ;;  %v10782_v54 = vrot.slane %v14926_v20, 9  ;;  %v3944_v3 = vrot.slane %v16145_v27, 5 }
 0x120   : > { %19014 = vst [vmem:[#allocation78_spill] sm:$0xff] %v16131_v29  ;;  %13259 = vmatmul.mubr.msk.bf16.gmra.mrb[40].mxu0 %vm1946_vm4, %v16131_v29  ;;  %v1549_v48 = vor.u32 %v1548_v23, %v1544_v44  ;;  %v3947_v62 = vrot.slane %v14928_v25, 5  ;;  %v1556_v59 = vshrl.u32 %v16112_v53, 16  ;;  %v1540_v60 = vrot.slane %v1539_v50, 4 }
 0x121   : > { %19015 = vst [vmem:[#allocation79_spill] sm:$0xff] %v16139_v32  ;;  %12673 = vmatmul.mubr.msk.bf16.gmra.mrb[104].mxu1 %vm1946_vm4, %v16139_v32  ;;  %v1562_v55 = vshll.u32 %v16134_v46, 16  ;;  %v1566_v31 = vshrl.u32 %v16134_v46, 16  ;;  %v1572_v19 = vshll.u32 %v16137_v13, 16  ;;  %v3945_v35 = vsel %vm15646_vm8, %v10782_v54, %v3944_v3 }
 0x122   : > { %v1550_v24 = vrot.slane %v1549_v48, 4  ;;  %v3946_v15 = vrot.slane %v3944_v3, 4  ;;  %v1558_v23 = vrot.slane %v1556_v59, 4  ;;  %v1545_v20 = vsel %vm15249_vm5, %v1540_v60, %v1544_v44  ;;  %v16167_v3 = vld [vmem:[%s15236_s9 + $0x234] sm:$0xf] }
 0x123   : > { %v1564_v25 = vrot.slane %v1562_v55, 5  ;;  %v1568_v50 = vrot.slane %v1566_v31, 4  ;;  %v1574_v32 = vrot.slane %v1572_v19, 5  ;;  %v3949_v10 = vrot.slane %v3947_v62, 4  ;;  %v16174_v55 = vld [vmem:[%s15236_s9 + $0xfc] sm:$0xf] }
 0x124   : > { %v1555_v47 = vsel %vm15249_vm5, %v1550_v24, %v1554_v16  ;;  %v3948_v48 = vsel %vm15646_vm8, %v3946_v15, %v3947_v62  ;;  %v1559_v54 = vor.u32 %v1558_v23, %v1554_v16  ;;  %v3950_v31 = vrot.slane %v16174_v55, 5  ;;  %v16179_v24 = vld [vmem:[%s15236_s9 + $0x238] sm:$0xf] }
 0x125   : > { %v16169_v59 = vcombine.low %v1545_v20, %v1555_v47  ;;  %v16171_v44 = vcombine.low %v3945_v35, %v3948_v48  ;;  %v1569_v60 = vor.u32 %v1568_v50, %v1564_v25  ;;  %v3953_v38 = vrot.slane %v14930_v61, 5 }
 0x126   : > { %v1560_v19 = vrot.slane %v1559_v54, 4  ;;  %v1577_v15 = vshrl.u32 %v16160_v0, 16  ;;  %v1580_v16 = vshll.u32 %v16160_v0, 16  ;;  %v3951_v62 = vsel %vm15646_vm8, %v3949_v10, %v3950_v31 }
 0x127   : > { %19016 = vst [vmem:[#allocation80_spill] sm:$0xff] %v16169_v59  ;;  %19017 = vst [vmem:[#allocation81_spill] sm:$0xff] %v16171_v44  ;;  %12676 = vmatprep.mubr.msk.bf16.mxu1 %vm1946_vm4, %v16169_v59  ;;  %13262 = vmatprep.mubr.msk.bf16.mxu0 %vm1946_vm4, %v16171_v44  ;;  %v1570_v47 = vrot.slane %v1569_v60, 4  ;;  %v3952_v35 = vrot.slane %v3950_v31, 4  ;;  %v1586_v61 = vshll.u32 %v16167_v3, 16  ;;  %v1590_v48 = vshrl.u32 %v16167_v3, 16 }
 0x128   : > { %v1565_v23 = vsel %vm15249_vm5, %v1560_v19, %v1564_v25  ;;  %v1579_v20 = vrot.slane %v1577_v15, 4  ;;  %v1582_v50 = vrot.slane %v1580_v16, 5  ;;  %v1596_v31 = vshll.u32 %v16179_v24, 16  ;;  %v16199_v59 = vld [vmem:[%s15236_s9 + $0x23c] sm:$0xf] }
 0x129   : > { %v1575_v54 = vsel %vm15249_vm5, %v1570_v47, %v1574_v32  ;;  %v3954_v10 = vsel %vm15646_vm8, %v3952_v35, %v3953_v38  ;;  %v1588_v60 = vrot.slane %v1586_v61, 5  ;;  %v1592_v15 = vrot.slane %v1590_v48, 4  ;;  %v16206_v16 = vld [vmem:[%s15236_s9 + $0x240] sm:$0x1]  ;;  %v16213_v47 = vld [vmem:[%s15236_s9 + $0x108] sm:$0xf] }
 0x12a   : > { %v16201_v17 = vcombine.low %v1565_v23, %v1575_v54  ;;  %v16203_v25 = vcombine.low %v3951_v62, %v3954_v10  ;;  %v1583_v19 = vor.u32 %v1582_v50, %v1579_v20  ;;  %v1598_v45 = vrot.slane %v1596_v31, 5  ;;  %v16217_v35 = vld [vmem:[%s15236_s9 + $0x10c] sm:$0xf] }
 0x12b   : > { %v10783_v32 = vrot.slane %v16209_v41, 9  ;;  %v3957_v38 = vrot.slane %v16213_v47, 5  ;;  %v3960_v61 = vrot.slane %v16217_v35, 5  ;;  %v1593_v23 = vor.u32 %v1592_v15, %v1588_v60 }
 0x12c   : > { %19018 = vst [vmem:[#allocation82_spill] sm:$0xff] %v16201_v17  ;;  %19019 = vst [vmem:[#allocation83_spill] sm:$0xff] %v16203_v25  ;;  %12677 = vmatmul.mubr.msk.bf16.gmra.mrb[108].mxu1 %vm1946_vm4, %v16201_v17  ;;  %13263 = vmatmul.mubr.msk.bf16.gmra.mrb[44].mxu0 %vm1946_vm4, %v16203_v25  ;;  %v1584_v62 = vrot.slane %v1583_v19, 4  ;;  %v1600_v20 = vshrl.u32 %v16179_v24, 16  ;;  %v1606_v50 = vshll.u32 %v16199_v59, 16  ;;  %v1610_v10 = vshrl.u32 %v16199_v59, 16 }
 0x12d   : > { %v3958_v48 = vsel %vm15646_vm8, %v10783_v32, %v3957_v38  ;;  %v3959_v54 = vrot.slane %v3957_v38, 4  ;;  %v1616_v31 = vshll.u32 %v16206_v16, 16  ;;  %v1594_v8 = vrot.slane %v1593_v23, 4  ;;  %v16246_v23 = vld [vmem:[%s15236_s9 + $0x248] sm:$0xf] }
 0x12e   : > { %v1589_v17 = vsel %vm15249_vm5, %v1584_v62, %v1588_v60  ;;  %v1602_v19 = vrot.slane %v1600_v20, 4  ;;  %v1608_v15 = vrot.slane %v1606_v50, 5  ;;  %v1612_v30 = vrot.slane %v1610_v10, 4  ;;  %v16242_v60 = vld [vmem:[%s15236_s9 + $0x110] sm:$0xf] }
 0x12f   : > { %v3961_v32 = vsel %vm15646_vm8, %v3959_v54, %v3960_v61  ;;  %v1618_v38 = vrot.slane %v1616_v31, 5  ;;  %v3962_v9 = vrot.slane %v3960_v61, 4  ;;  %v1599_v25 = vsel %vm15249_vm5, %v1594_v8, %v1598_v45  ;;  %v16252_v10 = vld [vmem:[%s15236_s9 + $0x24c] sm:$0xf] }
 0x130   : > { %v16239_v44 = vcombine.low %v3958_v48, %v3961_v32  ;;  %v1603_v29 = vor.u32 %v1602_v19, %v1598_v45  ;;  %v3963_v62 = vrot.slane %v16242_v60, 5  ;;  %v16248_v20 = vcombine.low %v1589_v17, %v1599_v25 }
 0x131   : > { %v1613_v50 = vor.u32 %v1612_v30, %v1608_v15  ;;  %v3966_v54 = vrot.slane %v14935_v11, 5  ;;  %v1621_v61 = vshrl.u32 %v16233_v49, 16  ;;  %v1624_v17 = vshll.u32 %v16233_v49, 16 }
 0x132   : > { %19020 = vst [vmem:[#allocation84_spill] sm:$0xff] %v16239_v44  ;;  %19021 = vst [vmem:[#allocation85_spill] sm:$0xff] %v16248_v20  ;;  %13266 = vmatprep.mubr.msk.bf16.mxu0 %vm1946_vm4, %v16239_v44  ;;  %v1604_v8 = vrot.slane %v1603_v29, 4  ;;  %v3964_v45 = vsel %vm15646_vm8, %v3962_v9, %v3963_v62  ;;  %v3965_v48 = vrot.slane %v3963_v62, 4  ;;  %12680 = vmatprep.mubr.msk.bf16.mxu1 %vm1946_vm4, %v16248_v20  ;;  %v1630_v25 = vshll.u32 %v16246_v23, 16 }
 0x133   : > { %v1614_v30 = vrot.slane %v1613_v50, 4  ;;  %v1623_v11 = vrot.slane %v1621_v61, 4  ;;  %v1634_v31 = vshrl.u32 %v16246_v23, 16  ;;  %v1626_v19 = vrot.slane %v1624_v17, 5  ;;  %v16274_v44 = vld [vmem:[%s15236_s9 + $0x250] sm:$0xf] }
 0x134   : > { %v1609_v29 = vsel %vm15249_vm5, %v1604_v8, %v1608_v15  ;;  %v3967_v9 = vsel %vm15646_vm8, %v3965_v48, %v3966_v54  ;;  %v1640_v32 = vshll.u32 %v16252_v10, 16  ;;  %v1632_v61 = vrot.slane %v1630_v25, 5  ;;  %v16282_v48 = vld [vmem:[%s15236_s9 + $0x118] sm:$0xf]  ;;  %v16292_v25 = vld [vmem:[%s15236_s9 + $0x120] sm:$0xf] }
 0x135   : > { %v1619_v62 = vsel %vm15249_vm5, %v1614_v30, %v1618_v38  ;;  %v16271_v50 = vcombine.low %v3964_v45, %v3967_v9  ;;  %v1636_v20 = vrot.slane %v1634_v31, 4  ;;  %v1627_v8 = vor.u32 %v1626_v19, %v1623_v11  ;;  %v16288_v45 = vld [vmem:[%s15236_s9 + $0x11c] sm:$0xf] }
 0x136   : > { %v16279_v15 = vcombine.low %v1609_v29, %v1619_v62  ;;  %v1642_v54 = vrot.slane %v1640_v32, 5  ;;  %v10784_v17 = vrot.slane %v16282_v48, 9  ;;  %v3970_v30 = vrot.slane %v16288_v45, 5 }
 0x137   : > { %19022 = vst [vmem:[#allocation86_spill] sm:$0xff] %v16271_v50  ;;  %13267 = vmatmul.mubr.msk.bf16.gmra.mrb[48].mxu0 %vm1946_vm4, %v16271_v50  ;;  %v1637_v38 = vor.u32 %v1636_v20, %v1632_v61  ;;  %v3973_v31 = vrot.slane %v16292_v25, 5  ;;  %v1644_v11 = vshrl.u32 %v16252_v10, 16  ;;  %v1628_v29 = vrot.slane %v1627_v8, 4 }
 0x138   : > { %19023 = vst [vmem:[#allocation87_spill] sm:$0xff] %v16279_v15  ;;  %12681 = vmatmul.mubr.msk.bf16.gmra.mrb[112].mxu1 %vm1946_vm4, %v16279_v15  ;;  %v1650_v9 = vshll.u32 %v16274_v44, 16  ;;  %v1654_v20 = vshrl.u32 %v16274_v44, 16  ;;  %v1660_v19 = vshll.u32 %v16277_v58, 16  ;;  %v3971_v62 = vsel %vm15646_vm8, %v10784_v17, %v3970_v30 }
 0x139   : > { %v1638_v32 = vrot.slane %v1637_v38, 4  ;;  %v3972_v50 = vrot.slane %v3970_v30, 4  ;;  %v1646_v6 = vrot.slane %v1644_v11, 4  ;;  %v1633_v40 = vsel %vm15249_vm5, %v1628_v29, %v1632_v61  ;;  %v16313_v30 = vld [vmem:[%s15236_s9 + $0x25c] sm:$0xf] }
 0x13a   : > { %v1652_v15 = vrot.slane %v1650_v9, 5  ;;  %v1656_v8 = vrot.slane %v1654_v20, 4  ;;  %v1662_v63 = vrot.slane %v1660_v19, 5  ;;  %v3975_v34 = vrot.slane %v3973_v31, 4  ;;  %v16320_v9 = vld [vmem:[%s15236_s9 + $0x124] sm:$0xf] }
 0x13b   : > { %v1643_v18 = vsel %vm15249_vm5, %v1638_v32, %v1642_v54  ;;  %v3974_v38 = vsel %vm15646_vm8, %v3972_v50, %v3973_v31  ;;  %v1647_v17 = vor.u32 %v1646_v6, %v1642_v54  ;;  %v3976_v20 = vrot.slane %v16320_v9, 5  ;;  %v16325_v32 = vld [vmem:[%s15236_s9 + $0x260] sm:$0xf] }
 0x13c   : > { %v16315_v11 = vcombine.low %v1633_v40, %v1643_v18  ;;  %v16317_v61 = vcombine.low %v3971_v62, %v3974_v38  ;;  %v1657_v29 = vor.u32 %v1656_v8, %v1652_v15  ;;  %v3979_v39 = vrot.slane %v14940_v33, 5 }
 0x13d   : > { %v1648_v19 = vrot.slane %v1647_v17, 4  ;;  %v1665_v50 = vshrl.u32 %v16306_v43, 16  ;;  %v1668_v6 = vshll.u32 %v16306_v43, 16  ;;  %v3977_v40 = vsel %vm15646_vm8, %v3975_v34, %v3976_v20 }
 0x13e   : > { %19024 = vst [vmem:[#allocation88_spill] sm:$0xff] %v16315_v11  ;;  %19025 = vst [vmem:[#allocation89_spill] sm:$0xff] %v16317_v61  ;;  %12684 = vmatprep.mubr.msk.bf16.mxu1 %vm1946_vm4, %v16315_v11  ;;  %13270 = vmatprep.mubr.msk.bf16.mxu0 %vm1946_vm4, %v16317_v61  ;;  %v1658_v18 = vrot.slane %v1657_v29, 4  ;;  %v3978_v54 = vrot.slane %v3976_v20, 4  ;;  %v1674_v33 = vshll.u32 %v16313_v30, 16  ;;  %v1678_v38 = vshrl.u32 %v16313_v30, 16 }
 0x13f   : > { %v1653_v31 = vsel %vm15249_vm5, %v1648_v19, %v1652_v15  ;;  %v1667_v62 = vrot.slane %v1665_v50, 4  ;;  %v1670_v8 = vrot.slane %v1668_v6, 5  ;;  %v1684_v20 = vshll.u32 %v16325_v32, 16  ;;  %v16345_v11 = vld [vmem:[%s15236_s9 + $0x264] sm:$0xf] }
 0x140   : > { %v1663_v17 = vsel %vm15249_vm5, %v1658_v18, %v1662_v63  ;;  %v3980_v34 = vsel %vm15646_vm8, %v3978_v54, %v3979_v39  ;;  %v1676_v29 = vrot.slane %v1674_v33, 5  ;;  %v1680_v50 = vrot.slane %v1678_v38, 4  ;;  %v16352_v6 = vld [vmem:[%s15236_s9 + $0x268] sm:$0x1]  ;;  %v16359_v18 = vld [vmem:[%s15236_s9 + $0x130] sm:$0xf] }
 0x141   : > { %v16347_v61 = vcombine.low %v1653_v31, %v1663_v17  ;;  %v16349_v15 = vcombine.low %v3977_v40, %v3980_v34  ;;  %v1671_v19 = vor.u32 %v1670_v8, %v1667_v62  ;;  %v1686_v14 = vrot.slane %v1684_v20, 5  ;;  %v16363_v54 = vld [vmem:[%s15236_s9 + $0x134] sm:$0xf] }
 0x142   : > { %v10785_v63 = vrot.slane %v16355_v26, 9  ;;  %v3983_v39 = vrot.slane %v16359_v18, 5  ;;  %19028 = vst [vmem:[#allocation92_spill] sm:$0xff] %v16363_v54  ;;  %v3986_v33 = vrot.slane %v16363_v54, 5  ;;  %v1681_v31 = vor.u32 %v1680_v50, %v1676_v29 }
 0x143   : > { %19026 = vst [vmem:[#allocation90_spill] sm:$0xff] %v16347_v61  ;;  %19027 = vst [vmem:[#allocation91_spill] sm:$0xff] %v16349_v15  ;;  %12685 = vmatmul.mubr.msk.bf16.gmra.mrb[116].mxu1 %vm1946_vm4, %v16347_v61  ;;  %13271 = vmatmul.mubr.msk.bf16.gmra.mrb[52].mxu0 %vm1946_vm4, %v16349_v15  ;;  %v1672_v40 = vrot.slane %v1671_v19, 4  ;;  %v1688_v62 = vshrl.u32 %v16325_v32, 16  ;;  %v1694_v8 = vshll.u32 %v16345_v11, 16  ;;  %v1698_v34 = vshrl.u32 %v16345_v11, 16 }
 0x144   : > { %v3984_v38 = vsel %vm15646_vm8, %v10785_v63, %v3983_v39  ;;  %v3985_v17 = vrot.slane %v3983_v39, 4  ;;  %v1704_v20 = vshll.u32 %v16352_v6, 16  ;;  %v1682_v15 = vrot.slane %v1681_v31, 4  ;;  %v16392_v31 = vld [vmem:[%s15236_s9 + $0x270] sm:$0xf] }
 0x145   : > { %v1677_v61 = vsel %vm15249_vm5, %v1672_v40, %v1676_v29  ;;  %v1690_v19 = vrot.slane %v1688_v62, 4  ;;  %v1696_v50 = vrot.slane %v1694_v8, 5  ;;  %v1700_v56 = vrot.slane %v1698_v34, 4  ;;  %v16388_v29 = vld [vmem:[%s15236_s9 + $0x138] sm:$0xf] }
 0x146   : > { %v3987_v63 = vsel %vm15646_vm8, %v3985_v17, %v3986_v33  ;;  %v1706_v39 = vrot.slane %v1704_v20, 5  ;;  %v3988_v42 = vrot.slane %v3986_v33, 4  ;;  %v1687_v37 = vsel %vm15249_vm5, %v1682_v15, %v1686_v14  ;;  %v16398_v34 = vld [vmem:[%s15236_s9 + $0x274] sm:$0xf] }
 0x147   : > { %v16385_v28 = vcombine.low %v3984_v38, %v3987_v63  ;;  %v1691_v57 = vor.u32 %v1690_v19, %v1686_v14  ;;  %v3989_v40 = vrot.slane %v16388_v29, 5  ;;  %v16394_v62 = vcombine.low %v1677_v61, %v1687_v37 }
 0x148   : > { %v1701_v8 = vor.u32 %v1700_v56, %v1696_v50  ;;  %v3992_v17 = vrot.slane %v14945_v22, 5  ;;  %v1709_v33 = vshrl.u32 %v16379_v51, 16  ;;  %v1712_v37 = vshll.u32 %v16379_v51, 16 }
 0x149   : > { %19029 = vst [vmem:[#allocation93_spill] sm:$0xff] %v16385_v28  ;;  %19030 = vst [vmem:[#allocation94_spill] sm:$0xff] %v16394_v62  ;;  %13274 = vmatprep.mubr.msk.bf16.mxu0 %vm1946_vm4, %v16385_v28  ;;  %v1692_v15 = vrot.slane %v1691_v57, 4  ;;  %v3990_v14 = vsel %vm15646_vm8, %v3988_v42, %v3989_v40  ;;  %v3991_v38 = vrot.slane %v3989_v40, 4  ;;  %12688 = vmatprep.mubr.msk.bf16.mxu1 %vm1946_vm4, %v16394_v62  ;;  %v1718_v61 = vshll.u32 %v16392_v31, 16 }
 0x14a   : > { %v1702_v22 = vrot.slane %v1701_v8, 4  ;;  %v1711_v56 = vrot.slane %v1709_v33, 4  ;;  %v1722_v20 = vshrl.u32 %v16392_v31, 16  ;;  %v1714_v19 = vrot.slane %v1712_v37, 5  ;;  %v16420_v28 = vld [vmem:[%s15236_s9 + $0x278] sm:$0xf] }
 0x14b   : > { %v1697_v57 = vsel %vm15249_vm5, %v1692_v15, %v1696_v50  ;;  %v3993_v42 = vsel %vm15646_vm8, %v3991_v38, %v3992_v17  ;;  %v1728_v63 = vshll.u32 %v16398_v34, 16  ;;  %v1720_v33 = vrot.slane %v1718_v61, 5  ;;  %v16428_v38 = vld [vmem:[%s15236_s9 + $0x140] sm:$0xf]  ;;  %v16438_v61 = vld [vmem:[%s15236_s9 + $0x148] sm:$0xf] }
 0x14c   : > { %v1707_v40 = vsel %vm15249_vm5, %v1702_v22, %v1706_v39  ;;  %v16417_v8 = vcombine.low %v3990_v14, %v3993_v42  ;;  %v1724_v62 = vrot.slane %v1722_v20, 4  ;;  %v1715_v15 = vor.u32 %v1714_v19, %v1711_v56  ;;  %19033 = vst [vmem:[#allocation97_spill] sm:$0xff] %v16428_v38  ;;  %v16434_v14 = vld [vmem:[%s15236_s9 + $0x144] sm:$0xf]  ;;  %19035 = vst [vmem:[#allocation99_spill] sm:$0xff] %v16438_v61 }
 0x14d   : > { %v16425_v50 = vcombine.low %v1697_v57, %v1707_v40  ;;  %v1730_v17 = vrot.slane %v1728_v63, 5  ;;  %v10786_v37 = vrot.slane %v16428_v38, 9  ;;  %19034 = vst [vmem:[#allocation98_spill] sm:$0xff] %v16434_v14  ;;  %v3996_v22 = vrot.slane %v16434_v14, 5  ;;  %v10802_v38 = vld [vmem:[%s18615_s1 + $0x4] sm:$0x3] }
 0x14e   : > { %19031 = vst [vmem:[#allocation95_spill] sm:$0xff] %v16417_v8  ;;  %13275 = vmatmul.mubr.msk.bf16.gmra.mrb[56].mxu0 %vm1946_vm4, %v16417_v8  ;;  %v1725_v39 = vor.u32 %v1724_v62, %v1720_v33  ;;  %v3999_v20 = vrot.slane %v16438_v61, 5  ;;  %v1732_v57 = vshrl.u32 %v16398_v34, 16  ;;  %v1716_v56 = vrot.slane %v1715_v15, 4 }
 0x14f   : > { %19032 = vst [vmem:[#allocation96_spill] sm:$0xff] %v16425_v50  ;;  %12689 = vmatmul.mubr.msk.bf16.gmra.mrb[120].mxu1 %vm1946_vm4, %v16425_v50  ;;  %v1738_v42 = vshll.u32 %v16420_v28, 16  ;;  %v1742_v19 = vshrl.u32 %v16420_v28, 16  ;;  %v1748_v62 = vshll.u32 %v16423_v21, 16  ;;  %v3997_v40 = vsel %vm15646_vm8, %v10786_v37, %v3996_v22 }
 0x150   : > { %v1726_v63 = vrot.slane %v1725_v39, 4  ;;  %v3998_v8 = vrot.slane %v3996_v22, 4  ;;  %v1734_v7 = vrot.slane %v1732_v57, 4  ;;  %v1721_v1 = vsel %vm15249_vm5, %v1716_v56, %v1720_v33  ;;  %v16463_v56 = vld [vmem:[%s15236_s9 + $0x14c] sm:$0xf] }
 0x151   : > { %v1740_v61 = vrot.slane %v1738_v42, 5  ;;  %v1744_v50 = vrot.slane %v1742_v19, 4  ;;  %v1750_v15 = vrot.slane %v1748_v62, 5  ;;  %v4001_v22 = vrot.slane %v3999_v20, 4  ;;  %19038 = vst [vmem:[#allocation102_spill] sm:$0xff] %v16463_v56 }
 0x152   : > { %v1731_v39 = vsel %vm15249_vm5, %v1726_v63, %v1730_v17  ;;  %v4000_v14 = vsel %vm15646_vm8, %v3998_v8, %v3999_v20  ;;  %v1735_v37 = vor.u32 %v1734_v7, %v1730_v17  ;;  %v4002_v42 = vrot.slane %v16463_v56, 5  ;;  %v14950_v62 = vld [vmem:[%s15236_s9 + $0x150] sm:$0x1]  ;;  %v16477_v17 = vld [vmem:[%s15236_s9 + $0x154] sm:$0xf] }
 0x153   : > { %v16458_v57 = vcombine.low %v1721_v1, %v1731_v39  ;;  %v16460_v54 = vcombine.low %v3997_v40, %v4000_v14  ;;  %v1745_v33 = vor.u32 %v1744_v50, %v1740_v61  ;;  %v4005_v63 = vrot.slane %v14950_v62, 5  ;;  %19039 = vst [vmem:[#allocation103_spill] sm:$0xff] %v16477_v17  ;;  %v16484_v20 = vld [vmem:[%s15236_s9 + $0x158] sm:$0xf]  ;;  %v16488_v39 = vld [vmem:[%s15236_s9 + $0x15c] sm:$0xf] }
 0x154   : > { %v1736_v19 = vrot.slane %v1735_v37, 4  ;;  %v16468_v8 = vand.u32 %v10802_v38, %v15212_v4  ;;  %v4003_v1 = vsel %vm15646_vm8, %v4001_v22, %v4002_v42  ;;  %v4004_v50 = vrot.slane %v4002_v42, 4  ;;  %19040 = vst [vmem:[#allocation104_spill] sm:$0xff] %v16484_v20  ;;  %19041 = vst [vmem:[#allocation105_spill] sm:$0xff] %v16488_v39  ;;  %v16492_v22 = vld [vmem:[%s15236_s9 + $0x160] sm:$0xf] }
 0x155   : > { %19036 = vst [vmem:[#allocation100_spill] sm:$0xff] %v16458_v57  ;;  %19037 = vst [vmem:[#allocation101_spill] sm:$0xff] %v16460_v54  ;;  %12692 = vmatprep.mubr.msk.bf16.mxu1 %vm1946_vm4, %v16458_v57  ;;  %13278 = vmatprep.mubr.msk.bf16.mxu0 %vm1946_vm4, %v16460_v54  ;;  %v1746_v7 = vrot.slane %v1745_v33, 4  ;;  %v10787_v14 = vrot.slane %v16477_v17, 9  ;;  %v4009_v40 = vrot.slane %v16484_v20, 5  ;;  %v4012_v37 = vrot.slane %v16488_v39, 5 }
 0x156   : > { %v1741_v38 = vsel %vm15249_vm5, %v1736_v19, %v1740_v61  ;;  %12826 = vmatprep.subr.bf16.mxu1 %v16468_v8  ;;  %19042 = vst [vmem:[#allocation106_spill] sm:$0xff] %v16492_v22  ;;  %v4015_v33 = vrot.slane %v16492_v22, 5  ;;  %v4006_v61 = vsel %vm15646_vm8, %v4004_v50, %v4005_v63  ;;  %v16500_v19 = vld [vmem:[%s15236_s9] sm:$0xf]  ;;  %v16503_v62 = vld [vmem:[%s15236_s9 + $0x4] sm:$0xf] }
 0x157   : > { %v1751_v42 = vsel %vm15249_vm5, %v1746_v7, %v1750_v15  ;;  %19043 = vst [vmem:[#allocation107_spill] sm:$0xff] %v16500_v19  ;;  %19044 = vst [vmem:[#allocation108_spill] sm:$0xff] %v16503_v62  ;;  %v10642_v57 = vcombine.low %v16500_v19, %v16503_v62  ;;  %v14957_v54 = vld [vmem:[%s15236_s9 + $0x164] sm:$0x1]  ;;  %v16510_v22 = vcombine.low %v4003_v1, %v4006_v61  ;;  %v4011_v7 = vrot.slane %v4009_v40, 4 }
 0x158   : > { %v4018_v39 = vrot.slane %v14957_v54, 5  ;;  %v16508_v17 = vcombine.low %v1741_v38, %v1751_v42  ;;  %v4010_v15 = vsel %vm15646_vm8, %v10787_v14, %v4009_v40  ;;  %v4014_v63 = vrot.slane %v4012_v37, 4  ;;  %v16519_v56 = vld [vmem:[%s15236_s9 + $0x16c] sm:$0xf]  ;;  %v16529_v14 = vld [vmem:[%s15236_s9 + $0x170] sm:$0xf] }
 0x159   : > { %19046 = vst [vmem:[#allocation110_spill] sm:$0xff] %v16510_v22  ;;  %v4017_v50 = vrot.slane %v4015_v33, 4  ;;  %v10788_v20 = vrot.slane %v16515_v36, 9  ;;  %19048 = vst [vmem:[#allocation112_spill] sm:$0xff] %v16519_v56  ;;  %v4022_v54 = vrot.slane %v16519_v56, 5  ;;  %13279 = vmatmul.mubr.msk.bf16.gmra.mrb[60].mxu0 %vm1946_vm4, %v16510_v22  ;;  %v4013_v1 = vsel %vm15646_vm8, %v4011_v7, %v4012_v37 }
 0x15a   : > { %19045 = vst [vmem:[#allocation109_spill] sm:$0xff] %v16508_v17  ;;  %12693 = vmatmul.mubr.msk.bf16.gmra.mrb[124].mxu1 %vm1946_vm4, %v16508_v17  ;;  %19049 = vst [vmem:[#allocation113_spill] sm:$0xff] %v16529_v14  ;;  %v4025_v38 = vrot.slane %v16529_v14, 5  ;;  %v16533_v40 = vcombine.low %v4010_v15, %v4013_v1  ;;  %v4016_v42 = vsel %vm15646_vm8, %v4014_v63, %v4015_v33  ;;  %v16540_v17 = vld [vmem:[%s15236_s9 + $0x174] sm:$0xf] }
 0x15b   : > { %12698 = vmatprep.mubr.msk.bf16.mxu1 %vm1946_vm4, %v10642_v57  ;;  %v4019_v61 = vsel %vm15646_vm8, %v4017_v50, %v4018_v39  ;;  %19051 = vst [vmem:[#allocation115_spill] sm:$0xff] %v16540_v17  ;;  %v4028_v37 = vrot.slane %v16540_v17, 5  ;;  %v4024_v7 = vrot.slane %v4022_v54, 4  ;;  %v4023_v57 = vsel %vm15646_vm8, %v10788_v20, %v4022_v54  ;;  %v16548_v15 = vld [vmem:[%s15236_s9 + $0x180] sm:$0xf] }
 0x15c   : > { %19050 = vst [vmem:[#allocation114_spill] sm:$0xff] %v16533_v40  ;;  %13282 = vmatprep.mubr.msk.bf16.mxu0 %vm1946_vm4, %v16533_v40  ;;  %19052 = vst [vmem:[#allocation116_spill] sm:$0xff] %v16548_v15  ;;  %v4035_v33 = vrot.slane %v16548_v15, 5  ;;  %v16552_v63 = vld [vmem:[%s15236_s9 + $0x8] sm:$0xf]  ;;  %v16559_v1 = vcombine.low %v4016_v42, %v4019_v61  ;;  %v4027_v19 = vrot.slane %v4025_v38, 4 }
 0x15d   : > { %19053 = vst [vmem:[#allocation117_spill] sm:$0xff] %v16552_v63  ;;  %v16555_v39 = vld [vmem:[%s15236_s9 + $0xc] sm:$0xf]  ;;  %v4026_v40 = vsel %vm15646_vm8, %v4024_v7, %v4025_v38  ;;  %v14965_v22 = vld [vmem:[%s15236_s9 + $0x14] sm:$0xf]  ;;  %v4030_v62 = vrot.slane %v4028_v37, 4 }
 0x15e   : > { %19054 = vst [vmem:[#allocation118_spill] sm:$0xff] %v16555_v39  ;;  %v10643_v50 = vcombine.low %v16552_v63, %v16555_v39  ;;  %19055 = vst [vmem:[#allocation119_spill] sm:$0xff] %v16559_v1  ;;  %v14966_v20 = vld [vmem:[%s15236_s9 + $0x18] sm:$0xf]  ;;  %v16568_v17 = vcombine.low %v4023_v57, %v4026_v40  ;;  %v16571_v36 = vld [vmem:[%s15236_s9 + $0x17c] sm:$0xf]  ;;  %v4029_v38 = vsel %vm15646_vm8, %v4027_v19, %v4028_v37 }
 0x15f   : > { %v16565_v54 = vcombine.low %v14965_v22, %v14966_v20  ;;  %v14967_v15 = vld [vmem:[%s15236_s9 + $0x178] sm:$0x1]  ;;  %19058 = vst [vmem:[#allocation122_spill] sm:$0xff] %v16571_v36  ;;  %v10789_v42 = vrot.slane %v16571_v36, 9  ;;  %v4037_v61 = vrot.slane %v4035_v33, 4 }
 0x160   : > { %v4031_v14 = vrot.slane %v14967_v15, 5  ;;  %19057 = vst [vmem:[#allocation121_spill] sm:$0xff] %v16568_v17  ;;  %v16575_v39 = vld [vmem:[%s15236_s9 + $0x184] sm:$0xf]  ;;  %v16589_v7 = vld [vmem:[%s15236_s9 + $0x188] sm:$0xf] }
 0x161   : > { %19056 = vst [vmem:[#allocation120_spill] sm:$0xff] %v16565_v54  ;;  %19059 = vst [vmem:[#allocation123_spill] sm:$0xff] %v16575_v39  ;;  %v4038_v22 = vrot.slane %v16575_v39, 5  ;;  %13283 = vmatmul.mubr.msk.bf16.gmra.mrb[64].mxu0 %vm1946_vm4, %v16559_v1  ;;  %v4041_v57 = vrot.slane %v16589_v7, 5  ;;  %v14976_v63 = vld [vmem:[%s15236_s9 + $0x18c] sm:$0x1] }
 0x162   : > { %12699 = vmatmul.mubr.msk.bf16.vlgmr.msra.gmra.mrb[0].mxu1 %vm1946_vm4, %v10643_v50  ;;  %v4032_v40 = vsel %vm15646_vm8, %v4030_v62, %v4031_v14  ;;  %19060 = vst [vmem:[#allocation124_spill] sm:$0xff] %v16589_v7  ;;  %13286 = vmatprep.mubr.msk.bf16.mxu0 %vm1946_vm4, %v16568_v17  ;;  %v16599_v50 = vld [vmem:[%s15236_s9 + $0x194] sm:$0xf]  ;;  %v14972_v62 = vld [vmem:[%s15236_s9 + $0x1c] sm:$0xf]  ;;  %v4044_v39 = vrot.slane %v14976_v63, 5 }
 0x163   : > { %12827 = vmatpush3.bf16.msra.mxu1 %v16468_v8  ;;  %12702 = vmatprep.mubr.msk.bf16.mxu1 %vm1946_vm4, %v16565_v54  ;;  %v4036_v8 = vsel %vm15646_vm8, %v10789_v42, %v4035_v33  ;;  %v4039_v15 = vsel %vm15646_vm8, %v4037_v61, %v4038_v22  ;;  %19061 = vst [vmem:[#allocation125_spill] sm:$0xff] %v16599_v50  ;;  %v4048_v19 = vrot.slane %v16599_v50, 5  ;;  %v14973_v14 = vld [vmem:[%s15236_s9 + $0x20] sm:$0xf]  ;;  %v14974_v54 = vld [vmem:[%s15236_s9 + $0x28] sm:$0xf] }
 0x164   : > { %v16604_v37 = vcombine.low %v14972_v62, %v14973_v14  ;;  %v16606_v20 = vcombine.low %v4029_v38, %v4032_v40  ;;  %v14975_v17 = vld [vmem:[%s15236_s9 + $0x2c] sm:$0xf]  ;;  %v16612_v33 = vcombine.low %v4036_v8, %v4039_v15  ;;  %v4040_v42 = vrot.slane %v4038_v22, 4  ;;  %v16616_v50 = vld [vmem:[%s15236_s9 + $0x190] sm:$0xf] }
 0x165   : > { %v16610_v1 = vcombine.low %v14974_v54, %v14975_v17  ;;  %v4043_v61 = vrot.slane %v4041_v57, 4  ;;  %19066 = vst [vmem:[#allocation130_spill] sm:$0xff] %v16616_v50  ;;  %v10790_v7 = vrot.slane %v16616_v50, 9  ;;  %v4050_v62 = vrot.slane %v4048_v19, 4  ;;  %v16620_v38 = vld [vmem:[%s15236_s9 + $0x198] sm:$0xf] }
 0x166   : > { %19062 = vst [vmem:[#allocation126_spill] sm:$0xff] %v16604_v37  ;;  %19063 = vst [vmem:[#allocation127_spill] sm:$0xff] %v16606_v20  ;;  %v4051_v17 = vrot.slane %v16620_v38, 5  ;;  %v4042_v63 = vsel %vm15646_vm8, %v4040_v42, %v4041_v57  ;;  %v16636_v22 = vld [vmem:[%s15236_s9 + $0x19c] sm:$0xf] }
 0x167   : > { %19064 = vst [vmem:[#allocation128_spill] sm:$0xff] %v16610_v1  ;;  %19065 = vst [vmem:[#allocation129_spill] sm:$0xff] %v16612_v33  ;;  %v4045_v54 = vsel %vm15646_vm8, %v4043_v61, %v4044_v39  ;;  %v4054_v40 = vrot.slane %v16636_v22, 5  ;;  %v4049_v8 = vsel %vm15646_vm8, %v10790_v7, %v4048_v19  ;;  %v16644_v14 = vld [vmem:[%s15236_s9 + $0x1a8] sm:$0xf] }
 0x168   : > { %19067 = vst [vmem:[#allocation131_spill] sm:$0xff] %v16620_v38  ;;  %19068 = vst [vmem:[#allocation132_spill] sm:$0xff] %v16636_v22  ;;  %v4052_v15 = vsel %vm15646_vm8, %v4050_v62, %v4051_v17  ;;  %v14981_v57 = vld [vmem:[%s15236_s9 + $0x30] sm:$0xf]  ;;  %v14982_v42 = vld [vmem:[%s15236_s9 + $0x34] sm:$0xf]  ;;  %v16651_v61 = vcombine.low %v4042_v63, %v4045_v54 }
 0x169   : > { %13287 = vmatmul.mubr.msk.bf16.gmra.mrb[68].mxu0 %vm1946_vm4, %v16606_v20  ;;  %19069 = vst [vmem:[#allocation133_spill] sm:$0xff] %v16644_v14  ;;  %v16649_v39 = vcombine.low %v14981_v57, %v14982_v42  ;;  %v14984_v20 = vld [vmem:[%s15236_s9 + $0x40] sm:$0xf]  ;;  %v16657_v7 = vcombine.low %v4049_v8, %v4052_v15  ;;  %v4053_v19 = vrot.slane %v4051_v17, 4  ;;  %v4056_v62 = vrot.slane %v4054_v40, 4 }
 0x16a   : > { %12703 = vmatmul.mubr.msk.bf16.gmra.mrb[4].mxu1 %vm1946_vm4, %v16604_v37  ;;  %13290 = vmatprep.mubr.msk.bf16.mxu0 %vm1946_vm4, %v16612_v33  ;;  %v4061_v37 = vrot.slane %v16644_v14, 5  ;;  %19071 = vst [vmem:[#allocation135_spill] sm:$0xff] %v16651_v61  ;;  %v14983_v33 = vld [vmem:[%s15236_s9 + $0x3c] sm:$0xf]  ;;  %v14985_v22 = vld [vmem:[%s15236_s9 + $0x1a0] sm:$0x1] }
 0x16b   : > { %12706 = vmatprep.mubr.msk.bf16.mxu1 %vm1946_vm4, %v16610_v1  ;;  %19070 = vst [vmem:[#allocation134_spill] sm:$0xff] %v16649_v39  ;;  %v16655_v38 = vcombine.low %v14983_v33, %v14984_v20  ;;  %19073 = vst [vmem:[#allocation137_spill] sm:$0xff] %v16657_v7  ;;  %v4057_v50 = vrot.slane %v14985_v22, 5  ;;  %v16661_v14 = vld [vmem:[%s15236_s9 + $0x1a4] sm:$0xf]  ;;  %v4055_v33 = vsel %vm15646_vm8, %v4053_v19, %v4054_v40 }
 0x16c   : > { %19074 = vst [vmem:[#allocation138_spill] sm:$0xff] %v16661_v14  ;;  %v10791_v36 = vrot.slane %v16661_v14, 9  ;;  %v4063_v57 = vrot.slane %v4061_v37, 4  ;;  %v16665_v63 = vld [vmem:[%s15236_s9 + $0x1ac] sm:$0xf] }
 0x16d   : > { %19072 = vst [vmem:[#allocation136_spill] sm:$0xff] %v16655_v38  ;;  %19075 = vst [vmem:[#allocation139_spill] sm:$0xff] %v16665_v63  ;;  %v4064_v20 = vrot.slane %v16665_v63, 5  ;;  %v4058_v17 = vsel %vm15646_vm8, %v4056_v62, %v4057_v50  ;;  %v16681_v54 = vld [vmem:[%s15236_s9 + $0x1b0] sm:$0xf] }
 0x16e   : > { %19076 = vst [vmem:[#allocation140_spill] sm:$0xff] %v16681_v54  ;;  %v4067_v22 = vrot.slane %v16681_v54, 5  ;;  %v4062_v8 = vsel %vm15646_vm8, %v10791_v36, %v4061_v37  ;;  %v16689_v42 = vld [vmem:[%s15236_s9 + $0x1bc] sm:$0xf]  ;;  %v14990_v40 = vld [vmem:[%s15236_s9 + $0x44] sm:$0xf]  ;;  %v16696_v62 = vcombine.low %v4055_v33, %v4058_v17 }
 0x16f   : > { %v4065_v15 = vsel %vm15646_vm8, %v4063_v57, %v4064_v20  ;;  %19077 = vst [vmem:[#allocation141_spill] sm:$0xff] %v16689_v42  ;;  %v14991_v19 = vld [vmem:[%s15236_s9 + $0x48] sm:$0xf]  ;;  %v14993_v63 = vld [vmem:[%s15236_s9 + $0x54] sm:$0xf]  ;;  %v4066_v37 = vrot.slane %v4064_v20, 4 }
 0x170   : > { %v16694_v50 = vcombine.low %v14990_v40, %v14991_v19  ;;  %19079 = vst [vmem:[#allocation143_spill] sm:$0xff] %v16696_v62  ;;  %v16702_v36 = vcombine.low %v4062_v8, %v4065_v15  ;;  %v4069_v57 = vrot.slane %v4067_v22, 4  ;;  %v14994_v14 = vld [vmem:[%s15236_s9 + $0x1b4] sm:$0x1]  ;;  %v16710_v33 = vld [vmem:[%s15236_s9 + $0x1c0] sm:$0xf] }
 0x171   : > { %13291 = vmatmul.mubr.msk.bf16.gmra.mrb[72].mxu0 %vm1946_vm4, %v16651_v61  ;;  %v14992_v61 = vld [vmem:[%s15236_s9 + $0x50] sm:$0xf]  ;;  %v4070_v56 = vrot.slane %v14994_v14, 5  ;;  %19083 = vst [vmem:[#allocation147_spill] sm:$0xff] %v16710_v33  ;;  %v4068_v14 = vsel %vm15646_vm8, %v4066_v37, %v4067_v22  ;;  %v16726_v20 = vld [vmem:[%s15236_s9 + $0x1c4] sm:$0xf] }
 0x172   : > { %12707 = vmatmul.mubr.msk.bf16.gmra.mrb[8].mxu1 %vm1946_vm4, %v16649_v39  ;;  %13294 = vmatprep.mubr.msk.bf16.mxu0 %vm1946_vm4, %v16657_v7  ;;  %v4074_v7 = vrot.slane %v16689_v42, 5  ;;  %19078 = vst [vmem:[#allocation142_spill] sm:$0xff] %v16694_v50  ;;  %v16700_v54 = vcombine.low %v14992_v61, %v14993_v63  ;;  %19081 = vst [vmem:[#allocation145_spill] sm:$0xff] %v16702_v36  ;;  %v16706_v42 = vld [vmem:[%s15236_s9 + $0x1b8] sm:$0xf]  ;;  %v4077_v61 = vrot.slane %v16710_v33, 5 }
 0x173   : > { %12710 = vmatprep.mubr.msk.bf16.mxu1 %vm1946_vm4, %v16655_v38  ;;  %19082 = vst [vmem:[#allocation146_spill] sm:$0xff] %v16706_v42  ;;  %v10792_v38 = vrot.slane %v16706_v42, 9  ;;  %v4071_v63 = vsel %vm15646_vm8, %v4069_v57, %v4070_v56  ;;  %19084 = vst [vmem:[#allocation148_spill] sm:$0xff] %v16726_v20  ;;  %v4080_v17 = vrot.slane %v16726_v20, 5  ;;  %v16734_v19 = vld [vmem:[%s15236_s9 + $0x1d0] sm:$0xf] }
 0x174   : > { %19080 = vst [vmem:[#allocation144_spill] sm:$0xff] %v16700_v54  ;;  %v4076_v40 = vrot.slane %v4074_v7, 4  ;;  %19085 = vst [vmem:[#allocation149_spill] sm:$0xff] %v16734_v19  ;;  %v14999_v22 = vld [vmem:[%s15236_s9 + $0x58] sm:$0xf]  ;;  %v16741_v57 = vcombine.low %v4068_v14, %v4071_v63 }
 0x175   : > { %v4075_v8 = vsel %vm15646_vm8, %v10792_v38, %v4074_v7  ;;  %v15000_v37 = vld [vmem:[%s15236_s9 + $0x5c] sm:$0xf]  ;;  %v15002_v33 = vld [vmem:[%s15236_s9 + $0x68] sm:$0xf]  ;;  %v4079_v7 = vrot.slane %v4077_v61, 4 }
 0x176   : > { %v4078_v15 = vsel %vm15646_vm8, %v4076_v40, %v4077_v61  ;;  %v16739_v56 = vcombine.low %v14999_v22, %v15000_v37  ;;  %19087 = vst [vmem:[#allocation151_spill] sm:$0xff] %v16741_v57  ;;  %v4082_v40 = vrot.slane %v4080_v17, 4  ;;  %v15003_v42 = vld [vmem:[%s15236_s9 + $0x1c8] sm:$0x1]  ;;  %v16755_v14 = vld [vmem:[%s15236_s9 + $0x1d4] sm:$0xf] }
 0x177   : > { %v16747_v38 = vcombine.low %v4075_v8, %v4078_v15  ;;  %19091 = vst [vmem:[#allocation155_spill] sm:$0xff] %v16755_v14  ;;  %v16771_v61 = vld [vmem:[%s15236_s9 + $0x1d8] sm:$0xf]  ;;  %v16779_v37 = vld [vmem:[%s15236_s9 + $0x1e4] sm:$0xf] }
 0x178   : > { %19086 = vst [vmem:[#allocation150_spill] sm:$0xff] %v16739_v56  ;;  %19092 = vst [vmem:[#allocation156_spill] sm:$0xff] %v16771_v61  ;;  %v4093_v63 = vrot.slane %v16771_v61, 5 }
 0x179   : > { %13295 = vmatmul.mubr.msk.bf16.gmra.mrb[76].mxu0 %vm1946_vm4, %v16696_v62  ;;  %v15001_v62 = vld [vmem:[%s15236_s9 + $0x64] sm:$0xf]  ;;  %19089 = vst [vmem:[#allocation153_spill] sm:$0xff] %v16747_v38  ;;  %19093 = vst [vmem:[#allocation157_spill] sm:$0xff] %v16779_v37 }
 0x17a   : > { %12711 = vmatmul.mubr.msk.bf16.gmra.mrb[12].mxu1 %vm1946_vm4, %v16694_v50  ;;  %13298 = vmatprep.mubr.msk.bf16.mxu0 %vm1946_vm4, %v16702_v36  ;;  %v4087_v36 = vrot.slane %v16734_v19, 5  ;;  %v16745_v20 = vcombine.low %v15001_v62, %v15002_v33  ;;  %v16751_v19 = vld [vmem:[%s15236_s9 + $0x1cc] sm:$0xf]  ;;  %v4090_v62 = vrot.slane %v16755_v14, 5  ;;  %v15011_v14 = vld [vmem:[%s15236_s9 + $0x7c] sm:$0xf] }
 0x17b   : > { %12714 = vmatprep.mubr.msk.bf16.mxu1 %vm1946_vm4, %v16700_v54  ;;  %v4083_v54 = vrot.slane %v15003_v42, 5  ;;  %19090 = vst [vmem:[#allocation154_spill] sm:$0xff] %v16751_v19  ;;  %v10793_v50 = vrot.slane %v16751_v19, 9  ;;  %v4081_v42 = vsel %vm15646_vm8, %v4079_v7, %v4080_v17  ;;  %v15008_v17 = vld [vmem:[%s15236_s9 + $0x6c] sm:$0xf] }
 0x17c   : > { %19088 = vst [vmem:[#allocation152_spill] sm:$0xff] %v16745_v20  ;;  %v4089_v22 = vrot.slane %v4087_v36, 4  ;;  %v15009_v7 = vld [vmem:[%s15236_s9 + $0x70] sm:$0xf]  ;;  %v15012_v19 = vld [vmem:[%s15236_s9 + $0x1dc] sm:$0x1] }
 0x17d   : > { %v4084_v33 = vsel %vm15646_vm8, %v4082_v40, %v4083_v54  ;;  %v4088_v8 = vsel %vm15646_vm8, %v10793_v50, %v4087_v36  ;;  %v16784_v54 = vcombine.low %v15008_v17, %v15009_v7  ;;  %v4092_v36 = vrot.slane %v4090_v62, 4  ;;  %v16824_v7 = vld [vmem:[%s15236_s9 + $0x1f8] sm:$0xf] }
 0x17e   : > { %v4091_v15 = vsel %vm15646_vm8, %v4089_v22, %v4090_v62  ;;  %v16786_v40 = vcombine.low %v4081_v42, %v4084_v33  ;;  %v4095_v22 = vrot.slane %v4093_v63, 4  ;;  %v16800_v42 = vld [vmem:[%s15236_s9 + $0x1e8] sm:$0xf]  ;;  %v16816_v62 = vld [vmem:[%s15236_s9 + $0x1ec] sm:$0xf]  ;;  %19101 = vst [vmem:[#allocation165_spill] sm:$0xff] %v16824_v7 }
 0x17f   : > { %19094 = vst [vmem:[#allocation158_spill] sm:$0xff] %v16784_v54  ;;  %v16792_v50 = vcombine.low %v4088_v8, %v4091_v15  ;;  %19099 = vst [vmem:[#allocation163_spill] sm:$0xff] %v16800_v42  ;;  %v4106_v33 = vrot.slane %v16816_v62, 5 }
 0x180   : > { %19095 = vst [vmem:[#allocation159_spill] sm:$0xff] %v16786_v40  ;;  %19100 = vst [vmem:[#allocation164_spill] sm:$0xff] %v16816_v62 }
 0x181   : > { %13299 = vmatmul.mubr.msk.bf16.gmra.mrb[80].mxu0 %vm1946_vm4, %v16741_v57  ;;  %v15010_v57 = vld [vmem:[%s15236_s9 + $0x78] sm:$0xf]  ;;  %19097 = vst [vmem:[#allocation161_spill] sm:$0xff] %v16792_v50 }
 0x182   : > { %12715 = vmatmul.mubr.msk.bf16.gmra.mrb[16].mxu1 %vm1946_vm4, %v16739_v56  ;;  %13302 = vmatprep.mubr.msk.bf16.mxu0 %vm1946_vm4, %v16747_v38  ;;  %v4100_v38 = vrot.slane %v16779_v37, 5  ;;  %v16790_v61 = vcombine.low %v15010_v57, %v15011_v14  ;;  %v16796_v37 = vld [vmem:[%s15236_s9 + $0x1e0] sm:$0xf]  ;;  %v4103_v57 = vrot.slane %v16800_v42, 5  ;;  %v15020_v42 = vld [vmem:[%s15236_s9 + $0x90] sm:$0xf] }
 0x183   : > { %12718 = vmatprep.mubr.msk.bf16.mxu1 %vm1946_vm4, %v16745_v20  ;;  %v4096_v20 = vrot.slane %v15012_v19, 5  ;;  %19098 = vst [vmem:[#allocation162_spill] sm:$0xff] %v16796_v37  ;;  %v10794_v56 = vrot.slane %v16796_v37, 9  ;;  %v4094_v19 = vsel %vm15646_vm8, %v4092_v36, %v4093_v63  ;;  %v15017_v63 = vld [vmem:[%s15236_s9 + $0x80] sm:$0xf] }
 0x184   : > { %19096 = vst [vmem:[#allocation160_spill] sm:$0xff] %v16790_v61  ;;  %v4102_v17 = vrot.slane %v4100_v38, 4  ;;  %v15018_v36 = vld [vmem:[%s15236_s9 + $0x84] sm:$0xf]  ;;  %v15021_v37 = vld [vmem:[%s15236_s9 + $0x1f0] sm:$0x1] }
 0x185   : > { %v4097_v14 = vsel %vm15646_vm8, %v4095_v22, %v4096_v20  ;;  %v4101_v8 = vsel %vm15646_vm8, %v10794_v56, %v4100_v38  ;;  %v16829_v20 = vcombine.low %v15017_v63, %v15018_v36  ;;  %v4105_v38 = vrot.slane %v4103_v57, 4  ;;  %v16845_v36 = vld [vmem:[%s15236_s9 + $0x1fc] sm:$0xf] }
 0x186   : > { %v4104_v15 = vsel %vm15646_vm8, %v4102_v17, %v4103_v57  ;;  %v16831_v22 = vcombine.low %v4094_v19, %v4097_v14  ;;  %v4108_v17 = vrot.slane %v4106_v33, 4  ;;  %19107 = vst [vmem:[#allocation171_spill] sm:$0xff] %v16845_v36  ;;  %v4116_v19 = vrot.slane %v16845_v36, 5  ;;  %v16864_v57 = vld [vmem:[%s15236_s9 + $0x200] sm:$0xf] }
 0x187   : > { %19102 = vst [vmem:[#allocation166_spill] sm:$0xff] %v16829_v20  ;;  %v16837_v56 = vcombine.low %v4101_v8, %v4104_v15  ;;  %19108 = vst [vmem:[#allocation172_spill] sm:$0xff] %v16864_v57  ;;  %v4119_v14 = vrot.slane %v16864_v57, 5  ;;  %v15028_v57 = vld [vmem:[%s15236_s9 + $0xa0] sm:$0xf] }
 0x188   : > { %19103 = vst [vmem:[#allocation167_spill] sm:$0xff] %v16831_v22 }
 0x189   : > { %13303 = vmatmul.mubr.msk.bf16.gmra.mrb[84].mxu0 %vm1946_vm4, %v16786_v40  ;;  %v15019_v40 = vld [vmem:[%s15236_s9 + $0x8c] sm:$0xf]  ;;  %19105 = vst [vmem:[#allocation169_spill] sm:$0xff] %v16837_v56 }
 0x18a   : > { %12719 = vmatmul.mubr.msk.bf16.gmra.mrb[20].mxu1 %vm1946_vm4, %v16784_v54  ;;  %13306 = vmatprep.mubr.msk.bf16.mxu0 %vm1946_vm4, %v16792_v50  ;;  %v4113_v50 = vrot.slane %v16824_v7, 5  ;;  %v16835_v62 = vcombine.low %v15019_v40, %v15020_v42  ;;  %v16841_v54 = vld [vmem:[%s15236_s9 + $0x1f4] sm:$0xf]  ;;  %v4107_v40 = vsel %vm15646_vm8, %v4105_v38, %v4106_v33  ;;  %v15027_v38 = vld [vmem:[%s15236_s9 + $0x98] sm:$0xf] }
 0x18b   : > { %12722 = vmatprep.mubr.msk.bf16.mxu1 %vm1946_vm4, %v16790_v61  ;;  %v4109_v61 = vrot.slane %v15021_v37, 5  ;;  %19106 = vst [vmem:[#allocation170_spill] sm:$0xff] %v16841_v54  ;;  %v10795_v7 = vrot.slane %v16841_v54, 9  ;;  %v11200_v37 = vld [vmem:[%s18615_s1 + $0xe] sm:$0x3]  ;;  %v4118_v54 = vrot.slane %v4116_v19, 4 }
 0x18c   : > { %19104 = vst [vmem:[#allocation168_spill] sm:$0xff] %v16835_v62  ;;  %v4115_v63 = vrot.slane %v4113_v50, 4  ;;  %v16876_v33 = vand.u32 %v11200_v37, %v15212_v4  ;;  %v16893_v37 = vld [vmem:[%s15236_s9 + $0x208] sm:$0xf] }
 0x18d   : > { %v4110_v42 = vsel %vm15646_vm8, %v4108_v17, %v4109_v61  ;;  %v4114_v8 = vsel %vm15646_vm8, %v10795_v7, %v4113_v50  ;;  %v15026_v61 = vld [vmem:[%s15236_s9 + $0x94] sm:$0xf]  ;;  %v15029_v50 = vld [vmem:[%s15236_s9 + $0xa4] sm:$0xf]  ;;  %19114 = vst [vmem:[#allocation178_spill] sm:$0xff] %v16893_v37 }
 0x18e   : > { %v4117_v15 = vsel %vm15646_vm8, %v4115_v63, %v4116_v19  ;;  %v16880_v17 = vcombine.low %v15026_v61, %v15027_v38  ;;  %v16882_v36 = vcombine.low %v4107_v40, %v4110_v42  ;;  %v16886_v7 = vcombine.low %v15028_v57, %v15029_v50  ;;  %13476 = vmatprep.subr.bf16.mxu0 %v16876_v33  ;;  %v16897_v42 = vld [vmem:[%s15236_s9 + $0x210] sm:$0xf] }
 0x18f   : > { %v16888_v63 = vcombine.low %v4114_v8, %v4117_v15  ;;  %v10796_v61 = vrot.slane %v16893_v37, 9  ;;  %19115 = vst [vmem:[#allocation179_spill] sm:$0xff] %v16897_v42  ;;  %v4129_v57 = vrot.slane %v16897_v42, 5  ;;  %v4132_v8 = vrot.slane %v16075_v5, 5  ;;  %v15034_v42 = vld [vmem:[%s15236_s9 + $0xac] sm:$0xf] }
 0x190   : > { %19110 = vst [vmem:[#allocation174_spill] sm:$0xff] %v16880_v17  ;;  %19111 = vst [vmem:[#allocation175_spill] sm:$0xff] %v16882_v36  ;;  %v4139_v50 = vrot.slane %v16106_v12, 5  ;;  %v10797_v12 = vrot.slane %v16096_v52, 9 }
 0x191   : > { %13307 = vmatmul.mubr.msk.bf16.gmra.mrb[88].mxu0 %vm1946_vm4, %v16831_v22  ;;  %v16872_v22 = vld [vmem:[%s15236_s9 + $0x20c] sm:$0xf]  ;;  %19112 = vst [vmem:[#allocation176_spill] sm:$0xff] %v16886_v7  ;;  %19113 = vst [vmem:[#allocation177_spill] sm:$0xff] %v16888_v63  ;;  %v4131_v5 = vrot.slane %v4129_v57, 4 }
 0x192   : > { %12723 = vmatmul.mubr.msk.bf16.gmra.mrb[24].mxu1 %vm1946_vm4, %v16829_v20  ;;  %13310 = vmatprep.mubr.msk.bf16.mxu0 %vm1946_vm4, %v16837_v56  ;;  %19109 = vst [vmem:[#allocation173_spill] sm:$0xff] %v16872_v22  ;;  %v4126_v56 = vrot.slane %v16872_v22, 5  ;;  %v15030_v20 = vld [vmem:[%s15236_s9 + $0x204] sm:$0x1] }
 0x193   : > { %12726 = vmatprep.mubr.msk.bf16.mxu1 %vm1946_vm4, %v16835_v62  ;;  %v4121_v62 = vrot.slane %v4119_v14, 4  ;;  %v4122_v22 = vrot.slane %v15030_v20, 5  ;;  %v4120_v20 = vsel %vm15646_vm8, %v4118_v54, %v4119_v14  ;;  %v15035_v54 = vld [vmem:[%s15236_s9 + $0xb4] sm:$0xf]  ;;  %v15036_v14 = vld [vmem:[%s15236_s9 + $0xb8] sm:$0xf]  ;;  %v4133_v52 = vsel %vm15646_vm8, %v4131_v5, %v4132_v8 }
 0x194   : > { %v4128_v40 = vrot.slane %v4126_v56, 4  ;;  %v4127_v15 = vsel %vm15646_vm8, %v10796_v61, %v4126_v56  ;;  %v15037_v56 = vld [vmem:[%s15236_s9 + $0x218] sm:$0x1]  ;;  %v15041_v5 = vld [vmem:[%s15236_s9 + $0xcc] sm:$0xf] }
 0x195   : > { %v4123_v19 = vsel %vm15646_vm8, %v4121_v62, %v4122_v22  ;;  %v4134_v22 = vrot.slane %v4132_v8, 4  ;;  %v4135_v61 = vrot.slane %v15037_v56, 5  ;;  %v15040_v8 = vld [vmem:[%s15236_s9 + $0xc8] sm:$0xf] }
 0x196   : > { %v4130_v38 = vsel %vm15646_vm8, %v4128_v40, %v4129_v57  ;;  %v16922_v37 = vcombine.low %v4120_v20, %v4123_v19  ;;  %v4141_v40 = vrot.slane %v4139_v50, 4  ;;  %v4140_v57 = vsel %vm15646_vm8, %v10797_v12, %v4139_v50 }
 0x197   : > { %v16928_v62 = vcombine.low %v4127_v15, %v4130_v38  ;;  %v4152_v19 = vrot.slane %v16167_v3, 5  ;;  %v15038_v15 = vld [vmem:[%s15236_s9 + $0xbc] sm:$0xf]  ;;  %v15039_v38 = vld [vmem:[%s15236_s9 + $0xc0] sm:$0xf]  ;;  %v16959_v56 = vcombine.low %v15040_v8, %v15041_v5  ;;  %v10798_v3 = vrot.slane %v16160_v0, 9 }
 0x198   : > { %19117 = vst [vmem:[#allocation181_spill] sm:$0xff] %v16922_v37  ;;  %v15045_v8 = vld [vmem:[%s15236_s9 + $0xe0] sm:$0xf] }
 0x199   : > { %13311 = vmatmul.mubr.msk.bf16.gmra.mrb[92].mxu0 %vm1946_vm4, %v16882_v36  ;;  %v15033_v36 = vld [vmem:[%s15236_s9 + $0xa8] sm:$0xf]  ;;  %19119 = vst [vmem:[#allocation183_spill] sm:$0xff] %v16928_v62  ;;  %19122 = vst [vmem:[#allocation186_spill] sm:$0xff] %v16959_v56  ;;  %v4154_v12 = vrot.slane %v4152_v19, 4 }
 0x19a   : > { %12727 = vmatmul.mubr.msk.bf16.gmra.mrb[28].mxu1 %vm1946_vm4, %v16880_v17  ;;  %13314 = vmatprep.mubr.msk.bf16.mxu0 %vm1946_vm4, %v16888_v63  ;;  %v16920_v63 = vcombine.low %v15033_v36, %v15034_v42  ;;  %v4142_v36 = vrot.slane %v16112_v53, 5  ;;  %v4136_v42 = vsel %vm15646_vm8, %v4134_v22, %v4135_v61  ;;  %v4145_v53 = vrot.slane %v16134_v46, 5 }
 0x19b   : > { %12730 = vmatprep.mubr.msk.bf16.mxu1 %vm1946_vm4, %v16886_v7  ;;  %v16926_v7 = vcombine.low %v15035_v54, %v15036_v14  ;;  %v16953_v54 = vcombine.low %v15038_v15, %v15039_v38  ;;  %v16955_v14 = vcombine.low %v4133_v52, %v4136_v42  ;;  %v4148_v61 = vrot.slane %v16137_v13, 5 }
 0x19c   : > { %19116 = vst [vmem:[#allocation180_spill] sm:$0xff] %v16920_v63  ;;  %v4143_v20 = vsel %vm15646_vm8, %v4141_v40, %v4142_v36  ;;  %v4144_v46 = vrot.slane %v4142_v36, 4  ;;  %v4147_v50 = vrot.slane %v4145_v53, 4  ;;  %v4155_v40 = vrot.slane %v16179_v24, 5 }
 0x19d   : > { %19118 = vst [vmem:[#allocation182_spill] sm:$0xff] %v16926_v7  ;;  %19120 = vst [vmem:[#allocation184_spill] sm:$0xff] %v16953_v54  ;;  %v16961_v22 = vcombine.low %v4140_v57, %v4143_v20  ;;  %v4158_v24 = vrot.slane %v16199_v59, 5  ;;  %v4153_v36 = vsel %vm15646_vm8, %v10798_v3, %v4152_v19  ;;  %v4165_v42 = vrot.slane %v16246_v23, 5  ;;  %v15042_v57 = vld [vmem:[%s15236_s9 + $0xd0] sm:$0xf] }
 0x19e   : > { %19121 = vst [vmem:[#allocation185_spill] sm:$0xff] %v16955_v14  ;;  %v4146_v0 = vsel %vm15646_vm8, %v4144_v46, %v4145_v53  ;;  %v4149_v13 = vsel %vm15646_vm8, %v4147_v50, %v4148_v61  ;;  %v4156_v52 = vsel %vm15646_vm8, %v4154_v12, %v4155_v40  ;;  %v15043_v20 = vld [vmem:[%s15236_s9 + $0xd4] sm:$0xf]  ;;  %v15044_v53 = vld [vmem:[%s15236_s9 + $0xdc] sm:$0xf]  ;;  %v4157_v59 = vrot.slane %v4155_v40, 4 }
 0x19f   : > { %19123 = vst [vmem:[#allocation187_spill] sm:$0xff] %v16961_v22  ;;  %v16986_v15 = vcombine.low %v15042_v57, %v15043_v20  ;;  %v16988_v38 = vcombine.low %v4146_v0, %v4149_v13  ;;  %v16992_v5 = vcombine.low %v15044_v53, %v15045_v8  ;;  %v16994_v46 = vcombine.low %v4153_v36, %v4156_v52  ;;  %v15046_v13 = vld [vmem:[%s15236_s9 + $0xe4] sm:$0xf]  ;;  %v15047_v36 = vld [vmem:[%s15236_s9 + $0xe8] sm:$0xf] }
 0x1a0   : > { %v4160_v19 = vrot.slane %v4158_v24, 4  ;;  %v4161_v50 = vrot.slane %v16206_v16, 5  ;;  %v10799_v23 = vrot.slane %v16233_v49, 9  ;;  %v4167_v61 = vrot.slane %v4165_v42, 4 }
 0x1a1   : > { %13315 = vmatmul.mubr.msk.bf16.gmra.mrb[96].mxu0 %vm1946_vm4, %v16922_v37  ;;  %19124 = vst [vmem:[#allocation188_spill] sm:$0xff] %v16986_v15  ;;  %19125 = vst [vmem:[#allocation189_spill] sm:$0xff] %v16988_v38  ;;  %v4168_v3 = vrot.slane %v16252_v10, 5  ;;  %v4159_v16 = vsel %vm15646_vm8, %v4157_v59, %v4158_v24  ;;  %v4171_v10 = vrot.slane %v16274_v44, 5  ;;  %v4178_v0 = vrot.slane %v16313_v30, 5 }
 0x1a2   : > { %12731 = vmatmul.mubr.msk.bf16.gmra.mrb[32].mxu1 %vm1946_vm4, %v16920_v63  ;;  %13318 = vmatprep.mubr.msk.bf16.mxu0 %vm1946_vm4, %v16928_v62  ;;  %19126 = vst [vmem:[#allocation190_spill] sm:$0xff] %v16992_v5  ;;  %19127 = vst [vmem:[#allocation191_spill] sm:$0xff] %v16994_v46  ;;  %v4162_v49 = vsel %vm15646_vm8, %v4160_v19, %v4161_v50  ;;  %v4166_v12 = vsel %vm15646_vm8, %v10799_v23, %v4165_v42  ;;  %v15048_v24 = vld [vmem:[%s15236_s9 + $0xf0] sm:$0xf]  ;;  %v4174_v8 = vrot.slane %v16277_v58, 5 }
 0x1a3   : > { %12734 = vmatprep.mubr.msk.bf16.mxu1 %vm1946_vm4, %v16926_v7  ;;  %v4169_v40 = vsel %vm15646_vm8, %v4167_v61, %v4168_v3  ;;  %v17019_v52 = vcombine.low %v15046_v13, %v15047_v36  ;;  %v17021_v57 = vcombine.low %v4159_v16, %v4162_v49  ;;  %v17025_v20 = vcombine.low %v15048_v24, %v16145_v27  ;;  %v15049_v61 = vld [vmem:[%s15236_s9 + $0xf8] sm:$0xf]  ;;  %v17066_v36 = vld [vmem:[%s15236_s9 + $0x284] sm:$0xf] }
 0x1a4   : > { %v17027_v53 = vcombine.low %v4166_v12, %v4169_v40  ;;  %v4170_v44 = vrot.slane %v4168_v3, 4  ;;  %v4173_v42 = vrot.slane %v4171_v10, 4  ;;  %v10800_v59 = vrot.slane %v16306_v43, 9 }
 0x1a5   : > { %19128 = vst [vmem:[#allocation192_spill] sm:$0xff] %v17019_v52  ;;  %19129 = vst [vmem:[#allocation193_spill] sm:$0xff] %v17021_v57  ;;  %v4180_v30 = vrot.slane %v4178_v0, 4  ;;  %v4181_v19 = vrot.slane %v16325_v32, 5  ;;  %v4184_v58 = vrot.slane %v16345_v11, 5  ;;  %v4191_v23 = vrot.slane %v16392_v31, 5 }
 0x1a6   : > { %19130 = vst [vmem:[#allocation194_spill] sm:$0xff] %v17025_v20  ;;  %19131 = vst [vmem:[#allocation195_spill] sm:$0xff] %v17027_v53  ;;  %v4172_v27 = vsel %vm15646_vm8, %v4170_v44, %v4171_v10  ;;  %v4175_v43 = vsel %vm15646_vm8, %v4173_v42, %v4174_v8  ;;  %v4179_v32 = vsel %vm15646_vm8, %v10800_v59, %v4178_v0  ;;  %v4187_v40 = vrot.slane %v16352_v6, 5  ;;  %v17087_v8 = vld [vmem:[%s15236_s9 + $0x280] sm:$0xf] }
 0x1a7   : > { %v4182_v50 = vsel %vm15646_vm8, %v4180_v30, %v4181_v19  ;;  %v17052_v3 = vcombine.low %v15049_v61, %v16174_v55  ;;  %v17054_v16 = vcombine.low %v4172_v27, %v4175_v43  ;;  %v17058_v49 = vcombine.low %v16209_v41, %v16213_v47  ;;  %v17090_v59 = vld [vmem:[%s15236_s9 + $0x288] sm:$0xf] }
 0x1a8   : > { %v17060_v10 = vcombine.low %v4179_v32, %v4182_v50  ;;  %v4183_v11 = vrot.slane %v4181_v19, 4  ;;  %v4186_v12 = vrot.slane %v4184_v58, 4  ;;  %v10801_v0 = vrot.slane %v16379_v51, 9 }
 0x1a9   : > { %13319 = vmatmul.mubr.msk.bf16.gmra.mrb[100].mxu0 %vm1946_vm4, %v16955_v14  ;;  %19132 = vst [vmem:[#allocation196_spill] sm:$0xff] %v17052_v3  ;;  %19133 = vst [vmem:[#allocation197_spill] sm:$0xff] %v17054_v16  ;;  %v4193_v13 = vrot.slane %v4191_v23, 4  ;;  %v4194_v55 = vrot.slane %v16398_v34, 5  ;;  %v4197_v6 = vrot.slane %v16420_v28, 5  ;;  %v6695_v42 = vrot.slane %v17066_v36, 5 }
 0x1aa   : > { %12735 = vmatmul.mubr.msk.bf16.gmra.mrb[36].mxu1 %vm1946_vm4, %v16953_v54  ;;  %13322 = vmatprep.mubr.msk.bf16.mxu0 %vm1946_vm4, %v16961_v22  ;;  %19134 = vst [vmem:[#allocation198_spill] sm:$0xff] %v17058_v49  ;;  %19135 = vst [vmem:[#allocation199_spill] sm:$0xff] %v17060_v10  ;;  %v4185_v41 = vsel %vm15646_vm8, %v4183_v11, %v4184_v58  ;;  %v4188_v47 = vsel %vm15646_vm8, %v4186_v12, %v4187_v40  ;;  %v4200_v50 = vrot.slane %v16423_v21, 5  ;;  %v17128_v40 = vld [vmem:[%s15236_s9 + $0x290] sm:$0x1] }
 0x1ab   : > { %12738 = vmatprep.mubr.msk.bf16.mxu1 %vm1946_vm4, %v16959_v56  ;;  %v4192_v24 = vsel %vm15646_vm8, %v10801_v0, %v4191_v23  ;;  %v4195_v44 = vsel %vm15646_vm8, %v4193_v13, %v4194_v55  ;;  %v17094_v30 = vcombine.low %v16217_v35, %v16242_v60  ;;  %v17096_v19 = vcombine.low %v4185_v41, %v4188_v47  ;;  %v17108_v35 = vld [vmem:[%s15236_s9 + $0x28c] sm:$0xf] }
 0x1ac   : > { %v17100_v27 = vcombine.low %v16282_v48, %v16288_v45  ;;  %v17102_v43 = vcombine.low %v4192_v24, %v4195_v44  ;;  %v4196_v58 = vrot.slane %v4194_v55, 4  ;;  %v4199_v32 = vrot.slane %v4197_v6, 4  ;;  %19140 = vst [vmem:[#allocation204_spill] sm:$0xff] %v17128_v40 }
 0x1ad   : > { %19136 = vst [vmem:[#allocation200_spill] sm:$0xff] %v17094_v30  ;;  %19137 = vst [vmem:[#allocation201_spill] sm:$0xff] %v17096_v19  ;;  %v11065_v23 = vrot.slane %v17087_v8, 9  ;;  %v6697_v61 = vrot.slane %v6695_v42, 4  ;;  %v6698_v11 = vrot.slane %v17090_v59, 5  ;;  %v6701_v48 = vrot.slane %v17108_v35, 5 }
 0x1ae   : > { %19138 = vst [vmem:[#allocation202_spill] sm:$0xff] %v17100_v27  ;;  %19139 = vst [vmem:[#allocation203_spill] sm:$0xff] %v17102_v43  ;;  %v4198_v21 = vsel %vm15646_vm8, %v4196_v58, %v4197_v6  ;;  %v4201_v60 = vsel %vm15646_vm8, %v4199_v32, %v4200_v50  ;;  %v17132_v0 = vcombine.low %v16292_v25, %v16320_v9  ;;  %v6704_v24 = vrot.slane %v17128_v40, 5  ;;  %v19145_v9 = vld [vmem:[#allocation92_spill] sm:$0xff]  ;;  %v19149_v58 = vld [vmem:[#allocation97_spill] sm:$0xff] }
 0x1af   : > { %v6696_v45 = vsel %vm15646_vm8, %v11065_v23, %v6695_v42  ;;  %v6699_v12 = vsel %vm15646_vm8, %v6697_v61, %v6698_v11  ;;  %v17134_v13 = vcombine.low %v4198_v21, %v4201_v60  ;;  %v17138_v55 = vcombine.low %v16355_v26, %v16359_v18  ;;  %v19148_v42 = vld [vmem:[#allocation98_spill] sm:$0xff]  ;;  %v19152_v61 = vld [vmem:[#allocation99_spill] sm:$0xff]  ;;  %v19154_v21 = vld [vmem:[#allocation104_spill] sm:$0xff] }
 0x1b0   : > { %19141 = vst [vmem:[#allocation205_spill] sm:$0xff] %v17132_v0  ;;  %v17140_v41 = vcombine.low %v6696_v45, %v6699_v12  ;;  %v6700_v47 = vrot.slane %v6698_v11, 4  ;;  %v6703_v6 = vrot.slane %v6701_v48, 4  ;;  %v17157_v18 = vcombine.low %v19145_v9, %v16388_v29  ;;  %v10931_v29 = vld [vmem:[%s18615_s1 + $0x6] sm:$0x3]  ;;  %v19151_v23 = vld [vmem:[#allocation102_spill] sm:$0xff] }
 0x1b1   : > { %13323 = vmatmul.mubr.msk.bf16.gmra.mrb[104].mxu0 %vm1946_vm4, %v16988_v38  ;;  %19142 = vst [vmem:[#allocation206_spill] sm:$0xff] %v17134_v13  ;;  %19143 = vst [vmem:[#allocation207_spill] sm:$0xff] %v17138_v55  ;;  %v17163_v32 = vcombine.low %v19149_v58, %v19148_v42  ;;  %v17177_v50 = vand.u32 %v10931_v29, %v15212_v4  ;;  %v17181_v11 = vcombine.low %v19152_v61, %v19151_v23  ;;  %v19155_v60 = vld [vmem:[#allocation103_spill] sm:$0xff]  ;;  %v19156_v45 = vld [vmem:[#allocation136_spill] sm:$0xff] }
 0x1b2   : > { %12739 = vmatmul.mubr.msk.bf16.gmra.mrb[40].mxu1 %vm1946_vm4, %v16986_v15  ;;  %13326 = vmatprep.mubr.msk.bf16.mxu0 %vm1946_vm4, %v16994_v46  ;;  %19144 = vst [vmem:[#allocation208_spill] sm:$0xff] %v17140_v41  ;;  %v6702_v26 = vsel %vm15646_vm8, %v6700_v47, %v6701_v48  ;;  %v6705_v25 = vsel %vm15646_vm8, %v6703_v6, %v6704_v24  ;;  %19146 = vst [vmem:[#allocation92_spill] sm:$0xff] %v17157_v18  ;;  %v19157_v12 = vld [vmem:[#allocation106_spill] sm:$0xff]  ;;  %v19158_v47 = vld [vmem:[#allocation105_spill] sm:$0xff] }
 0x1b3   : > { %12742 = vmatprep.mubr.msk.bf16.mxu1 %vm1946_vm4, %v16992_v5  ;;  %v17159_v44 = vcombine.low %v6702_v26, %v6705_v25  ;;  %19150 = vst [vmem:[#allocation98_spill] sm:$0xff] %v17163_v32  ;;  %19153 = vst [vmem:[#allocation97_spill] sm:$0xff] %v17181_v11  ;;  %12956 = vmatprep.subr.bf16.mxu1 %v17177_v50  ;;  %v17186_v48 = vcombine.low %v19155_v60, %v19154_v21  ;;  %v19159_v24 = vld [vmem:[#allocation112_spill] sm:$0xff]  ;;  %v19160_v26 = vld [vmem:[#allocation111_spill] sm:$0xff] }
 0x1b4   : > { %v17199_v6 = vcombine.low %v19158_v47, %v19157_v12  ;;  %v17203_v25 = vcombine.low %v19160_v26, %v19159_v24  ;;  %v19161_v9 = vld [vmem:[#allocation142_spill] sm:$0xff]  ;;  %v19163_v42 = vld [vmem:[#allocation115_spill] sm:$0xff]  ;;  %v19164_v58 = vld [vmem:[#allocation113_spill] sm:$0xff] }
 0x1b5   : > { %19147 = vst [vmem:[#allocation209_spill] sm:$0xff] %v17159_v44  ;;  %v17215_v29 = vcombine.low %v19164_v58, %v19163_v42  ;;  %v19165_v23 = vld [vmem:[#allocation116_spill] sm:$0xff]  ;;  %v19166_v61 = vld [vmem:[#allocation122_spill] sm:$0xff]  ;;  %v19170_v24 = vld [vmem:[#allocation123_spill] sm:$0xff] }
 0x1b6   : > { %v17219_v21 = vcombine.low %v19166_v61, %v19165_v23  ;;  %v19167_v60 = vld [vmem:[#allocation150_spill] sm:$0xff]  ;;  %v19168_v12 = vld [vmem:[#allocation152_spill] sm:$0xff]  ;;  %v19171_v42 = vld [vmem:[#allocation125_spill] sm:$0xff] }
 0x1b7   : > { %v19169_v47 = vld [vmem:[#allocation124_spill] sm:$0xff]  ;;  %v19172_v58 = vld [vmem:[#allocation130_spill] sm:$0xff]  ;;  %v19176_v40 = vld [vmem:[#allocation131_spill] sm:$0xff] }
 0x1b8   : > { %v17231_v26 = vcombine.low %v19170_v24, %v19169_v47  ;;  %v17235_v23 = vcombine.low %v19172_v58, %v19171_v42  ;;  %v19173_v61 = vld [vmem:[#allocation158_spill] sm:$0xff]  ;;  %v19177_v24 = vld [vmem:[#allocation133_spill] sm:$0xff] }
 0x1b9   : > { %13327 = vmatmul.mubr.msk.bf16.gmra.mrb[108].mxu0 %vm1946_vm4, %v17021_v57  ;;  %v19179_v58 = vld [vmem:[#allocation166_spill] sm:$0xff] }
 0x1ba   : > { %12743 = vmatmul.mubr.msk.bf16.gmra.mrb[44].mxu1 %vm1946_vm4, %v17019_v52  ;;  %13330 = vmatprep.mubr.msk.bf16.mxu0 %vm1946_vm4, %v17027_v53 }
 0x1bb   : > { %12746 = vmatprep.mubr.msk.bf16.mxu1 %vm1946_vm4, %v17025_v20 }
 0x1c1   : > { %13331 = vmatmul.mubr.msk.bf16.gmra.mrb[112].mxu0 %vm1946_vm4, %v17054_v16 }
 0x1c2   : > { %12747 = vmatmul.mubr.msk.bf16.gmra.mrb[48].mxu1 %vm1946_vm4, %v17052_v3  ;;  %13334 = vmatprep.mubr.msk.bf16.mxu0 %vm1946_vm4, %v17060_v10 }
 0x1c3   : > { %12750 = vmatprep.mubr.msk.bf16.mxu1 %vm1946_vm4, %v17058_v49 }
 0x1c9   : > { %13335 = vmatmul.mubr.msk.bf16.gmra.mrb[116].mxu0 %vm1946_vm4, %v17096_v19 }
 0x1ca   : > { %12751 = vmatmul.mubr.msk.bf16.gmra.mrb[52].mxu1 %vm1946_vm4, %v17094_v30  ;;  %13338 = vmatprep.mubr.msk.bf16.mxu0 %vm1946_vm4, %v17102_v43 }
 0x1cb   : > { %12754 = vmatprep.mubr.msk.bf16.mxu1 %vm1946_vm4, %v17100_v27 }
 0x1d1   : > { %13339 = vmatmul.mubr.msk.bf16.gmra.mrb[120].mxu0 %vm1946_vm4, %v17134_v13 }
 0x1d2   : > { %12755 = vmatmul.mubr.msk.bf16.gmra.mrb[56].mxu1 %vm1946_vm4, %v17132_v0  ;;  %13342 = vmatprep.mubr.msk.bf16.mxu0 %vm1946_vm4, %v17140_v41  ;;  %v19175_v41 = vld [vmem:[#allocation132_spill] sm:$0xff] }
 0x1d3   : > { %12758 = vmatprep.mubr.msk.bf16.mxu1 %vm1946_vm4, %v17138_v55  ;;  %v17247_v47 = vcombine.low %v19176_v40, %v19175_v41  ;;  %v19183_v41 = vld [vmem:[#allocation141_spill] sm:$0xff] }
 0x1d9   : > { %13343 = vmatmul.mubr.msk.bf16.gmra.mrb[124].mxu0 %vm1946_vm4, %v17159_v44  ;;  %v19174_v44 = vld [vmem:[#allocation160_spill] sm:$0xff] }
 0x1da   : > { %12759 = vmatmul.mubr.msk.bf16.gmra.mrb[60].mxu1 %vm1946_vm4, %v17157_v18  ;;  %13348 = vmatprep.mubr.msk.bf16.mxu0 %vm1946_vm4, %v16610_v1 }
 0x1db   : > { %12762 = vmatprep.mubr.msk.bf16.mxu1 %vm1946_vm4, %v17163_v32 }
 0x1e1   : > { %13349 = vmatmul.mubr.msk.bf16.vlgmr.msra.gmra.mrb[0].mxu0 %vm1946_vm4, %v16649_v39  ;;  %v19218_v39 = vld [vmem:[#allocation117_spill] sm:$0xff] }
 0x1e2   : > { %12763 = vmatmul.mubr.msk.bf16.gmra.mrb[64].mxu1 %vm1946_vm4, %v17181_v11  ;;  %13477 = vmatpush3.bf16.msra.mxu0 %v16876_v33  ;;  %v19162_v33 = vld [vmem:[#allocation144_spill] sm:$0xff]  ;;  %v3791_v1 = vrot.slane %v19218_v39, 5 }
 0x1e3   : > { %12766 = vmatprep.mubr.msk.bf16.mxu1 %vm1946_vm4, %v17186_v48  ;;  %13352 = vmatprep.mubr.msk.bf16.mxu0 %vm1946_vm4, %v19156_v45 }
 0x1e9   : > { %13353 = vmatmul.mubr.msk.bf16.gmra.mrb[4].mxu0 %vm1946_vm4, %v19161_v9  ;;  %v19189_v9 = vld [vmem:[#allocation154_spill] sm:$0xff] }
 0x1ea   : > { %12767 = vmatmul.mubr.msk.bf16.gmra.mrb[68].mxu1 %vm1946_vm4, %v17199_v6  ;;  %13356 = vmatprep.mubr.msk.bf16.mxu0 %vm1946_vm4, %v19162_v33  ;;  %v19184_v33 = vld [vmem:[#allocation146_spill] sm:$0xff] }
 0x1eb   : > { %12770 = vmatprep.mubr.msk.bf16.mxu1 %vm1946_vm4, %v17203_v25 }
 0x1f1   : > { %13357 = vmatmul.mubr.msk.bf16.gmra.mrb[8].mxu0 %vm1946_vm4, %v19167_v60  ;;  %v19182_v60 = vld [vmem:[#allocation139_spill] sm:$0xff] }
 0x1f2   : > { %12771 = vmatmul.mubr.msk.bf16.gmra.mrb[72].mxu1 %vm1946_vm4, %v17215_v29  ;;  %13360 = vmatprep.mubr.msk.bf16.mxu0 %vm1946_vm4, %v19168_v12  ;;  %v19178_v12 = vld [vmem:[#allocation138_spill] sm:$0xff] }
 0x1f3   : > { %12774 = vmatprep.mubr.msk.bf16.mxu1 %vm1946_vm4, %v17219_v21  ;;  %v17251_v42 = vcombine.low %v19178_v12, %v19177_v24  ;;  %v17267_v12 = vcombine.low %v19184_v33, %v19183_v41  ;;  %v19185_v24 = vld [vmem:[#allocation176_spill] sm:$0xff] }
 0x1f4   : > { %v19190_v41 = vld [vmem:[#allocation156_spill] sm:$0xff] }
 0x1f9   : > { %13361 = vmatmul.mubr.msk.bf16.gmra.mrb[12].mxu0 %vm1946_vm4, %v19173_v61  ;;  %v19180_v61 = vld [vmem:[#allocation168_spill] sm:$0xff] }
 0x1fa   : > { %12775 = vmatmul.mubr.msk.bf16.gmra.mrb[76].mxu1 %vm1946_vm4, %v17231_v26  ;;  %13364 = vmatprep.mubr.msk.bf16.mxu0 %vm1946_vm4, %v19174_v44  ;;  %v19181_v44 = vld [vmem:[#allocation140_spill] sm:$0xff] }
 0x1fb   : > { %12778 = vmatprep.mubr.msk.bf16.mxu1 %vm1946_vm4, %v17235_v23  ;;  %v17263_v40 = vcombine.low %v19182_v60, %v19181_v44  ;;  %v19188_v60 = vld [vmem:[#allocation149_spill] sm:$0xff] }
 0x1fc   : > { %v17283_v33 = vcombine.low %v19189_v9, %v19188_v60  ;;  %v19195_v60 = vld [vmem:[#allocation163_spill] sm:$0xff] }
 0x201   : > { %13365 = vmatmul.mubr.msk.bf16.gmra.mrb[16].mxu0 %vm1946_vm4, %v19179_v58  ;;  %v19187_v58 = vld [vmem:[#allocation147_spill] sm:$0xff] }
 0x202   : > { %12779 = vmatmul.mubr.msk.bf16.gmra.mrb[80].mxu1 %vm1946_vm4, %v17247_v47  ;;  %13368 = vmatprep.mubr.msk.bf16.mxu0 %vm1946_vm4, %v19180_v61  ;;  %v19186_v61 = vld [vmem:[#allocation148_spill] sm:$0xff] }
 0x203   : > { %12782 = vmatprep.mubr.msk.bf16.mxu1 %vm1946_vm4, %v17251_v42  ;;  %v17279_v44 = vcombine.low %v19187_v58, %v19186_v61  ;;  %v19192_v58 = vld [vmem:[#allocation157_spill] sm:$0xff] }
 0x209   : > { %13369 = vmatmul.mubr.msk.bf16.gmra.mrb[20].mxu0 %vm1946_vm4, %v16880_v17  ;;  %v19193_v17 = vld [vmem:[#allocation162_spill] sm:$0xff] }
 0x20a   : > { %12783 = vmatmul.mubr.msk.bf16.gmra.mrb[84].mxu1 %vm1946_vm4, %v17263_v40  ;;  %13372 = vmatprep.mubr.msk.bf16.mxu0 %vm1946_vm4, %v19185_v24  ;;  %v19191_v24 = vld [vmem:[#allocation155_spill] sm:$0xff]  ;;  %v17299_v9 = vcombine.low %v19193_v17, %v19192_v58  ;;  %v19196_v17 = vld [vmem:[#allocation165_spill] sm:$0xff]  ;;  %v19197_v58 = vld [vmem:[#allocation170_spill] sm:$0xff] }
 0x20b   : > { %12786 = vmatprep.mubr.msk.bf16.mxu1 %vm1946_vm4, %v17267_v12  ;;  %v17295_v61 = vcombine.low %v19191_v24, %v19190_v41  ;;  %v19194_v24 = vld [vmem:[#allocation164_spill] sm:$0xff] }
 0x20c   : > { %v17311_v41 = vcombine.low %v19195_v60, %v19194_v24  ;;  %v19202_v60 = vld [vmem:[#allocation173_spill] sm:$0xff] }
 0x211   : > { %13373 = vmatmul.mubr.msk.bf16.gmra.mrb[24].mxu0 %vm1946_vm4, %v16920_v63 }
 0x212   : > { %12787 = vmatmul.mubr.msk.bf16.gmra.mrb[88].mxu1 %vm1946_vm4, %v17279_v44  ;;  %13376 = vmatprep.mubr.msk.bf16.mxu0 %vm1946_vm4, %v16926_v7  ;;  %v17315_v7 = vcombine.low %v19197_v58, %v19196_v17  ;;  %v19203_v17 = vld [vmem:[#allocation178_spill] sm:$0xff] }
 0x213   : > { %12790 = vmatprep.mubr.msk.bf16.mxu1 %vm1946_vm4, %v17283_v33  ;;  %v17331_v58 = vcombine.low %v19203_v17, %v19202_v60  ;;  %v15051_v60 = vld [vmem:[%s15236_s9 + $0x21c] sm:$0xf]  ;;  %v15052_v17 = vld [vmem:[%s15236_s9 + $0x220] sm:$0xf] }
 0x214   : > { %19198 = vst [vmem:[#allocation102_spill] sm:$0xff] %v17315_v7 }
 0x215   : > { %19204 = vst [vmem:[#allocation104_spill] sm:$0xff] %v17331_v58 }
 0x219   : > { %13377 = vmatmul.mubr.msk.bf16.gmra.mrb[28].mxu0 %vm1946_vm4, %v16953_v54  ;;  %v19200_v54 = vld [vmem:[#allocation171_spill] sm:$0xff] }
 0x21a   : > { %12791 = vmatmul.mubr.msk.bf16.gmra.mrb[92].mxu1 %vm1946_vm4, %v17295_v61  ;;  %13380 = vmatprep.mubr.msk.bf16.mxu0 %vm1946_vm4, %v16959_v56  ;;  %v19199_v56 = vld [vmem:[#allocation172_spill] sm:$0xff] }
 0x21b   : > { %12794 = vmatprep.mubr.msk.bf16.mxu1 %vm1946_vm4, %v17299_v9  ;;  %v17327_v24 = vcombine.low %v19200_v54, %v19199_v56  ;;  %v15050_v54 = vld [vmem:[%s15236_s9 + $0x214] sm:$0xf]  ;;  %v19205_v56 = vld [vmem:[#allocation179_spill] sm:$0xff] }
 0x21d   : > { %19201 = vst [vmem:[#allocation99_spill] sm:$0xff] %v17327_v24 }
 0x221   : > { %13381 = vmatmul.mubr.msk.bf16.gmra.mrb[32].mxu0 %vm1946_vm4, %v16986_v15  ;;  %v17347_v15 = vcombine.low %v15051_v60, %v15052_v17  ;;  %v15055_v60 = vld [vmem:[%s15236_s9 + $0x230] sm:$0xf]  ;;  %v15056_v17 = vld [vmem:[%s15236_s9 + $0x234] sm:$0xf] }
 0x222   : > { %12795 = vmatmul.mubr.msk.bf16.gmra.mrb[96].mxu1 %vm1946_vm4, %v17311_v41  ;;  %13384 = vmatprep.mubr.msk.bf16.mxu0 %vm1946_vm4, %v16992_v5  ;;  %v17343_v5 = vcombine.low %v19205_v56, %v15050_v54  ;;  %v15053_v54 = vld [vmem:[%s15236_s9 + $0x224] sm:$0xf]  ;;  %v15054_v56 = vld [vmem:[%s15236_s9 + $0x228] sm:$0xf] }
 0x223   : > { %12798 = vmatprep.mubr.msk.bf16.mxu1 %vm1946_vm4, %v17315_v7  ;;  %19207 = vst [vmem:[#allocation106_spill] sm:$0xff] %v17347_v15 }
 0x224   : > { %19206 = vst [vmem:[#allocation103_spill] sm:$0xff] %v17343_v5 }
 0x229   : > { %13385 = vmatmul.mubr.msk.bf16.gmra.mrb[36].mxu0 %vm1946_vm4, %v17019_v52  ;;  %v17363_v52 = vcombine.low %v15055_v60, %v15056_v17  ;;  %v15059_v60 = vld [vmem:[%s15236_s9 + $0x244] sm:$0xf]  ;;  %v15060_v17 = vld [vmem:[%s15236_s9 + $0x248] sm:$0xf] }
 0x22a   : > { %12799 = vmatmul.mubr.msk.bf16.gmra.mrb[100].mxu1 %vm1946_vm4, %v17327_v24  ;;  %13388 = vmatprep.mubr.msk.bf16.mxu0 %vm1946_vm4, %v17025_v20  ;;  %v17359_v20 = vcombine.low %v15053_v54, %v15054_v56  ;;  %v15057_v54 = vld [vmem:[%s15236_s9 + $0x238] sm:$0xf]  ;;  %v15058_v56 = vld [vmem:[%s15236_s9 + $0x23c] sm:$0xf] }
 0x22b   : > { %12802 = vmatprep.mubr.msk.bf16.mxu1 %vm1946_vm4, %v17331_v58  ;;  %19209 = vst [vmem:[#allocation112_spill] sm:$0xff] %v17363_v52 }
 0x22c   : > { %19208 = vst [vmem:[#allocation105_spill] sm:$0xff] %v17359_v20 }
 0x231   : > { %13389 = vmatmul.mubr.msk.bf16.gmra.mrb[40].mxu0 %vm1946_vm4, %v17052_v3  ;;  %v17379_v3 = vcombine.low %v15059_v60, %v15060_v17  ;;  %v15063_v60 = vld [vmem:[%s15236_s9 + $0x258] sm:$0xf]  ;;  %v15064_v17 = vld [vmem:[%s15236_s9 + $0x25c] sm:$0xf] }
 0x232   : > { %12803 = vmatmul.mubr.msk.bf16.gmra.mrb[104].mxu1 %vm1946_vm4, %v17343_v5  ;;  %13392 = vmatprep.mubr.msk.bf16.mxu0 %vm1946_vm4, %v17058_v49  ;;  %v17375_v49 = vcombine.low %v15057_v54, %v15058_v56  ;;  %v15061_v54 = vld [vmem:[%s15236_s9 + $0x24c] sm:$0xf]  ;;  %v15062_v56 = vld [vmem:[%s15236_s9 + $0x250] sm:$0xf] }
 0x233   : > { %12806 = vmatprep.mubr.msk.bf16.mxu1 %vm1946_vm4, %v17347_v15  ;;  %19211 = vst [vmem:[#allocation115_spill] sm:$0xff] %v17379_v3 }
 0x234   : > { %19210 = vst [vmem:[#allocation111_spill] sm:$0xff] %v17375_v49 }
 0x239   : > { %13393 = vmatmul.mubr.msk.bf16.gmra.mrb[44].mxu0 %vm1946_vm4, %v17094_v30  ;;  %v17395_v30 = vcombine.low %v15063_v60, %v15064_v17  ;;  %v17412_v60 = vcombine.low %v16379_v51, %v16392_v31  ;;  %v19217_v17 = vld [vmem:[#allocation107_spill] sm:$0xff] }
 0x23a   : > { %12807 = vmatmul.mubr.msk.bf16.gmra.mrb[108].mxu1 %vm1946_vm4, %v17359_v20  ;;  %13396 = vmatprep.mubr.msk.bf16.mxu0 %vm1946_vm4, %v17100_v27  ;;  %v17391_v27 = vcombine.low %v15061_v54, %v15062_v56  ;;  %v15065_v54 = vld [vmem:[%s15236_s9 + $0x260] sm:$0xf]  ;;  %v15066_v56 = vld [vmem:[%s15236_s9 + $0x264] sm:$0xf]  ;;  %v10770_v45 = vrot.slane %v19217_v17, 9 }
 0x23b   : > { %12810 = vmatprep.mubr.msk.bf16.mxu1 %vm1946_vm4, %v17363_v52  ;;  %19213 = vst [vmem:[#allocation116_spill] sm:$0xff] %v17395_v30  ;;  %v17408_v63 = vcombine.low %v15065_v54, %v15066_v56  ;;  %19216 = vst [vmem:[#allocation124_spill] sm:$0xff] %v17412_v60  ;;  %v17431_v54 = vcombine.low %v16398_v34, %v16420_v28  ;;  %v15067_v56 = vld [vmem:[%s15236_s9 + $0x10] sm:$0x1] }
 0x23c   : > { %19212 = vst [vmem:[#allocation113_spill] sm:$0xff] %v17391_v27  ;;  %v3797_v17 = vrot.slane %v15067_v56, 5  ;;  %v19231_v56 = vld [vmem:[#allocation54_spill] sm:$0xff] }
 0x23d   : > { %19215 = vst [vmem:[#allocation122_spill] sm:$0xff] %v17408_v63  ;;  %19220 = vst [vmem:[#allocation123_spill] sm:$0xff] %v17431_v54 }
 0x241   : > { %13397 = vmatmul.mubr.msk.bf16.gmra.mrb[48].mxu0 %vm1946_vm4, %v17132_v0 }
 0x242   : > { %12811 = vmatmul.mubr.msk.bf16.gmra.mrb[112].mxu1 %vm1946_vm4, %v17375_v49  ;;  %13400 = vmatprep.mubr.msk.bf16.mxu0 %vm1946_vm4, %v17138_v55  ;;  %v19214_v55 = vld [vmem:[#allocation108_spill] sm:$0xff] }
 0x243   : > { %12814 = vmatprep.mubr.msk.bf16.mxu1 %vm1946_vm4, %v17379_v3  ;;  %v3788_v0 = vrot.slane %v19214_v55, 5  ;;  %v19219_v55 = vld [vmem:[#allocation118_spill] sm:$0xff] }
 0x244   : > { %v3794_v51 = vrot.slane %v19219_v55, 5  ;;  %v19227_v55 = vld [vmem:[#allocation46_spill] sm:$0xff] }
 0x245   : > { %v3789_v31 = vsel %vm15646_vm8, %v10770_v45, %v3788_v0  ;;  %v19226_v45 = vld [vmem:[#allocation44_spill] sm:$0xff] }
 0x246   : > { %v3796_v13 = vrot.slane %v3794_v51, 4 }
 0x248   : > { %v3798_v34 = vsel %vm15646_vm8, %v3796_v13, %v3797_v17  ;;  %v19222_v13 = vld [vmem:[#allocation5_spill] sm:$0xff] }
 0x249   : > { %13401 = vmatmul.mubr.msk.bf16.gmra.mrb[52].mxu0 %vm1946_vm4, %v17157_v18  ;;  %v3790_v18 = vrot.slane %v3788_v0, 4  ;;  %v19232_v17 = vld [vmem:[#allocation57_spill] sm:$0xff] }
 0x24a   : > { %12815 = vmatmul.mubr.msk.bf16.gmra.mrb[116].mxu1 %vm1946_vm4, %v17391_v27  ;;  %13404 = vmatprep.mubr.msk.bf16.mxu0 %vm1946_vm4, %v17163_v32 }
 0x24b   : > { %12818 = vmatprep.mubr.msk.bf16.mxu1 %vm1946_vm4, %v17395_v30  ;;  %v3792_v39 = vsel %vm15646_vm8, %v3790_v18, %v3791_v1 }
 0x24c   : > { %v10803_v32 = vcombine.low %v3789_v31, %v3792_v39  ;;  %v19229_v31 = vld [vmem:[#allocation51_spill] sm:$0xff]  ;;  %v19230_v39 = vld [vmem:[#allocation52_spill] sm:$0xff] }
 0x251   : > { %13405 = vmatmul.mubr.msk.bf16.gmra.mrb[56].mxu0 %vm1946_vm4, %v17181_v11  ;;  %v3793_v11 = vrot.slane %v3791_v1, 4  ;;  %v11268_v1 = vld [vmem:[%s18615_s1 + $0x10] sm:$0x3] }
 0x252   : > { %12819 = vmatmul.mubr.msk.bf16.gmra.mrb[120].mxu1 %vm1946_vm4, %v17408_v63  ;;  %13408 = vmatprep.mubr.msk.bf16.mxu0 %vm1946_vm4, %v17186_v48  ;;  %v17449_v0 = vand.u32 %v11268_v1, %v15212_v4  ;;  %v19223_v4 = vld [vmem:[#allocation39_spill] sm:$0xff]  ;;  %v19235_v1 = vld [vmem:[#allocation62_spill] sm:$0xff] }
 0x253   : > { %12822 = vmatprep.mubr.msk.bf16.mxu1 %vm1946_vm4, %v17412_v60  ;;  %v3795_v28 = vsel %vm15646_vm8, %v3793_v11, %v3794_v51  ;;  %v19224_v11 = vld [vmem:[#allocation40_spill] sm:$0xff]  ;;  %v19228_v51 = vld [vmem:[#allocation49_spill] sm:$0xff] }
 0x254   : > { %v10804_v18 = vcombine.low %v3795_v28, %v3798_v34  ;;  %13606 = vmatprep.subr.bf16.mxu0 %v17449_v0  ;;  %v19233_v28 = vld [vmem:[#allocation59_spill] sm:$0xff]  ;;  %v19234_v34 = vld [vmem:[#allocation60_spill] sm:$0xff] }
 0x259   : > { %13409 = vmatmul.mubr.msk.bf16.gmra.mrb[60].mxu0 %vm1946_vm4, %v17199_v6 }
 0x25a   : > { %12823 = vmatmul.mubr.msk.bf16.gmra.mrb[124].mxu1 %vm1946_vm4, %v17431_v54  ;;  %13412 = vmatprep.mubr.msk.bf16.mxu0 %vm1946_vm4, %v17203_v25 }
 0x25b   : > { %12828 = vmatprep.mubr.msk.bf16.mxu1 %vm1946_vm4, %v10803_v32  ;;  %v19221_v32 = vld [vmem:[#allocation38_spill] sm:$0xff] }
 0x261   : > { %13413 = vmatmul.mubr.msk.bf16.gmra.mrb[64].mxu0 %vm1946_vm4, %v17215_v29 }
 0x262   : > { %12829 = vmatmul.mubr.msk.bf16.vlgmr.msra.gmra.mrb[0].mxu1 %vm1946_vm4, %v10804_v18  ;;  %13416 = vmatprep.mubr.msk.bf16.mxu0 %vm1946_vm4, %v17219_v21  ;;  %v19236_v18 = vld [vmem:[#allocation65_spill] sm:$0xff] }
 0x263   : > { %12957 = vmatpush3.bf16.msra.mxu1 %v17177_v50  ;;  %12832 = vmatprep.mubr.msk.bf16.mxu1 %vm1946_vm4, %v19221_v32  ;;  %v19225_v50 = vld [vmem:[#allocation43_spill] sm:$0xff] }
 0x264   : > { %13736 = vmatprep.subr.bf16.mxu1 %v19222_v13  ;;  %v19237_v32 = vld [vmem:[#allocation67_spill] sm:$0xff] }
 0x269   : > { %13417 = vmatmul.mubr.msk.bf16.gmra.mrb[68].mxu0 %vm1946_vm4, %v17231_v26 }
 0x26a   : > { %12833 = vmatmul.mubr.msk.bf16.gmra.mrb[4].mxu1 %vm1946_vm4, %v19223_v4  ;;  %13420 = vmatprep.mubr.msk.bf16.mxu0 %vm1946_vm4, %v17235_v23  ;;  %v19238_v4 = vld [vmem:[#allocation68_spill] sm:$0xff] }
 0x26b   : > { %12836 = vmatprep.mubr.msk.bf16.mxu1 %vm1946_vm4, %v19224_v11 }
 0x271   : > { %13421 = vmatmul.mubr.msk.bf16.gmra.mrb[72].mxu0 %vm1946_vm4, %v17247_v47 }
 0x272   : > { %12837 = vmatmul.mubr.msk.bf16.gmra.mrb[8].mxu1 %vm1946_vm4, %v19225_v50  ;;  %13424 = vmatprep.mubr.msk.bf16.mxu0 %vm1946_vm4, %v17251_v42 }
 0x273   : > { %12840 = vmatprep.mubr.msk.bf16.mxu1 %vm1946_vm4, %v19226_v45 }
 0x279   : > { %13425 = vmatmul.mubr.msk.bf16.gmra.mrb[76].mxu0 %vm1946_vm4, %v17263_v40 }
 0x27a   : > { %12841 = vmatmul.mubr.msk.bf16.gmra.mrb[12].mxu1 %vm1946_vm4, %v19227_v55  ;;  %13428 = vmatprep.mubr.msk.bf16.mxu0 %vm1946_vm4, %v17267_v12 }
 0x27b   : > { %12844 = vmatprep.mubr.msk.bf16.mxu1 %vm1946_vm4, %v19228_v51 }
 0x281   : > { %13429 = vmatmul.mubr.msk.bf16.gmra.mrb[80].mxu0 %vm1946_vm4, %v17279_v44 }
 0x282   : > { %12845 = vmatmul.mubr.msk.bf16.gmra.mrb[16].mxu1 %vm1946_vm4, %v19229_v31  ;;  %13432 = vmatprep.mubr.msk.bf16.mxu0 %vm1946_vm4, %v17283_v33 }
 0x283   : > { %12848 = vmatprep.mubr.msk.bf16.mxu1 %vm1946_vm4, %v19230_v39 }
 0x289   : > { %13433 = vmatmul.mubr.msk.bf16.gmra.mrb[84].mxu0 %vm1946_vm4, %v17295_v61 }
 0x28a   : > { %12849 = vmatmul.mubr.msk.bf16.gmra.mrb[20].mxu1 %vm1946_vm4, %v19231_v56  ;;  %13436 = vmatprep.mubr.msk.bf16.mxu0 %vm1946_vm4, %v17299_v9 }
 0x28b   : > { %12852 = vmatprep.mubr.msk.bf16.mxu1 %vm1946_vm4, %v19232_v17 }
 0x291   : > { %13437 = vmatmul.mubr.msk.bf16.gmra.mrb[88].mxu0 %vm1946_vm4, %v17311_v41 }
 0x292   : > { %12853 = vmatmul.mubr.msk.bf16.gmra.mrb[24].mxu1 %vm1946_vm4, %v19233_v28  ;;  %13440 = vmatprep.mubr.msk.bf16.mxu0 %vm1946_vm4, %v17315_v7  ;;  %v17861_v7 = vld [vmem:[%s15236_s9 + $0x2a4] sm:$0x1] }
 0x293   : > { %12856 = vmatprep.mubr.msk.bf16.mxu1 %vm1946_vm4, %v19234_v34 }
 0x299   : > { %13441 = vmatmul.mubr.msk.bf16.gmra.mrb[92].mxu0 %vm1946_vm4, %v17327_v24  ;;  %v19240_v24 = vld [vmem:[#allocation73_spill] sm:$0xff] }
 0x29a   : > { %12857 = vmatmul.mubr.msk.bf16.gmra.mrb[28].mxu1 %vm1946_vm4, %v19235_v1  ;;  %13444 = vmatprep.mubr.msk.bf16.mxu0 %vm1946_vm4, %v17331_v58  ;;  %v19241_v58 = vld [vmem:[#allocation75_spill] sm:$0xff] }
 0x29b   : > { %12860 = vmatprep.mubr.msk.bf16.mxu1 %vm1946_vm4, %v19236_v18 }
 0x2a1   : > { %13445 = vmatmul.mubr.msk.bf16.gmra.mrb[96].mxu0 %vm1946_vm4, %v17343_v5  ;;  %v19242_v5 = vld [vmem:[#allocation76_spill] sm:$0xff] }
 0x2a2   : > { %12861 = vmatmul.mubr.msk.bf16.gmra.mrb[32].mxu1 %vm1946_vm4, %v19237_v32  ;;  %13448 = vmatprep.mubr.msk.bf16.mxu0 %vm1946_vm4, %v17347_v15  ;;  %v19246_v15 = vld [vmem:[#allocation84_spill] sm:$0xff] }
 0x2a3   : > { %12864 = vmatprep.mubr.msk.bf16.mxu1 %vm1946_vm4, %v19238_v4 }
 0x2a9   : > { %13449 = vmatmul.mubr.msk.bf16.gmra.mrb[100].mxu0 %vm1946_vm4, %v17359_v20  ;;  %v19243_v20 = vld [vmem:[#allocation78_spill] sm:$0xff] }
 0x2aa   : > { %12865 = vmatmul.mubr.msk.bf16.gmra.mrb[36].mxu1 %vm1946_vm4, %v19239_v2  ;;  %13452 = vmatprep.mubr.msk.bf16.mxu0 %vm1946_vm4, %v17363_v52  ;;  %v19244_v52 = vld [vmem:[#allocation81_spill] sm:$0xff] }
 0x2ab   : > { %12868 = vmatprep.mubr.msk.bf16.mxu1 %vm1946_vm4, %v19240_v24 }
 0x2b1   : > { %13453 = vmatmul.mubr.msk.bf16.gmra.mrb[104].mxu0 %vm1946_vm4, %v17375_v49  ;;  %v19245_v49 = vld [vmem:[#allocation83_spill] sm:$0xff] }
 0x2b2   : > { %12869 = vmatmul.mubr.msk.bf16.gmra.mrb[40].mxu1 %vm1946_vm4, %v19241_v58  ;;  %13456 = vmatprep.mubr.msk.bf16.mxu0 %vm1946_vm4, %v17379_v3  ;;  %v19248_v3 = vld [vmem:[#allocation86_spill] sm:$0xff] }
 0x2b3   : > { %12872 = vmatprep.mubr.msk.bf16.mxu1 %vm1946_vm4, %v19242_v5  ;;  %v19260_v5 = vld [vmem:[#allocation114_spill] sm:$0xff] }
 0x2b9   : > { %13457 = vmatmul.mubr.msk.bf16.gmra.mrb[108].mxu0 %vm1946_vm4, %v17391_v27  ;;  %v17559_v27 = vcombine.low %v17087_v8, %v17066_v36 }
 0x2ba   : > { %12873 = vmatmul.mubr.msk.bf16.gmra.mrb[44].mxu1 %vm1946_vm4, %v19243_v20  ;;  %13460 = vmatprep.mubr.msk.bf16.mxu0 %vm1946_vm4, %v17395_v30  ;;  %v19249_v30 = vld [vmem:[#allocation89_spill] sm:$0xff]  ;;  %v19255_v20 = vld [vmem:[#allocation95_spill] sm:$0xff] }
 0x2bb   : > { %12876 = vmatprep.mubr.msk.bf16.mxu1 %vm1946_vm4, %v19244_v52  ;;  %19247 = vst [vmem:[#allocation125_spill] sm:$0xff] %v17559_v27 }
 0x2c1   : > { %13461 = vmatmul.mubr.msk.bf16.gmra.mrb[112].mxu0 %vm1946_vm4, %v17408_v63  ;;  %v17570_v63 = vld [vmem:[%s15236_s9 + $0x294] sm:$0xf] }
 0x2c2   : > { %12877 = vmatmul.mubr.msk.bf16.gmra.mrb[48].mxu1 %vm1946_vm4, %v19245_v49  ;;  %13464 = vmatprep.mubr.msk.bf16.mxu0 %vm1946_vm4, %v17412_v60  ;;  %19250 = vst [vmem:[#allocation130_spill] sm:$0xff] %v17570_v63  ;;  %v17577_v60 = vcombine.low %v17090_v59, %v17108_v35  ;;  %v19253_v49 = vld [vmem:[#allocation91_spill] sm:$0xff] }
 0x2c3   : > { %12880 = vmatprep.mubr.msk.bf16.mxu1 %vm1946_vm4, %v19246_v15  ;;  %v17573_v15 = vld [vmem:[%s15236_s9 + $0x298] sm:$0xf] }
 0x2c4   : > { %19251 = vst [vmem:[#allocation132_spill] sm:$0xff] %v17573_v15  ;;  %19252 = vst [vmem:[#allocation131_spill] sm:$0xff] %v17577_v60 }
 0x2c9   : > { %13465 = vmatmul.mubr.msk.bf16.gmra.mrb[116].mxu0 %vm1946_vm4, %v17431_v54  ;;  %v19254_v54 = vld [vmem:[#allocation93_spill] sm:$0xff] }
 0x2ca   : > { %12881 = vmatmul.mubr.msk.bf16.gmra.mrb[52].mxu1 %vm1946_vm4, %v19248_v3  ;;  %13468 = vmatprep.mubr.msk.bf16.mxu0 %vm1946_vm4, %v17559_v27  ;;  %v11134_v3 = vcombine.low %v17570_v63, %v17573_v15  ;;  %v17589_v27 = vld [vmem:[%s15236_s9 + $0x29c] sm:$0xf] }
 0x2cb   : > { %12884 = vmatprep.mubr.msk.bf16.mxu1 %vm1946_vm4, %v19249_v30  ;;  %v17592_v30 = vld [vmem:[%s15236_s9 + $0x2a0] sm:$0xf]  ;;  %s11597_s9 = sshll.u32 %s15178_s16, 13  ;;  %s18573_s16 = scalar_lea.sflag [#allocation3], %s161_s4 }
 0x2cc   : > { %v11135_v52 = vcombine.low %v17589_v27, %v17592_v30  ;;  %s18565_s19 = scalar_lea.hbm %s18617_s3, %s11597_s9 }
 0x2d1   : > { %13469 = vmatmul.mubr.msk.bf16.gmra.mrb[120].mxu0 %vm1946_vm4, %v17577_v60  ;;  %v19257_v60 = vld [vmem:[#allocation7_spill] sm:$0xff] }
 0x2d2   : > { %12885 = vmatmul.mubr.msk.bf16.gmra.mrb[56].mxu1 %vm1946_vm4, %v19253_v49  ;;  %13472 = vmatprep.mubr.msk.bf16.mxu0 %vm1946_vm4, %v11134_v3  ;;  %v19256_v49 = vld [vmem:[#allocation101_spill] sm:$0xff]  ;;  %v19259_v3 = vld [vmem:[#allocation8_spill] sm:$0xff] }
 0x2d3   : > { %12888 = vmatprep.mubr.msk.bf16.mxu1 %vm1946_vm4, %v19254_v54  ;;  %v19258_v54 = vld [vmem:[#allocation110_spill] sm:$0xff] }
 0x2d9   : > { %13473 = vmatmul.mubr.msk.bf16.gmra.mrb[124].mxu0 %vm1946_vm4, %v11135_v52  ;;  %v19262_v52 = vld [vmem:[#allocation119_spill] sm:$0xff] }
 0x2da   : > { %12889 = vmatmul.mubr.msk.bf16.gmra.mrb[60].mxu1 %vm1946_vm4, %v19255_v20  ;;  %13478 = vmatprep.mubr.msk.bf16.mxu0 %vm1946_vm4, %v19257_v60  ;;  %v19261_v20 = vld [vmem:[#allocation9_spill] sm:$0xff] }
 0x2db   : > { %12892 = vmatprep.mubr.msk.bf16.mxu1 %vm1946_vm4, %v19256_v49  ;;  %v19263_v49 = vld [vmem:[#allocation10_spill] sm:$0xff]  ;;  %v19264_v60 = vld [vmem:[#allocation121_spill] sm:$0xff] }
 0x2e1   : > { %13479 = vmatmul.mubr.msk.bf16.vlgmr.msra.gmra.mrb[0].mxu0 %vm1946_vm4, %v19259_v3  ;;  %v19266_v3 = vld [vmem:[#allocation127_spill] sm:$0xff] }
 0x2e2   : > { %12893 = vmatmul.mubr.msk.bf16.gmra.mrb[64].mxu1 %vm1946_vm4, %v19258_v54  ;;  %13607 = vmatpush3.bf16.msra.mxu0 %v17449_v0  ;;  %v19265_v54 = vld [vmem:[#allocation11_spill] sm:$0xff]  ;;  %v19267_v0 = vld [vmem:[#allocation12_spill] sm:$0xff] }
 0x2e3   : > { %12896 = vmatprep.mubr.msk.bf16.mxu1 %vm1946_vm4, %v19260_v5  ;;  %13482 = vmatprep.mubr.msk.bf16.mxu0 %vm1946_vm4, %v19261_v20  ;;  %v19268_v5 = vld [vmem:[#allocation129_spill] sm:$0xff] }
 0x2e4   : > { %v19269_v20 = vld [vmem:[#allocation13_spill] sm:$0xff] }
 0x2e9   : > { %13483 = vmatmul.mubr.msk.bf16.gmra.mrb[4].mxu0 %vm1946_vm4, %v19263_v49  ;;  %v19271_v49 = vld [vmem:[#allocation14_spill] sm:$0xff] }
 0x2ea   : > { %12897 = vmatmul.mubr.msk.bf16.gmra.mrb[68].mxu1 %vm1946_vm4, %v19262_v52  ;;  %13486 = vmatprep.mubr.msk.bf16.mxu0 %vm1946_vm4, %v19265_v54  ;;  %v19270_v52 = vld [vmem:[#allocation135_spill] sm:$0xff] }
 0x2eb   : > { %12900 = vmatprep.mubr.msk.bf16.mxu1 %vm1946_vm4, %v19264_v60  ;;  %v19272_v60 = vld [vmem:[#allocation137_spill] sm:$0xff]  ;;  %v19273_v54 = vld [vmem:[#allocation15_spill] sm:$0xff] }
 0x2f1   : > { %13487 = vmatmul.mubr.msk.bf16.gmra.mrb[8].mxu0 %vm1946_vm4, %v19267_v0  ;;  %v19275_v0 = vld [vmem:[#allocation16_spill] sm:$0xff] }
 0x2f2   : > { %12901 = vmatmul.mubr.msk.bf16.gmra.mrb[72].mxu1 %vm1946_vm4, %v19266_v3  ;;  %13490 = vmatprep.mubr.msk.bf16.mxu0 %vm1946_vm4, %v19269_v20  ;;  %v19274_v3 = vld [vmem:[#allocation143_spill] sm:$0xff]  ;;  %v19277_v20 = vld [vmem:[#allocation17_spill] sm:$0xff] }
 0x2f3   : > { %12904 = vmatprep.mubr.msk.bf16.mxu1 %vm1946_vm4, %v19268_v5  ;;  %v19276_v5 = vld [vmem:[#allocation145_spill] sm:$0xff] }
 0x2f9   : > { %13491 = vmatmul.mubr.msk.bf16.gmra.mrb[12].mxu0 %vm1946_vm4, %v19271_v49  ;;  %v19279_v49 = vld [vmem:[#allocation18_spill] sm:$0xff] }
 0x2fa   : > { %12905 = vmatmul.mubr.msk.bf16.gmra.mrb[76].mxu1 %vm1946_vm4, %v19270_v52  ;;  %13494 = vmatprep.mubr.msk.bf16.mxu0 %vm1946_vm4, %v19273_v54  ;;  %v19278_v52 = vld [vmem:[#allocation151_spill] sm:$0xff] }
 0x2fb   : > { %12908 = vmatprep.mubr.msk.bf16.mxu1 %vm1946_vm4, %v19272_v60  ;;  %v19280_v60 = vld [vmem:[#allocation153_spill] sm:$0xff]  ;;  %v19281_v54 = vld [vmem:[#allocation19_spill] sm:$0xff] }
 0x301   : > { %13495 = vmatmul.mubr.msk.bf16.gmra.mrb[16].mxu0 %vm1946_vm4, %v19275_v0  ;;  %v19283_v0 = vld [vmem:[#allocation20_spill] sm:$0xff] }
 0x302   : > { %12909 = vmatmul.mubr.msk.bf16.gmra.mrb[80].mxu1 %vm1946_vm4, %v19274_v3  ;;  %13498 = vmatprep.mubr.msk.bf16.mxu0 %vm1946_vm4, %v19277_v20  ;;  %v19282_v3 = vld [vmem:[#allocation159_spill] sm:$0xff]  ;;  %v19285_v20 = vld [vmem:[#allocation21_spill] sm:$0xff] }
 0x303   : > { %12912 = vmatprep.mubr.msk.bf16.mxu1 %vm1946_vm4, %v19276_v5  ;;  %v19284_v5 = vld [vmem:[#allocation161_spill] sm:$0xff] }
 0x309   : > { %13499 = vmatmul.mubr.msk.bf16.gmra.mrb[20].mxu0 %vm1946_vm4, %v19279_v49  ;;  %v19287_v49 = vld [vmem:[#allocation22_spill] sm:$0xff] }
 0x30a   : > { %12913 = vmatmul.mubr.msk.bf16.gmra.mrb[84].mxu1 %vm1946_vm4, %v19278_v52  ;;  %13502 = vmatprep.mubr.msk.bf16.mxu0 %vm1946_vm4, %v19281_v54  ;;  %v19286_v52 = vld [vmem:[#allocation167_spill] sm:$0xff] }
 0x30b   : > { %12916 = vmatprep.mubr.msk.bf16.mxu1 %vm1946_vm4, %v19280_v60  ;;  %v19288_v60 = vld [vmem:[#allocation169_spill] sm:$0xff]  ;;  %v19289_v54 = vld [vmem:[#allocation23_spill] sm:$0xff] }
 0x311   : > { %13503 = vmatmul.mubr.msk.bf16.gmra.mrb[24].mxu0 %vm1946_vm4, %v19283_v0  ;;  %v19291_v0 = vld [vmem:[#allocation24_spill] sm:$0xff] }
 0x312   : > { %12917 = vmatmul.mubr.msk.bf16.gmra.mrb[88].mxu1 %vm1946_vm4, %v19282_v3  ;;  %13506 = vmatprep.mubr.msk.bf16.mxu0 %vm1946_vm4, %v19285_v20  ;;  %v19290_v3 = vld [vmem:[#allocation175_spill] sm:$0xff]  ;;  %v19293_v20 = vld [vmem:[#allocation25_spill] sm:$0xff] }
 0x313   : > { %12920 = vmatprep.mubr.msk.bf16.mxu1 %vm1946_vm4, %v19284_v5  ;;  %v19292_v5 = vld [vmem:[#allocation177_spill] sm:$0xff] }
 0x319   : > { %13507 = vmatmul.mubr.msk.bf16.gmra.mrb[28].mxu0 %vm1946_vm4, %v19287_v49  ;;  %v19294_v49 = vld [vmem:[#allocation26_spill] sm:$0xff] }
 0x31a   : > { %12921 = vmatmul.mubr.msk.bf16.gmra.mrb[92].mxu1 %vm1946_vm4, %v19286_v52  ;;  %13510 = vmatprep.mubr.msk.bf16.mxu0 %vm1946_vm4, %v19289_v54  ;;  %v19295_v54 = vld [vmem:[#allocation27_spill] sm:$0xff] }
 0x31b   : > { %12924 = vmatprep.mubr.msk.bf16.mxu1 %vm1946_vm4, %v19288_v60  ;;  %v19335_v60 = vld [vmem:[#allocation71_spill] sm:$0xff] }
 0x321   : > { %13511 = vmatmul.mubr.msk.bf16.gmra.mrb[32].mxu0 %vm1946_vm4, %v19291_v0  ;;  %v19296_v0 = vld [vmem:[#allocation28_spill] sm:$0xff] }
 0x322   : > { %12925 = vmatmul.mubr.msk.bf16.gmra.mrb[96].mxu1 %vm1946_vm4, %v19290_v3  ;;  %13514 = vmatprep.mubr.msk.bf16.mxu0 %vm1946_vm4, %v19293_v20  ;;  %v19297_v20 = vld [vmem:[#allocation29_spill] sm:$0xff] }
 0x323   : > { %12928 = vmatprep.mubr.msk.bf16.mxu1 %vm1946_vm4, %v19292_v5  ;;  %v19331_v5 = vld [vmem:[#allocation66_spill] sm:$0xff]  ;;  %v19333_v3 = vld [vmem:[#allocation69_spill] sm:$0xff] }
 0x329   : > { %13515 = vmatmul.mubr.msk.bf16.gmra.mrb[36].mxu0 %vm1946_vm4, %v19294_v49  ;;  %v19298_v49 = vld [vmem:[#allocation30_spill] sm:$0xff] }
 0x32a   : > { %12929 = vmatmul.mubr.msk.bf16.gmra.mrb[100].mxu1 %vm1946_vm4, %v16922_v37  ;;  %13518 = vmatprep.mubr.msk.bf16.mxu0 %vm1946_vm4, %v19295_v54  ;;  %v19299_v54 = vld [vmem:[#allocation31_spill] sm:$0xff]  ;;  %v19329_v37 = vld [vmem:[#allocation64_spill] sm:$0xff] }
 0x32b   : > { %12932 = vmatprep.mubr.msk.bf16.mxu1 %vm1946_vm4, %v16928_v62  ;;  %v19327_v62 = vld [vmem:[#allocation63_spill] sm:$0xff] }
 0x331   : > { %13519 = vmatmul.mubr.msk.bf16.gmra.mrb[40].mxu0 %vm1946_vm4, %v19296_v0  ;;  %v19300_v0 = vld [vmem:[#allocation32_spill] sm:$0xff] }
 0x332   : > { %12933 = vmatmul.mubr.msk.bf16.gmra.mrb[104].mxu1 %vm1946_vm4, %v16955_v14  ;;  %13522 = vmatprep.mubr.msk.bf16.mxu0 %vm1946_vm4, %v19297_v20  ;;  %v19301_v20 = vld [vmem:[#allocation33_spill] sm:$0xff] }
 0x333   : > { %12936 = vmatprep.mubr.msk.bf16.mxu1 %vm1946_vm4, %v16961_v22  ;;  %v19323_v22 = vld [vmem:[#allocation58_spill] sm:$0xff]  ;;  %v19325_v14 = vld [vmem:[#allocation61_spill] sm:$0xff] }
 0x339   : > { %13523 = vmatmul.mubr.msk.bf16.gmra.mrb[44].mxu0 %vm1946_vm4, %v19298_v49  ;;  %v19302_v49 = vld [vmem:[#allocation34_spill] sm:$0xff] }
 0x33a   : > { %12937 = vmatmul.mubr.msk.bf16.gmra.mrb[108].mxu1 %vm1946_vm4, %v16988_v38  ;;  %13526 = vmatprep.mubr.msk.bf16.mxu0 %vm1946_vm4, %v19299_v54  ;;  %v19303_v54 = vld [vmem:[#allocation36_spill] sm:$0xff] }
 0x33b   : > { %12940 = vmatprep.mubr.msk.bf16.mxu1 %vm1946_vm4, %v16994_v46  ;;  %v19318_v46 = vld [vmem:[#allocation142_spill] sm:$0xff]  ;;  %v19321_v38 = vld [vmem:[#allocation56_spill] sm:$0xff] }
 0x341   : > { %13527 = vmatmul.mubr.msk.bf16.gmra.mrb[48].mxu0 %vm1946_vm4, %v19300_v0  ;;  %v19304_v0 = vld [vmem:[#allocation37_spill] sm:$0xff] }
 0x342   : > { %12941 = vmatmul.mubr.msk.bf16.gmra.mrb[112].mxu1 %vm1946_vm4, %v17021_v57  ;;  %13530 = vmatprep.mubr.msk.bf16.mxu0 %vm1946_vm4, %v19301_v20  ;;  %v19305_v20 = vld [vmem:[#allocation41_spill] sm:$0xff]  ;;  %v19316_v57 = vld [vmem:[#allocation136_spill] sm:$0xff] }
 0x343   : > { %12944 = vmatprep.mubr.msk.bf16.mxu1 %vm1946_vm4, %v17027_v53  ;;  %v19314_v53 = vld [vmem:[#allocation134_spill] sm:$0xff] }
 0x349   : > { %13531 = vmatmul.mubr.msk.bf16.gmra.mrb[52].mxu0 %vm1946_vm4, %v19302_v49  ;;  %v19307_v49 = vld [vmem:[#allocation42_spill] sm:$0xff] }
 0x34a   : > { %12945 = vmatmul.mubr.msk.bf16.gmra.mrb[116].mxu1 %vm1946_vm4, %v17054_v16  ;;  %13534 = vmatprep.mubr.msk.bf16.mxu0 %vm1946_vm4, %v19303_v54  ;;  %v19306_v16 = vld [vmem:[#allocation206_spill] sm:$0xff]  ;;  %v19309_v54 = vld [vmem:[#allocation45_spill] sm:$0xff] }
 0x34b   : > { %12948 = vmatprep.mubr.msk.bf16.mxu1 %vm1946_vm4, %v17060_v10  ;;  %v19308_v10 = vld [vmem:[#allocation120_spill] sm:$0xff] }
 0x351   : > { %13535 = vmatmul.mubr.msk.bf16.gmra.mrb[56].mxu0 %vm1946_vm4, %v19304_v0  ;;  %v19311_v0 = vld [vmem:[#allocation47_spill] sm:$0xff] }
 0x352   : > { %12949 = vmatmul.mubr.msk.bf16.gmra.mrb[120].mxu1 %vm1946_vm4, %v17096_v19  ;;  %13538 = vmatprep.mubr.msk.bf16.mxu0 %vm1946_vm4, %v19305_v20  ;;  %v19310_v19 = vld [vmem:[#allocation126_spill] sm:$0xff] }
 0x353   : > { %12952 = vmatprep.mubr.msk.bf16.mxu1 %vm1946_vm4, %v17102_v43  ;;  %v19312_v43 = vld [vmem:[#allocation128_spill] sm:$0xff] }
 0x359   : > { %13539 = vmatmul.mubr.msk.bf16.gmra.mrb[60].mxu0 %vm1946_vm4, %v19307_v49 }
 0x35a   : > { %12953 = vmatmul.mubr.msk.bf16.gmra.mrb[124].mxu1 %vm1946_vm4, %v19306_v16  ;;  %13542 = vmatprep.mubr.msk.bf16.mxu0 %vm1946_vm4, %v19309_v54  ;;  %v19313_v16 = vld [vmem:[#allocation48_spill] sm:$0xff] }
 0x35b   : > { %12958 = vmatprep.mubr.msk.bf16.mxu1 %vm1946_vm4, %v19308_v10  ;;  %v19315_v10 = vld [vmem:[#allocation50_spill] sm:$0xff] }
 0x361   : > { %13543 = vmatmul.mubr.msk.bf16.gmra.mrb[64].mxu0 %vm1946_vm4, %v19311_v0 }
 0x362   : > { %12959 = vmatmul.mubr.msk.bf16.vlgmr.msra.gmra.mrb[0].mxu1 %vm1946_vm4, %v19310_v19  ;;  %13546 = vmatprep.mubr.msk.bf16.mxu0 %vm1946_vm4, %v19313_v16  ;;  %v19317_v19 = vld [vmem:[#allocation53_spill] sm:$0xff] }
 0x363   : > { %13737 = vmatpush3.bf16.msra.mxu1 %v19222_v13  ;;  %12962 = vmatprep.mubr.msk.bf16.mxu1 %vm1946_vm4, %v19312_v43  ;;  %v19319_v13 = vld [vmem:[#allocation55_spill] sm:$0xff]  ;;  %v19320_v43 = vld [vmem:[#allocation144_spill] sm:$0xff] }
 0x369   : > { %13547 = vmatmul.mubr.msk.bf16.gmra.mrb[68].mxu0 %vm1946_vm4, %v19315_v10 }
 0x36a   : > { %12963 = vmatmul.mubr.msk.bf16.gmra.mrb[4].mxu1 %vm1946_vm4, %v19314_v53  ;;  %13550 = vmatprep.mubr.msk.bf16.mxu0 %vm1946_vm4, %v19317_v19  ;;  %v19322_v53 = vld [vmem:[#allocation150_spill] sm:$0xff] }
 0x36b   : > { %12966 = vmatprep.mubr.msk.bf16.mxu1 %vm1946_vm4, %v19316_v57  ;;  %v19324_v57 = vld [vmem:[#allocation152_spill] sm:$0xff] }
 0x371   : > { %13551 = vmatmul.mubr.msk.bf16.gmra.mrb[72].mxu0 %vm1946_vm4, %v19319_v13  ;;  %v19356_v13 = vld [vmem:[#allocation198_spill] sm:$0xff] }
 0x372   : > { %12967 = vmatmul.mubr.msk.bf16.gmra.mrb[8].mxu1 %vm1946_vm4, %v19318_v46  ;;  %13554 = vmatprep.mubr.msk.bf16.mxu0 %vm1946_vm4, %v19321_v38  ;;  %v19326_v46 = vld [vmem:[#allocation158_spill] sm:$0xff]  ;;  %v5992_v38 = vshrl.u32 %v17108_v35, 16 }
 0x373   : > { %12970 = vmatprep.mubr.msk.bf16.mxu1 %vm1946_vm4, %v19320_v43  ;;  %v19328_v43 = vld [vmem:[#allocation160_spill] sm:$0xff] }
 0x379   : > { %13555 = vmatmul.mubr.msk.bf16.gmra.mrb[76].mxu0 %vm1946_vm4, %v19323_v22  ;;  %v19354_v22 = vld [vmem:[#allocation196_spill] sm:$0xff] }
 0x37a   : > { %12971 = vmatmul.mubr.msk.bf16.gmra.mrb[12].mxu1 %vm1946_vm4, %v19322_v53  ;;  %13558 = vmatprep.mubr.msk.bf16.mxu0 %vm1946_vm4, %v19325_v14  ;;  %v19330_v53 = vld [vmem:[#allocation166_spill] sm:$0xff] }
 0x37b   : > { %12974 = vmatprep.mubr.msk.bf16.mxu1 %vm1946_vm4, %v19324_v57  ;;  %v19332_v57 = vld [vmem:[#allocation168_spill] sm:$0xff] }
 0x381   : > { %13559 = vmatmul.mubr.msk.bf16.gmra.mrb[80].mxu0 %vm1946_vm4, %v19327_v62 }
 0x382   : > { %12975 = vmatmul.mubr.msk.bf16.gmra.mrb[16].mxu1 %vm1946_vm4, %v19326_v46  ;;  %13562 = vmatprep.mubr.msk.bf16.mxu0 %vm1946_vm4, %v19329_v37  ;;  %v19334_v46 = vld [vmem:[#allocation174_spill] sm:$0xff]  ;;  %v19337_v37 = vld [vmem:[#allocation72_spill] sm:$0xff] }
 0x383   : > { %12978 = vmatprep.mubr.msk.bf16.mxu1 %vm1946_vm4, %v19328_v43  ;;  %v19336_v43 = vld [vmem:[#allocation176_spill] sm:$0xff] }
 0x389   : > { %13563 = vmatmul.mubr.msk.bf16.gmra.mrb[84].mxu0 %vm1946_vm4, %v19331_v5  ;;  %v19339_v5 = vld [vmem:[#allocation74_spill] sm:$0xff] }
 0x38a   : > { %12979 = vmatmul.mubr.msk.bf16.gmra.mrb[20].mxu1 %vm1946_vm4, %v19330_v53  ;;  %13566 = vmatprep.mubr.msk.bf16.mxu0 %vm1946_vm4, %v19333_v3  ;;  %v19338_v53 = vld [vmem:[#allocation180_spill] sm:$0xff]  ;;  %v19341_v3 = vld [vmem:[#allocation77_spill] sm:$0xff] }
 0x38b   : > { %12982 = vmatprep.mubr.msk.bf16.mxu1 %vm1946_vm4, %v19332_v57  ;;  %v19340_v57 = vld [vmem:[#allocation182_spill] sm:$0xff] }
 0x391   : > { %13567 = vmatmul.mubr.msk.bf16.gmra.mrb[88].mxu0 %vm1946_vm4, %v19335_v60  ;;  %v19343_v60 = vld [vmem:[#allocation79_spill] sm:$0xff] }
 0x392   : > { %12983 = vmatmul.mubr.msk.bf16.gmra.mrb[24].mxu1 %vm1946_vm4, %v19334_v46  ;;  %13570 = vmatprep.mubr.msk.bf16.mxu0 %vm1946_vm4, %v19337_v37  ;;  %v19342_v46 = vld [vmem:[#allocation184_spill] sm:$0xff] }
 0x393   : > { %12986 = vmatprep.mubr.msk.bf16.mxu1 %vm1946_vm4, %v19336_v43  ;;  %v19344_v43 = vld [vmem:[#allocation186_spill] sm:$0xff]  ;;  %v19345_v37 = vld [vmem:[#allocation80_spill] sm:$0xff] }
 0x399   : > { %13571 = vmatmul.mubr.msk.bf16.gmra.mrb[92].mxu0 %vm1946_vm4, %v19339_v5  ;;  %v19347_v5 = vld [vmem:[#allocation82_spill] sm:$0xff] }
 0x39a   : > { %12987 = vmatmul.mubr.msk.bf16.gmra.mrb[28].mxu1 %vm1946_vm4, %v19338_v53  ;;  %13574 = vmatprep.mubr.msk.bf16.mxu0 %vm1946_vm4, %v19341_v3  ;;  %v19346_v53 = vld [vmem:[#allocation188_spill] sm:$0xff]  ;;  %v19349_v3 = vld [vmem:[#allocation85_spill] sm:$0xff] }
 0x39b   : > { %12990 = vmatprep.mubr.msk.bf16.mxu1 %vm1946_vm4, %v19340_v57  ;;  %v19348_v57 = vld [vmem:[#allocation190_spill] sm:$0xff] }
 0x3a1   : > { %13575 = vmatmul.mubr.msk.bf16.gmra.mrb[96].mxu0 %vm1946_vm4, %v19343_v60  ;;  %v19351_v60 = vld [vmem:[#allocation87_spill] sm:$0xff] }
 0x3a2   : > { %12991 = vmatmul.mubr.msk.bf16.gmra.mrb[32].mxu1 %vm1946_vm4, %v19342_v46  ;;  %13578 = vmatprep.mubr.msk.bf16.mxu0 %vm1946_vm4, %v19345_v37  ;;  %v19350_v46 = vld [vmem:[#allocation192_spill] sm:$0xff] }
 0x3a3   : > { %12994 = vmatprep.mubr.msk.bf16.mxu1 %vm1946_vm4, %v19344_v43  ;;  %v19352_v43 = vld [vmem:[#allocation194_spill] sm:$0xff]  ;;  %v19353_v37 = vld [vmem:[#allocation88_spill] sm:$0xff] }
 0x3a9   : > { %13579 = vmatmul.mubr.msk.bf16.gmra.mrb[100].mxu0 %vm1946_vm4, %v19347_v5  ;;  %v5962_v5 = vshll.u32 %v17087_v8, 16 }
 0x3aa   : > { %12995 = vmatmul.mubr.msk.bf16.gmra.mrb[36].mxu1 %vm1946_vm4, %v19346_v53  ;;  %13582 = vmatprep.mubr.msk.bf16.mxu0 %vm1946_vm4, %v19349_v3  ;;  %v5959_v53 = vshrl.u32 %v17087_v8, 16  ;;  %v5972_v3 = vshrl.u32 %v17066_v36, 16  ;;  %v5988_v8 = vshll.u32 %v17108_v35, 16  ;;  %v5994_v35 = vrot.slane %v5992_v38, 4 }
 0x3ab   : > { %12998 = vmatprep.mubr.msk.bf16.mxu1 %vm1946_vm4, %v19348_v57  ;;  %v5968_v57 = vshll.u32 %v17066_v36, 16  ;;  %v5964_v62 = vrot.slane %v5962_v5, 5  ;;  %v19357_v5 = vld [vmem:[#allocation94_spill] sm:$0xff] }
 0x3ac   : > { %v5961_v52 = vrot.slane %v5959_v53, 4  ;;  %v5974_v14 = vrot.slane %v5972_v3, 4  ;;  %v8094_v53 = vshll.u32 %v17570_v63, 16  ;;  %v5990_v10 = vrot.slane %v5988_v8, 5  ;;  %v19360_v8 = vld [vmem:[#allocation204_spill] sm:$0xff] }
 0x3ad   : > { %v5998_v38 = vshll.u32 %v19360_v8, 16 }
 0x3ae   : > { %v5965_v36 = vor.u32 %v5964_v62, %v5961_v52  ;;  %v8096_v54 = vrot.slane %v8094_v53, 5  ;;  %v8114_v62 = vshrl.u32 %v17589_v27, 16  ;;  %v19358_v52 = vld [vmem:[#allocation200_spill] sm:$0xff] }
 0x3b0   : > { %v5966_v16 = vrot.slane %v5965_v36, 4  ;;  %v19361_v36 = vld [vmem:[#allocation202_spill] sm:$0xff] }
 0x3b1   : > { %13583 = vmatmul.mubr.msk.bf16.gmra.mrb[104].mxu0 %vm1946_vm4, %v19351_v60  ;;  %v19355_v60 = vld [vmem:[#allocation90_spill] sm:$0xff] }
 0x3b2   : > { %12999 = vmatmul.mubr.msk.bf16.gmra.mrb[40].mxu1 %vm1946_vm4, %v19350_v46  ;;  %13586 = vmatprep.mubr.msk.bf16.mxu0 %vm1946_vm4, %v19353_v37  ;;  %v5970_v46 = vrot.slane %v5968_v57, 5  ;;  %v5982_v37 = vshrl.u32 %v17090_v59, 16  ;;  %v8104_v57 = vshrl.u32 %v17573_v15, 16 }
 0x3b3   : > { %13002 = vmatprep.mubr.msk.bf16.mxu1 %vm1946_vm4, %v19352_v43  ;;  %v5978_v43 = vshll.u32 %v17090_v59, 16  ;;  %v8100_v59 = vshll.u32 %v17573_v15, 16  ;;  %v6000_v15 = vrot.slane %v5998_v38, 5 }
 0x3b4   : > { %v5975_v3 = vor.u32 %v5974_v14, %v5970_v46  ;;  %v5984_v19 = vrot.slane %v5982_v37, 4  ;;  %v8124_v14 = vshrl.u32 %v17592_v30, 16  ;;  %v5995_v37 = vor.u32 %v5994_v35, %v5990_v10 }
 0x3b5   : > { %v8102_v49 = vrot.slane %v8100_v59, 5  ;;  %v5971_v53 = vsel %vm15249_vm5, %v5966_v16, %v5970_v46  ;;  %v8110_v59 = vshll.u32 %v17589_v27, 16 }
 0x3b6   : > { %v5976_v0 = vrot.slane %v5975_v3, 4  ;;  %v19362_v3 = vld [vmem:[#allocation100_spill] sm:$0xff]  ;;  %v8126_v24 = vrot.slane %v8124_v14, 4 }
 0x3b7   : > { %v8112_v20 = vrot.slane %v8110_v59, 5 }
 0x3b9   : > { %13587 = vmatmul.mubr.msk.bf16.gmra.mrb[108].mxu0 %vm1946_vm4, %v19355_v60  ;;  %v5980_v60 = vrot.slane %v5978_v43, 5 }
 0x3ba   : > { %13003 = vmatmul.mubr.msk.bf16.gmra.mrb[44].mxu1 %vm1946_vm4, %v19354_v22  ;;  %13590 = vmatprep.mubr.msk.bf16.mxu0 %vm1946_vm4, %v19357_v5  ;;  %v8091_v22 = vshrl.u32 %v17570_v63, 16  ;;  %v8106_v5 = vrot.slane %v8104_v57, 4  ;;  %v19359_v63 = vld [vmem:[#allocation96_spill] sm:$0xff] }
 0x3bb   : > { %13006 = vmatprep.mubr.msk.bf16.mxu1 %vm1946_vm4, %v19356_v13  ;;  %v5985_v43 = vor.u32 %v5984_v19, %v5980_v60  ;;  %v5981_v57 = vsel %vm15249_vm5, %v5976_v0, %v5980_v60  ;;  %v8120_v19 = vshll.u32 %v17592_v30, 16  ;;  %v19364_v60 = vld [vmem:[#allocation205_spill] sm:$0xff] }
 0x3bc   : > { %v8093_v13 = vrot.slane %v8091_v22, 4  ;;  %v17858_v8 = vcombine.low %v5971_v53, %v5981_v57  ;;  %v19365_v0 = vld [vmem:[#allocation109_spill] sm:$0xff] }
 0x3bd   : > { %v8122_v58 = vrot.slane %v8120_v19, 5  ;;  %v19367_v19 = vld [vmem:[#allocation92_spill] sm:$0xff] }
 0x3be   : > { %v8097_v35 = vor.u32 %v8096_v54, %v8093_v13 }
 0x3bf   : > { %v8127_v14 = vor.u32 %v8126_v24, %v8122_v58 }
 0x3c0   : > { %v8098_v16 = vrot.slane %v8097_v35, 4  ;;  %v19392_v35 = vld [vmem:[#allocation122_spill] sm:$0xff] }
 0x3c1   : > { %13591 = vmatmul.mubr.msk.bf16.gmra.mrb[112].mxu0 %vm1946_vm4, %v19359_v63  ;;  %v5986_v63 = vrot.slane %v5985_v43, 4  ;;  %v8130_v43 = vshll.u32 %v17861_v7, 16  ;;  %v8128_v57 = vrot.slane %v8127_v14, 4  ;;  %v19398_v14 = vld [vmem:[#allocation125_spill] sm:$0xff] }
 0x3c2   : > { %13007 = vmatmul.mubr.msk.bf16.gmra.mrb[48].mxu1 %vm1946_vm4, %v19358_v52  ;;  %13594 = vmatprep.mubr.msk.bf16.mxu0 %vm1946_vm4, %v19362_v3  ;;  %v8107_v52 = vor.u32 %v8106_v5, %v8102_v49  ;;  %v8116_v3 = vrot.slane %v8114_v62, 4  ;;  %v19366_v5 = vld [vmem:[#allocation207_spill] sm:$0xff] }
 0x3c3   : > { %13010 = vmatprep.mubr.msk.bf16.mxu1 %vm1946_vm4, %v19361_v36  ;;  %v5996_v36 = vrot.slane %v5995_v37, 4  ;;  %v5991_v54 = vsel %vm15249_vm5, %v5986_v63, %v5990_v10  ;;  %v8103_v37 = vsel %vm15249_vm5, %v8098_v16, %v8102_v49  ;;  %v8132_v59 = vrot.slane %v8130_v43, 5  ;;  %v19395_v16 = vld [vmem:[#allocation101_spill] sm:$0xff]  ;;  %v19399_v43 = vld [vmem:[#allocation114_spill] sm:$0xff] }
 0x3c4   : > { %v8108_v46 = vrot.slane %v8107_v52, 4  ;;  %v8117_v62 = vor.u32 %v8116_v3, %v8112_v20  ;;  %v19369_v3 = vld [vmem:[#allocation97_spill] sm:$0xff]  ;;  %v19393_v52 = vld [vmem:[#allocation95_spill] sm:$0xff] }
 0x3c5   : > { %v6001_v13 = vsel %vm15249_vm5, %v5996_v36, %v6000_v15  ;;  %v19368_v15 = vld [vmem:[#allocation98_spill] sm:$0xff]  ;;  %v19394_v36 = vld [vmem:[#allocation124_spill] sm:$0xff] }
 0x3c6   : > { %v8113_v38 = vsel %vm15249_vm5, %v8108_v46, %v8112_v20  ;;  %v17880_v63 = vcombine.low %v5991_v54, %v6001_v13  ;;  %v8118_v53 = vrot.slane %v8117_v62, 4  ;;  %v8133_v20 = vsel %vm15249_vm5, %v8128_v57, %v8132_v59  ;;  %v19396_v13 = vld [vmem:[#allocation123_spill] sm:$0xff]  ;;  %v19397_v62 = vld [vmem:[#allocation110_spill] sm:$0xff] }
 0x3c7   : > { %v11201_v10 = vcombine.low %v8103_v37, %v8113_v38  ;;  %v19400_v57 = vld [vmem:[#allocation131_spill] sm:$0xff] }
 0x3c8   : > { %v8123_v24 = vsel %vm15249_vm5, %v8118_v53, %v8122_v58  ;;  %v19401_v59 = vld [vmem:[#allocation119_spill] sm:$0xff] }
 0x3c9   : > { %13595 = vmatmul.mubr.msk.bf16.gmra.mrb[116].mxu0 %vm1946_vm4, %v19365_v0  ;;  %v11202_v49 = vcombine.low %v8123_v24, %v8133_v20 }
 0x3ca   : > { %13011 = vmatmul.mubr.msk.bf16.gmra.mrb[52].mxu1 %vm1946_vm4, %v19364_v60  ;;  %13598 = vmatprep.mubr.msk.bf16.mxu0 %vm1946_vm4, %v17858_v8 }
 0x3cb   : > { %13014 = vmatprep.mubr.msk.bf16.mxu1 %vm1946_vm4, %v19366_v5 }
 0x3d1   : > { %13599 = vmatmul.mubr.msk.bf16.gmra.mrb[120].mxu0 %vm1946_vm4, %v17880_v63 }
 0x3d2   : > { %13015 = vmatmul.mubr.msk.bf16.gmra.mrb[56].mxu1 %vm1946_vm4, %v19367_v19  ;;  %13602 = vmatprep.mubr.msk.bf16.mxu0 %vm1946_vm4, %v11201_v10  ;;  %v19402_v19 = vld [vmem:[#allocation41_spill] sm:$0xff] }
 0x3d3   : > { %13018 = vmatprep.mubr.msk.bf16.mxu1 %vm1946_vm4, %v19368_v15  ;;  %v19403_v15 = vld [vmem:[#allocation121_spill] sm:$0xff] }
 0x3d9   : > { %13603 = vmatmul.mubr.msk.bf16.gmra.mrb[124].mxu0 %vm1946_vm4, %v11202_v49 }
 0x3da   : > { %13019 = vmatmul.mubr.msk.bf16.gmra.mrb[60].mxu1 %vm1946_vm4, %v19369_v3  ;;  %13608 = vmatprep.mubr.msk.bf16.mxu0 %vm1946_vm4, %v19224_v11  ;;  %v19384_v11 = vld [vmem:[#allocation111_spill] sm:$0xff] }
 0x3db   : > { %13022 = vmatprep.mubr.msk.bf16.mxu1 %vm1946_vm4, %v17186_v48  ;;  %v19370_v48 = vld [vmem:[#allocation102_spill] sm:$0xff] }
 0x3e1   : > { %13609 = vmatmul.mubr.msk.bf16.vlgmr.msra.gmra.mrb[0].mxu0 %vm1946_vm4, %v19225_v50  ;;  %v19385_v50 = vld [vmem:[#allocation86_spill] sm:$0xff] }
 0x3e2   : > { %13023 = vmatmul.mubr.msk.bf16.gmra.mrb[64].mxu1 %vm1946_vm4, %v17199_v6  ;;  %13612 = vmatprep.mubr.msk.bf16.mxu0 %vm1946_vm4, %v19226_v45  ;;  %v19371_v6 = vld [vmem:[#allocation73_spill] sm:$0xff]  ;;  %v19386_v45 = vld [vmem:[#allocation115_spill] sm:$0xff] }
 0x3e3   : > { %13026 = vmatprep.mubr.msk.bf16.mxu1 %vm1946_vm4, %v17203_v25  ;;  %v19372_v25 = vld [vmem:[#allocation99_spill] sm:$0xff] }
 0x3e9   : > { %13613 = vmatmul.mubr.msk.bf16.gmra.mrb[4].mxu0 %vm1946_vm4, %v19227_v55  ;;  %v19387_v55 = vld [vmem:[#allocation89_spill] sm:$0xff] }
 0x3ea   : > { %13027 = vmatmul.mubr.msk.bf16.gmra.mrb[68].mxu1 %vm1946_vm4, %v17215_v29  ;;  %13616 = vmatprep.mubr.msk.bf16.mxu0 %vm1946_vm4, %v19228_v51  ;;  %v19373_v29 = vld [vmem:[#allocation75_spill] sm:$0xff] }
 0x3eb   : > { %13030 = vmatprep.mubr.msk.bf16.mxu1 %vm1946_vm4, %v17219_v21  ;;  %v19374_v21 = vld [vmem:[#allocation104_spill] sm:$0xff] }
 0x3f1   : > { %13617 = vmatmul.mubr.msk.bf16.gmra.mrb[8].mxu0 %vm1946_vm4, %v19229_v31 }
 0x3f2   : > { %13031 = vmatmul.mubr.msk.bf16.gmra.mrb[72].mxu1 %vm1946_vm4, %v17231_v26  ;;  %13620 = vmatprep.mubr.msk.bf16.mxu0 %vm1946_vm4, %v19230_v39  ;;  %v19375_v26 = vld [vmem:[#allocation76_spill] sm:$0xff] }
 0x3f3   : > { %13034 = vmatprep.mubr.msk.bf16.mxu1 %vm1946_vm4, %v17235_v23  ;;  %v19376_v23 = vld [vmem:[#allocation103_spill] sm:$0xff] }
 0x3f9   : > { %13621 = vmatmul.mubr.msk.bf16.gmra.mrb[12].mxu0 %vm1946_vm4, %v19231_v56 }
 0x3fa   : > { %13035 = vmatmul.mubr.msk.bf16.gmra.mrb[76].mxu1 %vm1946_vm4, %v17247_v47  ;;  %13624 = vmatprep.mubr.msk.bf16.mxu0 %vm1946_vm4, %v19232_v17  ;;  %v19378_v47 = vld [vmem:[#allocation106_spill] sm:$0xff]  ;;  %v19388_v17 = vld [vmem:[#allocation113_spill] sm:$0xff] }
 0x3fb   : > { %13038 = vmatprep.mubr.msk.bf16.mxu1 %vm1946_vm4, %v17251_v42  ;;  %v19379_v42 = vld [vmem:[#allocation81_spill] sm:$0xff] }
 0x401   : > { %13625 = vmatmul.mubr.msk.bf16.gmra.mrb[16].mxu0 %vm1946_vm4, %v19233_v28  ;;  %v19389_v28 = vld [vmem:[#allocation91_spill] sm:$0xff] }
 0x402   : > { %13039 = vmatmul.mubr.msk.bf16.gmra.mrb[80].mxu1 %vm1946_vm4, %v17263_v40  ;;  %13628 = vmatprep.mubr.msk.bf16.mxu0 %vm1946_vm4, %v19234_v34  ;;  %v19380_v40 = vld [vmem:[#allocation105_spill] sm:$0xff]  ;;  %v19390_v34 = vld [vmem:[#allocation116_spill] sm:$0xff] }
 0x403   : > { %13042 = vmatprep.mubr.msk.bf16.mxu1 %vm1946_vm4, %v17267_v12  ;;  %v19381_v12 = vld [vmem:[#allocation83_spill] sm:$0xff] }
 0x409   : > { %13629 = vmatmul.mubr.msk.bf16.gmra.mrb[20].mxu0 %vm1946_vm4, %v19235_v1  ;;  %v19391_v1 = vld [vmem:[#allocation93_spill] sm:$0xff] }
 0x40a   : > { %13043 = vmatmul.mubr.msk.bf16.gmra.mrb[84].mxu1 %vm1946_vm4, %v17279_v44  ;;  %13632 = vmatprep.mubr.msk.bf16.mxu0 %vm1946_vm4, %v19236_v18  ;;  %v19382_v44 = vld [vmem:[#allocation112_spill] sm:$0xff] }
 0x40b   : > { %13046 = vmatprep.mubr.msk.bf16.mxu1 %vm1946_vm4, %v17283_v33  ;;  %v19383_v33 = vld [vmem:[#allocation84_spill] sm:$0xff] }
 0x411   : > { %13633 = vmatmul.mubr.msk.bf16.gmra.mrb[24].mxu0 %vm1946_vm4, %v19237_v32 }
 0x412   : > { %13047 = vmatmul.mubr.msk.bf16.gmra.mrb[88].mxu1 %vm1946_vm4, %v17295_v61  ;;  %13636 = vmatprep.mubr.msk.bf16.mxu0 %vm1946_vm4, %v19238_v4 }
 0x413   : > { %13050 = vmatprep.mubr.msk.bf16.mxu1 %vm1946_vm4, %v17299_v9 }
 0x419   : > { %13637 = vmatmul.mubr.msk.bf16.gmra.mrb[28].mxu0 %vm1946_vm4, %v19239_v2  ;;  %v19377_v2 = vld [vmem:[#allocation78_spill] sm:$0xff] }
 0x41a   : > { %13051 = vmatmul.mubr.msk.bf16.gmra.mrb[92].mxu1 %vm1946_vm4, %v17311_v41  ;;  %13640 = vmatprep.mubr.msk.bf16.mxu0 %vm1946_vm4, %v19371_v6  ;;  %v19405_v6 = vld [vmem:[#allocation127_spill] sm:$0xff] }
 0x41b   : > { %13054 = vmatprep.mubr.msk.bf16.mxu1 %vm1946_vm4, %v19370_v48  ;;  %v19404_v48 = vld [vmem:[#allocation42_spill] sm:$0xff] }
 0x421   : > { %13641 = vmatmul.mubr.msk.bf16.gmra.mrb[32].mxu0 %vm1946_vm4, %v19373_v29  ;;  %v19407_v29 = vld [vmem:[#allocation129_spill] sm:$0xff] }
 0x422   : > { %13055 = vmatmul.mubr.msk.bf16.gmra.mrb[96].mxu1 %vm1946_vm4, %v19372_v25  ;;  %13644 = vmatprep.mubr.msk.bf16.mxu0 %vm1946_vm4, %v19375_v26  ;;  %v19406_v25 = vld [vmem:[#allocation45_spill] sm:$0xff] }
 0x423   : > { %13058 = vmatprep.mubr.msk.bf16.mxu1 %vm1946_vm4, %v19374_v21 }
 0x429   : > { %13645 = vmatmul.mubr.msk.bf16.gmra.mrb[36].mxu0 %vm1946_vm4, %v19377_v2 }
 0x42a   : > { %13059 = vmatmul.mubr.msk.bf16.gmra.mrb[100].mxu1 %vm1946_vm4, %v19376_v23  ;;  %13648 = vmatprep.mubr.msk.bf16.mxu0 %vm1946_vm4, %v19379_v42  ;;  %v19409_v42 = vld [vmem:[#allocation135_spill] sm:$0xff] }
 0x42b   : > { %13062 = vmatprep.mubr.msk.bf16.mxu1 %vm1946_vm4, %v19378_v47  ;;  %v19408_v47 = vld [vmem:[#allocation47_spill] sm:$0xff] }
 0x431   : > { %13649 = vmatmul.mubr.msk.bf16.gmra.mrb[40].mxu0 %vm1946_vm4, %v19381_v12  ;;  %v19411_v12 = vld [vmem:[#allocation137_spill] sm:$0xff] }
 0x432   : > { %13063 = vmatmul.mubr.msk.bf16.gmra.mrb[104].mxu1 %vm1946_vm4, %v19380_v40  ;;  %13652 = vmatprep.mubr.msk.bf16.mxu0 %vm1946_vm4, %v19383_v33  ;;  %v19410_v40 = vld [vmem:[#allocation48_spill] sm:$0xff] }
 0x433   : > { %13066 = vmatprep.mubr.msk.bf16.mxu1 %vm1946_vm4, %v19382_v44 }
 0x435   : > { %v17988_v61 = vpop.f32.mrb[0].mxu1 }
 0x436   : > { %v17990_v9 = vpop.f32.mrb[1].mxu1 }
 0x437   : > { %v17992_v41 = vpop.f32.mrb[2].mxu1 }
 0x438   : > { %v17994_v58 = vpop.f32.mrb[3].mxu1 }
 0x439   : > { %13653 = vmatmul.mubr.msk.bf16.gmra.mrb[44].mxu0 %vm1946_vm4, %v19385_v50 }
 0x43a   : > { %13067 = vmatmul.mubr.msk.bf16.gmra.mrb[108].mxu1 %vm1946_vm4, %v19384_v11  ;;  %13656 = vmatprep.mubr.msk.bf16.mxu0 %vm1946_vm4, %v19387_v55  ;;  %v19413_v55 = vld [vmem:[#allocation143_spill] sm:$0xff] }
 0x43b   : > { %13070 = vmatprep.mubr.msk.bf16.mxu1 %vm1946_vm4, %v19386_v45  ;;  %v19412_v45 = vld [vmem:[#allocation50_spill] sm:$0xff] }
 0x43d   : > { %v18004_v51 = vpop.f32.mrb[4].mxu1 }
 0x43e   : > { %v18006_v31 = vpop.f32.mrb[5].mxu1 }
 0x43f   : > { %v18008_v39 = vpop.f32.mrb[6].mxu1 }
 0x440   : > { %v18010_v56 = vpop.f32.mrb[7].mxu1 }
 0x441   : > { %13657 = vmatmul.mubr.msk.bf16.gmra.mrb[48].mxu0 %vm1946_vm4, %v19389_v28  ;;  %v19415_v28 = vld [vmem:[#allocation145_spill] sm:$0xff] }
 0x442   : > { %13071 = vmatmul.mubr.msk.bf16.gmra.mrb[112].mxu1 %vm1946_vm4, %v19388_v17  ;;  %13660 = vmatprep.mubr.msk.bf16.mxu0 %vm1946_vm4, %v19391_v1  ;;  %v19414_v17 = vld [vmem:[#allocation53_spill] sm:$0xff] }
 0x443   : > { %13074 = vmatprep.mubr.msk.bf16.mxu1 %vm1946_vm4, %v19390_v34 }
 0x445   : > { %v18020_v18 = vpop.f32.mrb[8].mxu1 }
 0x446   : > { %v18022_v32 = vpop.f32.mrb[9].mxu1 }
 0x447   : > { %v18024_v4 = vpop.f32.mrb[10].mxu1 }
 0x448   : > { %v18026_v22 = vpop.f32.mrb[11].mxu1 }
 0x449   : > { %13661 = vmatmul.mubr.msk.bf16.gmra.mrb[52].mxu0 %vm1946_vm4, %v19393_v52 }
 0x44a   : > { %13075 = vmatmul.mubr.msk.bf16.gmra.mrb[116].mxu1 %vm1946_vm4, %v19392_v35  ;;  %13664 = vmatprep.mubr.msk.bf16.mxu0 %vm1946_vm4, %v19395_v16  ;;  %v19417_v16 = vld [vmem:[#allocation151_spill] sm:$0xff] }
 0x44b   : > { %13078 = vmatprep.mubr.msk.bf16.mxu1 %vm1946_vm4, %v19394_v36  ;;  %v19416_v36 = vld [vmem:[#allocation55_spill] sm:$0xff] }
 0x44d   : > { %v18036_v46 = vpop.f32.mrb[12].mxu1 }
 0x44e   : > { %v18038_v60 = vpop.f32.mrb[13].mxu1 }
 0x44f   : > { %v18040_v54 = vpop.f32.mrb[14].mxu1 }
 0x450   : > { %v18042_v5 = vpop.f32.mrb[15].mxu1 }
 0x451   : > { %13665 = vmatmul.mubr.msk.bf16.gmra.mrb[56].mxu0 %vm1946_vm4, %v19397_v62  ;;  %v19419_v62 = vld [vmem:[#allocation153_spill] sm:$0xff] }
 0x452   : > { %13079 = vmatmul.mubr.msk.bf16.gmra.mrb[120].mxu1 %vm1946_vm4, %v19396_v13  ;;  %13668 = vmatprep.mubr.msk.bf16.mxu0 %vm1946_vm4, %v19399_v43  ;;  %v19418_v13 = vld [vmem:[#allocation56_spill] sm:$0xff] }
 0x453   : > { %13082 = vmatprep.mubr.msk.bf16.mxu1 %vm1946_vm4, %v19398_v14 }
 0x455   : > { %v18052_v37 = vpop.f32.mrb[16].mxu1 }
 0x456   : > { %v18054_v38 = vpop.f32.mrb[17].mxu1 }
 0x457   : > { %v18056_v10 = vpop.f32.mrb[18].mxu1 }
 0x458   : > { %v18058_v53 = vpop.f32.mrb[19].mxu1 }
 0x459   : > { %13669 = vmatmul.mubr.msk.bf16.gmra.mrb[60].mxu0 %vm1946_vm4, %v19401_v59 }
 0x45a   : > { %13083 = vmatmul.mubr.msk.bf16.gmra.mrb[124].mxu1 %vm1946_vm4, %v19400_v57  ;;  %13672 = vmatprep.mubr.msk.bf16.mxu0 %vm1946_vm4, %v19403_v15  ;;  %v19421_v15 = vld [vmem:[#allocation159_spill] sm:$0xff] }
 0x45b   : > { %13152 = vmatprep.mubr.msk.bf16.mxu1 %vm1946_vm4, %v19402_v19  ;;  %v19420_v19 = vld [vmem:[#allocation58_spill] sm:$0xff] }
 0x45d   : > { %v18068_v24 = vpop.f32.mrb[20].mxu1 }
 0x45e   : > { %v18070_v20 = vpop.f32.mrb[21].mxu1 }
 0x45f   : > { %v18072_v49 = vpop.f32.mrb[22].mxu1 }
 0x460   : > { %v18074_v3 = vpop.f32.mrb[23].mxu1 }
 0x461   : > { %13673 = vmatmul.mubr.msk.bf16.gmra.mrb[64].mxu0 %vm1946_vm4, %v19405_v6  ;;  %v19423_v6 = vld [vmem:[#allocation161_spill] sm:$0xff] }
 0x462   : > { %13153 = vmatmul.mubr.msk.bf16.vlgmr.msra.gmra.mrb[64].mxu1 %vm1946_vm4, %v19404_v48  ;;  %13676 = vmatprep.mubr.msk.bf16.mxu0 %vm1946_vm4, %v19407_v29  ;;  %v19422_v48 = vld [vmem:[#allocation61_spill] sm:$0xff] }
 0x463   : > { %13156 = vmatprep.mubr.msk.bf16.mxu1 %vm1946_vm4, %v19406_v25 }
 0x465   : > { %v18084_v21 = vpop.f32.mrb[24].mxu1 }
 0x466   : > { %v18086_v26 = vpop.f32.mrb[25].mxu1 }
 0x467   : > { %v18088_v23 = vpop.f32.mrb[26].mxu1 }
 0x468   : > { %v18090_v2 = vpop.f32.mrb[27].mxu1 }
 0x469   : > { %13677 = vmatmul.mubr.msk.bf16.gmra.mrb[68].mxu0 %vm1946_vm4, %v19409_v42 }
 0x46a   : > { %13157 = vmatmul.mubr.msk.bf16.gmra.mrb[68].mxu1 %vm1946_vm4, %v19408_v47  ;;  %13680 = vmatprep.mubr.msk.bf16.mxu0 %vm1946_vm4, %v19411_v12  ;;  %v19426_v12 = vld [vmem:[#allocation167_spill] sm:$0xff] }
 0x46b   : > { %13160 = vmatprep.mubr.msk.bf16.mxu1 %vm1946_vm4, %v19410_v40  ;;  %v19425_v40 = vld [vmem:[#allocation63_spill] sm:$0xff] }
 0x46d   : > { %v18100_v44 = vpop.f32.mrb[28].mxu1 }
 0x46e   : > { %v18102_v33 = vpop.f32.mrb[29].mxu1 }
 0x46f   : > { %v18104_v11 = vpop.f32.mrb[30].mxu1 }
 0x470   : > { %v18106_v50 = vpop.f32.mrb[31].mxu1 }
 0x471   : > { %13681 = vmatmul.mubr.msk.bf16.gmra.mrb[72].mxu0 %vm1946_vm4, %v19413_v55  ;;  %v19428_v55 = vld [vmem:[#allocation169_spill] sm:$0xff] }
 0x472   : > { %13161 = vmatmul.mubr.msk.bf16.gmra.mrb[72].mxu1 %vm1946_vm4, %v19412_v45  ;;  %13684 = vmatprep.mubr.msk.bf16.mxu0 %vm1946_vm4, %v19415_v28  ;;  %v19427_v45 = vld [vmem:[#allocation64_spill] sm:$0xff] }
 0x473   : > { %13164 = vmatprep.mubr.msk.bf16.mxu1 %vm1946_vm4, %v19414_v17 }
 0x475   : > { %v18116_v34 = vpop.f32.mrb[32].mxu1 }
 0x476   : > { %v18118_v1 = vpop.f32.mrb[33].mxu1 }
 0x477   : > { %v18120_v35 = vpop.f32.mrb[34].mxu1 }
 0x478   : > { %v18122_v52 = vpop.f32.mrb[35].mxu1 }
 0x479   : > { %13685 = vmatmul.mubr.msk.bf16.gmra.mrb[76].mxu0 %vm1946_vm4, %v19417_v16 }
 0x47a   : > { %13165 = vmatmul.mubr.msk.bf16.gmra.mrb[76].mxu1 %vm1946_vm4, %v19416_v36  ;;  %13688 = vmatprep.mubr.msk.bf16.mxu0 %vm1946_vm4, %v19419_v62  ;;  %v19434_v62 = vld [vmem:[#allocation175_spill] sm:$0xff] }
 0x47b   : > { %13168 = vmatprep.mubr.msk.bf16.mxu1 %vm1946_vm4, %v19418_v13  ;;  %v19433_v13 = vld [vmem:[#allocation66_spill] sm:$0xff] }
 0x47d   : > { %v18132_v14 = vpop.f32.mrb[36].mxu1 }
 0x47e   : > { %v18134_v43 = vpop.f32.mrb[37].mxu1 }
 0x47f   : > { %v18136_v57 = vpop.f32.mrb[38].mxu1 }
 0x480   : > { %v18138_v59 = vpop.f32.mrb[39].mxu1 }
 0x481   : > { %13689 = vmatmul.mubr.msk.bf16.gmra.mrb[80].mxu0 %vm1946_vm4, %v19421_v15  ;;  %v19436_v15 = vld [vmem:[#allocation177_spill] sm:$0xff] }
 0x482   : > { %13169 = vmatmul.mubr.msk.bf16.gmra.mrb[80].mxu1 %vm1946_vm4, %v19420_v19  ;;  %13692 = vmatprep.mubr.msk.bf16.mxu0 %vm1946_vm4, %v19423_v6  ;;  %v19435_v19 = vld [vmem:[#allocation69_spill] sm:$0xff] }
 0x483   : > { %13172 = vmatprep.mubr.msk.bf16.mxu1 %vm1946_vm4, %v19422_v48 }
 0x485   : > { %v18148_v25 = vpop.f32.mrb[40].mxu1 }
 0x486   : > { %v18150_v29 = vpop.f32.mrb[41].mxu1 }
 0x487   : > { %v18152_v47 = vpop.f32.mrb[42].mxu1 }
 0x488   : > { %v18154_v42 = vpop.f32.mrb[43].mxu1 }
 0x489   : > { %19424 = vst [vmem:[#allocation133_spill] sm:$0xff] %v18154_v42  ;;  %13693 = vmatmul.mubr.msk.bf16.gmra.mrb[84].mxu0 %vm1946_vm4, %v19426_v12 }
 0x48a   : > { %13173 = vmatmul.mubr.msk.bf16.gmra.mrb[84].mxu1 %vm1946_vm4, %v19425_v40  ;;  %13696 = vmatprep.mubr.msk.bf16.mxu0 %vm1946_vm4, %v19428_v55  ;;  %v19442_v55 = vld [vmem:[#allocation181_spill] sm:$0xff] }
 0x48b   : > { %13176 = vmatprep.mubr.msk.bf16.mxu1 %vm1946_vm4, %v19427_v45  ;;  %v19441_v45 = vld [vmem:[#allocation71_spill] sm:$0xff] }
 0x48d   : > { %v18164_v17 = vpop.f32.mrb[44].mxu1 }
 0x48e   : > { %19429 = vst [vmem:[#allocation138_spill] sm:$0xff] %v18164_v17  ;;  %v18166_v28 = vpop.f32.mrb[45].mxu1 }
 0x48f   : > { %19430 = vst [vmem:[#allocation140_spill] sm:$0xff] %v18166_v28  ;;  %v18168_v36 = vpop.f32.mrb[46].mxu1  ;;  %v19469_v28 = vld [vmem:[#allocation87_spill] sm:$0xff] }
 0x490   : > { %19431 = vst [vmem:[#allocation139_spill] sm:$0xff] %v18168_v36  ;;  %v18170_v16 = vpop.f32.mrb[47].mxu1 }
 0x491   : > { %19432 = vst [vmem:[#allocation141_spill] sm:$0xff] %v18170_v16  ;;  %13697 = vmatmul.mubr.msk.bf16.gmra.mrb[88].mxu0 %vm1946_vm4, %v19434_v62  ;;  %v19444_v62 = vld [vmem:[#allocation183_spill] sm:$0xff] }
 0x492   : > { %13177 = vmatmul.mubr.msk.bf16.gmra.mrb[88].mxu1 %vm1946_vm4, %v19433_v13  ;;  %13700 = vmatprep.mubr.msk.bf16.mxu0 %vm1946_vm4, %v19436_v15  ;;  %v19443_v13 = vld [vmem:[#allocation72_spill] sm:$0xff] }
 0x493   : > { %13180 = vmatprep.mubr.msk.bf16.mxu1 %vm1946_vm4, %v19435_v19 }
 0x495   : > { %v18180_v48 = vpop.f32.mrb[48].mxu1 }
 0x496   : > { %19437 = vst [vmem:[#allocation146_spill] sm:$0xff] %v18180_v48  ;;  %v18182_v6 = vpop.f32.mrb[49].mxu1 }
 0x497   : > { %19438 = vst [vmem:[#allocation148_spill] sm:$0xff] %v18182_v6  ;;  %v18184_v40 = vpop.f32.mrb[50].mxu1 }
 0x498   : > { %19439 = vst [vmem:[#allocation147_spill] sm:$0xff] %v18184_v40  ;;  %v18186_v12 = vpop.f32.mrb[51].mxu1 }
 0x499   : > { %19440 = vst [vmem:[#allocation149_spill] sm:$0xff] %v18186_v12  ;;  %13701 = vmatmul.mubr.msk.bf16.gmra.mrb[92].mxu0 %vm1946_vm4, %v19442_v55  ;;  %v19449_v12 = vld [vmem:[#allocation74_spill] sm:$0xff]  ;;  %v19451_v55 = vld [vmem:[#allocation77_spill] sm:$0xff] }
 0x49a   : > { %13181 = vmatmul.mubr.msk.bf16.gmra.mrb[92].mxu1 %vm1946_vm4, %v19441_v45  ;;  %13704 = vmatprep.mubr.msk.bf16.mxu0 %vm1946_vm4, %v19444_v62  ;;  %v19450_v45 = vld [vmem:[#allocation185_spill] sm:$0xff] }
 0x49b   : > { %13184 = vmatprep.mubr.msk.bf16.mxu1 %vm1946_vm4, %v19443_v13  ;;  %v19452_v13 = vld [vmem:[#allocation187_spill] sm:$0xff] }
 0x49d   : > { %v18196_v19 = vpop.f32.mrb[52].mxu1 }
 0x49e   : > { %19445 = vst [vmem:[#allocation154_spill] sm:$0xff] %v18196_v19  ;;  %v18198_v15 = vpop.f32.mrb[53].mxu1 }
 0x49f   : > { %19446 = vst [vmem:[#allocation156_spill] sm:$0xff] %v18198_v15  ;;  %v18200_v6 = vpop.f32.mrb[54].mxu1 }
 0x4a0   : > { %19447 = vst [vmem:[#allocation155_spill] sm:$0xff] %v18200_v6  ;;  %v18202_v40 = vpop.f32.mrb[55].mxu1 }
 0x4a1   : > { %19448 = vst [vmem:[#allocation157_spill] sm:$0xff] %v18202_v40  ;;  %13705 = vmatmul.mubr.msk.bf16.gmra.mrb[96].mxu0 %vm1946_vm4, %v19450_v45  ;;  %v19457_v40 = vld [vmem:[#allocation79_spill] sm:$0xff]  ;;  %v19459_v45 = vld [vmem:[#allocation80_spill] sm:$0xff] }
 0x4a2   : > { %13185 = vmatmul.mubr.msk.bf16.gmra.mrb[96].mxu1 %vm1946_vm4, %v19449_v12  ;;  %13708 = vmatprep.mubr.msk.bf16.mxu0 %vm1946_vm4, %v19452_v13  ;;  %v19458_v12 = vld [vmem:[#allocation189_spill] sm:$0xff] }
 0x4a3   : > { %13188 = vmatprep.mubr.msk.bf16.mxu1 %vm1946_vm4, %v19451_v55  ;;  %v19460_v55 = vld [vmem:[#allocation191_spill] sm:$0xff] }
 0x4a5   : > { %v18212_v62 = vpop.f32.mrb[56].mxu1 }
 0x4a6   : > { %19453 = vst [vmem:[#allocation162_spill] sm:$0xff] %v18212_v62  ;;  %v18214_v19 = vpop.f32.mrb[57].mxu1  ;;  %v19465_v62 = vld [vmem:[#allocation82_spill] sm:$0xff] }
 0x4a7   : > { %19454 = vst [vmem:[#allocation164_spill] sm:$0xff] %v18214_v19  ;;  %v18216_v15 = vpop.f32.mrb[58].mxu1 }
 0x4a8   : > { %19455 = vst [vmem:[#allocation163_spill] sm:$0xff] %v18216_v15  ;;  %v18218_v6 = vpop.f32.mrb[59].mxu1 }
 0x4a9   : > { %19456 = vst [vmem:[#allocation165_spill] sm:$0xff] %v18218_v6  ;;  %13709 = vmatmul.mubr.msk.bf16.gmra.mrb[100].mxu0 %vm1946_vm4, %v19458_v12  ;;  %v19467_v12 = vld [vmem:[#allocation85_spill] sm:$0xff] }
 0x4aa   : > { %13189 = vmatmul.mubr.msk.bf16.gmra.mrb[100].mxu1 %vm1946_vm4, %v19457_v40  ;;  %13712 = vmatprep.mubr.msk.bf16.mxu0 %vm1946_vm4, %v19460_v55  ;;  %v19466_v40 = vld [vmem:[#allocation193_spill] sm:$0xff] }
 0x4ab   : > { %13192 = vmatprep.mubr.msk.bf16.mxu1 %vm1946_vm4, %v19459_v45  ;;  %v19468_v45 = vld [vmem:[#allocation195_spill] sm:$0xff] }
 0x4ad   : > { %v18228_v13 = vpop.f32.mrb[60].mxu1 }
 0x4ae   : > { %19461 = vst [vmem:[#allocation170_spill] sm:$0xff] %v18228_v13  ;;  %v18230_v19 = vpop.f32.mrb[61].mxu1 }
 0x4af   : > { %19462 = vst [vmem:[#allocation172_spill] sm:$0xff] %v18230_v19  ;;  %v18232_v15 = vpop.f32.mrb[62].mxu1 }
 0x4b0   : > { %19463 = vst [vmem:[#allocation171_spill] sm:$0xff] %v18232_v15  ;;  %v18234_v6 = vpop.f32.mrb[63].mxu1  ;;  %v18247_v15 = vld [vmem:[%s18616_s2] ss:$0 sm:$0xff] }
 0x4b1   : > { %19464 = vst [vmem:[#allocation173_spill] sm:$0xff] %v18234_v6  ;;  %13713 = vmatmul.mubr.msk.bf16.gmra.mrb[104].mxu0 %vm1946_vm4, %v19466_v40 }
 0x4b2   : > { %13193 = vmatmul.mubr.msk.bf16.gmra.mrb[104].mxu1 %vm1946_vm4, %v19465_v62  ;;  %13716 = vmatprep.mubr.msk.bf16.mxu0 %vm1946_vm4, %v19468_v45 }
 0x4b3   : > { %13196 = vmatprep.mubr.msk.bf16.mxu1 %vm1946_vm4, %v19467_v12 }
 0x4b4   : > { %v13610_v55 = vpop.f32.mrb[0].mxu0 }
 0x4b5   : > { %v13738_v6 = vadd.f32 %v13610_v55, %v17988_v61  ;;  %v8889_v19 = vpop.f32.mrb[1].mxu0  ;;  %v19470_v61 = vld [vmem:[#allocation197_spill] sm:$0xff] }
 0x4b6   : > { %v13739_v62 = vadd.f32 %v8889_v19, %v17990_v9  ;;  %v13611_v13 = vpop.f32.mrb[2].mxu0 }
 0x4b7   : > { %v9537_v40 = vadd.f32 %v13738_v6, %v18247_v15  ;;  %v13740_v12 = vadd.f32 %v13611_v13, %v17992_v41  ;;  %v8892_v48 = vpop.f32.mrb[3].mxu0  ;;  %v19471_v6 = vld [vmem:[#allocation88_spill] sm:$0xff]  ;;  %v19472_v41 = vld [vmem:[#allocation199_spill] sm:$0xff] }
 0x4b8   : > { %v9535_v45 = vadd.f32 %v13739_v62, %v18247_v15  ;;  %v13741_v16 = vadd.f32 %v8892_v48, %v17994_v58 }
 0x4b9   : > { %v9538_v36 = vadd.f32 %v13740_v12, %v18247_v15  ;;  %13717 = vmatmul.mubr.msk.bf16.gmra.mrb[108].mxu0 %vm1946_vm4, %v19470_v61  ;;  %v9665_v19 = vmax.f32 %v9537_v40, 0.0 }
 0x4ba   : > { %13197 = vmatmul.mubr.msk.bf16.gmra.mrb[108].mxu1 %vm1946_vm4, %v19469_v28  ;;  %v9536_v9 = vadd.f32 %v13741_v16, %v18247_v15  ;;  %13720 = vmatprep.mubr.msk.bf16.mxu0 %vm1946_vm4, %v19472_v41  ;;  %v9663_v48 = vmax.f32 %v9535_v45, 0.0 }
 0x4bb   : > { %13200 = vmatprep.mubr.msk.bf16.mxu1 %vm1946_vm4, %v19471_v6  ;;  %v9666_v58 = vmax.f32 %v9538_v36, 0.0  ;;  %v19473_v6 = vld [vmem:[#allocation90_spill] sm:$0xff] }
 0x4bc   : > { %v9664_v13 = vmax.f32 %v9536_v9, 0.0  ;;  %v13614_v55 = vpop.f32.mrb[4].mxu0 }
 0x4bd   : > { %v11606_v62 = vpack.c.bf16 %v9666_v58, %v9665_v19  ;;  %v13742_v12 = vadd.f32 %v13614_v55, %v18004_v51  ;;  %v8905_v28 = vpop.f32.mrb[5].mxu0  ;;  %v19475_v19 = vld [vmem:[#allocation94_spill] sm:$0xff] }
 0x4be   : > { %v11601_v17 = vpack.c.bf16 %v9664_v13, %v9663_v48  ;;  %v13743_v61 = vadd.f32 %v8905_v28, %v18006_v31  ;;  %v13615_v42 = vpop.f32.mrb[6].mxu0  ;;  %v19474_v31 = vld [vmem:[#allocation201_spill] sm:$0xff] }
 0x4bf   : > { %11918 = vst [vmem:[%s18270_s6 + $0x8] sm:$0xff] %v11606_v62   ;;  %v9541_v16 = vadd.f32 %v13742_v12, %v18247_v15  ;;  %v13744_v36 = vadd.f32 %v13615_v42, %v18008_v39  ;;  %v8908_v40 = vpop.f32.mrb[7].mxu0  ;;  %v19476_v39 = vld [vmem:[#allocation203_spill] sm:$0xff] }
 0x4c0   : > { %11602 = vst [vmem:[%s18270_s6] sm:$0xff] %v11601_v17   ;;  %v9539_v45 = vadd.f32 %v13743_v61, %v18247_v15  ;;  %v13745_v51 = vadd.f32 %v8908_v40, %v18010_v56  ;;  %v19477_v56 = vld [vmem:[#allocation132_spill] sm:$0xff] }
 0x4c1   : > { %v9542_v9 = vadd.f32 %v13744_v36, %v18247_v15  ;;  %13721 = vmatmul.mubr.msk.bf16.gmra.mrb[112].mxu0 %vm1946_vm4, %v19474_v31  ;;  %v9669_v42 = vmax.f32 %v9541_v16, 0.0  ;;  %v8827_v58 = vrot.slane %v19477_v56, 5  ;;  %v19482_v56 = vld [vmem:[#allocation208_spill] sm:$0xff] }
 0x4c2   : > { %13201 = vmatmul.mubr.msk.bf16.gmra.mrb[112].mxu1 %vm1946_vm4, %v19473_v6  ;;  %v9540_v41 = vadd.f32 %v13745_v51, %v18247_v15  ;;  %13724 = vmatprep.mubr.msk.bf16.mxu0 %vm1946_vm4, %v19476_v39  ;;  %v9667_v48 = vmax.f32 %v9539_v45, 0.0  ;;  %v8830_v51 = vrot.slane %v17589_v27, 5  ;;  %v19478_v45 = vld [vmem:[#allocation130_spill] sm:$0xff] }
 0x4c3   : > { %13204 = vmatprep.mubr.msk.bf16.mxu1 %vm1946_vm4, %v19475_v19  ;;  %v9670_v17 = vmax.f32 %v9542_v9, 0.0  ;;  %v11267_v31 = vrot.slane %v19478_v45, 9  ;;  %v19480_v27 = vld [vmem:[#allocation206_spill] sm:$0xff] }
 0x4c4   : > { %v9668_v13 = vmax.f32 %v9540_v41, 0.0  ;;  %v13618_v55 = vpop.f32.mrb[8].mxu0  ;;  %v8829_v41 = vrot.slane %v8827_v58, 4 }
 0x4c5   : > { %v11616_v62 = vpack.c.bf16 %v9670_v17, %v9669_v42  ;;  %v13746_v12 = vadd.f32 %v13618_v55, %v18020_v18  ;;  %v8921_v28 = vpop.f32.mrb[9].mxu0  ;;  %v8833_v42 = vrot.slane %v17592_v30, 5  ;;  %v19481_v17 = vld [vmem:[#allocation100_spill] sm:$0xff]  ;;  %v8828_v55 = vsel %vm15646_vm8, %v11267_v31, %v8827_v58 }
 0x4c6   : > { %v11611_v61 = vpack.c.bf16 %v9668_v13, %v9667_v48  ;;  %v13747_v36 = vadd.f32 %v8921_v28, %v18022_v32  ;;  %v13619_v40 = vpop.f32.mrb[10].mxu0  ;;  %v19479_v32 = vld [vmem:[#allocation96_spill] sm:$0xff]  ;;  %v8836_v58 = vrot.slane %v17861_v7, 5 }
 0x4c7   : > { %11920 = vst [vmem:[%s18270_s6 + $0x18] sm:$0xff] %v11616_v62   ;;  %v9545_v16 = vadd.f32 %v13746_v12, %v18247_v15  ;;  %v13748_v9 = vadd.f32 %v13619_v40, %v18024_v4  ;;  %v8924_v6 = vpop.f32.mrb[11].mxu0  ;;  %v8831_v62 = vsel %vm15646_vm8, %v8829_v41, %v8830_v51 }
 0x4c8   : > { %11919 = vst [vmem:[%s18270_s6 + $0x10] sm:$0xff] %v11611_v61   ;;  %v9543_v19 = vadd.f32 %v13747_v36, %v18247_v15  ;;  %v13749_v18 = vadd.f32 %v8924_v6, %v18026_v22  ;;  %v8835_v6 = vrot.slane %v8833_v42, 4 }
 0x4c9   : > { %v9546_v39 = vadd.f32 %v13748_v9, %v18247_v15  ;;  %13725 = vmatmul.mubr.msk.bf16.gmra.mrb[116].mxu0 %vm1946_vm4, %v19480_v27  ;;  %v9673_v48 = vmax.f32 %v9545_v16, 0.0  ;;  %v8832_v9 = vrot.slane %v8830_v51, 4 }
 0x4ca   : > { %13205 = vmatmul.mubr.msk.bf16.gmra.mrb[116].mxu1 %vm1946_vm4, %v19479_v32  ;;  %v9544_v4 = vadd.f32 %v13749_v18, %v18247_v15  ;;  %13728 = vmatprep.mubr.msk.bf16.mxu0 %vm1946_vm4, %v19482_v56  ;;  %v9671_v12 = vmax.f32 %v9543_v19, 0.0 }
 0x4cb   : > { %13208 = vmatprep.mubr.msk.bf16.mxu1 %vm1946_vm4, %v19481_v17  ;;  %v9674_v22 = vmax.f32 %v9546_v39, 0.0  ;;  %v11269_v39 = vcombine.low %v8828_v55, %v8831_v62 }
 0x4cc   : > { %v9672_v28 = vmax.f32 %v9544_v4, 0.0  ;;  %v13622_v30 = vpop.f32.mrb[12].mxu0 }
 0x4cd   : > { %v11626_v61 = vpack.c.bf16 %v9674_v22, %v9673_v48  ;;  %v13750_v36 = vadd.f32 %v13622_v30, %v18036_v46  ;;  %v8937_v40 = vpop.f32.mrb[13].mxu0 }
 0x4ce   : > { %v11621_v45 = vpack.c.bf16 %v9672_v28, %v9671_v12  ;;  %v13751_v16 = vadd.f32 %v8937_v40, %v18038_v60  ;;  %v13623_v18 = vpop.f32.mrb[14].mxu0  ;;  %v19484_v60 = vld [vmem:[#allocation209_spill] sm:$0xff] }
 0x4cf   : > { %11922 = vst [vmem:[%s18270_s6 + $0x28] sm:$0xff] %v11626_v61   ;;  %v9549_v31 = vadd.f32 %v13750_v36, %v18247_v15  ;;  %v13752_v41 = vadd.f32 %v13623_v18, %v18040_v54  ;;  %v8940_v19 = vpop.f32.mrb[15].mxu0  ;;  %v8834_v54 = vsel %vm15646_vm8, %v8832_v9, %v8833_v42 }
 0x4d0   : > { %11921 = vst [vmem:[%s18270_s6 + $0x20] sm:$0xff] %v11621_v45   ;;  %v9547_v32 = vadd.f32 %v13751_v16, %v18247_v15  ;;  %v13753_v46 = vadd.f32 %v8940_v19, %v18042_v5  ;;  %v8837_v5 = vsel %vm15646_vm8, %v8835_v6, %v8836_v58 }
 0x4d1   : > { %v9550_v51 = vadd.f32 %v13752_v41, %v18247_v15  ;;  %13729 = vmatmul.mubr.msk.bf16.gmra.mrb[120].mxu0 %vm1946_vm4, %v19484_v60  ;;  %v9677_v27 = vmax.f32 %v9549_v31, 0.0 }
 0x4d2   : > { %13209 = vmatmul.mubr.msk.bf16.gmra.mrb[120].mxu1 %vm1946_vm4, %v19365_v0  ;;  %v9548_v7 = vadd.f32 %v13753_v46, %v18247_v15  ;;  %13732 = vmatprep.mubr.msk.bf16.mxu0 %vm1946_vm4, %v11269_v39  ;;  %v9675_v4 = vmax.f32 %v9547_v32, 0.0 }
 0x4d3   : > { %13212 = vmatprep.mubr.msk.bf16.mxu1 %vm1946_vm4, %v17858_v8  ;;  %v9678_v0 = vmax.f32 %v9550_v51, 0.0  ;;  %v11270_v8 = vcombine.low %v8834_v54, %v8837_v5 }
 0x4d4   : > { %v9676_v17 = vmax.f32 %v9548_v7, 0.0  ;;  %v13626_v56 = vpop.f32.mrb[16].mxu0 }
 0x4d5   : > { %v11636_v48 = vpack.c.bf16 %v9678_v0, %v9677_v27  ;;  %v13754_v22 = vadd.f32 %v13626_v56, %v18052_v37  ;;  %v8953_v55 = vpop.f32.mrb[17].mxu0 }
 0x4d6   : > { %v11631_v62 = vpack.c.bf16 %v9676_v17, %v9675_v4  ;;  %v13755_v12 = vadd.f32 %v8953_v55, %v18054_v38  ;;  %v13627_v28 = vpop.f32.mrb[18].mxu0 }
 0x4d7   : > { %11924 = vst [vmem:[%s18270_s6 + $0x38] sm:$0xff] %v11636_v48   ;;  %v9553_v42 = vadd.f32 %v13754_v22, %v18247_v15  ;;  %v13756_v13 = vadd.f32 %v13627_v28, %v18056_v10  ;;  %v8956_v30 = vpop.f32.mrb[19].mxu0 }
 0x4d8   : > { %11923 = vst [vmem:[%s18270_s6 + $0x30] sm:$0xff] %v11631_v62   ;;  %v9551_v61 = vadd.f32 %v13755_v12, %v18247_v15  ;;  %v13757_v36 = vadd.f32 %v8956_v30, %v18058_v53 }
 0x4d9   : > { %v9554_v37 = vadd.f32 %v13756_v13, %v18247_v15  ;;  %13733 = vmatmul.mubr.msk.bf16.gmra.mrb[124].mxu0 %vm1946_vm4, %v11270_v8  ;;  %v9681_v40 = vmax.f32 %v9553_v42, 0.0 }
 0x4da   : > { %13213 = vmatmul.mubr.msk.bf16.gmra.mrb[124].mxu1 %vm1946_vm4, %v17880_v63  ;;  %v9552_v38 = vadd.f32 %v13757_v36, %v18247_v15  ;;  %v9679_v10 = vmax.f32 %v9551_v61, 0.0 }
 0x4db   : > { %v9682_v9 = vmax.f32 %v9554_v37, 0.0 }
 0x4dc   : > { %v9680_v6 = vmax.f32 %v9552_v38, 0.0  ;;  %v13630_v45 = vpop.f32.mrb[20].mxu0 }
 0x4dd   : > { %v11646_v16 = vpack.c.bf16 %v9682_v9, %v9681_v40  ;;  %v13758_v18 = vadd.f32 %v13630_v45, %v18068_v24  ;;  %v8969_v53 = vpop.f32.mrb[21].mxu0 }
 0x4de   : > { %v11641_v39 = vpack.c.bf16 %v9680_v6, %v9679_v10  ;;  %v13759_v58 = vadd.f32 %v8969_v53, %v18070_v20  ;;  %v13631_v31 = vpop.f32.mrb[22].mxu0 }
 0x4df   : > { %11926 = vst [vmem:[%s18270_s6 + $0x48] sm:$0xff] %v11646_v16   ;;  %v9557_v63 = vadd.f32 %v13758_v18, %v18247_v15  ;;  %v13760_v41 = vadd.f32 %v13631_v31, %v18072_v49  ;;  %v8972_v19 = vpop.f32.mrb[23].mxu0 }
 0x4e0   : > { %11925 = vst [vmem:[%s18270_s6 + $0x40] sm:$0xff] %v11641_v39   ;;  %v9555_v32 = vadd.f32 %v13759_v58, %v18247_v15  ;;  %v13761_v46 = vadd.f32 %v8972_v19, %v18074_v3 }
 0x4e1   : > { %v9558_v51 = vadd.f32 %v13760_v41, %v18247_v15  ;;  %v9685_v60 = vmax.f32 %v9557_v63, 0.0 }
 0x4e2   : > { %v9556_v24 = vadd.f32 %v13761_v46, %v18247_v15  ;;  %v9683_v7 = vmax.f32 %v9555_v32, 0.0 }
 0x4e3   : > { %v9686_v20 = vmax.f32 %v9558_v51, 0.0 }
 0x4e4   : > { %v9684_v54 = vmax.f32 %v9556_v24, 0.0  ;;  %v13634_v5 = vpop.f32.mrb[24].mxu0 }
 0x4e5   : > { %v11656_v27 = vpack.c.bf16 %v9686_v20, %v9685_v60  ;;  %v13762_v49 = vadd.f32 %v13634_v5, %v18084_v21  ;;  %v8985_v0 = vpop.f32.mrb[25].mxu0 }
 0x4e6   : > { %v11651_v4 = vpack.c.bf16 %v9684_v54, %v9683_v7  ;;  %v13763_v17 = vadd.f32 %v8985_v0, %v18086_v26  ;;  %v13635_v56 = vpop.f32.mrb[26].mxu0 }
 0x4e7   : > { %11928 = vst [vmem:[%s18270_s6 + $0x58] sm:$0xff] %v11656_v27   ;;  %v9561_v3 = vadd.f32 %v13762_v49, %v18247_v15  ;;  %v13764_v48 = vadd.f32 %v13635_v56, %v18088_v23  ;;  %v8988_v22 = vpop.f32.mrb[27].mxu0 }
 0x4e8   : > { %11927 = vst [vmem:[%s18270_s6 + $0x50] sm:$0xff] %v11651_v4   ;;  %v9559_v55 = vadd.f32 %v13763_v17, %v18247_v15  ;;  %v13765_v8 = vadd.f32 %v8988_v22, %v18090_v2 }
 0x4e9   : > { %v9562_v62 = vadd.f32 %v13764_v48, %v18247_v15  ;;  %v9689_v12 = vmax.f32 %v9561_v3, 0.0 }
 0x4ea   : > { %v9560_v21 = vadd.f32 %v13765_v8, %v18247_v15  ;;  %v9687_v28 = vmax.f32 %v9559_v55, 0.0 }
 0x4eb   : > { %v9690_v26 = vmax.f32 %v9562_v62, 0.0 }
 0x4ec   : > { %v9688_v42 = vmax.f32 %v9560_v21, 0.0  ;;  %v13638_v13 = vpop.f32.mrb[28].mxu0 }
 0x4ed   : > { %v11666_v30 = vpack.c.bf16 %v9690_v26, %v9689_v12  ;;  %v13766_v23 = vadd.f32 %v13638_v13, %v18100_v44  ;;  %v9001_v61 = vpop.f32.mrb[29].mxu0 }
 0x4ee   : > { %v11661_v36 = vpack.c.bf16 %v9688_v42, %v9687_v28  ;;  %v13767_v37 = vadd.f32 %v9001_v61, %v18102_v33  ;;  %v13639_v38 = vpop.f32.mrb[30].mxu0 }
 0x4ef   : > { %11930 = vst [vmem:[%s18270_s6 + $0x68] sm:$0xff] %v11666_v30   ;;  %v9565_v2 = vadd.f32 %v13766_v23, %v18247_v15  ;;  %v13768_v40 = vadd.f32 %v13639_v38, %v18104_v11  ;;  %v9004_v9 = vpop.f32.mrb[31].mxu0 }
 0x4f0   : > { %11929 = vst [vmem:[%s18270_s6 + $0x60] sm:$0xff] %v11661_v36   ;;  %v9563_v10 = vadd.f32 %v13767_v37, %v18247_v15  ;;  %v13769_v6 = vadd.f32 %v9004_v9, %v18106_v50  ;;  %v19485_v37 = vld [vmem:[#allocation133_spill] sm:$0xff] }
 0x4f1   : > { %v9566_v45 = vadd.f32 %v13768_v40, %v18247_v15  ;;  %v9693_v16 = vmax.f32 %v9565_v2, 0.0 }
 0x4f2   : > { %v9564_v44 = vadd.f32 %v13769_v6, %v18247_v15  ;;  %v9691_v18 = vmax.f32 %v9563_v10, 0.0 }
 0x4f3   : > { %v9694_v33 = vmax.f32 %v9566_v45, 0.0 }
 0x4f4   : > { %v9692_v53 = vmax.f32 %v9564_v44, 0.0  ;;  %v13642_v39 = vpop.f32.mrb[32].mxu0  ;;  %v19486_v44 = vld [vmem:[#allocation138_spill] sm:$0xff] }
 0x4f5   : > { %v11676_v58 = vpack.c.bf16 %v9694_v33, %v9693_v16  ;;  %v13770_v11 = vadd.f32 %v13642_v39, %v18116_v34  ;;  %v9017_v31 = vpop.f32.mrb[33].mxu0 }
 0x4f6   : > { %v11671_v63 = vpack.c.bf16 %v9692_v53, %v9691_v18  ;;  %v13771_v41 = vadd.f32 %v9017_v31, %v18118_v1  ;;  %v13643_v19 = vpop.f32.mrb[34].mxu0  ;;  %v19487_v18 = vld [vmem:[#allocation140_spill] sm:$0xff] }
 0x4f7   : > { %11932 = vst [vmem:[%s18270_s6 + $0x78] sm:$0xff] %v11676_v58   ;;  %v9569_v50 = vadd.f32 %v13770_v11, %v18247_v15  ;;  %v13772_v32 = vadd.f32 %v13643_v19, %v18120_v35  ;;  %v9020_v46 = vpop.f32.mrb[35].mxu0  ;;  %v19488_v11 = vld [vmem:[#allocation139_spill] sm:$0xff]  ;;  %v19489_v19 = vld [vmem:[#allocation141_spill] sm:$0xff] }
 0x4f8   : > { %11931 = vst [vmem:[%s18270_s6 + $0x70] sm:$0xff] %v11671_v63   ;;  %v9567_v51 = vadd.f32 %v13771_v41, %v18247_v15  ;;  %v13773_v24 = vadd.f32 %v9020_v46, %v18122_v52 }
 0x4f9   : > { %v9570_v60 = vadd.f32 %v13772_v32, %v18247_v15  ;;  %v9697_v20 = vmax.f32 %v9569_v50, 0.0 }
 0x4fa   : > { %v9568_v34 = vadd.f32 %v13773_v24, %v18247_v15  ;;  %v9695_v7 = vmax.f32 %v9567_v51, 0.0 }
 0x4fb   : > { %v9698_v1 = vmax.f32 %v9570_v60, 0.0 }
 0x4fc   : > { %v9696_v54 = vmax.f32 %v9568_v34, 0.0  ;;  %v13646_v5 = vpop.f32.mrb[36].mxu0 }
 0x4fd   : > { %v11686_v27 = vpack.c.bf16 %v9698_v1, %v9697_v20  ;;  %v13774_v35 = vadd.f32 %v13646_v5, %v18132_v14  ;;  %v9033_v49 = vpop.f32.mrb[37].mxu0 }
 0x4fe   : > { %v11681_v0 = vpack.c.bf16 %v9696_v54, %v9695_v7  ;;  %v13775_v4 = vadd.f32 %v9033_v49, %v18134_v43  ;;  %v13647_v17 = vpop.f32.mrb[38].mxu0  ;;  %v19490_v7 = vld [vmem:[#allocation146_spill] sm:$0xff] }
 0x4ff   : > { %11934 = vst [vmem:[%s18270_s6 + $0x88] sm:$0xff] %v11686_v27   ;;  %v9573_v52 = vadd.f32 %v13774_v35, %v18247_v15  ;;  %v13776_v56 = vadd.f32 %v13647_v17, %v18136_v57  ;;  %v9036_v3 = vpop.f32.mrb[39].mxu0  ;;  %v19491_v35 = vld [vmem:[#allocation148_spill] sm:$0xff]  ;;  %v19492_v17 = vld [vmem:[#allocation147_spill] sm:$0xff] }
 0x500   : > { %11933 = vst [vmem:[%s18270_s6 + $0x80] sm:$0xff] %v11681_v0   ;;  %v9571_v48 = vadd.f32 %v13775_v4, %v18247_v15  ;;  %v13777_v22 = vadd.f32 %v9036_v3, %v18138_v59 }
 0x501   : > { %v9574_v55 = vadd.f32 %v13776_v56, %v18247_v15  ;;  %v9701_v8 = vmax.f32 %v9573_v52, 0.0 }
 0x502   : > { %v9572_v14 = vadd.f32 %v13777_v22, %v18247_v15  ;;  %v9699_v62 = vmax.f32 %v9571_v48, 0.0  ;;  %v19493_v48 = vld [vmem:[#allocation149_spill] sm:$0xff] }
 0x503   : > { %v9702_v43 = vmax.f32 %v9574_v55, 0.0 }
 0x504   : > { %v9700_v21 = vmax.f32 %v9572_v14, 0.0  ;;  %v13650_v12 = vpop.f32.mrb[40].mxu0 }
 0x505   : > { %v11696_v26 = vpack.c.bf16 %v9702_v43, %v9701_v8  ;;  %v13778_v57 = vadd.f32 %v13650_v12, %v18148_v25  ;;  %v9049_v28 = vpop.f32.mrb[41].mxu0 }
 0x506   : > { %v11691_v42 = vpack.c.bf16 %v9700_v21, %v9699_v62  ;;  %v13779_v13 = vadd.f32 %v9049_v28, %v18150_v29  ;;  %v13651_v30 = vpop.f32.mrb[42].mxu0 }
 0x507   : > { %11936 = vst [vmem:[%s18270_s6 + $0x98] sm:$0xff] %v11696_v26   ;;  %v9577_v59 = vadd.f32 %v13778_v57, %v18247_v15  ;;  %v13780_v23 = vadd.f32 %v13651_v30, %v18152_v47  ;;  %v9052_v61 = vpop.f32.mrb[43].mxu0  ;;  %v19494_v57 = vld [vmem:[#allocation154_spill] sm:$0xff]  ;;  %v19495_v30 = vld [vmem:[#allocation156_spill] sm:$0xff] }
 0x508   : > { %11935 = vst [vmem:[%s18270_s6 + $0x90] sm:$0xff] %v11691_v42   ;;  %v9575_v36 = vadd.f32 %v13779_v13, %v18247_v15  ;;  %v13781_v38 = vadd.f32 %v9052_v61, %v19485_v37 }
 0x509   : > { %v9578_v2 = vadd.f32 %v13780_v23, %v18247_v15  ;;  %v9705_v40 = vmax.f32 %v9577_v59, 0.0 }
 0x50a   : > { %v9576_v25 = vadd.f32 %v13781_v38, %v18247_v15  ;;  %v9703_v9 = vmax.f32 %v9575_v36, 0.0  ;;  %v19496_v36 = vld [vmem:[#allocation155_spill] sm:$0xff] }
 0x50b   : > { %v9706_v29 = vmax.f32 %v9578_v2, 0.0 }
 0x50c   : > { %v9704_v10 = vmax.f32 %v9576_v25, 0.0  ;;  %v13654_v6 = vpop.f32.mrb[44].mxu0  ;;  %v19497_v25 = vld [vmem:[#allocation157_spill] sm:$0xff] }
 0x50d   : > { %v11706_v45 = vpack.c.bf16 %v9706_v29, %v9705_v40  ;;  %v13782_v47 = vadd.f32 %v13654_v6, %v19486_v44  ;;  %v9065_v16 = vpop.f32.mrb[45].mxu0 }
 0x50e   : > { %v11701_v33 = vpack.c.bf16 %v9704_v10, %v9703_v9  ;;  %v13783_v53 = vadd.f32 %v9065_v16, %v19487_v18  ;;  %v13655_v39 = vpop.f32.mrb[46].mxu0 }
 0x50f   : > { %11938 = vst [vmem:[%s18270_s6 + $0xa8] sm:$0xff] %v11706_v45   ;;  %v9581_v58 = vadd.f32 %v13782_v47, %v18247_v15  ;;  %v13784_v31 = vadd.f32 %v13655_v39, %v19488_v11  ;;  %v9068_v63 = vpop.f32.mrb[47].mxu0 }
 0x510   : > { %11937 = vst [vmem:[%s18270_s6 + $0xa0] sm:$0xff] %v11701_v33   ;;  %v9579_v41 = vadd.f32 %v13783_v53, %v18247_v15  ;;  %v13785_v50 = vadd.f32 %v9068_v63, %v19489_v19  ;;  %v19498_v33 = vld [vmem:[#allocation162_spill] sm:$0xff] }
 0x511   : > { %v9582_v32 = vadd.f32 %v13784_v31, %v18247_v15  ;;  %v9709_v51 = vmax.f32 %v9581_v58, 0.0  ;;  %v19499_v58 = vld [vmem:[#allocation164_spill] sm:$0xff] }
 0x512   : > { %v9580_v46 = vadd.f32 %v13785_v50, %v18247_v15  ;;  %v9707_v60 = vmax.f32 %v9579_v41, 0.0  ;;  %v19500_v41 = vld [vmem:[#allocation163_spill] sm:$0xff] }
 0x513   : > { %v9710_v24 = vmax.f32 %v9582_v32, 0.0 }
 0x514   : > { %v9708_v34 = vmax.f32 %v9580_v46, 0.0  ;;  %v13658_v20 = vpop.f32.mrb[48].mxu0  ;;  %v19501_v46 = vld [vmem:[#allocation165_spill] sm:$0xff] }
 0x515   : > { %v11716_v1 = vpack.c.bf16 %v9710_v24, %v9709_v51  ;;  %v13786_v54 = vadd.f32 %v13658_v20, %v19490_v7  ;;  %v9081_v5 = vpop.f32.mrb[49].mxu0 }
 0x516   : > { %v11711_v27 = vpack.c.bf16 %v9708_v34, %v9707_v60  ;;  %v13787_v49 = vadd.f32 %v9081_v5, %v19491_v35  ;;  %v13659_v0 = vpop.f32.mrb[50].mxu0 }
 0x517   : > { %11940 = vst [vmem:[%s18270_s6 + $0xb8] sm:$0xff] %v11716_v1   ;;  %v9585_v4 = vadd.f32 %v13786_v54, %v18247_v15  ;;  %v13788_v52 = vadd.f32 %v13659_v0, %v19492_v17  ;;  %v9084_v56 = vpop.f32.mrb[51].mxu0 }
 0x518   : > { %11939 = vst [vmem:[%s18270_s6 + $0xb0] sm:$0xff] %v11711_v27   ;;  %v9583_v3 = vadd.f32 %v13787_v49, %v18247_v15  ;;  %v13789_v22 = vadd.f32 %v9084_v56, %v19493_v48  ;;  %v19502_v27 = vld [vmem:[#allocation170_spill] sm:$0xff] }
 0x519   : > { %v9586_v55 = vadd.f32 %v13788_v52, %v18247_v15  ;;  %v9713_v8 = vmax.f32 %v9585_v4, 0.0  ;;  %v19503_v4 = vld [vmem:[#allocation172_spill] sm:$0xff] }
 0x51a   : > { %v9584_v14 = vadd.f32 %v13789_v22, %v18247_v15  ;;  %v9711_v62 = vmax.f32 %v9583_v3, 0.0  ;;  %v19504_v3 = vld [vmem:[#allocation171_spill] sm:$0xff] }
 0x51b   : > { %v9714_v43 = vmax.f32 %v9586_v55, 0.0 }
 0x51c   : > { %v9712_v21 = vmax.f32 %v9584_v14, 0.0  ;;  %v13662_v12 = vpop.f32.mrb[52].mxu0  ;;  %v19505_v14 = vld [vmem:[#allocation173_spill] sm:$0xff] }
 0x51d   : > { %v11726_v26 = vpack.c.bf16 %v9714_v43, %v9713_v8  ;;  %v13790_v28 = vadd.f32 %v13662_v12, %v19494_v57  ;;  %v9097_v42 = vpop.f32.mrb[53].mxu0 }
 0x51e   : > { %v11721_v13 = vpack.c.bf16 %v9712_v21, %v9711_v62  ;;  %v13791_v59 = vadd.f32 %v9097_v42, %v19495_v30  ;;  %v13663_v23 = vpop.f32.mrb[54].mxu0 }
 0x51f   : > { %11942 = vst [vmem:[%s18270_s6 + $0xc8] sm:$0xff] %v11726_v26   ;;  %v9589_v61 = vadd.f32 %v13790_v28, %v18247_v15  ;;  %v13792_v37 = vadd.f32 %v13663_v23, %v19496_v36  ;;  %v9100_v38 = vpop.f32.mrb[55].mxu0 }
 0x520   : > { %11941 = vst [vmem:[%s18270_s6 + $0xc0] sm:$0xff] %v11721_v13   ;;  %v9587_v2 = vadd.f32 %v13791_v59, %v18247_v15  ;;  %v13793_v40 = vadd.f32 %v9100_v38, %v19497_v25 }
 0x521   : > { %v9590_v29 = vadd.f32 %v13792_v37, %v18247_v15  ;;  %v9717_v10 = vmax.f32 %v9589_v61, 0.0 }
 0x522   : > { %v9588_v9 = vadd.f32 %v13793_v40, %v18247_v15  ;;  %v9715_v45 = vmax.f32 %v9587_v2, 0.0 }
 0x523   : > { %v9718_v6 = vmax.f32 %v9590_v29, 0.0 }
 0x524   : > { %v9716_v44 = vmax.f32 %v9588_v9, 0.0  ;;  %v13666_v47 = vpop.f32.mrb[56].mxu0 }
 0x525   : > { %v11736_v16 = vpack.c.bf16 %v9718_v6, %v9717_v10  ;;  %v13794_v18 = vadd.f32 %v13666_v47, %v19498_v33  ;;  %v9113_v53 = vpop.f32.mrb[57].mxu0 }
 0x526   : > { %v11731_v39 = vpack.c.bf16 %v9716_v44, %v9715_v45  ;;  %v13795_v11 = vadd.f32 %v9113_v53, %v19499_v58  ;;  %v13667_v31 = vpop.f32.mrb[58].mxu0 }
 0x527   : > { %11944 = vst [vmem:[%s18270_s6 + $0xd8] sm:$0xff] %v11736_v16   ;;  %v9593_v63 = vadd.f32 %v13794_v18, %v18247_v15  ;;  %v13796_v19 = vadd.f32 %v13667_v31, %v19500_v41  ;;  %v9116_v50 = vpop.f32.mrb[59].mxu0 }
 0x528   : > { %11943 = vst [vmem:[%s18270_s6 + $0xd0] sm:$0xff] %v11731_v39   ;;  %v9591_v32 = vadd.f32 %v13795_v11, %v18247_v15  ;;  %v13797_v51 = vadd.f32 %v9116_v50, %v19501_v46 }
 0x529   : > { %v9594_v24 = vadd.f32 %v13796_v19, %v18247_v15  ;;  %v9721_v34 = vmax.f32 %v9593_v63, 0.0 }
 0x52a   : > { %v9592_v60 = vadd.f32 %v13797_v51, %v18247_v15  ;;  %v9719_v1 = vmax.f32 %v9591_v32, 0.0 }
 0x52b   : > { %v9722_v20 = vmax.f32 %v9594_v24, 0.0 }
 0x52c   : > { %v9720_v7 = vmax.f32 %v9592_v60, 0.0  ;;  %v13670_v54 = vpop.f32.mrb[60].mxu0 }
 0x52d   : > { %v11746_v5 = vpack.c.bf16 %v9722_v20, %v9721_v34  ;;  %v13798_v35 = vadd.f32 %v13670_v54, %v19502_v27  ;;  %v9129_v49 = vpop.f32.mrb[61].mxu0 }
 0x52e   : > { %v11741_v0 = vpack.c.bf16 %v9720_v7, %v9719_v1  ;;  %v13799_v17 = vadd.f32 %v9129_v49, %v19503_v4  ;;  %v13671_v52 = vpop.f32.mrb[62].mxu0 }
 0x52f   : > { %11946 = vst [vmem:[%s18270_s6 + $0xe8] sm:$0xff] %v11746_v5   ;;  %v9597_v56 = vadd.f32 %v13798_v35, %v18247_v15  ;;  %v13800_v48 = vadd.f32 %v13671_v52, %v19504_v3  ;;  %v9132_v22 = vpop.f32.mrb[63].mxu0 }
 0x530   : > { %11945 = vst [vmem:[%s18270_s6 + $0xe0] sm:$0xff] %v11741_v0   ;;  %v9595_v55 = vadd.f32 %v13799_v17, %v18247_v15  ;;  %v13801_v8 = vadd.f32 %v9132_v22, %v19505_v14 }
 0x531   : > { %v9598_v43 = vadd.f32 %v13800_v48, %v18247_v15  ;;  %v9725_v21 = vmax.f32 %v9597_v56, 0.0 }
 0x532   : > { %v9596_v62 = vadd.f32 %v13801_v8, %v18247_v15  ;;  %v9723_v26 = vmax.f32 %v9595_v55, 0.0 }
 0x533   : > { %v9726_v12 = vmax.f32 %v9598_v43, 0.0 }
 0x534   : > { %v9724_v57 = vmax.f32 %v9596_v62, 0.0  ;;  %v13674_v42 = vpop.f32.mrb[64].mxu0 }
 0x535   : > { %v13154_v28 = vpop.f32.mrb[64].mxu1  ;;  %v11756_v13 = vpack.c.bf16 %v9726_v12, %v9725_v21  ;;  %v9145_v23 = vpop.f32.mrb[65].mxu0 }
 0x536   : > { %v13802_v30 = vadd.f32 %v13674_v42, %v13154_v28  ;;  %v6309_v59 = vpop.f32.mrb[65].mxu1  ;;  %v11751_v61 = vpack.c.bf16 %v9724_v57, %v9723_v26  ;;  %v13675_v38 = vpop.f32.mrb[66].mxu0 }
 0x537   : > { %v13803_v36 = vadd.f32 %v9145_v23, %v6309_v59  ;;  %v13155_v37 = vpop.f32.mrb[66].mxu1  ;;  %11948 = vst [vmem:[%s18270_s6 + $0xf8] sm:$0xff] %v11756_v13   ;;  %v9148_v29 = vpop.f32.mrb[67].mxu0 }
 0x538   : > { %v9601_v2 = vadd.f32 %v13802_v30, %v18247_v15  ;;  %v13804_v25 = vadd.f32 %v13675_v38, %v13155_v37  ;;  %v6312_v40 = vpop.f32.mrb[67].mxu1  ;;  %11947 = vst [vmem:[%s18270_s6 + $0xf0] sm:$0xff] %v11751_v61  }
 0x539   : > { %v9599_v9 = vadd.f32 %v13803_v36, %v18247_v15  ;;  %v13805_v10 = vadd.f32 %v9148_v29, %v6312_v40 }
 0x53a   : > { %v9602_v6 = vadd.f32 %v13804_v25, %v18247_v15  ;;  %v9729_v44 = vmax.f32 %v9601_v2, 0.0 }
 0x53b   : > { %v9600_v45 = vadd.f32 %v13805_v10, %v18247_v15  ;;  %v9727_v16 = vmax.f32 %v9599_v9, 0.0 }
 0x53c   : > { %v9730_v47 = vmax.f32 %v9602_v6, 0.0  ;;  %v13678_v53 = vpop.f32.mrb[68].mxu0 }
 0x53d   : > { %v9728_v33 = vmax.f32 %v9600_v45, 0.0  ;;  %v13158_v18 = vpop.f32.mrb[68].mxu1  ;;  %v9161_v31 = vpop.f32.mrb[69].mxu0 }
 0x53e   : > { %v11766_v39 = vpack.c.bf16 %v9730_v47, %v9729_v44  ;;  %v13806_v58 = vadd.f32 %v13678_v53, %v13158_v18  ;;  %v6325_v11 = vpop.f32.mrb[69].mxu1  ;;  %v13679_v50 = vpop.f32.mrb[70].mxu0 }
 0x53f   : > { %v11761_v63 = vpack.c.bf16 %v9728_v33, %v9727_v16  ;;  %v13807_v41 = vadd.f32 %v9161_v31, %v6325_v11  ;;  %v13159_v19 = vpop.f32.mrb[70].mxu1  ;;  %v9164_v24 = vpop.f32.mrb[71].mxu0 }
 0x540   : > { %11950 = vst [vmem:[%s18270_s6 + $0x108] sm:$0xff] %v11766_v39   ;;  %v9605_v32 = vadd.f32 %v13806_v58, %v18247_v15  ;;  %v13808_v46 = vadd.f32 %v13679_v50, %v13159_v19  ;;  %v6328_v51 = vpop.f32.mrb[71].mxu1 }
 0x541   : > { %11949 = vst [vmem:[%s18270_s6 + $0x100] sm:$0xff] %v11761_v63   ;;  %v9603_v60 = vadd.f32 %v13807_v41, %v18247_v15  ;;  %v13809_v34 = vadd.f32 %v9164_v24, %v6328_v51 }
 0x542   : > { %v9606_v20 = vadd.f32 %v13808_v46, %v18247_v15  ;;  %v9733_v7 = vmax.f32 %v9605_v32, 0.0 }
 0x543   : > { %v9604_v1 = vadd.f32 %v13809_v34, %v18247_v15  ;;  %v9731_v5 = vmax.f32 %v9603_v60, 0.0 }
 0x544   : > { %v9734_v54 = vmax.f32 %v9606_v20, 0.0  ;;  %v13682_v49 = vpop.f32.mrb[72].mxu0 }
 0x545   : > { %v9732_v27 = vmax.f32 %v9604_v1, 0.0  ;;  %v13162_v35 = vpop.f32.mrb[72].mxu1  ;;  %v9177_v52 = vpop.f32.mrb[73].mxu0 }
 0x546   : > { %v11776_v0 = vpack.c.bf16 %v9734_v54, %v9733_v7  ;;  %v13810_v4 = vadd.f32 %v13682_v49, %v13162_v35  ;;  %v6341_v17 = vpop.f32.mrb[73].mxu1  ;;  %v13683_v22 = vpop.f32.mrb[74].mxu0 }
 0x547   : > { %v11771_v56 = vpack.c.bf16 %v9732_v27, %v9731_v5  ;;  %v13811_v3 = vadd.f32 %v9177_v52, %v6341_v17  ;;  %v13163_v48 = vpop.f32.mrb[74].mxu1  ;;  %v9180_v43 = vpop.f32.mrb[75].mxu0 }
 0x548   : > { %11952 = vst [vmem:[%s18270_s6 + $0x118] sm:$0xff] %v11776_v0   ;;  %v9609_v55 = vadd.f32 %v13810_v4, %v18247_v15  ;;  %v13812_v14 = vadd.f32 %v13683_v22, %v13163_v48  ;;  %v6344_v8 = vpop.f32.mrb[75].mxu1 }
 0x549   : > { %11951 = vst [vmem:[%s18270_s6 + $0x110] sm:$0xff] %v11771_v56   ;;  %v9607_v62 = vadd.f32 %v13811_v3, %v18247_v15  ;;  %v13813_v21 = vadd.f32 %v9180_v43, %v6344_v8 }
 0x54a   : > { %v9610_v12 = vadd.f32 %v13812_v14, %v18247_v15  ;;  %v9737_v57 = vmax.f32 %v9609_v55, 0.0 }
 0x54b   : > { %v9608_v26 = vadd.f32 %v13813_v21, %v18247_v15  ;;  %v9735_v42 = vmax.f32 %v9607_v62, 0.0 }
 0x54c   : > { %v9738_v28 = vmax.f32 %v9610_v12, 0.0  ;;  %v13686_v59 = vpop.f32.mrb[76].mxu0 }
 0x54d   : > { %v9736_v13 = vmax.f32 %v9608_v26, 0.0  ;;  %v13166_v30 = vpop.f32.mrb[76].mxu1  ;;  %v9193_v37 = vpop.f32.mrb[77].mxu0 }
 0x54e   : > { %v11786_v23 = vpack.c.bf16 %v9738_v28, %v9737_v57  ;;  %v13814_v61 = vadd.f32 %v13686_v59, %v13166_v30  ;;  %v6357_v36 = vpop.f32.mrb[77].mxu1  ;;  %v13687_v40 = vpop.f32.mrb[78].mxu0 }
 0x54f   : > { %v11781_v38 = vpack.c.bf16 %v9736_v13, %v9735_v42  ;;  %v13815_v2 = vadd.f32 %v9193_v37, %v6357_v36  ;;  %v13167_v25 = vpop.f32.mrb[78].mxu1  ;;  %v9196_v6 = vpop.f32.mrb[79].mxu0 }
 0x550   : > { %11954 = vst [vmem:[%s18270_s6 + $0x128] sm:$0xff] %v11786_v23   ;;  %v9613_v29 = vadd.f32 %v13814_v61, %v18247_v15  ;;  %v13816_v9 = vadd.f32 %v13687_v40, %v13167_v25  ;;  %v6360_v10 = vpop.f32.mrb[79].mxu1 }
 0x551   : > { %11953 = vst [vmem:[%s18270_s6 + $0x120] sm:$0xff] %v11781_v38   ;;  %v9611_v45 = vadd.f32 %v13815_v2, %v18247_v15  ;;  %v13817_v44 = vadd.f32 %v9196_v6, %v6360_v10 }
 0x552   : > { %v9614_v47 = vadd.f32 %v13816_v9, %v18247_v15  ;;  %v9741_v33 = vmax.f32 %v9613_v29, 0.0 }
 0x553   : > { %v9612_v16 = vadd.f32 %v13817_v44, %v18247_v15  ;;  %v9739_v53 = vmax.f32 %v9611_v45, 0.0 }
 0x554   : > { %v9742_v18 = vmax.f32 %v9614_v47, 0.0  ;;  %v13690_v11 = vpop.f32.mrb[80].mxu0 }
 0x555   : > { %v9740_v39 = vmax.f32 %v9612_v16, 0.0  ;;  %v13170_v58 = vpop.f32.mrb[80].mxu1  ;;  %v9209_v19 = vpop.f32.mrb[81].mxu0 }
 0x556   : > { %v11796_v31 = vpack.c.bf16 %v9742_v18, %v9741_v33  ;;  %v13818_v63 = vadd.f32 %v13690_v11, %v13170_v58  ;;  %v6373_v41 = vpop.f32.mrb[81].mxu1  ;;  %v13691_v51 = vpop.f32.mrb[82].mxu0  ;;  %v18502_v18 = vld [vmem:[%s18616_s2] ss:$0 sm:$0xff] }
 0x557   : > { %v11791_v50 = vpack.c.bf16 %v9740_v39, %v9739_v53  ;;  %v13819_v32 = vadd.f32 %v9209_v19, %v6373_v41  ;;  %v13171_v46 = vpop.f32.mrb[82].mxu1  ;;  %v9212_v20 = vpop.f32.mrb[83].mxu0 }
 0x558   : > { %11956 = vst [vmem:[%s18270_s6 + $0x138] sm:$0xff] %v11796_v31   ;;  %v9617_v24 = vadd.f32 %v13818_v63, %v18247_v15  ;;  %v13820_v60 = vadd.f32 %v13691_v51, %v13171_v46  ;;  %v6376_v34 = vpop.f32.mrb[83].mxu1 }
 0x559   : > { %11955 = vst [vmem:[%s18270_s6 + $0x130] sm:$0xff] %v11791_v50   ;;  %v9615_v1 = vadd.f32 %v13819_v32, %v18247_v15  ;;  %v13821_v7 = vadd.f32 %v9212_v20, %v6376_v34 }
 0x55a   : > { %v9618_v54 = vadd.f32 %v13820_v60, %v18247_v15  ;;  %v9745_v27 = vmax.f32 %v9617_v24, 0.0 }
 0x55b   : > { %v9616_v5 = vadd.f32 %v13821_v7, %v18247_v15  ;;  %v9743_v49 = vmax.f32 %v9615_v1, 0.0 }
 0x55c   : > { %v9746_v35 = vmax.f32 %v9618_v54, 0.0  ;;  %v13694_v17 = vpop.f32.mrb[84].mxu0 }
 0x55d   : > { %v9744_v0 = vmax.f32 %v9616_v5, 0.0  ;;  %v13174_v4 = vpop.f32.mrb[84].mxu1  ;;  %v9225_v48 = vpop.f32.mrb[85].mxu0 }
 0x55e   : > { %v11806_v52 = vpack.c.bf16 %v9746_v35, %v9745_v27  ;;  %v13822_v56 = vadd.f32 %v13694_v17, %v13174_v4  ;;  %v6389_v3 = vpop.f32.mrb[85].mxu1  ;;  %v13695_v8 = vpop.f32.mrb[86].mxu0 }
 0x55f   : > { %v11801_v22 = vpack.c.bf16 %v9744_v0, %v9743_v49  ;;  %v13823_v55 = vadd.f32 %v9225_v48, %v6389_v3  ;;  %v13175_v14 = vpop.f32.mrb[86].mxu1  ;;  %v9228_v12 = vpop.f32.mrb[87].mxu0 }
 0x560   : > { %11958 = vst [vmem:[%s18270_s6 + $0x148] sm:$0xff] %v11806_v52   ;;  %v9621_v43 = vadd.f32 %v13822_v56, %v18247_v15  ;;  %v13824_v62 = vadd.f32 %v13695_v8, %v13175_v14  ;;  %v6392_v21 = vpop.f32.mrb[87].mxu1 }
 0x561   : > { %11957 = vst [vmem:[%s18270_s6 + $0x140] sm:$0xff] %v11801_v22   ;;  %v9619_v26 = vadd.f32 %v13823_v55, %v18247_v15  ;;  %v13825_v57 = vadd.f32 %v9228_v12, %v6392_v21 }
 0x562   : > { %v9622_v28 = vadd.f32 %v13824_v62, %v18247_v15  ;;  %v9749_v13 = vmax.f32 %v9621_v43, 0.0 }
 0x563   : > { %v9620_v42 = vadd.f32 %v13825_v57, %v18247_v15  ;;  %v9747_v59 = vmax.f32 %v9619_v26, 0.0 }
 0x564   : > { %v9750_v30 = vmax.f32 %v9622_v28, 0.0  ;;  %v13698_v36 = vpop.f32.mrb[88].mxu0 }
 0x565   : > { %v9748_v23 = vmax.f32 %v9620_v42, 0.0  ;;  %v13178_v61 = vpop.f32.mrb[88].mxu1  ;;  %v9241_v25 = vpop.f32.mrb[89].mxu0 }
 0x566   : > { %v11816_v37 = vpack.c.bf16 %v9750_v30, %v9749_v13  ;;  %v13826_v38 = vadd.f32 %v13698_v36, %v13178_v61  ;;  %v6405_v2 = vpop.f32.mrb[89].mxu1  ;;  %v13699_v10 = vpop.f32.mrb[90].mxu0 }
 0x567   : > { %v11811_v40 = vpack.c.bf16 %v9748_v23, %v9747_v59  ;;  %v13827_v29 = vadd.f32 %v9241_v25, %v6405_v2  ;;  %v13179_v9 = vpop.f32.mrb[90].mxu1  ;;  %v9244_v47 = vpop.f32.mrb[91].mxu0 }
 0x568   : > { %11960 = vst [vmem:[%s18270_s6 + $0x158] sm:$0xff] %v11816_v37   ;;  %v9625_v6 = vadd.f32 %v13826_v38, %v18247_v15  ;;  %v13828_v45 = vadd.f32 %v13699_v10, %v13179_v9  ;;  %v6408_v44 = vpop.f32.mrb[91].mxu1 }
 0x569   : > { %11959 = vst [vmem:[%s18270_s6 + $0x150] sm:$0xff] %v11811_v40   ;;  %v9623_v16 = vadd.f32 %v13827_v29, %v18247_v15  ;;  %v13829_v33 = vadd.f32 %v9244_v47, %v6408_v44 }
 0x56a   : > { %v9626_v53 = vadd.f32 %v18502_v18, %v13828_v45  ;;  %v9753_v58 = vmax.f32 %v9625_v6, 0.0 }
 0x56b   : > { %v9624_v39 = vadd.f32 %v18502_v18, %v13829_v33  ;;  %v9751_v31 = vmax.f32 %v9623_v16, 0.0 }
 0x56c   : > { %v9754_v11 = vmax.f32 %v9626_v53, 0.0  ;;  %v13702_v19 = vpop.f32.mrb[92].mxu0 }
 0x56d   : > { %v9752_v63 = vmax.f32 %v9624_v39, 0.0  ;;  %v13182_v41 = vpop.f32.mrb[92].mxu1  ;;  %v9257_v46 = vpop.f32.mrb[93].mxu0 }
 0x56e   : > { %v11826_v50 = vpack.c.bf16 %v9754_v11, %v9753_v58  ;;  %v13830_v15 = vadd.f32 %v13702_v19, %v13182_v41  ;;  %v6421_v32 = vpop.f32.mrb[93].mxu1  ;;  %v13703_v34 = vpop.f32.mrb[94].mxu0 }
 0x56f   : > { %v11821_v51 = vpack.c.bf16 %v9752_v63, %v9751_v31  ;;  %v13831_v24 = vadd.f32 %v9257_v46, %v6421_v32  ;;  %v13183_v60 = vpop.f32.mrb[94].mxu1  ;;  %v9260_v54 = vpop.f32.mrb[95].mxu0 }
 0x570   : > { %11962 = vst [vmem:[%s18270_s6 + $0x168] sm:$0xff] %v11826_v50   ;;  %v9629_v20 = vadd.f32 %v18502_v18, %v13830_v15  ;;  %v13832_v1 = vadd.f32 %v13703_v34, %v13183_v60  ;;  %v6424_v7 = vpop.f32.mrb[95].mxu1 }
 0x571   : > { %11961 = vst [vmem:[%s18270_s6 + $0x160] sm:$0xff] %v11821_v51   ;;  %v9627_v5 = vadd.f32 %v18502_v18, %v13831_v24  ;;  %v13833_v27 = vadd.f32 %v9260_v54, %v6424_v7 }
 0x572   : > { %v9630_v35 = vadd.f32 %v18502_v18, %v13832_v1  ;;  %v9757_v0 = vmax.f32 %v9629_v20, 0.0 }
 0x573   : > { %v9628_v49 = vadd.f32 %v18502_v18, %v13833_v27  ;;  %v9755_v17 = vmax.f32 %v9627_v5, 0.0 }
 0x574   : > { %v9758_v4 = vmax.f32 %v9630_v35, 0.0  ;;  %v13706_v3 = vpop.f32.mrb[96].mxu0 }
 0x575   : > { %v9756_v52 = vmax.f32 %v9628_v49, 0.0  ;;  %v13186_v56 = vpop.f32.mrb[96].mxu1  ;;  %v9273_v14 = vpop.f32.mrb[97].mxu0 }
 0x576   : > { %v11836_v48 = vpack.c.bf16 %v9758_v4, %v9757_v0  ;;  %v13834_v22 = vadd.f32 %v13706_v3, %v13186_v56  ;;  %v6437_v55 = vpop.f32.mrb[97].mxu1  ;;  %v13707_v21 = vpop.f32.mrb[98].mxu0 }
 0x577   : > { %v11831_v8 = vpack.c.bf16 %v9756_v52, %v9755_v17  ;;  %v13835_v43 = vadd.f32 %v9273_v14, %v6437_v55  ;;  %v13187_v62 = vpop.f32.mrb[98].mxu1  ;;  %v9276_v28 = vpop.f32.mrb[99].mxu0 }
 0x578   : > { %11964 = vst [vmem:[%s18270_s6 + $0x178] sm:$0xff] %v11836_v48   ;;  %v9633_v12 = vadd.f32 %v18502_v18, %v13834_v22  ;;  %v13836_v26 = vadd.f32 %v13707_v21, %v13187_v62  ;;  %v6440_v57 = vpop.f32.mrb[99].mxu1 }
 0x579   : > { %11963 = vst [vmem:[%s18270_s6 + $0x170] sm:$0xff] %v11831_v8   ;;  %v9631_v42 = vadd.f32 %v18502_v18, %v13835_v43  ;;  %v13837_v13 = vadd.f32 %v9276_v28, %v6440_v57 }
 0x57a   : > { %v9634_v30 = vadd.f32 %v18502_v18, %v13836_v26  ;;  %v9761_v23 = vmax.f32 %v9633_v12, 0.0 }
 0x57b   : > { %v9632_v59 = vadd.f32 %v18502_v18, %v13837_v13  ;;  %v9759_v36 = vmax.f32 %v9631_v42, 0.0 }
 0x57c   : > { %v9762_v61 = vmax.f32 %v9634_v30, 0.0  ;;  %v13710_v2 = vpop.f32.mrb[100].mxu0 }
 0x57d   : > { %v9760_v37 = vmax.f32 %v9632_v59, 0.0  ;;  %v13190_v38 = vpop.f32.mrb[100].mxu1  ;;  %v9289_v9 = vpop.f32.mrb[101].mxu0 }
 0x57e   : > { %v11846_v25 = vpack.c.bf16 %v9762_v61, %v9761_v23  ;;  %v13838_v40 = vadd.f32 %v13710_v2, %v13190_v38  ;;  %v6453_v29 = vpop.f32.mrb[101].mxu1  ;;  %v13711_v44 = vpop.f32.mrb[102].mxu0 }
 0x57f   : > { %v11841_v10 = vpack.c.bf16 %v9760_v37, %v9759_v36  ;;  %v13839_v6 = vadd.f32 %v9289_v9, %v6453_v29  ;;  %v13191_v45 = vpop.f32.mrb[102].mxu1  ;;  %v9292_v53 = vpop.f32.mrb[103].mxu0 }
 0x580   : > { %11966 = vst [vmem:[%s18270_s6 + $0x188] sm:$0xff] %v11846_v25   ;;  %v9637_v47 = vadd.f32 %v18502_v18, %v13838_v40  ;;  %v13840_v16 = vadd.f32 %v13711_v44, %v13191_v45  ;;  %v6456_v33 = vpop.f32.mrb[103].mxu1 }
 0x581   : > { %11965 = vst [vmem:[%s18270_s6 + $0x180] sm:$0xff] %v11841_v10   ;;  %v9635_v39 = vadd.f32 %v18502_v18, %v13839_v6  ;;  %v13841_v58 = vadd.f32 %v9292_v53, %v6456_v33 }
 0x582   : > { %v9638_v11 = vadd.f32 %v18502_v18, %v13840_v16  ;;  %v9765_v63 = vmax.f32 %v9637_v47, 0.0 }
 0x583   : > { %v9636_v31 = vadd.f32 %v18502_v18, %v13841_v58  ;;  %v9763_v19 = vmax.f32 %v9635_v39, 0.0 }
 0x584   : > { %v9766_v41 = vmax.f32 %v9638_v11, 0.0  ;;  %v13714_v32 = vpop.f32.mrb[104].mxu0 }
 0x585   : > { %v9764_v50 = vmax.f32 %v9636_v31, 0.0  ;;  %v13194_v15 = vpop.f32.mrb[104].mxu1  ;;  %v9305_v60 = vpop.f32.mrb[105].mxu0 }
 0x586   : > { %v11856_v46 = vpack.c.bf16 %v9766_v41, %v9765_v63  ;;  %v13842_v51 = vadd.f32 %v13714_v32, %v13194_v15  ;;  %v6469_v24 = vpop.f32.mrb[105].mxu1  ;;  %v13715_v7 = vpop.f32.mrb[106].mxu0 }
 0x587   : > { %v11851_v34 = vpack.c.bf16 %v9764_v50, %v9763_v19  ;;  %v13843_v20 = vadd.f32 %v9305_v60, %v6469_v24  ;;  %v13195_v1 = vpop.f32.mrb[106].mxu1  ;;  %v9308_v35 = vpop.f32.mrb[107].mxu0 }
 0x588   : > { %11968 = vst [vmem:[%s18270_s6 + $0x198] sm:$0xff] %v11856_v46   ;;  %v9641_v54 = vadd.f32 %v18502_v18, %v13842_v51  ;;  %v13844_v5 = vadd.f32 %v13715_v7, %v13195_v1  ;;  %v6472_v27 = vpop.f32.mrb[107].mxu1 }
 0x589   : > { %11967 = vst [vmem:[%s18270_s6 + $0x190] sm:$0xff] %v11851_v34   ;;  %v9639_v49 = vadd.f32 %v18502_v18, %v13843_v20  ;;  %v13845_v0 = vadd.f32 %v9308_v35, %v6472_v27 }
 0x58a   : > { %v9642_v4 = vadd.f32 %v18502_v18, %v13844_v5  ;;  %v9769_v52 = vmax.f32 %v9641_v54, 0.0 }
 0x58b   : > { %v9640_v17 = vadd.f32 %v18502_v18, %v13845_v0  ;;  %v9767_v3 = vmax.f32 %v9639_v49, 0.0 }
 0x58c   : > { %v9770_v56 = vmax.f32 %v9642_v4, 0.0  ;;  %v13718_v55 = vpop.f32.mrb[108].mxu0 }
 0x58d   : > { %v9768_v48 = vmax.f32 %v9640_v17, 0.0  ;;  %v13198_v22 = vpop.f32.mrb[108].mxu1  ;;  %v9321_v62 = vpop.f32.mrb[109].mxu0 }
 0x58e   : > { %v11866_v14 = vpack.c.bf16 %v9770_v56, %v9769_v52  ;;  %v13846_v8 = vadd.f32 %v13718_v55, %v13198_v22  ;;  %v6485_v43 = vpop.f32.mrb[109].mxu1  ;;  %v13719_v57 = vpop.f32.mrb[110].mxu0 }
 0x58f   : > { %v11861_v21 = vpack.c.bf16 %v9768_v48, %v9767_v3  ;;  %v13847_v12 = vadd.f32 %v9321_v62, %v6485_v43  ;;  %v13199_v26 = vpop.f32.mrb[110].mxu1  ;;  %v9324_v30 = vpop.f32.mrb[111].mxu0 }
 0x590   : > { %11970 = vst [vmem:[%s18270_s6 + $0x1a8] sm:$0xff] %v11866_v14   ;;  %v9645_v28 = vadd.f32 %v18502_v18, %v13846_v8  ;;  %v13848_v42 = vadd.f32 %v13719_v57, %v13199_v26  ;;  %v6488_v13 = vpop.f32.mrb[111].mxu1 }
 0x591   : > { %11969 = vst [vmem:[%s18270_s6 + $0x1a0] sm:$0xff] %v11861_v21   ;;  %v9643_v59 = vadd.f32 %v18502_v18, %v13847_v12  ;;  %v13849_v23 = vadd.f32 %v9324_v30, %v6488_v13 }
 0x592   : > { %v9646_v61 = vadd.f32 %v18502_v18, %v13848_v42  ;;  %v9773_v37 = vmax.f32 %v9645_v28, 0.0 }
 0x593   : > { %v9644_v36 = vadd.f32 %v18502_v18, %v13849_v23  ;;  %v9771_v2 = vmax.f32 %v9643_v59, 0.0 }
 0x594   : > { %v9774_v38 = vmax.f32 %v9646_v61, 0.0  ;;  %v13722_v29 = vpop.f32.mrb[112].mxu0 }
 0x595   : > { %v9772_v25 = vmax.f32 %v9644_v36, 0.0  ;;  %v13202_v40 = vpop.f32.mrb[112].mxu1  ;;  %v9337_v45 = vpop.f32.mrb[113].mxu0 }
 0x596   : > { %v11876_v9 = vpack.c.bf16 %v9774_v38, %v9773_v37  ;;  %v13850_v10 = vadd.f32 %v13722_v29, %v13202_v40  ;;  %v6501_v6 = vpop.f32.mrb[113].mxu1  ;;  %v13723_v33 = vpop.f32.mrb[114].mxu0 }
 0x597   : > { %v11871_v44 = vpack.c.bf16 %v9772_v25, %v9771_v2  ;;  %v13851_v47 = vadd.f32 %v9337_v45, %v6501_v6  ;;  %v13203_v16 = vpop.f32.mrb[114].mxu1  ;;  %v9340_v11 = vpop.f32.mrb[115].mxu0 }
 0x598   : > { %11972 = vst [vmem:[%s18270_s6 + $0x1b8] sm:$0xff] %v11876_v9   ;;  %v9649_v53 = vadd.f32 %v18502_v18, %v13850_v10  ;;  %v13852_v39 = vadd.f32 %v13723_v33, %v13203_v16  ;;  %v6504_v58 = vpop.f32.mrb[115].mxu1 }
 0x599   : > { %11971 = vst [vmem:[%s18270_s6 + $0x1b0] sm:$0xff] %v11871_v44   ;;  %v9647_v31 = vadd.f32 %v18502_v18, %v13851_v47  ;;  %v13853_v63 = vadd.f32 %v9340_v11, %v6504_v58 }
 0x59a   : > { %v9650_v41 = vadd.f32 %v18502_v18, %v13852_v39  ;;  %v9777_v50 = vmax.f32 %v9649_v53, 0.0 }
 0x59b   : > { %v9648_v19 = vadd.f32 %v18502_v18, %v13853_v63  ;;  %v9775_v32 = vmax.f32 %v9647_v31, 0.0 }
 0x59c   : > { %v9778_v15 = vmax.f32 %v9650_v41, 0.0  ;;  %v13726_v24 = vpop.f32.mrb[116].mxu0 }
 0x59d   : > { %v9776_v46 = vmax.f32 %v9648_v19, 0.0  ;;  %v13206_v51 = vpop.f32.mrb[116].mxu1  ;;  %v9353_v1 = vpop.f32.mrb[117].mxu0 }
 0x59e   : > { %v11886_v60 = vpack.c.bf16 %v9778_v15, %v9777_v50  ;;  %v13854_v34 = vadd.f32 %v13726_v24, %v13206_v51  ;;  %v6517_v20 = vpop.f32.mrb[117].mxu1  ;;  %v13727_v27 = vpop.f32.mrb[118].mxu0 }
 0x59f   : > { %v11881_v7 = vpack.c.bf16 %v9776_v46, %v9775_v32  ;;  %v13855_v54 = vadd.f32 %v9353_v1, %v6517_v20  ;;  %v13207_v5 = vpop.f32.mrb[118].mxu1  ;;  %v9356_v4 = vpop.f32.mrb[119].mxu0 }
 0x5a0   : > { %11974 = vst [vmem:[%s18270_s6 + $0x1c8] sm:$0xff] %v11886_v60   ;;  %v9653_v35 = vadd.f32 %v18502_v18, %v13854_v34  ;;  %v13856_v49 = vadd.f32 %v13727_v27, %v13207_v5  ;;  %v6520_v0 = vpop.f32.mrb[119].mxu1 }
 0x5a1   : > { %11973 = vst [vmem:[%s18270_s6 + $0x1c0] sm:$0xff] %v11881_v7   ;;  %v9651_v17 = vadd.f32 %v18502_v18, %v13855_v54  ;;  %v13857_v52 = vadd.f32 %v9356_v4, %v6520_v0 }
 0x5a2   : > { %v9654_v56 = vadd.f32 %v18502_v18, %v13856_v49  ;;  %v9781_v48 = vmax.f32 %v9653_v35, 0.0 }
 0x5a3   : > { %v9652_v3 = vadd.f32 %v18502_v18, %v13857_v52  ;;  %v9779_v55 = vmax.f32 %v9651_v17, 0.0 }
 0x5a4   : > { %v9782_v22 = vmax.f32 %v9654_v56, 0.0  ;;  %v13730_v43 = vpop.f32.mrb[120].mxu0 }
 0x5a5   : > { %v9780_v14 = vmax.f32 %v9652_v3, 0.0  ;;  %v13210_v8 = vpop.f32.mrb[120].mxu1  ;;  %v9369_v26 = vpop.f32.mrb[121].mxu0 }
 0x5a6   : > { %v11896_v62 = vpack.c.bf16 %v9782_v22, %v9781_v48  ;;  %v13858_v21 = vadd.f32 %v13730_v43, %v13210_v8  ;;  %v6533_v12 = vpop.f32.mrb[121].mxu1  ;;  %v13731_v13 = vpop.f32.mrb[122].mxu0 }
 0x5a7   : > { %v11891_v57 = vpack.c.bf16 %v9780_v14, %v9779_v55  ;;  %v13859_v28 = vadd.f32 %v9369_v26, %v6533_v12  ;;  %v13211_v42 = vpop.f32.mrb[122].mxu1  ;;  %v9372_v61 = vpop.f32.mrb[123].mxu0 }
 0x5a8   : > { %11976 = vst [vmem:[%s18270_s6 + $0x1d8] sm:$0xff] %v11896_v62   ;;  %v9657_v30 = vadd.f32 %v18502_v18, %v13858_v21  ;;  %v13860_v59 = vadd.f32 %v13731_v13, %v13211_v42  ;;  %v6536_v23 = vpop.f32.mrb[123].mxu1 }
 0x5a9   : > { %11975 = vst [vmem:[%s18270_s6 + $0x1d0] sm:$0xff] %v11891_v57   ;;  %v9655_v36 = vadd.f32 %v18502_v18, %v13859_v28  ;;  %v13861_v37 = vadd.f32 %v9372_v61, %v6536_v23 }
 0x5aa   : > { %v9658_v38 = vadd.f32 %v18502_v18, %v13860_v59  ;;  %v9785_v25 = vmax.f32 %v9657_v30, 0.0 }
 0x5ab   : > { %v9656_v2 = vadd.f32 %v18502_v18, %v13861_v37  ;;  %v9783_v29 = vmax.f32 %v9655_v36, 0.0 }
 0x5ac   : > { %v9786_v40 = vmax.f32 %v9658_v38, 0.0  ;;  %v13734_v6 = vpop.f32.mrb[124].mxu0 }
 0x5ad   : > { %v9784_v9 = vmax.f32 %v9656_v2, 0.0  ;;  %v13214_v10 = vpop.f32.mrb[124].mxu1  ;;  %v9385_v16 = vpop.f32.mrb[125].mxu0 }
 0x5ae   : > { %v11906_v45 = vpack.c.bf16 %v9786_v40, %v9785_v25  ;;  %v13862_v44 = vadd.f32 %v13734_v6, %v13214_v10  ;;  %v6549_v47 = vpop.f32.mrb[125].mxu1  ;;  %v13735_v58 = vpop.f32.mrb[126].mxu0 }
 0x5af   : > { %v11901_v33 = vpack.c.bf16 %v9784_v9, %v9783_v29  ;;  %v13863_v53 = vadd.f32 %v9385_v16, %v6549_v47  ;;  %v13215_v39 = vpop.f32.mrb[126].mxu1  ;;  %v9388_v41 = vpop.f32.mrb[127].mxu0 }
 0x5b0   : > { %11978 = vst [vmem:[%s18270_s6 + $0x1e8] sm:$0xff] %v11906_v45   ;;  %v9661_v11 = vadd.f32 %v18502_v18, %v13862_v44  ;;  %v13864_v31 = vadd.f32 %v13735_v58, %v13215_v39  ;;  %v6552_v63 = vpop.f32.mrb[127].mxu1 }
 0x5b1   : > { %11977 = vst [vmem:[%s18270_s6 + $0x1e0] sm:$0xff] %v11901_v33   ;;  %v9659_v19 = vadd.f32 %v18502_v18, %v13863_v53  ;;  %v13865_v50 = vadd.f32 %v9388_v41, %v6552_v63 }
 0x5b2   : > { %v9662_v15 = vadd.f32 %v18502_v18, %v13864_v31  ;;  %v9789_v46 = vmax.f32 %v9661_v11, 0.0 }
 0x5b3   : > { %v9660_v32 = vadd.f32 %v18502_v18, %v13865_v50  ;;  %v9787_v24 = vmax.f32 %v9659_v19, 0.0 }
 0x5b4   : > { %v9790_v51 = vmax.f32 %v9662_v15, 0.0 }
 0x5b5   : > { %v9788_v60 = vmax.f32 %v9660_v32, 0.0 }
 0x5b6   : > { %v11916_v34 = vpack.c.bf16 %v9790_v51, %v9789_v46 }
 0x5b7   : > { %v11911_v20 = vpack.c.bf16 %v9788_v60, %v9787_v24 }
 0x5b8   : > { %11980 = vst [vmem:[%s18270_s6 + $0x1f8] sm:$0xff] %v11916_v34  }
 0x5b9   : > { %11979 = vst [vmem:[%s18270_s6 + $0x1f0] sm:$0xff] %v11911_v20  }
 0x5ba   : > { %15082 = shalt.err (!%p15079_p3)
}
 0x5bb   : > { %s15083_s27 = scalar_lea.hbm %s18565_s19, 8192  ;;  %s15087_s30 = scalar_lea.hbm %s18617_s3, 16384 }
 0x5bc   : > { %p15084_p4 = scmp.ne.s32.totalorder %s18565_s19, %s15083_s27  ;;  %p15088_p9 = scmp.lt.u32.totalorder %s18565_s19, %s18617_s3 }
 0x5bd   : > { %p15089_p10 = scmp.lt.u32.totalorder %s15087_s30, %s15083_s27  ;;  %p15091_p12 = scmp.lt.u32.totalorder %s15083_s27, %s18565_s19 }
 0x5be   : > { %p15085_p7 = pnand %p15084_p4, %p15195_p5 }
 0x5bf   : > { %p15090_p11 = por %p15089_p10, %p15088_p9 }
 0x5c0   : > { %p15086_p8 = pneg %p15085_p7 }
 0x5c1   : > { %p15092_p13 = por %p15091_p12, %p15090_p11 }
 0x5c3   : > { %p15093_p0 = pnand %p15092_p13, %p15086_p8 }
 0x5c5   : > { %15096 = shalt.err (!%p15093_p0)
}
 0x5c6   : > { %s15135_s6 = smov 64   ;;  %s15136_s7 = smov 4  }
 0x5c7   : > { %14763 = dma.vmem_to_hbm [thread:$0]  (%p15195_p5), %s18567_s10, 8192, %s18565_s19, %s18573_s16, %s15135_s6, %s15135_s6, %s15136_s7  }
 0x5c8 PF: > { %p14769_p1 = scmp.ge.s32.totalorder %s15131_s15, 2  ;;  %s10460_s8 = sand.u32 1, %s15119_s12  }
 0x5c9   : > { %s10461_s9 = scalar_lea.sflag [#allocation3], %s10460_s8 }
 0x5ca   : > { %p14766_p2 = pnand %p14769_p1, %p15199_p6 }
 0x5cc   : > { %15114 = dma.done.wait (!%p14766_p2), %s10461_s9, 8192  }
 0x5cd   : > { %15116 = vsyncadd (!%p14766_p2), %s10461_s9, 4294959104  ;;  %p13_p3 = scmp.ge.s32.totalorder %s15182_s18, 4   ;;  %s19506_s12 = smov %s15123_s13 }
 0x5ce   : > { %s19507_s13 = smov %s15127_s14  ;;  %s19508_s14 = smov %s15193_s21 }
 0x5cf   : > { %s19509_s15 = smov %s15182_s18  ;;  %15 = sbr.rel (!%p13_p3) target bundleno = 3 (0x3), region = 75 }
 0x5d6   :  { %10466 = vsyncpa [#allocation3], 1 }
 0x5d7   :  { %10468 = vsyncpa [#allocation3 + $0x1], 1 }

</bundles_post_ra>
